<compile_context>
chip_gen: v5e
topology: v5e:2x2
jax: 0.10.0
libtpu: 0.0.40
codegen_flags: <defaults>
</compile_context>

<pallas_src>
import functools

import jax
import jax.numpy as jnp
from jax.experimental import pallas as pl
from jax.experimental.pallas import tpu as pltpu

EPS = 1e-5
CHAIN_ORDER = ("conv1", "conv2", "conv3", "conv4", "conv5")


def _round_up(v, m):
    return ((v + m - 1) // m) * m


# ----------------------------------------------------------------------------
# One-off probe: detect pltpu.roll availability / rotation direction
# ----------------------------------------------------------------------------
@functools.lru_cache(maxsize=None)
def _roll_mode():
    """+1: pltpu.roll(x, s) == jnp.roll(x, s); -1: opposite direction;
    0: roll unavailable -> use the slice+concat shift fallback everywhere."""
    base = jnp.arange(8 * 128, dtype=jnp.float32).reshape(8, 128)

    def probe(x_ref, o_ref):
        o_ref[...] = pltpu.roll(x_ref[...], 3, axis=1)

    try:
        got = pl.pallas_call(
            probe, out_shape=jax.ShapeDtypeStruct((8, 128), jnp.float32))(base)
        if bool(jnp.all(got == jnp.roll(base, 3, axis=1))):
            return 1
        if bool(jnp.all(got == jnp.roll(base, -3, axis=1))):
            return -1
    except Exception:  # conservative fallback: correctness over micro-opt
        pass
    return 0


# ----------------------------------------------------------------------------
# Exact 0/1 pool-subsample / nearest-upsample matrices (built once, host side)
# ----------------------------------------------------------------------------
def _downsample_matrix(n, hh, ww):
    """S: (n*hh*ww, n*(hh//2)*(ww//2)); (x @ S) picks the top-left lane of each 2x2 block."""
    ho, wo = hh // 2, ww // 2
    lin, lout = n * hh * ww, n * ho * wo
    q = jnp.arange(lout, dtype=jnp.int32)
    img, rem = q // (ho * wo), q % (ho * wo)
    y, x = rem // wo, rem % wo
    src = img * (hh * ww) + (2 * y) * ww + (2 * x)
    return (jnp.arange(lin, dtype=jnp.int32)[:, None] == src[None, :]).astype(jnp.float32)


def _upsample_matrix(n, hh, ww):
    """U: (n*hh*ww, n*(2hh)*(2ww)); (x @ U) is exact nearest-neighbor 2x upsample."""
    ho, wo = 2 * hh, 2 * ww
    lin, lout = n * hh * ww, n * ho * wo
    q = jnp.arange(lout, dtype=jnp.int32)
    img, rem = q // (ho * wo), q % (ho * wo)
    y, x = rem // wo, rem % wo
    src = img * (hh * ww) + (y // 2) * ww + (x // 2)
    return (jnp.arange(lin, dtype=jnp.int32)[:, None] == src[None, :]).astype(jnp.float32)


# ----------------------------------------------------------------------------
# Parameter packing: 15 conv_dw layers -> 4 lane-dense arrays (+ selection mats)
# ----------------------------------------------------------------------------
def pack_hourglass2(params, *, n, h, w, cmax):
    dww_blocks, dwb_cols, pww_blocks, pwb_cols = [], [], [], []
    layer_idx, off = {}, 0
    for name in CHAIN_ORDER:
        idxs = []
        for dww, dwb, pww, pwb in params[name]:
            cin = dww.shape[1]
            cout = pww.shape[0]
            dww_blocks.append(
                jnp.zeros((cmax, 9), jnp.float32).at[:cin, :].set(dww[:, :, 0].T))
            dwb_cols.append(jnp.zeros((cmax, 1), jnp.float32).at[:cin, :].set(dwb))
            pww_blocks.append(
                jnp.zeros((cmax, cmax), jnp.float32).at[:cout, :cin].set(pww))
            pwb_cols.append(jnp.zeros((cmax, 1), jnp.float32).at[:cout, :].set(pwb))
            idxs.append(off)
            off += 1
        layer_idx[name] = tuple(idxs)
    packed = {
        "dww": jnp.concatenate(dww_blocks, axis=1),   # (cmax, 9*L)  folded BN1 scale
        "dwb": jnp.concatenate(dwb_cols, axis=1),     # (cmax, L)    folded BN1 bias
        "pww": jnp.concatenate(pww_blocks, axis=1),   # (cmax, cmax*L) folded BN2 scale
        "pwb": jnp.concatenate(pwb_cols, axis=1),     # (cmax, L)    folded BN2 bias
        "pool_full": _downsample_matrix(n, h, w),
        "pool_half": _downsample_matrix(n, h // 2, w // 2),
        "up_q2h": _upsample_matrix(n, h // 4, w // 4),
        "up_h2f": _upsample_matrix(n, h // 2, w // 2),
    }
    return packed, layer_idx


# ----------------------------------------------------------------------------
# The single fused Pallas kernel
# ----------------------------------------------------------------------------
def make_hourglass_kernel(n, h, w, cmax, oup, layer_idx, roll_mode):
    h2, w2, h4, w4 = h // 2, w // 2, h // 4, w // 4
    lf, lh, lq = n * h * w, n * h2 * w2, n * h4 * w4

    def kernel(x_ref, dww_ref, dwb_ref, pww_ref, pwb_ref,
               poolf_ref, poolh_ref, upq_ref, uph_ref, o_ref):
        f32 = jnp.float32
        dww = dww_ref[...]
        dwb = dwb_ref[...]
        pww = pww_ref[...]
        pwb = pwb_ref[...]

        # ---- per-resolution boundary masks (hoisted; shared by every layer) ----
        def tap_masks(hh, ww, ll):
            pos = jax.lax.broadcasted_iota(jnp.int32, (1, ll), 1)
            cpos = pos % ww             # column inside a row
            rpos = pos % (hh * ww)      # offset inside one image (blocks image bleed)
            ml = (cpos >= 1).astype(f32)              # dx == -1 valid
            mr = (cpos < ww - 1).astype(f32)          # dx == +1 valid
            mt = (rpos >= ww).astype(f32)             # dy == -1 valid
            mb = (rpos < (hh - 1) * ww).astype(f32)   # dy == +1 valid
            mrow = {-1: mt, 0: None, 1: mb}
            mcol = {-1: ml, 0: None, 1: mr}
            out = {}
            for dy in (-1, 0, 1):
                for dx in (-1, 0, 1):
                    if mrow[dy] is None:
                        out[(dy, dx)] = mcol[dx]
                    elif mcol[dx] is None:
                        out[(dy, dx)] = mrow[dy]
                    else:
                        out[(dy, dx)] = mrow[dy] * mcol[dx]
            return out

        masks = {(h, w): tap_masks(h, w, lf),
                 (h2, w2): tap_masks(h2, w2, lh),
                 (h4, w4): tap_masks(h4, w4, lq)}

        def shift(xv, off):
            """shifted[:, p] ~ xv[:, p + off]; out-of-range / cross-image lanes are
            zeroed by the caller's masks (or irrelevant for the pool subsample)."""
            ll = xv.shape[1]
            if off == 0:
                return xv
            if roll_mode != 0 and ll % 128 == 0:
                amt = ((-roll_mode) * off) % ll        # XLU lane rotate (free slot)
                return pltpu.roll(xv, amt, axis=1)
            # Fallback: zero-filled slice+concat (unambiguous semantics).
            pad = jnp.zeros((xv.shape[0], abs(off)), xv.dtype)
            if off > 0:
                return jnp.concatenate([xv[:, off:], pad], axis=1)
            return jnp.concatenate([pad, xv[:, :ll + off]], axis=1)

        def conv_dw(xv, l, hh, ww):
            """depthwise3x3 + BN + ReLU then pointwise1x1 + BN (BN folded), layer l."""
            mk = masks[(hh, ww)]
            acc = None
            for dy in (-1, 0, 1):
                for dx in (-1, 0, 1):
                    k = (dy + 1) * 3 + (dx + 1)
                    wk = dww[:, l * 9 + k:l * 9 + k + 1]       # (C, 1) per-channel tap
                    t = shift(xv, dy * ww + dx)
                    m = mk[(dy, dx)]
                    if m is not None:
                        t = t * m
                    term = t * wk
                    acc = term if acc is None else acc + term
            y = jnp.maximum(acc + dwb[:, l:l + 1], 0.0)
            wl = pww[:, l * cmax:(l + 1) * cmax]               # (C, C)
            z = jnp.dot(wl.astype(jnp.bfloat16), y.astype(jnp.bfloat16),
                        preferred_element_type=f32)            # MXU, f32 accumulate
            return z + pwb[:, l:l + 1]

        def chain(xv, name, hh, ww):
            for l in layer_idx[name]:
                xv = conv_dw(xv, l, hh, ww)
            return xv

        def maxpool2x2(xv, ww, sel):
            a = jnp.maximum(xv, shift(xv, 1))      # max over dx in {0, 1}
            b = jnp.maximum(a, shift(a, ww))       # max over dy in {0, 1}
            return jnp.dot(b, sel, preferred_element_type=f32)   # exact 0/1 subsample

        def upsample2x(xv, sel):
            return jnp.dot(xv, sel, preferred_element_type=f32)  # exact 0/1 nearest x2

        xin = x_ref[...].astype(f32)                              # (C, lf)

        # conv1: MaxPool(2,2) + 3x conv_dw at half resolution
        c1 = chain(maxpool2x2(xin, w, poolf_ref[...]), "conv1", h2, w2)

        # conv4: MaxPool(2,2) + 5x conv_dw at quarter resolution + Upsample(x2)
        t = chain(maxpool2x2(c1, w2, poolh_ref[...]), "conv4", h4, w4)
        t = upsample2x(t, upq_ref[...])
        # conv5 (shared weights) + Upsample(x2) -> x1 at full resolution
        x1 = upsample2x(chain(t, "conv5", h2, w2), uph_ref[...])

        # conv3 then the shared conv5 + Upsample(x2) -> x2 at full resolution
        s = chain(chain(c1, "conv3", h2, w2), "conv5", h2, w2)
        x2 = upsample2x(s, uph_ref[...])

        # conv2 at full resolution, residual adds fused; lane-dense (oup, lf) store
        out = chain(xin, "conv2", h, w) + x1 + x2
        o_ref[...] = out[:oup, :].astype(o_ref.dtype)

    return kernel


# ----------------------------------------------------------------------------
# Wrapper: whole Hourglass2 forward = one pallas_call
# ----------------------------------------------------------------------------
def build_hourglass2_forward(params, *, n, h, w, oup):
    cmax = 0
    for name in CHAIN_ORDER:
        for dww, _, pww, _ in params[name]:
            cmax = max(cmax, dww.shape[1], pww.shape[0])
    cmax = _round_up(max(cmax, 8), 8)

    packed, layer_idx = pack_hourglass2(params, n=n, h=h, w=w, cmax=cmax)
    kernel = make_hourglass_kernel(n, h, w, cmax, oup, layer_idx, _roll_mode())

    lf = n * h * w
    vmem = pltpu.MemorySpace.VMEM
    call = pl.pallas_call(
        kernel,
        out_shape=jax.ShapeDtypeStruct((oup, lf), jnp.float32),
        in_specs=[pl.BlockSpec(memory_space=vmem) for _ in range(9)],
        out_specs=pl.BlockSpec(memory_space=vmem),
    )
    # TODO(synk): v7x -- add a 'parallel' grid axis (H-strips / per-branch split) and
    #             budget tiles for the 64 MiB VMEM once spatial sizes become realistic.

    def forward(x):
        nb, c, hh, ww = x.shape
        assert (nb, hh, ww) == (n, h, w), (x.shape, (n, h, w))
        # NCHW -> channel-major (C, N*H*W): batch folded onto the 128-lane axis.
        xc = jnp.transpose(x, (1, 0, 2, 3)).reshape(c, nb * hh * ww)
        xc = jnp.pad(xc, ((0, cmax - c), (0, 0)))
        out = call(xc, packed["dww"], packed["dwb"], packed["pww"], packed["pwb"],
                   packed["pool_full"], packed["pool_half"],
                   packed["up_q2h"], packed["up_h2f"])
        return jnp.transpose(out.reshape(oup, nb, hh, ww), (1, 0, 2, 3))

    return forward


# ----------------------------------------------------------------------------
# Parameters (deterministic synthetic init; eval-mode BN folded into convs)
# ----------------------------------------------------------------------------
def init_conv_dw_params(key, cin, cout):
    ks = jax.random.split(key, 10)
    dw_w = 0.2 * jax.random.normal(ks[0], (cin, 3, 3), jnp.float32)
    g1 = 1.0 + 0.1 * jax.random.normal(ks[1], (cin,), jnp.float32)
    b1 = 0.1 * jax.random.normal(ks[2], (cin,), jnp.float32)
    m1 = 0.1 * jax.random.normal(ks[3], (cin,), jnp.float32)
    v1 = 0.5 + jax.random.uniform(ks[4], (cin,), jnp.float32)
    pw_w = jax.random.normal(ks[5], (cout, cin), jnp.float32) / jnp.sqrt(cin)
    g2 = 1.0 + 0.1 * jax.random.normal(ks[6], (cout,), jnp.float32)
    b2 = 0.1 * jax.random.normal(ks[7], (cout,), jnp.float32)
    m2 = 0.1 * jax.random.normal(ks[8], (cout,), jnp.float32)
    v2 = 0.5 + jax.random.uniform(ks[9], (cout,), jnp.float32)

    s1 = g1 / jnp.sqrt(v1 + EPS)          # BN after depthwise (eval mode, folded)
    bias1 = b1 - m1 * s1
    s2 = g2 / jnp.sqrt(v2 + EPS)          # BN after pointwise (eval mode, folded)
    bias2 = b2 - m2 * s2

    # dww[k=ky*3+kx, c, 0] = dw_w[c, ky, kx] * s1[c]
    dww = (dw_w * s1[:, None, None]).transpose(1, 2, 0).reshape(9, cin, 1)
    pww = pw_w * s2[:, None]              # (cout, cin), BN2 scale folded
    return (dww, bias1.reshape(cin, 1), pww, bias2.reshape(cout, 1))


def init_hourglass2_params(key, inp, oup, inner):
    specs = {
        "conv1": [(inp, inner), (inner, inner), (inner, inner)],
        "conv2": [(inp, inner), (inner, inner), (inner, oup)],
        "conv3": [(inner, inner), (inner, inner), (inner, oup)],
        "conv4": [(inner, inner), (inner, inner), (inner, inner),
                  (inner, oup), (oup, oup)],
        "conv5": [(oup, oup)],
    }
    params = {}
    for name in CHAIN_ORDER:
        key, sub = jax.random.split(key)
        keys = jax.random.split(sub, len(specs[name]))
        params[name] = [init_conv_dw_params(k, ci, co)
                        for k, (ci, co) in zip(keys, specs[name])]
    return params


# ----------------------------------------------------------------------------
# Pure-XLA reference (same folded BN params) for the correctness check
# ----------------------------------------------------------------------------
def maxpool2(x):
    N, C, H, W = x.shape
    return jnp.max(x.reshape(N, C, H // 2, 2, W // 2, 2), axis=(3, 5))


def upsample2(x):
    N, C, H, W = x.shape
    return jnp.broadcast_to(
        x[:, :, :, None, :, None], (N, C, H, 2, W, 2)
    ).reshape(N, C, 2 * H, 2 * W)


def conv_dw_ref(x, p):
    dww, dwb, pww, pwb = p
    cin = dww.shape[1]
    w = dww.reshape(3, 3, cin).transpose(2, 0, 1)[:, None]    # (cin, 1, 3, 3)
    t = jax.lax.conv_general_dilated(
        x, w, window_strides=(1, 1), padding=((1, 1), (1, 1)),
        dimension_numbers=("NCHW", "OIHW", "NCHW"),
        feature_group_count=cin, precision=jax.lax.Precision.HIGHEST)
    y = jnp.maximum(t + dwb.reshape(1, cin, 1, 1), 0.0)
    z = jnp.einsum("oc,nchw->nohw", pww, y,
                   precision=jax.lax.Precision.HIGHEST)
    return z + pwb.reshape(1, -1, 1, 1)


def hourglass2_ref(params, x):
    def seq(v, plist):
        for p in plist:
            v = conv_dw_ref(v, p)
        return v
    c1 = seq(maxpool2(x), params["conv1"])
    x1 = upsample2(seq(upsample2(seq(maxpool2(c1), params["conv4"])),
                       params["conv5"]))
    x2 = upsample2(seq(seq(c1, params["conv3"]), params["conv5"]))
    return seq(x, params["conv2"]) + x1 + x2


# ----------------------------------------------------------------------------
if __name__ == "__main__":
    key = jax.random.PRNGKey(0)
    kx, kp = jax.random.split(key)

    inp, oup, inner = 4, 8, 16
    N, H, W = 2, 16, 16

    x = jax.random.normal(kx, (N, inp, H, W), jnp.float32)
    params = init_hourglass2_params(kp, inp, oup, inner)

    fwd = jax.jit(build_hourglass2_forward(params, n=N, h=H, w=W, oup=oup))
    out = jax.block_until_ready(fwd(x))

    assert out.shape == (N, oup, H, W), out.shape
    assert out.dtype == jnp.float32
    assert bool(jnp.all(jnp.isfinite(out)))

    # Numerical check against the plain-XLA reference (same folded parameters).
    # Tolerance allows the intentional bf16 MXU operands (f32 accumulation).
    ref = jax.block_until_ready(hourglass2_ref(params, x))
    err = float(jnp.max(jnp.abs(out - ref)))
    scale = float(jnp.max(jnp.abs(ref))) + 1e-6
    assert err <= 2.5e-2 * scale + 1e-3, (err, scale)

    print("KERNEL_OK")
</pallas_src>

<mosaic_0001>
module attributes {stable_mosaic.version = 11 : i64} {
  func.func @probe(%arg0: memref<8x128xf32, #tpu.memory_space<vmem>>, %arg1: memref<8x128xf32, #tpu.memory_space<vmem>>) attributes {dimension_semantics = [], scalar_prefetch = 0 : i64, scratch_operands = 0 : i64, tpu.core_type = #tpu.core_type<tc>} {
    %c0 = arith.constant 0 : index
    %c0_0 = arith.constant 0 : index
    %0 = vector.load %arg0[%c0, %c0_0] : memref<8x128xf32, #tpu.memory_space<vmem>>, vector<8x128xf32>
    %c3_i32 = arith.constant 3 : i32
    %1 = tpu.dynamic_rotate %0 by %c3_i32 dim 1 : vector<8x128xf32>, i32 -> vector<8x128xf32>
    %c0_1 = arith.constant 0 : index
    %c0_2 = arith.constant 0 : index
    %2 = vector.load %arg1[%c0_1, %c0_2] : memref<8x128xf32, #tpu.memory_space<vmem>>, vector<8x128xf32>
    tpu.vector_store %arg1[%c0_1, %c0_2], %1 {strides = array<i32>} : memref<8x128xf32, #tpu.memory_space<vmem>>, vector<8x128xf32>,
    return
  }
}

module attributes {stable_mosaic.version = 11 : i64} {
  func.func @kernel(%arg0: memref<16x512xf32, #tpu.memory_space<vmem>>, %arg1: memref<16x135xf32, #tpu.memory_space<vmem>>, %arg2: memref<16x15xf32, #tpu.memory_space<vmem>>, %arg3: memref<16x240xf32, #tpu.memory_space<vmem>>, %arg4: memref<16x15xf32, #tpu.memory_space<vmem>>, %arg5: memref<512x128xf32, #tpu.memory_space<vmem>>, %arg6: memref<128x32xf32, #tpu.memory_space<vmem>>, %arg7: memref<32x128xf32, #tpu.memory_space<vmem>>, %arg8: memref<128x512xf32, #tpu.memory_space<vmem>>, %arg9: memref<8x512xf32, #tpu.memory_space<vmem>>) attributes {dimension_semantics = [], scalar_prefetch = 0 : i64, scratch_operands = 0 : i64, tpu.core_type = #tpu.core_type<tc>} {
    %c0 = arith.constant 0 : index
    %c0_0 = arith.constant 0 : index
    %0 = vector.load %arg1[%c0, %c0_0] : memref<16x135xf32, #tpu.memory_space<vmem>>, vector<16x135xf32>
    %c0_1 = arith.constant 0 : index
    %c0_2 = arith.constant 0 : index
    %1 = vector.load %arg2[%c0_1, %c0_2] : memref<16x15xf32, #tpu.memory_space<vmem>>, vector<16x15xf32>
    %c0_3 = arith.constant 0 : index
    %c0_4 = arith.constant 0 : index
    %2 = vector.load %arg3[%c0_3, %c0_4] : memref<16x240xf32, #tpu.memory_space<vmem>>, vector<16x240xf32>
    %c0_5 = arith.constant 0 : index
    %c0_6 = arith.constant 0 : index
    %3 = vector.load %arg4[%c0_5, %c0_6] : memref<16x15xf32, #tpu.memory_space<vmem>>, vector<16x15xf32>
    %4 = tpu.iota {dimensions = array<i32: 1>} : vector<1x512xi32>
    %c16_i32 = arith.constant 16 : i32
    %c0_i32 = arith.constant 0 : i32
    %5 = arith.cmpi eq, %c16_i32, %c0_i32 : i32
    %c1_i32 = arith.constant 1 : i32
    %6 = arith.select %5, %c1_i32, %c16_i32 : i32
    %7 = vector.broadcast %6 : i32 to vector<1x512xi32>
    %8 = arith.remsi %4, %7 : vector<1x512xi32>
    %c0_i32_7 = arith.constant 0 : i32
    %9 = vector.broadcast %c0_i32_7 : i32 to vector<1x512xi32>
    %10 = arith.cmpi ne, %8, %9 : vector<1x512xi32>
    %c0_i32_8 = arith.constant 0 : i32
    %11 = vector.broadcast %c0_i32_8 : i32 to vector<1x512xi32>
    %12 = arith.cmpi slt, %8, %11 : vector<1x512xi32>
    %c0_i32_9 = arith.constant 0 : i32
    %13 = arith.cmpi slt, %6, %c0_i32_9 : i32
    %14 = vector.broadcast %13 : i1 to vector<1x512xi1>
    %15 = vector.broadcast %14 : vector<1x512xi1> to vector<1x512xi1>
    %16 = arith.xori %12, %15 : vector<1x512xi1>
    %17 = arith.andi %16, %10 : vector<1x512xi1>
    %18 = vector.broadcast %6 : i32 to vector<1x512xi32>
    %19 = arith.addi %8, %18 : vector<1x512xi32>
    %20 = arith.select %17, %19, %8 : vector<1x512xi1>, vector<1x512xi32>
    %c256_i32 = arith.constant 256 : i32
    %c0_i32_10 = arith.constant 0 : i32
    %21 = arith.cmpi eq, %c256_i32, %c0_i32_10 : i32
    %c1_i32_11 = arith.constant 1 : i32
    %22 = arith.select %21, %c1_i32_11, %c256_i32 : i32
    %23 = vector.broadcast %22 : i32 to vector<1x512xi32>
    %24 = arith.remsi %4, %23 : vector<1x512xi32>
    %c0_i32_12 = arith.constant 0 : i32
    %25 = vector.broadcast %c0_i32_12 : i32 to vector<1x512xi32>
    %26 = arith.cmpi ne, %24, %25 : vector<1x512xi32>
    %c0_i32_13 = arith.constant 0 : i32
    %27 = vector.broadcast %c0_i32_13 : i32 to vector<1x512xi32>
    %28 = arith.cmpi slt, %24, %27 : vector<1x512xi32>
    %c0_i32_14 = arith.constant 0 : i32
    %29 = arith.cmpi slt, %22, %c0_i32_14 : i32
    %30 = vector.broadcast %29 : i1 to vector<1x512xi1>
    %31 = vector.broadcast %30 : vector<1x512xi1> to vector<1x512xi1>
    %32 = arith.xori %28, %31 : vector<1x512xi1>
    %33 = arith.andi %32, %26 : vector<1x512xi1>
    %34 = vector.broadcast %22 : i32 to vector<1x512xi32>
    %35 = arith.addi %24, %34 : vector<1x512xi32>
    %36 = arith.select %33, %35, %24 : vector<1x512xi1>, vector<1x512xi32>
    %c1_i32_15 = arith.constant 1 : i32
    %37 = vector.broadcast %c1_i32_15 : i32 to vector<1x512xi32>
    %38 = arith.cmpi sge, %20, %37 : vector<1x512xi32>
    %39 = arith.extui %38 : vector<1x512xi1> to vector<1x512xi32>
    %40 = arith.sitofp %39 : vector<1x512xi32> to vector<1x512xf32>
    %c15_i32 = arith.constant 15 : i32
    %41 = vector.broadcast %c15_i32 : i32 to vector<1x512xi32>
    %42 = arith.cmpi slt, %20, %41 : vector<1x512xi32>
    %43 = arith.extui %42 : vector<1x512xi1> to vector<1x512xi32>
    %44 = arith.sitofp %43 : vector<1x512xi32> to vector<1x512xf32>
    %c16_i32_16 = arith.constant 16 : i32
    %45 = vector.broadcast %c16_i32_16 : i32 to vector<1x512xi32>
    %46 = arith.cmpi sge, %36, %45 : vector<1x512xi32>
    %47 = arith.extui %46 : vector<1x512xi1> to vector<1x512xi32>
    %48 = arith.sitofp %47 : vector<1x512xi32> to vector<1x512xf32>
    %c240_i32 = arith.constant 240 : i32
    %49 = vector.broadcast %c240_i32 : i32 to vector<1x512xi32>
    %50 = arith.cmpi slt, %36, %49 : vector<1x512xi32>
    %51 = arith.extui %50 : vector<1x512xi1> to vector<1x512xi32>
    %52 = arith.sitofp %51 : vector<1x512xi32> to vector<1x512xf32>
    %53 = arith.mulf %48, %40 : vector<1x512xf32>
    %54 = arith.mulf %48, %44 : vector<1x512xf32>
    %55 = arith.mulf %52, %40 : vector<1x512xf32>
    %56 = arith.mulf %52, %44 : vector<1x512xf32>
    %57 = tpu.iota {dimensions = array<i32: 1>} : vector<1x128xi32>
    %c8_i32 = arith.constant 8 : i32
    %c0_i32_17 = arith.constant 0 : i32
    %58 = arith.cmpi eq, %c8_i32, %c0_i32_17 : i32
    %c1_i32_18 = arith.constant 1 : i32
    %59 = arith.select %58, %c1_i32_18, %c8_i32 : i32
    %60 = vector.broadcast %59 : i32 to vector<1x128xi32>
    %61 = arith.remsi %57, %60 : vector<1x128xi32>
    %c0_i32_19 = arith.constant 0 : i32
    %62 = vector.broadcast %c0_i32_19 : i32 to vector<1x128xi32>
    %63 = arith.cmpi ne, %61, %62 : vector<1x128xi32>
    %c0_i32_20 = arith.constant 0 : i32
    %64 = vector.broadcast %c0_i32_20 : i32 to vector<1x128xi32>
    %65 = arith.cmpi slt, %61, %64 : vector<1x128xi32>
    %c0_i32_21 = arith.constant 0 : i32
    %66 = arith.cmpi slt, %59, %c0_i32_21 : i32
    %67 = vector.broadcast %66 : i1 to vector<1x128xi1>
    %68 = vector.broadcast %67 : vector<1x128xi1> to vector<1x128xi1>
    %69 = arith.xori %65, %68 : vector<1x128xi1>
    %70 = arith.andi %69, %63 : vector<1x128xi1>
    %71 = vector.broadcast %59 : i32 to vector<1x128xi32>
    %72 = arith.addi %61, %71 : vector<1x128xi32>
    %73 = arith.select %70, %72, %61 : vector<1x128xi1>, vector<1x128xi32>
    %c64_i32 = arith.constant 64 : i32
    %c0_i32_22 = arith.constant 0 : i32
    %74 = arith.cmpi eq, %c64_i32, %c0_i32_22 : i32
    %c1_i32_23 = arith.constant 1 : i32
    %75 = arith.select %74, %c1_i32_23, %c64_i32 : i32
    %76 = vector.broadcast %75 : i32 to vector<1x128xi32>
    %77 = arith.remsi %57, %76 : vector<1x128xi32>
    %c0_i32_24 = arith.constant 0 : i32
    %78 = vector.broadcast %c0_i32_24 : i32 to vector<1x128xi32>
    %79 = arith.cmpi ne, %77, %78 : vector<1x128xi32>
    %c0_i32_25 = arith.constant 0 : i32
    %80 = vector.broadcast %c0_i32_25 : i32 to vector<1x128xi32>
    %81 = arith.cmpi slt, %77, %80 : vector<1x128xi32>
    %c0_i32_26 = arith.constant 0 : i32
    %82 = arith.cmpi slt, %75, %c0_i32_26 : i32
    %83 = vector.broadcast %82 : i1 to vector<1x128xi1>
    %84 = vector.broadcast %83 : vector<1x128xi1> to vector<1x128xi1>
    %85 = arith.xori %81, %84 : vector<1x128xi1>
    %86 = arith.andi %85, %79 : vector<1x128xi1>
    %87 = vector.broadcast %75 : i32 to vector<1x128xi32>
    %88 = arith.addi %77, %87 : vector<1x128xi32>
    %89 = arith.select %86, %88, %77 : vector<1x128xi1>, vector<1x128xi32>
    %c1_i32_27 = arith.constant 1 : i32
    %90 = vector.broadcast %c1_i32_27 : i32 to vector<1x128xi32>
    %91 = arith.cmpi sge, %73, %90 : vector<1x128xi32>
    %92 = arith.extui %91 : vector<1x128xi1> to vector<1x128xi32>
    %93 = arith.sitofp %92 : vector<1x128xi32> to vector<1x128xf32>
    %c7_i32 = arith.constant 7 : i32
    %94 = vector.broadcast %c7_i32 : i32 to vector<1x128xi32>
    %95 = arith.cmpi slt, %73, %94 : vector<1x128xi32>
    %96 = arith.extui %95 : vector<1x128xi1> to vector<1x128xi32>
    %97 = arith.sitofp %96 : vector<1x128xi32> to vector<1x128xf32>
    %c8_i32_28 = arith.constant 8 : i32
    %98 = vector.broadcast %c8_i32_28 : i32 to vector<1x128xi32>
    %99 = arith.cmpi sge, %89, %98 : vector<1x128xi32>
    %100 = arith.extui %99 : vector<1x128xi1> to vector<1x128xi32>
    %101 = arith.sitofp %100 : vector<1x128xi32> to vector<1x128xf32>
    %c56_i32 = arith.constant 56 : i32
    %102 = vector.broadcast %c56_i32 : i32 to vector<1x128xi32>
    %103 = arith.cmpi slt, %89, %102 : vector<1x128xi32>
    %104 = arith.extui %103 : vector<1x128xi1> to vector<1x128xi32>
    %105 = arith.sitofp %104 : vector<1x128xi32> to vector<1x128xf32>
    %106 = arith.mulf %101, %93 : vector<1x128xf32>
    %107 = arith.mulf %101, %97 : vector<1x128xf32>
    %108 = arith.mulf %105, %93 : vector<1x128xf32>
    %109 = arith.mulf %105, %97 : vector<1x128xf32>
    %110 = tpu.iota {dimensions = array<i32: 1>} : vector<1x32xi32>
    %c4_i32 = arith.constant 4 : i32
    %c0_i32_29 = arith.constant 0 : i32
    %111 = arith.cmpi eq, %c4_i32, %c0_i32_29 : i32
    %c1_i32_30 = arith.constant 1 : i32
    %112 = arith.select %111, %c1_i32_30, %c4_i32 : i32
    %113 = vector.broadcast %112 : i32 to vector<1x32xi32>
    %114 = arith.remsi %110, %113 : vector<1x32xi32>
    %c0_i32_31 = arith.constant 0 : i32
    %115 = vector.broadcast %c0_i32_31 : i32 to vector<1x32xi32>
    %116 = arith.cmpi ne, %114, %115 : vector<1x32xi32>
    %c0_i32_32 = arith.constant 0 : i32
    %117 = vector.broadcast %c0_i32_32 : i32 to vector<1x32xi32>
    %118 = arith.cmpi slt, %114, %117 : vector<1x32xi32>
    %c0_i32_33 = arith.constant 0 : i32
    %119 = arith.cmpi slt, %112, %c0_i32_33 : i32
    %120 = vector.broadcast %119 : i1 to vector<1x32xi1>
    %121 = vector.broadcast %120 : vector<1x32xi1> to vector<1x32xi1>
    %122 = arith.xori %118, %121 : vector<1x32xi1>
    %123 = arith.andi %122, %116 : vector<1x32xi1>
    %124 = vector.broadcast %112 : i32 to vector<1x32xi32>
    %125 = arith.addi %114, %124 : vector<1x32xi32>
    %126 = arith.select %123, %125, %114 : vector<1x32xi1>, vector<1x32xi32>
    %c16_i32_34 = arith.constant 16 : i32
    %c0_i32_35 = arith.constant 0 : i32
    %127 = arith.cmpi eq, %c16_i32_34, %c0_i32_35 : i32
    %c1_i32_36 = arith.constant 1 : i32
    %128 = arith.select %127, %c1_i32_36, %c16_i32_34 : i32
    %129 = vector.broadcast %128 : i32 to vector<1x32xi32>
    %130 = arith.remsi %110, %129 : vector<1x32xi32>
    %c0_i32_37 = arith.constant 0 : i32
    %131 = vector.broadcast %c0_i32_37 : i32 to vector<1x32xi32>
    %132 = arith.cmpi ne, %130, %131 : vector<1x32xi32>
    %c0_i32_38 = arith.constant 0 : i32
    %133 = vector.broadcast %c0_i32_38 : i32 to vector<1x32xi32>
    %134 = arith.cmpi slt, %130, %133 : vector<1x32xi32>
    %c0_i32_39 = arith.constant 0 : i32
    %135 = arith.cmpi slt, %128, %c0_i32_39 : i32
    %136 = vector.broadcast %135 : i1 to vector<1x32xi1>
    %137 = vector.broadcast %136 : vector<1x32xi1> to vector<1x32xi1>
    %138 = arith.xori %134, %137 : vector<1x32xi1>
    %139 = arith.andi %138, %132 : vector<1x32xi1>
    %140 = vector.broadcast %128 : i32 to vector<1x32xi32>
    %141 = arith.addi %130, %140 : vector<1x32xi32>
    %142 = arith.select %139, %141, %130 : vector<1x32xi1>, vector<1x32xi32>
    %c1_i32_40 = arith.constant 1 : i32
    %143 = vector.broadcast %c1_i32_40 : i32 to vector<1x32xi32>
    %144 = arith.cmpi sge, %126, %143 : vector<1x32xi32>
    %145 = arith.extui %144 : vector<1x32xi1> to vector<1x32xi32>
    %146 = arith.sitofp %145 : vector<1x32xi32> to vector<1x32xf32>
    %c3_i32 = arith.constant 3 : i32
    %147 = vector.broadcast %c3_i32 : i32 to vector<1x32xi32>
    %148 = arith.cmpi slt, %126, %147 : vector<1x32xi32>
    %149 = arith.extui %148 : vector<1x32xi1> to vector<1x32xi32>
    %150 = arith.sitofp %149 : vector<1x32xi32> to vector<1x32xf32>
    %c4_i32_41 = arith.constant 4 : i32
    %151 = vector.broadcast %c4_i32_41 : i32 to vector<1x32xi32>
    %152 = arith.cmpi sge, %142, %151 : vector<1x32xi32>
    %153 = arith.extui %152 : vector<1x32xi1> to vector<1x32xi32>
    %154 = arith.sitofp %153 : vector<1x32xi32> to vector<1x32xf32>
    %c12_i32 = arith.constant 12 : i32
    %155 = vector.broadcast %c12_i32 : i32 to vector<1x32xi32>
    %156 = arith.cmpi slt, %142, %155 : vector<1x32xi32>
    %157 = arith.extui %156 : vector<1x32xi1> to vector<1x32xi32>
    %158 = arith.sitofp %157 : vector<1x32xi32> to vector<1x32xf32>
    %159 = arith.mulf %154, %146 : vector<1x32xf32>
    %160 = arith.mulf %154, %150 : vector<1x32xf32>
    %161 = arith.mulf %158, %146 : vector<1x32xf32>
    %162 = arith.mulf %158, %150 : vector<1x32xf32>
    %c0_42 = arith.constant 0 : index
    %c0_43 = arith.constant 0 : index
    %163 = vector.load %arg0[%c0_42, %c0_43] : memref<16x512xf32, #tpu.memory_space<vmem>>, vector<16x512xf32>
    %c0_44 = arith.constant 0 : index
    %c0_45 = arith.constant 0 : index
    %164 = vector.load %arg5[%c0_44, %c0_45] : memref<512x128xf32, #tpu.memory_space<vmem>>, vector<512x128xf32>
    %cst = arith.constant 0.000000e+00 : f32
    %165 = vector.broadcast %cst : f32 to vector<16x1xf32>
    %166 = vector.extract_strided_slice %163 {offsets = [0, 1], sizes = [16, 511], strides = [1, 1]} : vector<16x512xf32> to vector<16x511xf32>
    %167 = tpu.concatenate %166, %165 in 1 : vector<16x511xf32>, vector<16x1xf32> -> vector<16x512xf32>
    %168 = arith.maximumf %163, %167 : vector<16x512xf32>
    %cst_46 = arith.constant 0.000000e+00 : f32
    %169 = vector.broadcast %cst_46 : f32 to vector<16x16xf32>
    %170 = vector.extract_strided_slice %168 {offsets = [0, 16], sizes = [16, 496], strides = [1, 1]} : vector<16x512xf32> to vector<16x496xf32>
    %171 = tpu.concatenate %170, %169 in 1 : vector<16x496xf32>, vector<16x16xf32> -> vector<16x512xf32>
    %172 = arith.maximumf %168, %171 : vector<16x512xf32>
    %cst_47 = arith.constant dense<0.000000e+00> : vector<16x128xf32>
    %173 = tpu.matmul %172, %164, %cst_47 {dimension_numbers = #tpu.dot_dimension_numbers<[1], [0], [0], [1], [0, 0, 1, 1], [], []>} : vector<16x512xf32>, vector<512x128xf32>, vector<16x128xf32> -> vector<16x128xf32>
    %174 = vector.extract_strided_slice %0 {offsets = [0, 0], sizes = [16, 1], strides = [1, 1]} : vector<16x135xf32> to vector<16x1xf32>
    %cst_48 = arith.constant 0.000000e+00 : f32
    %175 = vector.broadcast %cst_48 : f32 to vector<16x9xf32>
    %176 = vector.extract_strided_slice %173 {offsets = [0, 0], sizes = [16, 119], strides = [1, 1]} : vector<16x128xf32> to vector<16x119xf32>
    %177 = tpu.concatenate %175, %176 in 1 : vector<16x9xf32>, vector<16x119xf32> -> vector<16x128xf32>
    %178 = vector.broadcast %106 : vector<1x128xf32> to vector<16x128xf32>
    %179 = arith.mulf %177, %178 : vector<16x128xf32>
    %180 = vector.broadcast %174 : vector<16x1xf32> to vector<16x128xf32>
    %181 = arith.mulf %179, %180 : vector<16x128xf32>
    %182 = vector.extract_strided_slice %0 {offsets = [0, 1], sizes = [16, 1], strides = [1, 1]} : vector<16x135xf32> to vector<16x1xf32>
    %cst_49 = arith.constant 0.000000e+00 : f32
    %183 = vector.broadcast %cst_49 : f32 to vector<16x8xf32>
    %184 = vector.extract_strided_slice %173 {offsets = [0, 0], sizes = [16, 120], strides = [1, 1]} : vector<16x128xf32> to vector<16x120xf32>
    %185 = tpu.concatenate %183, %184 in 1 : vector<16x8xf32>, vector<16x120xf32> -> vector<16x128xf32>
    %186 = vector.broadcast %101 : vector<1x128xf32> to vector<16x128xf32>
    %187 = arith.mulf %185, %186 : vector<16x128xf32>
    %188 = vector.broadcast %182 : vector<16x1xf32> to vector<16x128xf32>
    %189 = arith.mulf %187, %188 : vector<16x128xf32>
    %190 = arith.addf %181, %189 : vector<16x128xf32>
    %191 = vector.extract_strided_slice %0 {offsets = [0, 2], sizes = [16, 1], strides = [1, 1]} : vector<16x135xf32> to vector<16x1xf32>
    %cst_50 = arith.constant 0.000000e+00 : f32
    %192 = vector.broadcast %cst_50 : f32 to vector<16x7xf32>
    %193 = vector.extract_strided_slice %173 {offsets = [0, 0], sizes = [16, 121], strides = [1, 1]} : vector<16x128xf32> to vector<16x121xf32>
    %194 = tpu.concatenate %192, %193 in 1 : vector<16x7xf32>, vector<16x121xf32> -> vector<16x128xf32>
    %195 = vector.broadcast %107 : vector<1x128xf32> to vector<16x128xf32>
    %196 = arith.mulf %194, %195 : vector<16x128xf32>
    %197 = vector.broadcast %191 : vector<16x1xf32> to vector<16x128xf32>
    %198 = arith.mulf %196, %197 : vector<16x128xf32>
    %199 = arith.addf %190, %198 : vector<16x128xf32>
    %200 = vector.extract_strided_slice %0 {offsets = [0, 3], sizes = [16, 1], strides = [1, 1]} : vector<16x135xf32> to vector<16x1xf32>
    %cst_51 = arith.constant 0.000000e+00 : f32
    %201 = vector.broadcast %cst_51 : f32 to vector<16x1xf32>
    %202 = vector.extract_strided_slice %173 {offsets = [0, 0], sizes = [16, 127], strides = [1, 1]} : vector<16x128xf32> to vector<16x127xf32>
    %203 = tpu.concatenate %201, %202 in 1 : vector<16x1xf32>, vector<16x127xf32> -> vector<16x128xf32>
    %204 = vector.broadcast %93 : vector<1x128xf32> to vector<16x128xf32>
    %205 = arith.mulf %203, %204 : vector<16x128xf32>
    %206 = vector.broadcast %200 : vector<16x1xf32> to vector<16x128xf32>
    %207 = arith.mulf %205, %206 : vector<16x128xf32>
    %208 = arith.addf %199, %207 : vector<16x128xf32>
    %209 = vector.extract_strided_slice %0 {offsets = [0, 4], sizes = [16, 1], strides = [1, 1]} : vector<16x135xf32> to vector<16x1xf32>
    %210 = vector.broadcast %209 : vector<16x1xf32> to vector<16x128xf32>
    %211 = arith.mulf %173, %210 : vector<16x128xf32>
    %212 = arith.addf %208, %211 : vector<16x128xf32>
    %213 = vector.extract_strided_slice %0 {offsets = [0, 5], sizes = [16, 1], strides = [1, 1]} : vector<16x135xf32> to vector<16x1xf32>
    %cst_52 = arith.constant 0.000000e+00 : f32
    %214 = vector.broadcast %cst_52 : f32 to vector<16x1xf32>
    %215 = vector.extract_strided_slice %173 {offsets = [0, 1], sizes = [16, 127], strides = [1, 1]} : vector<16x128xf32> to vector<16x127xf32>
    %216 = tpu.concatenate %215, %214 in 1 : vector<16x127xf32>, vector<16x1xf32> -> vector<16x128xf32>
    %217 = vector.broadcast %97 : vector<1x128xf32> to vector<16x128xf32>
    %218 = arith.mulf %216, %217 : vector<16x128xf32>
    %219 = vector.broadcast %213 : vector<16x1xf32> to vector<16x128xf32>
    %220 = arith.mulf %218, %219 : vector<16x128xf32>
    %221 = arith.addf %212, %220 : vector<16x128xf32>
    %222 = vector.extract_strided_slice %0 {offsets = [0, 6], sizes = [16, 1], strides = [1, 1]} : vector<16x135xf32> to vector<16x1xf32>
    %cst_53 = arith.constant 0.000000e+00 : f32
    %223 = vector.broadcast %cst_53 : f32 to vector<16x7xf32>
    %224 = vector.extract_strided_slice %173 {offsets = [0, 7], sizes = [16, 121], strides = [1, 1]} : vector<16x128xf32> to vector<16x121xf32>
    %225 = tpu.concatenate %224, %223 in 1 : vector<16x121xf32>, vector<16x7xf32> -> vector<16x128xf32>
    %226 = vector.broadcast %108 : vector<1x128xf32> to vector<16x128xf32>
    %227 = arith.mulf %225, %226 : vector<16x128xf32>
    %228 = vector.broadcast %222 : vector<16x1xf32> to vector<16x128xf32>
    %229 = arith.mulf %227, %228 : vector<16x128xf32>
    %230 = arith.addf %221, %229 : vector<16x128xf32>
    %231 = vector.extract_strided_slice %0 {offsets = [0, 7], sizes = [16, 1], strides = [1, 1]} : vector<16x135xf32> to vector<16x1xf32>
    %cst_54 = arith.constant 0.000000e+00 : f32
    %232 = vector.broadcast %cst_54 : f32 to vector<16x8xf32>
    %233 = vector.extract_strided_slice %173 {offsets = [0, 8], sizes = [16, 120], strides = [1, 1]} : vector<16x128xf32> to vector<16x120xf32>
    %234 = tpu.concatenate %233, %232 in 1 : vector<16x120xf32>, vector<16x8xf32> -> vector<16x128xf32>
    %235 = vector.broadcast %105 : vector<1x128xf32> to vector<16x128xf32>
    %236 = arith.mulf %234, %235 : vector<16x128xf32>
    %237 = vector.broadcast %231 : vector<16x1xf32> to vector<16x128xf32>
    %238 = arith.mulf %236, %237 : vector<16x128xf32>
    %239 = arith.addf %230, %238 : vector<16x128xf32>
    %240 = vector.extract_strided_slice %0 {offsets = [0, 8], sizes = [16, 1], strides = [1, 1]} : vector<16x135xf32> to vector<16x1xf32>
    %cst_55 = arith.constant 0.000000e+00 : f32
    %241 = vector.broadcast %cst_55 : f32 to vector<16x9xf32>
    %242 = vector.extract_strided_slice %173 {offsets = [0, 9], sizes = [16, 119], strides = [1, 1]} : vector<16x128xf32> to vector<16x119xf32>
    %243 = tpu.concatenate %242, %241 in 1 : vector<16x119xf32>, vector<16x9xf32> -> vector<16x128xf32>
    %244 = vector.broadcast %109 : vector<1x128xf32> to vector<16x128xf32>
    %245 = arith.mulf %243, %244 : vector<16x128xf32>
    %246 = vector.broadcast %240 : vector<16x1xf32> to vector<16x128xf32>
    %247 = arith.mulf %245, %246 : vector<16x128xf32>
    %248 = arith.addf %239, %247 : vector<16x128xf32>
    %249 = vector.extract_strided_slice %1 {offsets = [0, 0], sizes = [16, 1], strides = [1, 1]} : vector<16x15xf32> to vector<16x1xf32>
    %250 = vector.broadcast %249 : vector<16x1xf32> to vector<16x128xf32>
    %251 = arith.addf %248, %250 : vector<16x128xf32>
    %cst_56 = arith.constant 0.000000e+00 : f32
    %252 = vector.broadcast %cst_56 : f32 to vector<16x128xf32>
    %253 = arith.maximumf %251, %252 : vector<16x128xf32>
    %254 = vector.extract_strided_slice %2 {offsets = [0, 0], sizes = [16, 16], strides = [1, 1]} : vector<16x240xf32> to vector<16x16xf32>
    %255 = arith.truncf %254 : vector<16x16xf32> to vector<16x16xbf16>
    %256 = arith.truncf %253 : vector<16x128xf32> to vector<16x128xbf16>
    %cst_57 = arith.constant dense<0.000000e+00> : vector<16x128xf32>
    %257 = tpu.matmul %255, %256, %cst_57 {dimension_numbers = #tpu.dot_dimension_numbers<[1], [0], [0], [1], [0, 0, 1, 1], [], []>} : vector<16x16xbf16>, vector<16x128xbf16>, vector<16x128xf32> -> vector<16x128xf32>
    %258 = vector.extract_strided_slice %3 {offsets = [0, 0], sizes = [16, 1], strides = [1, 1]} : vector<16x15xf32> to vector<16x1xf32>
    %259 = vector.broadcast %258 : vector<16x1xf32> to vector<16x128xf32>
    %260 = arith.addf %257, %259 : vector<16x128xf32>
    %261 = vector.extract_strided_slice %0 {offsets = [0, 9], sizes = [16, 1], strides = [1, 1]} : vector<16x135xf32> to vector<16x1xf32>
    %cst_58 = arith.constant 0.000000e+00 : f32
    %262 = vector.broadcast %cst_58 : f32 to vector<16x9xf32>
    %263 = vector.extract_strided_slice %260 {offsets = [0, 0], sizes = [16, 119], strides = [1, 1]} : vector<16x128xf32> to vector<16x119xf32>
    %264 = tpu.concatenate %262, %263 in 1 : vector<16x9xf32>, vector<16x119xf32> -> vector<16x128xf32>
    %265 = vector.broadcast %106 : vector<1x128xf32> to vector<16x128xf32>
    %266 = arith.mulf %264, %265 : vector<16x128xf32>
    %267 = vector.broadcast %261 : vector<16x1xf32> to vector<16x128xf32>
    %268 = arith.mulf %266, %267 : vector<16x128xf32>
    %269 = vector.extract_strided_slice %0 {offsets = [0, 10], sizes = [16, 1], strides = [1, 1]} : vector<16x135xf32> to vector<16x1xf32>
    %cst_59 = arith.constant 0.000000e+00 : f32
    %270 = vector.broadcast %cst_59 : f32 to vector<16x8xf32>
    %271 = vector.extract_strided_slice %260 {offsets = [0, 0], sizes = [16, 120], strides = [1, 1]} : vector<16x128xf32> to vector<16x120xf32>
    %272 = tpu.concatenate %270, %271 in 1 : vector<16x8xf32>, vector<16x120xf32> -> vector<16x128xf32>
    %273 = vector.broadcast %101 : vector<1x128xf32> to vector<16x128xf32>
    %274 = arith.mulf %272, %273 : vector<16x128xf32>
    %275 = vector.broadcast %269 : vector<16x1xf32> to vector<16x128xf32>
    %276 = arith.mulf %274, %275 : vector<16x128xf32>
    %277 = arith.addf %268, %276 : vector<16x128xf32>
    %278 = vector.extract_strided_slice %0 {offsets = [0, 11], sizes = [16, 1], strides = [1, 1]} : vector<16x135xf32> to vector<16x1xf32>
    %cst_60 = arith.constant 0.000000e+00 : f32
    %279 = vector.broadcast %cst_60 : f32 to vector<16x7xf32>
    %280 = vector.extract_strided_slice %260 {offsets = [0, 0], sizes = [16, 121], strides = [1, 1]} : vector<16x128xf32> to vector<16x121xf32>
    %281 = tpu.concatenate %279, %280 in 1 : vector<16x7xf32>, vector<16x121xf32> -> vector<16x128xf32>
    %282 = vector.broadcast %107 : vector<1x128xf32> to vector<16x128xf32>
    %283 = arith.mulf %281, %282 : vector<16x128xf32>
    %284 = vector.broadcast %278 : vector<16x1xf32> to vector<16x128xf32>
    %285 = arith.mulf %283, %284 : vector<16x128xf32>
    %286 = arith.addf %277, %285 : vector<16x128xf32>
    %287 = vector.extract_strided_slice %0 {offsets = [0, 12], sizes = [16, 1], strides = [1, 1]} : vector<16x135xf32> to vector<16x1xf32>
    %cst_61 = arith.constant 0.000000e+00 : f32
    %288 = vector.broadcast %cst_61 : f32 to vector<16x1xf32>
    %289 = vector.extract_strided_slice %260 {offsets = [0, 0], sizes = [16, 127], strides = [1, 1]} : vector<16x128xf32> to vector<16x127xf32>
    %290 = tpu.concatenate %288, %289 in 1 : vector<16x1xf32>, vector<16x127xf32> -> vector<16x128xf32>
    %291 = vector.broadcast %93 : vector<1x128xf32> to vector<16x128xf32>
    %292 = arith.mulf %290, %291 : vector<16x128xf32>
    %293 = vector.broadcast %287 : vector<16x1xf32> to vector<16x128xf32>
    %294 = arith.mulf %292, %293 : vector<16x128xf32>
    %295 = arith.addf %286, %294 : vector<16x128xf32>
    %296 = vector.extract_strided_slice %0 {offsets = [0, 13], sizes = [16, 1], strides = [1, 1]} : vector<16x135xf32> to vector<16x1xf32>
    %297 = vector.broadcast %296 : vector<16x1xf32> to vector<16x128xf32>
    %298 = arith.mulf %260, %297 : vector<16x128xf32>
    %299 = arith.addf %295, %298 : vector<16x128xf32>
    %300 = vector.extract_strided_slice %0 {offsets = [0, 14], sizes = [16, 1], strides = [1, 1]} : vector<16x135xf32> to vector<16x1xf32>
    %cst_62 = arith.constant 0.000000e+00 : f32
    %301 = vector.broadcast %cst_62 : f32 to vector<16x1xf32>
    %302 = vector.extract_strided_slice %260 {offsets = [0, 1], sizes = [16, 127], strides = [1, 1]} : vector<16x128xf32> to vector<16x127xf32>
    %303 = tpu.concatenate %302, %301 in 1 : vector<16x127xf32>, vector<16x1xf32> -> vector<16x128xf32>
    %304 = vector.broadcast %97 : vector<1x128xf32> to vector<16x128xf32>
    %305 = arith.mulf %303, %304 : vector<16x128xf32>
    %306 = vector.broadcast %300 : vector<16x1xf32> to vector<16x128xf32>
    %307 = arith.mulf %305, %306 : vector<16x128xf32>
    %308 = arith.addf %299, %307 : vector<16x128xf32>
    %309 = vector.extract_strided_slice %0 {offsets = [0, 15], sizes = [16, 1], strides = [1, 1]} : vector<16x135xf32> to vector<16x1xf32>
    %cst_63 = arith.constant 0.000000e+00 : f32
    %310 = vector.broadcast %cst_63 : f32 to vector<16x7xf32>
    %311 = vector.extract_strided_slice %260 {offsets = [0, 7], sizes = [16, 121], strides = [1, 1]} : vector<16x128xf32> to vector<16x121xf32>
    %312 = tpu.concatenate %311, %310 in 1 : vector<16x121xf32>, vector<16x7xf32> -> vector<16x128xf32>
    %313 = vector.broadcast %108 : vector<1x128xf32> to vector<16x128xf32>
    %314 = arith.mulf %312, %313 : vector<16x128xf32>
    %315 = vector.broadcast %309 : vector<16x1xf32> to vector<16x128xf32>
    %316 = arith.mulf %314, %315 : vector<16x128xf32>
    %317 = arith.addf %308, %316 : vector<16x128xf32>
    %318 = vector.extract_strided_slice %0 {offsets = [0, 16], sizes = [16, 1], strides = [1, 1]} : vector<16x135xf32> to vector<16x1xf32>
    %cst_64 = arith.constant 0.000000e+00 : f32
    %319 = vector.broadcast %cst_64 : f32 to vector<16x8xf32>
    %320 = vector.extract_strided_slice %260 {offsets = [0, 8], sizes = [16, 120], strides = [1, 1]} : vector<16x128xf32> to vector<16x120xf32>
    %321 = tpu.concatenate %320, %319 in 1 : vector<16x120xf32>, vector<16x8xf32> -> vector<16x128xf32>
    %322 = vector.broadcast %105 : vector<1x128xf32> to vector<16x128xf32>
    %323 = arith.mulf %321, %322 : vector<16x128xf32>
    %324 = vector.broadcast %318 : vector<16x1xf32> to vector<16x128xf32>
    %325 = arith.mulf %323, %324 : vector<16x128xf32>
    %326 = arith.addf %317, %325 : vector<16x128xf32>
    %327 = vector.extract_strided_slice %0 {offsets = [0, 17], sizes = [16, 1], strides = [1, 1]} : vector<16x135xf32> to vector<16x1xf32>
    %cst_65 = arith.constant 0.000000e+00 : f32
    %328 = vector.broadcast %cst_65 : f32 to vector<16x9xf32>
    %329 = vector.extract_strided_slice %260 {offsets = [0, 9], sizes = [16, 119], strides = [1, 1]} : vector<16x128xf32> to vector<16x119xf32>
    %330 = tpu.concatenate %329, %328 in 1 : vector<16x119xf32>, vector<16x9xf32> -> vector<16x128xf32>
    %331 = vector.broadcast %109 : vector<1x128xf32> to vector<16x128xf32>
    %332 = arith.mulf %330, %331 : vector<16x128xf32>
    %333 = vector.broadcast %327 : vector<16x1xf32> to vector<16x128xf32>
    %334 = arith.mulf %332, %333 : vector<16x128xf32>
    %335 = arith.addf %326, %334 : vector<16x128xf32>
    %336 = vector.extract_strided_slice %1 {offsets = [0, 1], sizes = [16, 1], strides = [1, 1]} : vector<16x15xf32> to vector<16x1xf32>
    %337 = vector.broadcast %336 : vector<16x1xf32> to vector<16x128xf32>
    %338 = arith.addf %335, %337 : vector<16x128xf32>
    %cst_66 = arith.constant 0.000000e+00 : f32
    %339 = vector.broadcast %cst_66 : f32 to vector<16x128xf32>
    %340 = arith.maximumf %338, %339 : vector<16x128xf32>
    %341 = vector.extract_strided_slice %2 {offsets = [0, 16], sizes = [16, 16], strides = [1, 1]} : vector<16x240xf32> to vector<16x16xf32>
    %342 = arith.truncf %341 : vector<16x16xf32> to vector<16x16xbf16>
    %343 = arith.truncf %340 : vector<16x128xf32> to vector<16x128xbf16>
    %cst_67 = arith.constant dense<0.000000e+00> : vector<16x128xf32>
    %344 = tpu.matmul %342, %343, %cst_67 {dimension_numbers = #tpu.dot_dimension_numbers<[1], [0], [0], [1], [0, 0, 1, 1], [], []>} : vector<16x16xbf16>, vector<16x128xbf16>, vector<16x128xf32> -> vector<16x128xf32>
    %345 = vector.extract_strided_slice %3 {offsets = [0, 1], sizes = [16, 1], strides = [1, 1]} : vector<16x15xf32> to vector<16x1xf32>
    %346 = vector.broadcast %345 : vector<16x1xf32> to vector<16x128xf32>
    %347 = arith.addf %344, %346 : vector<16x128xf32>
    %348 = vector.extract_strided_slice %0 {offsets = [0, 18], sizes = [16, 1], strides = [1, 1]} : vector<16x135xf32> to vector<16x1xf32>
    %cst_68 = arith.constant 0.000000e+00 : f32
    %349 = vector.broadcast %cst_68 : f32 to vector<16x9xf32>
    %350 = vector.extract_strided_slice %347 {offsets = [0, 0], sizes = [16, 119], strides = [1, 1]} : vector<16x128xf32> to vector<16x119xf32>
    %351 = tpu.concatenate %349, %350 in 1 : vector<16x9xf32>, vector<16x119xf32> -> vector<16x128xf32>
    %352 = vector.broadcast %106 : vector<1x128xf32> to vector<16x128xf32>
    %353 = arith.mulf %351, %352 : vector<16x128xf32>
    %354 = vector.broadcast %348 : vector<16x1xf32> to vector<16x128xf32>
    %355 = arith.mulf %353, %354 : vector<16x128xf32>
    %356 = vector.extract_strided_slice %0 {offsets = [0, 19], sizes = [16, 1], strides = [1, 1]} : vector<16x135xf32> to vector<16x1xf32>
    %cst_69 = arith.constant 0.000000e+00 : f32
    %357 = vector.broadcast %cst_69 : f32 to vector<16x8xf32>
    %358 = vector.extract_strided_slice %347 {offsets = [0, 0], sizes = [16, 120], strides = [1, 1]} : vector<16x128xf32> to vector<16x120xf32>
    %359 = tpu.concatenate %357, %358 in 1 : vector<16x8xf32>, vector<16x120xf32> -> vector<16x128xf32>
    %360 = vector.broadcast %101 : vector<1x128xf32> to vector<16x128xf32>
    %361 = arith.mulf %359, %360 : vector<16x128xf32>
    %362 = vector.broadcast %356 : vector<16x1xf32> to vector<16x128xf32>
    %363 = arith.mulf %361, %362 : vector<16x128xf32>
    %364 = arith.addf %355, %363 : vector<16x128xf32>
    %365 = vector.extract_strided_slice %0 {offsets = [0, 20], sizes = [16, 1], strides = [1, 1]} : vector<16x135xf32> to vector<16x1xf32>
    %cst_70 = arith.constant 0.000000e+00 : f32
    %366 = vector.broadcast %cst_70 : f32 to vector<16x7xf32>
    %367 = vector.extract_strided_slice %347 {offsets = [0, 0], sizes = [16, 121], strides = [1, 1]} : vector<16x128xf32> to vector<16x121xf32>
    %368 = tpu.concatenate %366, %367 in 1 : vector<16x7xf32>, vector<16x121xf32> -> vector<16x128xf32>
    %369 = vector.broadcast %107 : vector<1x128xf32> to vector<16x128xf32>
    %370 = arith.mulf %368, %369 : vector<16x128xf32>
    %371 = vector.broadcast %365 : vector<16x1xf32> to vector<16x128xf32>
    %372 = arith.mulf %370, %371 : vector<16x128xf32>
    %373 = arith.addf %364, %372 : vector<16x128xf32>
    %374 = vector.extract_strided_slice %0 {offsets = [0, 21], sizes = [16, 1], strides = [1, 1]} : vector<16x135xf32> to vector<16x1xf32>
    %cst_71 = arith.constant 0.000000e+00 : f32
    %375 = vector.broadcast %cst_71 : f32 to vector<16x1xf32>
    %376 = vector.extract_strided_slice %347 {offsets = [0, 0], sizes = [16, 127], strides = [1, 1]} : vector<16x128xf32> to vector<16x127xf32>
    %377 = tpu.concatenate %375, %376 in 1 : vector<16x1xf32>, vector<16x127xf32> -> vector<16x128xf32>
    %378 = vector.broadcast %93 : vector<1x128xf32> to vector<16x128xf32>
    %379 = arith.mulf %377, %378 : vector<16x128xf32>
    %380 = vector.broadcast %374 : vector<16x1xf32> to vector<16x128xf32>
    %381 = arith.mulf %379, %380 : vector<16x128xf32>
    %382 = arith.addf %373, %381 : vector<16x128xf32>
    %383 = vector.extract_strided_slice %0 {offsets = [0, 22], sizes = [16, 1], strides = [1, 1]} : vector<16x135xf32> to vector<16x1xf32>
    %384 = vector.broadcast %383 : vector<16x1xf32> to vector<16x128xf32>
    %385 = arith.mulf %347, %384 : vector<16x128xf32>
    %386 = arith.addf %382, %385 : vector<16x128xf32>
    %387 = vector.extract_strided_slice %0 {offsets = [0, 23], sizes = [16, 1], strides = [1, 1]} : vector<16x135xf32> to vector<16x1xf32>
    %cst_72 = arith.constant 0.000000e+00 : f32
    %388 = vector.broadcast %cst_72 : f32 to vector<16x1xf32>
    %389 = vector.extract_strided_slice %347 {offsets = [0, 1], sizes = [16, 127], strides = [1, 1]} : vector<16x128xf32> to vector<16x127xf32>
    %390 = tpu.concatenate %389, %388 in 1 : vector<16x127xf32>, vector<16x1xf32> -> vector<16x128xf32>
    %391 = vector.broadcast %97 : vector<1x128xf32> to vector<16x128xf32>
    %392 = arith.mulf %390, %391 : vector<16x128xf32>
    %393 = vector.broadcast %387 : vector<16x1xf32> to vector<16x128xf32>
    %394 = arith.mulf %392, %393 : vector<16x128xf32>
    %395 = arith.addf %386, %394 : vector<16x128xf32>
    %396 = vector.extract_strided_slice %0 {offsets = [0, 24], sizes = [16, 1], strides = [1, 1]} : vector<16x135xf32> to vector<16x1xf32>
    %cst_73 = arith.constant 0.000000e+00 : f32
    %397 = vector.broadcast %cst_73 : f32 to vector<16x7xf32>
    %398 = vector.extract_strided_slice %347 {offsets = [0, 7], sizes = [16, 121], strides = [1, 1]} : vector<16x128xf32> to vector<16x121xf32>
    %399 = tpu.concatenate %398, %397 in 1 : vector<16x121xf32>, vector<16x7xf32> -> vector<16x128xf32>
    %400 = vector.broadcast %108 : vector<1x128xf32> to vector<16x128xf32>
    %401 = arith.mulf %399, %400 : vector<16x128xf32>
    %402 = vector.broadcast %396 : vector<16x1xf32> to vector<16x128xf32>
    %403 = arith.mulf %401, %402 : vector<16x128xf32>
    %404 = arith.addf %395, %403 : vector<16x128xf32>
    %405 = vector.extract_strided_slice %0 {offsets = [0, 25], sizes = [16, 1], strides = [1, 1]} : vector<16x135xf32> to vector<16x1xf32>
    %cst_74 = arith.constant 0.000000e+00 : f32
    %406 = vector.broadcast %cst_74 : f32 to vector<16x8xf32>
    %407 = vector.extract_strided_slice %347 {offsets = [0, 8], sizes = [16, 120], strides = [1, 1]} : vector<16x128xf32> to vector<16x120xf32>
    %408 = tpu.concatenate %407, %406 in 1 : vector<16x120xf32>, vector<16x8xf32> -> vector<16x128xf32>
    %409 = vector.broadcast %105 : vector<1x128xf32> to vector<16x128xf32>
    %410 = arith.mulf %408, %409 : vector<16x128xf32>
    %411 = vector.broadcast %405 : vector<16x1xf32> to vector<16x128xf32>
    %412 = arith.mulf %410, %411 : vector<16x128xf32>
    %413 = arith.addf %404, %412 : vector<16x128xf32>
    %414 = vector.extract_strided_slice %0 {offsets = [0, 26], sizes = [16, 1], strides = [1, 1]} : vector<16x135xf32> to vector<16x1xf32>
    %cst_75 = arith.constant 0.000000e+00 : f32
    %415 = vector.broadcast %cst_75 : f32 to vector<16x9xf32>
    %416 = vector.extract_strided_slice %347 {offsets = [0, 9], sizes = [16, 119], strides = [1, 1]} : vector<16x128xf32> to vector<16x119xf32>
    %417 = tpu.concatenate %416, %415 in 1 : vector<16x119xf32>, vector<16x9xf32> -> vector<16x128xf32>
    %418 = vector.broadcast %109 : vector<1x128xf32> to vector<16x128xf32>
    %419 = arith.mulf %417, %418 : vector<16x128xf32>
    %420 = vector.broadcast %414 : vector<16x1xf32> to vector<16x128xf32>
    %421 = arith.mulf %419, %420 : vector<16x128xf32>
    %422 = arith.addf %413, %421 : vector<16x128xf32>
    %423 = vector.extract_strided_slice %1 {offsets = [0, 2], sizes = [16, 1], strides = [1, 1]} : vector<16x15xf32> to vector<16x1xf32>
    %424 = vector.broadcast %423 : vector<16x1xf32> to vector<16x128xf32>
    %425 = arith.addf %422, %424 : vector<16x128xf32>
    %cst_76 = arith.constant 0.000000e+00 : f32
    %426 = vector.broadcast %cst_76 : f32 to vector<16x128xf32>
    %427 = arith.maximumf %425, %426 : vector<16x128xf32>
    %428 = vector.extract_strided_slice %2 {offsets = [0, 32], sizes = [16, 16], strides = [1, 1]} : vector<16x240xf32> to vector<16x16xf32>
    %429 = arith.truncf %428 : vector<16x16xf32> to vector<16x16xbf16>
    %430 = arith.truncf %427 : vector<16x128xf32> to vector<16x128xbf16>
    %cst_77 = arith.constant dense<0.000000e+00> : vector<16x128xf32>
    %431 = tpu.matmul %429, %430, %cst_77 {dimension_numbers = #tpu.dot_dimension_numbers<[1], [0], [0], [1], [0, 0, 1, 1], [], []>} : vector<16x16xbf16>, vector<16x128xbf16>, vector<16x128xf32> -> vector<16x128xf32>
    %432 = vector.extract_strided_slice %3 {offsets = [0, 2], sizes = [16, 1], strides = [1, 1]} : vector<16x15xf32> to vector<16x1xf32>
    %433 = vector.broadcast %432 : vector<16x1xf32> to vector<16x128xf32>
    %434 = arith.addf %431, %433 : vector<16x128xf32>
    %c0_78 = arith.constant 0 : index
    %c0_79 = arith.constant 0 : index
    %435 = vector.load %arg6[%c0_78, %c0_79] : memref<128x32xf32, #tpu.memory_space<vmem>>, vector<128x32xf32>
    %cst_80 = arith.constant 0.000000e+00 : f32
    %436 = vector.broadcast %cst_80 : f32 to vector<16x1xf32>
    %437 = vector.extract_strided_slice %434 {offsets = [0, 1], sizes = [16, 127], strides = [1, 1]} : vector<16x128xf32> to vector<16x127xf32>
    %438 = tpu.concatenate %437, %436 in 1 : vector<16x127xf32>, vector<16x1xf32> -> vector<16x128xf32>
    %439 = arith.maximumf %434, %438 : vector<16x128xf32>
    %cst_81 = arith.constant 0.000000e+00 : f32
    %440 = vector.broadcast %cst_81 : f32 to vector<16x8xf32>
    %441 = vector.extract_strided_slice %439 {offsets = [0, 8], sizes = [16, 120], strides = [1, 1]} : vector<16x128xf32> to vector<16x120xf32>
    %442 = tpu.concatenate %441, %440 in 1 : vector<16x120xf32>, vector<16x8xf32> -> vector<16x128xf32>
    %443 = arith.maximumf %439, %442 : vector<16x128xf32>
    %cst_82 = arith.constant dense<0.000000e+00> : vector<16x32xf32>
    %444 = tpu.matmul %443, %435, %cst_82 {dimension_numbers = #tpu.dot_dimension_numbers<[1], [0], [0], [1], [0, 0, 1, 1], [], []>} : vector<16x128xf32>, vector<128x32xf32>, vector<16x32xf32> -> vector<16x32xf32>
    %445 = vector.extract_strided_slice %0 {offsets = [0, 81], sizes = [16, 1], strides = [1, 1]} : vector<16x135xf32> to vector<16x1xf32>
    %cst_83 = arith.constant 0.000000e+00 : f32
    %446 = vector.broadcast %cst_83 : f32 to vector<16x5xf32>
    %447 = vector.extract_strided_slice %444 {offsets = [0, 0], sizes = [16, 27], strides = [1, 1]} : vector<16x32xf32> to vector<16x27xf32>
    %448 = tpu.concatenate %446, %447 in 1 : vector<16x5xf32>, vector<16x27xf32> -> vector<16x32xf32>
    %449 = vector.broadcast %159 : vector<1x32xf32> to vector<16x32xf32>
    %450 = arith.mulf %448, %449 : vector<16x32xf32>
    %451 = vector.broadcast %445 : vector<16x1xf32> to vector<16x32xf32>
    %452 = arith.mulf %450, %451 : vector<16x32xf32>
    %453 = vector.extract_strided_slice %0 {offsets = [0, 82], sizes = [16, 1], strides = [1, 1]} : vector<16x135xf32> to vector<16x1xf32>
    %cst_84 = arith.constant 0.000000e+00 : f32
    %454 = vector.broadcast %cst_84 : f32 to vector<16x4xf32>
    %455 = vector.extract_strided_slice %444 {offsets = [0, 0], sizes = [16, 28], strides = [1, 1]} : vector<16x32xf32> to vector<16x28xf32>
    %456 = tpu.concatenate %454, %455 in 1 : vector<16x4xf32>, vector<16x28xf32> -> vector<16x32xf32>
    %457 = vector.broadcast %154 : vector<1x32xf32> to vector<16x32xf32>
    %458 = arith.mulf %456, %457 : vector<16x32xf32>
    %459 = vector.broadcast %453 : vector<16x1xf32> to vector<16x32xf32>
    %460 = arith.mulf %458, %459 : vector<16x32xf32>
    %461 = arith.addf %452, %460 : vector<16x32xf32>
    %462 = vector.extract_strided_slice %0 {offsets = [0, 83], sizes = [16, 1], strides = [1, 1]} : vector<16x135xf32> to vector<16x1xf32>
    %cst_85 = arith.constant 0.000000e+00 : f32
    %463 = vector.broadcast %cst_85 : f32 to vector<16x3xf32>
    %464 = vector.extract_strided_slice %444 {offsets = [0, 0], sizes = [16, 29], strides = [1, 1]} : vector<16x32xf32> to vector<16x29xf32>
    %465 = tpu.concatenate %463, %464 in 1 : vector<16x3xf32>, vector<16x29xf32> -> vector<16x32xf32>
    %466 = vector.broadcast %160 : vector<1x32xf32> to vector<16x32xf32>
    %467 = arith.mulf %465, %466 : vector<16x32xf32>
    %468 = vector.broadcast %462 : vector<16x1xf32> to vector<16x32xf32>
    %469 = arith.mulf %467, %468 : vector<16x32xf32>
    %470 = arith.addf %461, %469 : vector<16x32xf32>
    %471 = vector.extract_strided_slice %0 {offsets = [0, 84], sizes = [16, 1], strides = [1, 1]} : vector<16x135xf32> to vector<16x1xf32>
    %cst_86 = arith.constant 0.000000e+00 : f32
    %472 = vector.broadcast %cst_86 : f32 to vector<16x1xf32>
    %473 = vector.extract_strided_slice %444 {offsets = [0, 0], sizes = [16, 31], strides = [1, 1]} : vector<16x32xf32> to vector<16x31xf32>
    %474 = tpu.concatenate %472, %473 in 1 : vector<16x1xf32>, vector<16x31xf32> -> vector<16x32xf32>
    %475 = vector.broadcast %146 : vector<1x32xf32> to vector<16x32xf32>
    %476 = arith.mulf %474, %475 : vector<16x32xf32>
    %477 = vector.broadcast %471 : vector<16x1xf32> to vector<16x32xf32>
    %478 = arith.mulf %476, %477 : vector<16x32xf32>
    %479 = arith.addf %470, %478 : vector<16x32xf32>
    %480 = vector.extract_strided_slice %0 {offsets = [0, 85], sizes = [16, 1], strides = [1, 1]} : vector<16x135xf32> to vector<16x1xf32>
    %481 = vector.broadcast %480 : vector<16x1xf32> to vector<16x32xf32>
    %482 = arith.mulf %444, %481 : vector<16x32xf32>
    %483 = arith.addf %479, %482 : vector<16x32xf32>
    %484 = vector.extract_strided_slice %0 {offsets = [0, 86], sizes = [16, 1], strides = [1, 1]} : vector<16x135xf32> to vector<16x1xf32>
    %cst_87 = arith.constant 0.000000e+00 : f32
    %485 = vector.broadcast %cst_87 : f32 to vector<16x1xf32>
    %486 = vector.extract_strided_slice %444 {offsets = [0, 1], sizes = [16, 31], strides = [1, 1]} : vector<16x32xf32> to vector<16x31xf32>
    %487 = tpu.concatenate %486, %485 in 1 : vector<16x31xf32>, vector<16x1xf32> -> vector<16x32xf32>
    %488 = vector.broadcast %150 : vector<1x32xf32> to vector<16x32xf32>
    %489 = arith.mulf %487, %488 : vector<16x32xf32>
    %490 = vector.broadcast %484 : vector<16x1xf32> to vector<16x32xf32>
    %491 = arith.mulf %489, %490 : vector<16x32xf32>
    %492 = arith.addf %483, %491 : vector<16x32xf32>
    %493 = vector.extract_strided_slice %0 {offsets = [0, 87], sizes = [16, 1], strides = [1, 1]} : vector<16x135xf32> to vector<16x1xf32>
    %cst_88 = arith.constant 0.000000e+00 : f32
    %494 = vector.broadcast %cst_88 : f32 to vector<16x3xf32>
    %495 = vector.extract_strided_slice %444 {offsets = [0, 3], sizes = [16, 29], strides = [1, 1]} : vector<16x32xf32> to vector<16x29xf32>
    %496 = tpu.concatenate %495, %494 in 1 : vector<16x29xf32>, vector<16x3xf32> -> vector<16x32xf32>
    %497 = vector.broadcast %161 : vector<1x32xf32> to vector<16x32xf32>
    %498 = arith.mulf %496, %497 : vector<16x32xf32>
    %499 = vector.broadcast %493 : vector<16x1xf32> to vector<16x32xf32>
    %500 = arith.mulf %498, %499 : vector<16x32xf32>
    %501 = arith.addf %492, %500 : vector<16x32xf32>
    %502 = vector.extract_strided_slice %0 {offsets = [0, 88], sizes = [16, 1], strides = [1, 1]} : vector<16x135xf32> to vector<16x1xf32>
    %cst_89 = arith.constant 0.000000e+00 : f32
    %503 = vector.broadcast %cst_89 : f32 to vector<16x4xf32>
    %504 = vector.extract_strided_slice %444 {offsets = [0, 4], sizes = [16, 28], strides = [1, 1]} : vector<16x32xf32> to vector<16x28xf32>
    %505 = tpu.concatenate %504, %503 in 1 : vector<16x28xf32>, vector<16x4xf32> -> vector<16x32xf32>
    %506 = vector.broadcast %158 : vector<1x32xf32> to vector<16x32xf32>
    %507 = arith.mulf %505, %506 : vector<16x32xf32>
    %508 = vector.broadcast %502 : vector<16x1xf32> to vector<16x32xf32>
    %509 = arith.mulf %507, %508 : vector<16x32xf32>
    %510 = arith.addf %501, %509 : vector<16x32xf32>
    %511 = vector.extract_strided_slice %0 {offsets = [0, 89], sizes = [16, 1], strides = [1, 1]} : vector<16x135xf32> to vector<16x1xf32>
    %cst_90 = arith.constant 0.000000e+00 : f32
    %512 = vector.broadcast %cst_90 : f32 to vector<16x5xf32>
    %513 = vector.extract_strided_slice %444 {offsets = [0, 5], sizes = [16, 27], strides = [1, 1]} : vector<16x32xf32> to vector<16x27xf32>
    %514 = tpu.concatenate %513, %512 in 1 : vector<16x27xf32>, vector<16x5xf32> -> vector<16x32xf32>
    %515 = vector.broadcast %162 : vector<1x32xf32> to vector<16x32xf32>
    %516 = arith.mulf %514, %515 : vector<16x32xf32>
    %517 = vector.broadcast %511 : vector<16x1xf32> to vector<16x32xf32>
    %518 = arith.mulf %516, %517 : vector<16x32xf32>
    %519 = arith.addf %510, %518 : vector<16x32xf32>
    %520 = vector.extract_strided_slice %1 {offsets = [0, 9], sizes = [16, 1], strides = [1, 1]} : vector<16x15xf32> to vector<16x1xf32>
    %521 = vector.broadcast %520 : vector<16x1xf32> to vector<16x32xf32>
    %522 = arith.addf %519, %521 : vector<16x32xf32>
    %cst_91 = arith.constant 0.000000e+00 : f32
    %523 = vector.broadcast %cst_91 : f32 to vector<16x32xf32>
    %524 = arith.maximumf %522, %523 : vector<16x32xf32>
    %525 = vector.extract_strided_slice %2 {offsets = [0, 144], sizes = [16, 16], strides = [1, 1]} : vector<16x240xf32> to vector<16x16xf32>
    %526 = arith.truncf %525 : vector<16x16xf32> to vector<16x16xbf16>
    %527 = arith.truncf %524 : vector<16x32xf32> to vector<16x32xbf16>
    %cst_92 = arith.constant dense<0.000000e+00> : vector<16x32xf32>
    %528 = tpu.matmul %526, %527, %cst_92 {dimension_numbers = #tpu.dot_dimension_numbers<[1], [0], [0], [1], [0, 0, 1, 1], [], []>} : vector<16x16xbf16>, vector<16x32xbf16>, vector<16x32xf32> -> vector<16x32xf32>
    %529 = vector.extract_strided_slice %3 {offsets = [0, 9], sizes = [16, 1], strides = [1, 1]} : vector<16x15xf32> to vector<16x1xf32>
    %530 = vector.broadcast %529 : vector<16x1xf32> to vector<16x32xf32>
    %531 = arith.addf %528, %530 : vector<16x32xf32>
    %532 = vector.extract_strided_slice %0 {offsets = [0, 90], sizes = [16, 1], strides = [1, 1]} : vector<16x135xf32> to vector<16x1xf32>
    %cst_93 = arith.constant 0.000000e+00 : f32
    %533 = vector.broadcast %cst_93 : f32 to vector<16x5xf32>
    %534 = vector.extract_strided_slice %531 {offsets = [0, 0], sizes = [16, 27], strides = [1, 1]} : vector<16x32xf32> to vector<16x27xf32>
    %535 = tpu.concatenate %533, %534 in 1 : vector<16x5xf32>, vector<16x27xf32> -> vector<16x32xf32>
    %536 = vector.broadcast %159 : vector<1x32xf32> to vector<16x32xf32>
    %537 = arith.mulf %535, %536 : vector<16x32xf32>
    %538 = vector.broadcast %532 : vector<16x1xf32> to vector<16x32xf32>
    %539 = arith.mulf %537, %538 : vector<16x32xf32>
    %540 = vector.extract_strided_slice %0 {offsets = [0, 91], sizes = [16, 1], strides = [1, 1]} : vector<16x135xf32> to vector<16x1xf32>
    %cst_94 = arith.constant 0.000000e+00 : f32
    %541 = vector.broadcast %cst_94 : f32 to vector<16x4xf32>
    %542 = vector.extract_strided_slice %531 {offsets = [0, 0], sizes = [16, 28], strides = [1, 1]} : vector<16x32xf32> to vector<16x28xf32>
    %543 = tpu.concatenate %541, %542 in 1 : vector<16x4xf32>, vector<16x28xf32> -> vector<16x32xf32>
    %544 = vector.broadcast %154 : vector<1x32xf32> to vector<16x32xf32>
    %545 = arith.mulf %543, %544 : vector<16x32xf32>
    %546 = vector.broadcast %540 : vector<16x1xf32> to vector<16x32xf32>
    %547 = arith.mulf %545, %546 : vector<16x32xf32>
    %548 = arith.addf %539, %547 : vector<16x32xf32>
    %549 = vector.extract_strided_slice %0 {offsets = [0, 92], sizes = [16, 1], strides = [1, 1]} : vector<16x135xf32> to vector<16x1xf32>
    %cst_95 = arith.constant 0.000000e+00 : f32
    %550 = vector.broadcast %cst_95 : f32 to vector<16x3xf32>
    %551 = vector.extract_strided_slice %531 {offsets = [0, 0], sizes = [16, 29], strides = [1, 1]} : vector<16x32xf32> to vector<16x29xf32>
    %552 = tpu.concatenate %550, %551 in 1 : vector<16x3xf32>, vector<16x29xf32> -> vector<16x32xf32>
    %553 = vector.broadcast %160 : vector<1x32xf32> to vector<16x32xf32>
    %554 = arith.mulf %552, %553 : vector<16x32xf32>
    %555 = vector.broadcast %549 : vector<16x1xf32> to vector<16x32xf32>
    %556 = arith.mulf %554, %555 : vector<16x32xf32>
    %557 = arith.addf %548, %556 : vector<16x32xf32>
    %558 = vector.extract_strided_slice %0 {offsets = [0, 93], sizes = [16, 1], strides = [1, 1]} : vector<16x135xf32> to vector<16x1xf32>
    %cst_96 = arith.constant 0.000000e+00 : f32
    %559 = vector.broadcast %cst_96 : f32 to vector<16x1xf32>
    %560 = vector.extract_strided_slice %531 {offsets = [0, 0], sizes = [16, 31], strides = [1, 1]} : vector<16x32xf32> to vector<16x31xf32>
    %561 = tpu.concatenate %559, %560 in 1 : vector<16x1xf32>, vector<16x31xf32> -> vector<16x32xf32>
    %562 = vector.broadcast %146 : vector<1x32xf32> to vector<16x32xf32>
    %563 = arith.mulf %561, %562 : vector<16x32xf32>
    %564 = vector.broadcast %558 : vector<16x1xf32> to vector<16x32xf32>
    %565 = arith.mulf %563, %564 : vector<16x32xf32>
    %566 = arith.addf %557, %565 : vector<16x32xf32>
    %567 = vector.extract_strided_slice %0 {offsets = [0, 94], sizes = [16, 1], strides = [1, 1]} : vector<16x135xf32> to vector<16x1xf32>
    %568 = vector.broadcast %567 : vector<16x1xf32> to vector<16x32xf32>
    %569 = arith.mulf %531, %568 : vector<16x32xf32>
    %570 = arith.addf %566, %569 : vector<16x32xf32>
    %571 = vector.extract_strided_slice %0 {offsets = [0, 95], sizes = [16, 1], strides = [1, 1]} : vector<16x135xf32> to vector<16x1xf32>
    %cst_97 = arith.constant 0.000000e+00 : f32
    %572 = vector.broadcast %cst_97 : f32 to vector<16x1xf32>
    %573 = vector.extract_strided_slice %531 {offsets = [0, 1], sizes = [16, 31], strides = [1, 1]} : vector<16x32xf32> to vector<16x31xf32>
    %574 = tpu.concatenate %573, %572 in 1 : vector<16x31xf32>, vector<16x1xf32> -> vector<16x32xf32>
    %575 = vector.broadcast %150 : vector<1x32xf32> to vector<16x32xf32>
    %576 = arith.mulf %574, %575 : vector<16x32xf32>
    %577 = vector.broadcast %571 : vector<16x1xf32> to vector<16x32xf32>
    %578 = arith.mulf %576, %577 : vector<16x32xf32>
    %579 = arith.addf %570, %578 : vector<16x32xf32>
    %580 = vector.extract_strided_slice %0 {offsets = [0, 96], sizes = [16, 1], strides = [1, 1]} : vector<16x135xf32> to vector<16x1xf32>
    %cst_98 = arith.constant 0.000000e+00 : f32
    %581 = vector.broadcast %cst_98 : f32 to vector<16x3xf32>
    %582 = vector.extract_strided_slice %531 {offsets = [0, 3], sizes = [16, 29], strides = [1, 1]} : vector<16x32xf32> to vector<16x29xf32>
    %583 = tpu.concatenate %582, %581 in 1 : vector<16x29xf32>, vector<16x3xf32> -> vector<16x32xf32>
    %584 = vector.broadcast %161 : vector<1x32xf32> to vector<16x32xf32>
    %585 = arith.mulf %583, %584 : vector<16x32xf32>
    %586 = vector.broadcast %580 : vector<16x1xf32> to vector<16x32xf32>
    %587 = arith.mulf %585, %586 : vector<16x32xf32>
    %588 = arith.addf %579, %587 : vector<16x32xf32>
    %589 = vector.extract_strided_slice %0 {offsets = [0, 97], sizes = [16, 1], strides = [1, 1]} : vector<16x135xf32> to vector<16x1xf32>
    %cst_99 = arith.constant 0.000000e+00 : f32
    %590 = vector.broadcast %cst_99 : f32 to vector<16x4xf32>
    %591 = vector.extract_strided_slice %531 {offsets = [0, 4], sizes = [16, 28], strides = [1, 1]} : vector<16x32xf32> to vector<16x28xf32>
    %592 = tpu.concatenate %591, %590 in 1 : vector<16x28xf32>, vector<16x4xf32> -> vector<16x32xf32>
    %593 = vector.broadcast %158 : vector<1x32xf32> to vector<16x32xf32>
    %594 = arith.mulf %592, %593 : vector<16x32xf32>
    %595 = vector.broadcast %589 : vector<16x1xf32> to vector<16x32xf32>
    %596 = arith.mulf %594, %595 : vector<16x32xf32>
    %597 = arith.addf %588, %596 : vector<16x32xf32>
    %598 = vector.extract_strided_slice %0 {offsets = [0, 98], sizes = [16, 1], strides = [1, 1]} : vector<16x135xf32> to vector<16x1xf32>
    %cst_100 = arith.constant 0.000000e+00 : f32
    %599 = vector.broadcast %cst_100 : f32 to vector<16x5xf32>
    %600 = vector.extract_strided_slice %531 {offsets = [0, 5], sizes = [16, 27], strides = [1, 1]} : vector<16x32xf32> to vector<16x27xf32>
    %601 = tpu.concatenate %600, %599 in 1 : vector<16x27xf32>, vector<16x5xf32> -> vector<16x32xf32>
    %602 = vector.broadcast %162 : vector<1x32xf32> to vector<16x32xf32>
    %603 = arith.mulf %601, %602 : vector<16x32xf32>
    %604 = vector.broadcast %598 : vector<16x1xf32> to vector<16x32xf32>
    %605 = arith.mulf %603, %604 : vector<16x32xf32>
    %606 = arith.addf %597, %605 : vector<16x32xf32>
    %607 = vector.extract_strided_slice %1 {offsets = [0, 10], sizes = [16, 1], strides = [1, 1]} : vector<16x15xf32> to vector<16x1xf32>
    %608 = vector.broadcast %607 : vector<16x1xf32> to vector<16x32xf32>
    %609 = arith.addf %606, %608 : vector<16x32xf32>
    %cst_101 = arith.constant 0.000000e+00 : f32
    %610 = vector.broadcast %cst_101 : f32 to vector<16x32xf32>
    %611 = arith.maximumf %609, %610 : vector<16x32xf32>
    %612 = vector.extract_strided_slice %2 {offsets = [0, 160], sizes = [16, 16], strides = [1, 1]} : vector<16x240xf32> to vector<16x16xf32>
    %613 = arith.truncf %612 : vector<16x16xf32> to vector<16x16xbf16>
    %614 = arith.truncf %611 : vector<16x32xf32> to vector<16x32xbf16>
    %cst_102 = arith.constant dense<0.000000e+00> : vector<16x32xf32>
    %615 = tpu.matmul %613, %614, %cst_102 {dimension_numbers = #tpu.dot_dimension_numbers<[1], [0], [0], [1], [0, 0, 1, 1], [], []>} : vector<16x16xbf16>, vector<16x32xbf16>, vector<16x32xf32> -> vector<16x32xf32>
    %616 = vector.extract_strided_slice %3 {offsets = [0, 10], sizes = [16, 1], strides = [1, 1]} : vector<16x15xf32> to vector<16x1xf32>
    %617 = vector.broadcast %616 : vector<16x1xf32> to vector<16x32xf32>
    %618 = arith.addf %615, %617 : vector<16x32xf32>
    %619 = vector.extract_strided_slice %0 {offsets = [0, 99], sizes = [16, 1], strides = [1, 1]} : vector<16x135xf32> to vector<16x1xf32>
    %cst_103 = arith.constant 0.000000e+00 : f32
    %620 = vector.broadcast %cst_103 : f32 to vector<16x5xf32>
    %621 = vector.extract_strided_slice %618 {offsets = [0, 0], sizes = [16, 27], strides = [1, 1]} : vector<16x32xf32> to vector<16x27xf32>
    %622 = tpu.concatenate %620, %621 in 1 : vector<16x5xf32>, vector<16x27xf32> -> vector<16x32xf32>
    %623 = vector.broadcast %159 : vector<1x32xf32> to vector<16x32xf32>
    %624 = arith.mulf %622, %623 : vector<16x32xf32>
    %625 = vector.broadcast %619 : vector<16x1xf32> to vector<16x32xf32>
    %626 = arith.mulf %624, %625 : vector<16x32xf32>
    %627 = vector.extract_strided_slice %0 {offsets = [0, 100], sizes = [16, 1], strides = [1, 1]} : vector<16x135xf32> to vector<16x1xf32>
    %cst_104 = arith.constant 0.000000e+00 : f32
    %628 = vector.broadcast %cst_104 : f32 to vector<16x4xf32>
    %629 = vector.extract_strided_slice %618 {offsets = [0, 0], sizes = [16, 28], strides = [1, 1]} : vector<16x32xf32> to vector<16x28xf32>
    %630 = tpu.concatenate %628, %629 in 1 : vector<16x4xf32>, vector<16x28xf32> -> vector<16x32xf32>
    %631 = vector.broadcast %154 : vector<1x32xf32> to vector<16x32xf32>
    %632 = arith.mulf %630, %631 : vector<16x32xf32>
    %633 = vector.broadcast %627 : vector<16x1xf32> to vector<16x32xf32>
    %634 = arith.mulf %632, %633 : vector<16x32xf32>
    %635 = arith.addf %626, %634 : vector<16x32xf32>
    %636 = vector.extract_strided_slice %0 {offsets = [0, 101], sizes = [16, 1], strides = [1, 1]} : vector<16x135xf32> to vector<16x1xf32>
    %cst_105 = arith.constant 0.000000e+00 : f32
    %637 = vector.broadcast %cst_105 : f32 to vector<16x3xf32>
    %638 = vector.extract_strided_slice %618 {offsets = [0, 0], sizes = [16, 29], strides = [1, 1]} : vector<16x32xf32> to vector<16x29xf32>
    %639 = tpu.concatenate %637, %638 in 1 : vector<16x3xf32>, vector<16x29xf32> -> vector<16x32xf32>
    %640 = vector.broadcast %160 : vector<1x32xf32> to vector<16x32xf32>
    %641 = arith.mulf %639, %640 : vector<16x32xf32>
    %642 = vector.broadcast %636 : vector<16x1xf32> to vector<16x32xf32>
    %643 = arith.mulf %641, %642 : vector<16x32xf32>
    %644 = arith.addf %635, %643 : vector<16x32xf32>
    %645 = vector.extract_strided_slice %0 {offsets = [0, 102], sizes = [16, 1], strides = [1, 1]} : vector<16x135xf32> to vector<16x1xf32>
    %cst_106 = arith.constant 0.000000e+00 : f32
    %646 = vector.broadcast %cst_106 : f32 to vector<16x1xf32>
    %647 = vector.extract_strided_slice %618 {offsets = [0, 0], sizes = [16, 31], strides = [1, 1]} : vector<16x32xf32> to vector<16x31xf32>
    %648 = tpu.concatenate %646, %647 in 1 : vector<16x1xf32>, vector<16x31xf32> -> vector<16x32xf32>
    %649 = vector.broadcast %146 : vector<1x32xf32> to vector<16x32xf32>
    %650 = arith.mulf %648, %649 : vector<16x32xf32>
    %651 = vector.broadcast %645 : vector<16x1xf32> to vector<16x32xf32>
    %652 = arith.mulf %650, %651 : vector<16x32xf32>
    %653 = arith.addf %644, %652 : vector<16x32xf32>
    %654 = vector.extract_strided_slice %0 {offsets = [0, 103], sizes = [16, 1], strides = [1, 1]} : vector<16x135xf32> to vector<16x1xf32>
    %655 = vector.broadcast %654 : vector<16x1xf32> to vector<16x32xf32>
    %656 = arith.mulf %618, %655 : vector<16x32xf32>
    %657 = arith.addf %653, %656 : vector<16x32xf32>
    %658 = vector.extract_strided_slice %0 {offsets = [0, 104], sizes = [16, 1], strides = [1, 1]} : vector<16x135xf32> to vector<16x1xf32>
    %cst_107 = arith.constant 0.000000e+00 : f32
    %659 = vector.broadcast %cst_107 : f32 to vector<16x1xf32>
    %660 = vector.extract_strided_slice %618 {offsets = [0, 1], sizes = [16, 31], strides = [1, 1]} : vector<16x32xf32> to vector<16x31xf32>
    %661 = tpu.concatenate %660, %659 in 1 : vector<16x31xf32>, vector<16x1xf32> -> vector<16x32xf32>
    %662 = vector.broadcast %150 : vector<1x32xf32> to vector<16x32xf32>
    %663 = arith.mulf %661, %662 : vector<16x32xf32>
    %664 = vector.broadcast %658 : vector<16x1xf32> to vector<16x32xf32>
    %665 = arith.mulf %663, %664 : vector<16x32xf32>
    %666 = arith.addf %657, %665 : vector<16x32xf32>
    %667 = vector.extract_strided_slice %0 {offsets = [0, 105], sizes = [16, 1], strides = [1, 1]} : vector<16x135xf32> to vector<16x1xf32>
    %cst_108 = arith.constant 0.000000e+00 : f32
    %668 = vector.broadcast %cst_108 : f32 to vector<16x3xf32>
    %669 = vector.extract_strided_slice %618 {offsets = [0, 3], sizes = [16, 29], strides = [1, 1]} : vector<16x32xf32> to vector<16x29xf32>
    %670 = tpu.concatenate %669, %668 in 1 : vector<16x29xf32>, vector<16x3xf32> -> vector<16x32xf32>
    %671 = vector.broadcast %161 : vector<1x32xf32> to vector<16x32xf32>
    %672 = arith.mulf %670, %671 : vector<16x32xf32>
    %673 = vector.broadcast %667 : vector<16x1xf32> to vector<16x32xf32>
    %674 = arith.mulf %672, %673 : vector<16x32xf32>
    %675 = arith.addf %666, %674 : vector<16x32xf32>
    %676 = vector.extract_strided_slice %0 {offsets = [0, 106], sizes = [16, 1], strides = [1, 1]} : vector<16x135xf32> to vector<16x1xf32>
    %cst_109 = arith.constant 0.000000e+00 : f32
    %677 = vector.broadcast %cst_109 : f32 to vector<16x4xf32>
    %678 = vector.extract_strided_slice %618 {offsets = [0, 4], sizes = [16, 28], strides = [1, 1]} : vector<16x32xf32> to vector<16x28xf32>
    %679 = tpu.concatenate %678, %677 in 1 : vector<16x28xf32>, vector<16x4xf32> -> vector<16x32xf32>
    %680 = vector.broadcast %158 : vector<1x32xf32> to vector<16x32xf32>
    %681 = arith.mulf %679, %680 : vector<16x32xf32>
    %682 = vector.broadcast %676 : vector<16x1xf32> to vector<16x32xf32>
    %683 = arith.mulf %681, %682 : vector<16x32xf32>
    %684 = arith.addf %675, %683 : vector<16x32xf32>
    %685 = vector.extract_strided_slice %0 {offsets = [0, 107], sizes = [16, 1], strides = [1, 1]} : vector<16x135xf32> to vector<16x1xf32>
    %cst_110 = arith.constant 0.000000e+00 : f32
    %686 = vector.broadcast %cst_110 : f32 to vector<16x5xf32>
    %687 = vector.extract_strided_slice %618 {offsets = [0, 5], sizes = [16, 27], strides = [1, 1]} : vector<16x32xf32> to vector<16x27xf32>
    %688 = tpu.concatenate %687, %686 in 1 : vector<16x27xf32>, vector<16x5xf32> -> vector<16x32xf32>
    %689 = vector.broadcast %162 : vector<1x32xf32> to vector<16x32xf32>
    %690 = arith.mulf %688, %689 : vector<16x32xf32>
    %691 = vector.broadcast %685 : vector<16x1xf32> to vector<16x32xf32>
    %692 = arith.mulf %690, %691 : vector<16x32xf32>
    %693 = arith.addf %684, %692 : vector<16x32xf32>
    %694 = vector.extract_strided_slice %1 {offsets = [0, 11], sizes = [16, 1], strides = [1, 1]} : vector<16x15xf32> to vector<16x1xf32>
    %695 = vector.broadcast %694 : vector<16x1xf32> to vector<16x32xf32>
    %696 = arith.addf %693, %695 : vector<16x32xf32>
    %cst_111 = arith.constant 0.000000e+00 : f32
    %697 = vector.broadcast %cst_111 : f32 to vector<16x32xf32>
    %698 = arith.maximumf %696, %697 : vector<16x32xf32>
    %699 = vector.extract_strided_slice %2 {offsets = [0, 176], sizes = [16, 16], strides = [1, 1]} : vector<16x240xf32> to vector<16x16xf32>
    %700 = arith.truncf %699 : vector<16x16xf32> to vector<16x16xbf16>
    %701 = arith.truncf %698 : vector<16x32xf32> to vector<16x32xbf16>
    %cst_112 = arith.constant dense<0.000000e+00> : vector<16x32xf32>
    %702 = tpu.matmul %700, %701, %cst_112 {dimension_numbers = #tpu.dot_dimension_numbers<[1], [0], [0], [1], [0, 0, 1, 1], [], []>} : vector<16x16xbf16>, vector<16x32xbf16>, vector<16x32xf32> -> vector<16x32xf32>
    %703 = vector.extract_strided_slice %3 {offsets = [0, 11], sizes = [16, 1], strides = [1, 1]} : vector<16x15xf32> to vector<16x1xf32>
    %704 = vector.broadcast %703 : vector<16x1xf32> to vector<16x32xf32>
    %705 = arith.addf %702, %704 : vector<16x32xf32>
    %706 = vector.extract_strided_slice %0 {offsets = [0, 108], sizes = [16, 1], strides = [1, 1]} : vector<16x135xf32> to vector<16x1xf32>
    %cst_113 = arith.constant 0.000000e+00 : f32
    %707 = vector.broadcast %cst_113 : f32 to vector<16x5xf32>
    %708 = vector.extract_strided_slice %705 {offsets = [0, 0], sizes = [16, 27], strides = [1, 1]} : vector<16x32xf32> to vector<16x27xf32>
    %709 = tpu.concatenate %707, %708 in 1 : vector<16x5xf32>, vector<16x27xf32> -> vector<16x32xf32>
    %710 = vector.broadcast %159 : vector<1x32xf32> to vector<16x32xf32>
    %711 = arith.mulf %709, %710 : vector<16x32xf32>
    %712 = vector.broadcast %706 : vector<16x1xf32> to vector<16x32xf32>
    %713 = arith.mulf %711, %712 : vector<16x32xf32>
    %714 = vector.extract_strided_slice %0 {offsets = [0, 109], sizes = [16, 1], strides = [1, 1]} : vector<16x135xf32> to vector<16x1xf32>
    %cst_114 = arith.constant 0.000000e+00 : f32
    %715 = vector.broadcast %cst_114 : f32 to vector<16x4xf32>
    %716 = vector.extract_strided_slice %705 {offsets = [0, 0], sizes = [16, 28], strides = [1, 1]} : vector<16x32xf32> to vector<16x28xf32>
    %717 = tpu.concatenate %715, %716 in 1 : vector<16x4xf32>, vector<16x28xf32> -> vector<16x32xf32>
    %718 = vector.broadcast %154 : vector<1x32xf32> to vector<16x32xf32>
    %719 = arith.mulf %717, %718 : vector<16x32xf32>
    %720 = vector.broadcast %714 : vector<16x1xf32> to vector<16x32xf32>
    %721 = arith.mulf %719, %720 : vector<16x32xf32>
    %722 = arith.addf %713, %721 : vector<16x32xf32>
    %723 = vector.extract_strided_slice %0 {offsets = [0, 110], sizes = [16, 1], strides = [1, 1]} : vector<16x135xf32> to vector<16x1xf32>
    %cst_115 = arith.constant 0.000000e+00 : f32
    %724 = vector.broadcast %cst_115 : f32 to vector<16x3xf32>
    %725 = vector.extract_strided_slice %705 {offsets = [0, 0], sizes = [16, 29], strides = [1, 1]} : vector<16x32xf32> to vector<16x29xf32>
    %726 = tpu.concatenate %724, %725 in 1 : vector<16x3xf32>, vector<16x29xf32> -> vector<16x32xf32>
    %727 = vector.broadcast %160 : vector<1x32xf32> to vector<16x32xf32>
    %728 = arith.mulf %726, %727 : vector<16x32xf32>
    %729 = vector.broadcast %723 : vector<16x1xf32> to vector<16x32xf32>
    %730 = arith.mulf %728, %729 : vector<16x32xf32>
    %731 = arith.addf %722, %730 : vector<16x32xf32>
    %732 = vector.extract_strided_slice %0 {offsets = [0, 111], sizes = [16, 1], strides = [1, 1]} : vector<16x135xf32> to vector<16x1xf32>
    %cst_116 = arith.constant 0.000000e+00 : f32
    %733 = vector.broadcast %cst_116 : f32 to vector<16x1xf32>
    %734 = vector.extract_strided_slice %705 {offsets = [0, 0], sizes = [16, 31], strides = [1, 1]} : vector<16x32xf32> to vector<16x31xf32>
    %735 = tpu.concatenate %733, %734 in 1 : vector<16x1xf32>, vector<16x31xf32> -> vector<16x32xf32>
    %736 = vector.broadcast %146 : vector<1x32xf32> to vector<16x32xf32>
    %737 = arith.mulf %735, %736 : vector<16x32xf32>
    %738 = vector.broadcast %732 : vector<16x1xf32> to vector<16x32xf32>
    %739 = arith.mulf %737, %738 : vector<16x32xf32>
    %740 = arith.addf %731, %739 : vector<16x32xf32>
    %741 = vector.extract_strided_slice %0 {offsets = [0, 112], sizes = [16, 1], strides = [1, 1]} : vector<16x135xf32> to vector<16x1xf32>
    %742 = vector.broadcast %741 : vector<16x1xf32> to vector<16x32xf32>
    %743 = arith.mulf %705, %742 : vector<16x32xf32>
    %744 = arith.addf %740, %743 : vector<16x32xf32>
    %745 = vector.extract_strided_slice %0 {offsets = [0, 113], sizes = [16, 1], strides = [1, 1]} : vector<16x135xf32> to vector<16x1xf32>
    %cst_117 = arith.constant 0.000000e+00 : f32
    %746 = vector.broadcast %cst_117 : f32 to vector<16x1xf32>
    %747 = vector.extract_strided_slice %705 {offsets = [0, 1], sizes = [16, 31], strides = [1, 1]} : vector<16x32xf32> to vector<16x31xf32>
    %748 = tpu.concatenate %747, %746 in 1 : vector<16x31xf32>, vector<16x1xf32> -> vector<16x32xf32>
    %749 = vector.broadcast %150 : vector<1x32xf32> to vector<16x32xf32>
    %750 = arith.mulf %748, %749 : vector<16x32xf32>
    %751 = vector.broadcast %745 : vector<16x1xf32> to vector<16x32xf32>
    %752 = arith.mulf %750, %751 : vector<16x32xf32>
    %753 = arith.addf %744, %752 : vector<16x32xf32>
    %754 = vector.extract_strided_slice %0 {offsets = [0, 114], sizes = [16, 1], strides = [1, 1]} : vector<16x135xf32> to vector<16x1xf32>
    %cst_118 = arith.constant 0.000000e+00 : f32
    %755 = vector.broadcast %cst_118 : f32 to vector<16x3xf32>
    %756 = vector.extract_strided_slice %705 {offsets = [0, 3], sizes = [16, 29], strides = [1, 1]} : vector<16x32xf32> to vector<16x29xf32>
    %757 = tpu.concatenate %756, %755 in 1 : vector<16x29xf32>, vector<16x3xf32> -> vector<16x32xf32>
    %758 = vector.broadcast %161 : vector<1x32xf32> to vector<16x32xf32>
    %759 = arith.mulf %757, %758 : vector<16x32xf32>
    %760 = vector.broadcast %754 : vector<16x1xf32> to vector<16x32xf32>
    %761 = arith.mulf %759, %760 : vector<16x32xf32>
    %762 = arith.addf %753, %761 : vector<16x32xf32>
    %763 = vector.extract_strided_slice %0 {offsets = [0, 115], sizes = [16, 1], strides = [1, 1]} : vector<16x135xf32> to vector<16x1xf32>
    %cst_119 = arith.constant 0.000000e+00 : f32
    %764 = vector.broadcast %cst_119 : f32 to vector<16x4xf32>
    %765 = vector.extract_strided_slice %705 {offsets = [0, 4], sizes = [16, 28], strides = [1, 1]} : vector<16x32xf32> to vector<16x28xf32>
    %766 = tpu.concatenate %765, %764 in 1 : vector<16x28xf32>, vector<16x4xf32> -> vector<16x32xf32>
    %767 = vector.broadcast %158 : vector<1x32xf32> to vector<16x32xf32>
    %768 = arith.mulf %766, %767 : vector<16x32xf32>
    %769 = vector.broadcast %763 : vector<16x1xf32> to vector<16x32xf32>
    %770 = arith.mulf %768, %769 : vector<16x32xf32>
    %771 = arith.addf %762, %770 : vector<16x32xf32>
    %772 = vector.extract_strided_slice %0 {offsets = [0, 116], sizes = [16, 1], strides = [1, 1]} : vector<16x135xf32> to vector<16x1xf32>
    %cst_120 = arith.constant 0.000000e+00 : f32
    %773 = vector.broadcast %cst_120 : f32 to vector<16x5xf32>
    %774 = vector.extract_strided_slice %705 {offsets = [0, 5], sizes = [16, 27], strides = [1, 1]} : vector<16x32xf32> to vector<16x27xf32>
    %775 = tpu.concatenate %774, %773 in 1 : vector<16x27xf32>, vector<16x5xf32> -> vector<16x32xf32>
    %776 = vector.broadcast %162 : vector<1x32xf32> to vector<16x32xf32>
    %777 = arith.mulf %775, %776 : vector<16x32xf32>
    %778 = vector.broadcast %772 : vector<16x1xf32> to vector<16x32xf32>
    %779 = arith.mulf %777, %778 : vector<16x32xf32>
    %780 = arith.addf %771, %779 : vector<16x32xf32>
    %781 = vector.extract_strided_slice %1 {offsets = [0, 12], sizes = [16, 1], strides = [1, 1]} : vector<16x15xf32> to vector<16x1xf32>
    %782 = vector.broadcast %781 : vector<16x1xf32> to vector<16x32xf32>
    %783 = arith.addf %780, %782 : vector<16x32xf32>
    %cst_121 = arith.constant 0.000000e+00 : f32
    %784 = vector.broadcast %cst_121 : f32 to vector<16x32xf32>
    %785 = arith.maximumf %783, %784 : vector<16x32xf32>
    %786 = vector.extract_strided_slice %2 {offsets = [0, 192], sizes = [16, 16], strides = [1, 1]} : vector<16x240xf32> to vector<16x16xf32>
    %787 = arith.truncf %786 : vector<16x16xf32> to vector<16x16xbf16>
    %788 = arith.truncf %785 : vector<16x32xf32> to vector<16x32xbf16>
    %cst_122 = arith.constant dense<0.000000e+00> : vector<16x32xf32>
    %789 = tpu.matmul %787, %788, %cst_122 {dimension_numbers = #tpu.dot_dimension_numbers<[1], [0], [0], [1], [0, 0, 1, 1], [], []>} : vector<16x16xbf16>, vector<16x32xbf16>, vector<16x32xf32> -> vector<16x32xf32>
    %790 = vector.extract_strided_slice %3 {offsets = [0, 12], sizes = [16, 1], strides = [1, 1]} : vector<16x15xf32> to vector<16x1xf32>
    %791 = vector.broadcast %790 : vector<16x1xf32> to vector<16x32xf32>
    %792 = arith.addf %789, %791 : vector<16x32xf32>
    %793 = vector.extract_strided_slice %0 {offsets = [0, 117], sizes = [16, 1], strides = [1, 1]} : vector<16x135xf32> to vector<16x1xf32>
    %cst_123 = arith.constant 0.000000e+00 : f32
    %794 = vector.broadcast %cst_123 : f32 to vector<16x5xf32>
    %795 = vector.extract_strided_slice %792 {offsets = [0, 0], sizes = [16, 27], strides = [1, 1]} : vector<16x32xf32> to vector<16x27xf32>
    %796 = tpu.concatenate %794, %795 in 1 : vector<16x5xf32>, vector<16x27xf32> -> vector<16x32xf32>
    %797 = vector.broadcast %159 : vector<1x32xf32> to vector<16x32xf32>
    %798 = arith.mulf %796, %797 : vector<16x32xf32>
    %799 = vector.broadcast %793 : vector<16x1xf32> to vector<16x32xf32>
    %800 = arith.mulf %798, %799 : vector<16x32xf32>
    %801 = vector.extract_strided_slice %0 {offsets = [0, 118], sizes = [16, 1], strides = [1, 1]} : vector<16x135xf32> to vector<16x1xf32>
    %cst_124 = arith.constant 0.000000e+00 : f32
    %802 = vector.broadcast %cst_124 : f32 to vector<16x4xf32>
    %803 = vector.extract_strided_slice %792 {offsets = [0, 0], sizes = [16, 28], strides = [1, 1]} : vector<16x32xf32> to vector<16x28xf32>
    %804 = tpu.concatenate %802, %803 in 1 : vector<16x4xf32>, vector<16x28xf32> -> vector<16x32xf32>
    %805 = vector.broadcast %154 : vector<1x32xf32> to vector<16x32xf32>
    %806 = arith.mulf %804, %805 : vector<16x32xf32>
    %807 = vector.broadcast %801 : vector<16x1xf32> to vector<16x32xf32>
    %808 = arith.mulf %806, %807 : vector<16x32xf32>
    %809 = arith.addf %800, %808 : vector<16x32xf32>
    %810 = vector.extract_strided_slice %0 {offsets = [0, 119], sizes = [16, 1], strides = [1, 1]} : vector<16x135xf32> to vector<16x1xf32>
    %cst_125 = arith.constant 0.000000e+00 : f32
    %811 = vector.broadcast %cst_125 : f32 to vector<16x3xf32>
    %812 = vector.extract_strided_slice %792 {offsets = [0, 0], sizes = [16, 29], strides = [1, 1]} : vector<16x32xf32> to vector<16x29xf32>
    %813 = tpu.concatenate %811, %812 in 1 : vector<16x3xf32>, vector<16x29xf32> -> vector<16x32xf32>
    %814 = vector.broadcast %160 : vector<1x32xf32> to vector<16x32xf32>
    %815 = arith.mulf %813, %814 : vector<16x32xf32>
    %816 = vector.broadcast %810 : vector<16x1xf32> to vector<16x32xf32>
    %817 = arith.mulf %815, %816 : vector<16x32xf32>
    %818 = arith.addf %809, %817 : vector<16x32xf32>
    %819 = vector.extract_strided_slice %0 {offsets = [0, 120], sizes = [16, 1], strides = [1, 1]} : vector<16x135xf32> to vector<16x1xf32>
    %cst_126 = arith.constant 0.000000e+00 : f32
    %820 = vector.broadcast %cst_126 : f32 to vector<16x1xf32>
    %821 = vector.extract_strided_slice %792 {offsets = [0, 0], sizes = [16, 31], strides = [1, 1]} : vector<16x32xf32> to vector<16x31xf32>
    %822 = tpu.concatenate %820, %821 in 1 : vector<16x1xf32>, vector<16x31xf32> -> vector<16x32xf32>
    %823 = vector.broadcast %146 : vector<1x32xf32> to vector<16x32xf32>
    %824 = arith.mulf %822, %823 : vector<16x32xf32>
    %825 = vector.broadcast %819 : vector<16x1xf32> to vector<16x32xf32>
    %826 = arith.mulf %824, %825 : vector<16x32xf32>
    %827 = arith.addf %818, %826 : vector<16x32xf32>
    %828 = vector.extract_strided_slice %0 {offsets = [0, 121], sizes = [16, 1], strides = [1, 1]} : vector<16x135xf32> to vector<16x1xf32>
    %829 = vector.broadcast %828 : vector<16x1xf32> to vector<16x32xf32>
    %830 = arith.mulf %792, %829 : vector<16x32xf32>
    %831 = arith.addf %827, %830 : vector<16x32xf32>
    %832 = vector.extract_strided_slice %0 {offsets = [0, 122], sizes = [16, 1], strides = [1, 1]} : vector<16x135xf32> to vector<16x1xf32>
    %cst_127 = arith.constant 0.000000e+00 : f32
    %833 = vector.broadcast %cst_127 : f32 to vector<16x1xf32>
    %834 = vector.extract_strided_slice %792 {offsets = [0, 1], sizes = [16, 31], strides = [1, 1]} : vector<16x32xf32> to vector<16x31xf32>
    %835 = tpu.concatenate %834, %833 in 1 : vector<16x31xf32>, vector<16x1xf32> -> vector<16x32xf32>
    %836 = vector.broadcast %150 : vector<1x32xf32> to vector<16x32xf32>
    %837 = arith.mulf %835, %836 : vector<16x32xf32>
    %838 = vector.broadcast %832 : vector<16x1xf32> to vector<16x32xf32>
    %839 = arith.mulf %837, %838 : vector<16x32xf32>
    %840 = arith.addf %831, %839 : vector<16x32xf32>
    %841 = vector.extract_strided_slice %0 {offsets = [0, 123], sizes = [16, 1], strides = [1, 1]} : vector<16x135xf32> to vector<16x1xf32>
    %cst_128 = arith.constant 0.000000e+00 : f32
    %842 = vector.broadcast %cst_128 : f32 to vector<16x3xf32>
    %843 = vector.extract_strided_slice %792 {offsets = [0, 3], sizes = [16, 29], strides = [1, 1]} : vector<16x32xf32> to vector<16x29xf32>
    %844 = tpu.concatenate %843, %842 in 1 : vector<16x29xf32>, vector<16x3xf32> -> vector<16x32xf32>
    %845 = vector.broadcast %161 : vector<1x32xf32> to vector<16x32xf32>
    %846 = arith.mulf %844, %845 : vector<16x32xf32>
    %847 = vector.broadcast %841 : vector<16x1xf32> to vector<16x32xf32>
    %848 = arith.mulf %846, %847 : vector<16x32xf32>
    %849 = arith.addf %840, %848 : vector<16x32xf32>
    %850 = vector.extract_strided_slice %0 {offsets = [0, 124], sizes = [16, 1], strides = [1, 1]} : vector<16x135xf32> to vector<16x1xf32>
    %cst_129 = arith.constant 0.000000e+00 : f32
    %851 = vector.broadcast %cst_129 : f32 to vector<16x4xf32>
    %852 = vector.extract_strided_slice %792 {offsets = [0, 4], sizes = [16, 28], strides = [1, 1]} : vector<16x32xf32> to vector<16x28xf32>
    %853 = tpu.concatenate %852, %851 in 1 : vector<16x28xf32>, vector<16x4xf32> -> vector<16x32xf32>
    %854 = vector.broadcast %158 : vector<1x32xf32> to vector<16x32xf32>
    %855 = arith.mulf %853, %854 : vector<16x32xf32>
    %856 = vector.broadcast %850 : vector<16x1xf32> to vector<16x32xf32>
    %857 = arith.mulf %855, %856 : vector<16x32xf32>
    %858 = arith.addf %849, %857 : vector<16x32xf32>
    %859 = vector.extract_strided_slice %0 {offsets = [0, 125], sizes = [16, 1], strides = [1, 1]} : vector<16x135xf32> to vector<16x1xf32>
    %cst_130 = arith.constant 0.000000e+00 : f32
    %860 = vector.broadcast %cst_130 : f32 to vector<16x5xf32>
    %861 = vector.extract_strided_slice %792 {offsets = [0, 5], sizes = [16, 27], strides = [1, 1]} : vector<16x32xf32> to vector<16x27xf32>
    %862 = tpu.concatenate %861, %860 in 1 : vector<16x27xf32>, vector<16x5xf32> -> vector<16x32xf32>
    %863 = vector.broadcast %162 : vector<1x32xf32> to vector<16x32xf32>
    %864 = arith.mulf %862, %863 : vector<16x32xf32>
    %865 = vector.broadcast %859 : vector<16x1xf32> to vector<16x32xf32>
    %866 = arith.mulf %864, %865 : vector<16x32xf32>
    %867 = arith.addf %858, %866 : vector<16x32xf32>
    %868 = vector.extract_strided_slice %1 {offsets = [0, 13], sizes = [16, 1], strides = [1, 1]} : vector<16x15xf32> to vector<16x1xf32>
    %869 = vector.broadcast %868 : vector<16x1xf32> to vector<16x32xf32>
    %870 = arith.addf %867, %869 : vector<16x32xf32>
    %cst_131 = arith.constant 0.000000e+00 : f32
    %871 = vector.broadcast %cst_131 : f32 to vector<16x32xf32>
    %872 = arith.maximumf %870, %871 : vector<16x32xf32>
    %873 = vector.extract_strided_slice %2 {offsets = [0, 208], sizes = [16, 16], strides = [1, 1]} : vector<16x240xf32> to vector<16x16xf32>
    %874 = arith.truncf %873 : vector<16x16xf32> to vector<16x16xbf16>
    %875 = arith.truncf %872 : vector<16x32xf32> to vector<16x32xbf16>
    %cst_132 = arith.constant dense<0.000000e+00> : vector<16x32xf32>
    %876 = tpu.matmul %874, %875, %cst_132 {dimension_numbers = #tpu.dot_dimension_numbers<[1], [0], [0], [1], [0, 0, 1, 1], [], []>} : vector<16x16xbf16>, vector<16x32xbf16>, vector<16x32xf32> -> vector<16x32xf32>
    %877 = vector.extract_strided_slice %3 {offsets = [0, 13], sizes = [16, 1], strides = [1, 1]} : vector<16x15xf32> to vector<16x1xf32>
    %878 = vector.broadcast %877 : vector<16x1xf32> to vector<16x32xf32>
    %879 = arith.addf %876, %878 : vector<16x32xf32>
    %c0_133 = arith.constant 0 : index
    %c0_134 = arith.constant 0 : index
    %880 = vector.load %arg7[%c0_133, %c0_134] : memref<32x128xf32, #tpu.memory_space<vmem>>, vector<32x128xf32>
    %cst_135 = arith.constant dense<0.000000e+00> : vector<16x128xf32>
    %881 = tpu.matmul %879, %880, %cst_135 {dimension_numbers = #tpu.dot_dimension_numbers<[1], [0], [0], [1], [0, 0, 1, 1], [], []>} : vector<16x32xf32>, vector<32x128xf32>, vector<16x128xf32> -> vector<16x128xf32>
    %882 = vector.extract_strided_slice %0 {offsets = [0, 126], sizes = [16, 1], strides = [1, 1]} : vector<16x135xf32> to vector<16x1xf32>
    %cst_136 = arith.constant 0.000000e+00 : f32
    %883 = vector.broadcast %cst_136 : f32 to vector<16x9xf32>
    %884 = vector.extract_strided_slice %881 {offsets = [0, 0], sizes = [16, 119], strides = [1, 1]} : vector<16x128xf32> to vector<16x119xf32>
    %885 = tpu.concatenate %883, %884 in 1 : vector<16x9xf32>, vector<16x119xf32> -> vector<16x128xf32>
    %886 = vector.broadcast %106 : vector<1x128xf32> to vector<16x128xf32>
    %887 = arith.mulf %885, %886 : vector<16x128xf32>
    %888 = vector.broadcast %882 : vector<16x1xf32> to vector<16x128xf32>
    %889 = arith.mulf %887, %888 : vector<16x128xf32>
    %890 = vector.extract_strided_slice %0 {offsets = [0, 127], sizes = [16, 1], strides = [1, 1]} : vector<16x135xf32> to vector<16x1xf32>
    %cst_137 = arith.constant 0.000000e+00 : f32
    %891 = vector.broadcast %cst_137 : f32 to vector<16x8xf32>
    %892 = vector.extract_strided_slice %881 {offsets = [0, 0], sizes = [16, 120], strides = [1, 1]} : vector<16x128xf32> to vector<16x120xf32>
    %893 = tpu.concatenate %891, %892 in 1 : vector<16x8xf32>, vector<16x120xf32> -> vector<16x128xf32>
    %894 = vector.broadcast %101 : vector<1x128xf32> to vector<16x128xf32>
    %895 = arith.mulf %893, %894 : vector<16x128xf32>
    %896 = vector.broadcast %890 : vector<16x1xf32> to vector<16x128xf32>
    %897 = arith.mulf %895, %896 : vector<16x128xf32>
    %898 = arith.addf %889, %897 : vector<16x128xf32>
    %899 = vector.extract_strided_slice %0 {offsets = [0, 128], sizes = [16, 1], strides = [1, 1]} : vector<16x135xf32> to vector<16x1xf32>
    %cst_138 = arith.constant 0.000000e+00 : f32
    %900 = vector.broadcast %cst_138 : f32 to vector<16x7xf32>
    %901 = vector.extract_strided_slice %881 {offsets = [0, 0], sizes = [16, 121], strides = [1, 1]} : vector<16x128xf32> to vector<16x121xf32>
    %902 = tpu.concatenate %900, %901 in 1 : vector<16x7xf32>, vector<16x121xf32> -> vector<16x128xf32>
    %903 = vector.broadcast %107 : vector<1x128xf32> to vector<16x128xf32>
    %904 = arith.mulf %902, %903 : vector<16x128xf32>
    %905 = vector.broadcast %899 : vector<16x1xf32> to vector<16x128xf32>
    %906 = arith.mulf %904, %905 : vector<16x128xf32>
    %907 = arith.addf %898, %906 : vector<16x128xf32>
    %908 = vector.extract_strided_slice %0 {offsets = [0, 129], sizes = [16, 1], strides = [1, 1]} : vector<16x135xf32> to vector<16x1xf32>
    %cst_139 = arith.constant 0.000000e+00 : f32
    %909 = vector.broadcast %cst_139 : f32 to vector<16x1xf32>
    %910 = vector.extract_strided_slice %881 {offsets = [0, 0], sizes = [16, 127], strides = [1, 1]} : vector<16x128xf32> to vector<16x127xf32>
    %911 = tpu.concatenate %909, %910 in 1 : vector<16x1xf32>, vector<16x127xf32> -> vector<16x128xf32>
    %912 = vector.broadcast %93 : vector<1x128xf32> to vector<16x128xf32>
    %913 = arith.mulf %911, %912 : vector<16x128xf32>
    %914 = vector.broadcast %908 : vector<16x1xf32> to vector<16x128xf32>
    %915 = arith.mulf %913, %914 : vector<16x128xf32>
    %916 = arith.addf %907, %915 : vector<16x128xf32>
    %917 = vector.extract_strided_slice %0 {offsets = [0, 130], sizes = [16, 1], strides = [1, 1]} : vector<16x135xf32> to vector<16x1xf32>
    %918 = vector.broadcast %917 : vector<16x1xf32> to vector<16x128xf32>
    %919 = arith.mulf %881, %918 : vector<16x128xf32>
    %920 = arith.addf %916, %919 : vector<16x128xf32>
    %921 = vector.extract_strided_slice %0 {offsets = [0, 131], sizes = [16, 1], strides = [1, 1]} : vector<16x135xf32> to vector<16x1xf32>
    %cst_140 = arith.constant 0.000000e+00 : f32
    %922 = vector.broadcast %cst_140 : f32 to vector<16x1xf32>
    %923 = vector.extract_strided_slice %881 {offsets = [0, 1], sizes = [16, 127], strides = [1, 1]} : vector<16x128xf32> to vector<16x127xf32>
    %924 = tpu.concatenate %923, %922 in 1 : vector<16x127xf32>, vector<16x1xf32> -> vector<16x128xf32>
    %925 = vector.broadcast %97 : vector<1x128xf32> to vector<16x128xf32>
    %926 = arith.mulf %924, %925 : vector<16x128xf32>
    %927 = vector.broadcast %921 : vector<16x1xf32> to vector<16x128xf32>
    %928 = arith.mulf %926, %927 : vector<16x128xf32>
    %929 = arith.addf %920, %928 : vector<16x128xf32>
    %930 = vector.extract_strided_slice %0 {offsets = [0, 132], sizes = [16, 1], strides = [1, 1]} : vector<16x135xf32> to vector<16x1xf32>
    %cst_141 = arith.constant 0.000000e+00 : f32
    %931 = vector.broadcast %cst_141 : f32 to vector<16x7xf32>
    %932 = vector.extract_strided_slice %881 {offsets = [0, 7], sizes = [16, 121], strides = [1, 1]} : vector<16x128xf32> to vector<16x121xf32>
    %933 = tpu.concatenate %932, %931 in 1 : vector<16x121xf32>, vector<16x7xf32> -> vector<16x128xf32>
    %934 = vector.broadcast %108 : vector<1x128xf32> to vector<16x128xf32>
    %935 = arith.mulf %933, %934 : vector<16x128xf32>
    %936 = vector.broadcast %930 : vector<16x1xf32> to vector<16x128xf32>
    %937 = arith.mulf %935, %936 : vector<16x128xf32>
    %938 = arith.addf %929, %937 : vector<16x128xf32>
    %939 = vector.extract_strided_slice %0 {offsets = [0, 133], sizes = [16, 1], strides = [1, 1]} : vector<16x135xf32> to vector<16x1xf32>
    %cst_142 = arith.constant 0.000000e+00 : f32
    %940 = vector.broadcast %cst_142 : f32 to vector<16x8xf32>
    %941 = vector.extract_strided_slice %881 {offsets = [0, 8], sizes = [16, 120], strides = [1, 1]} : vector<16x128xf32> to vector<16x120xf32>
    %942 = tpu.concatenate %941, %940 in 1 : vector<16x120xf32>, vector<16x8xf32> -> vector<16x128xf32>
    %943 = vector.broadcast %105 : vector<1x128xf32> to vector<16x128xf32>
    %944 = arith.mulf %942, %943 : vector<16x128xf32>
    %945 = vector.broadcast %939 : vector<16x1xf32> to vector<16x128xf32>
    %946 = arith.mulf %944, %945 : vector<16x128xf32>
    %947 = arith.addf %938, %946 : vector<16x128xf32>
    %948 = vector.extract_strided_slice %0 {offsets = [0, 134], sizes = [16, 1], strides = [1, 1]} : vector<16x135xf32> to vector<16x1xf32>
    %cst_143 = arith.constant 0.000000e+00 : f32
    %949 = vector.broadcast %cst_143 : f32 to vector<16x9xf32>
    %950 = vector.extract_strided_slice %881 {offsets = [0, 9], sizes = [16, 119], strides = [1, 1]} : vector<16x128xf32> to vector<16x119xf32>
    %951 = tpu.concatenate %950, %949 in 1 : vector<16x119xf32>, vector<16x9xf32> -> vector<16x128xf32>
    %952 = vector.broadcast %109 : vector<1x128xf32> to vector<16x128xf32>
    %953 = arith.mulf %951, %952 : vector<16x128xf32>
    %954 = vector.broadcast %948 : vector<16x1xf32> to vector<16x128xf32>
    %955 = arith.mulf %953, %954 : vector<16x128xf32>
    %956 = arith.addf %947, %955 : vector<16x128xf32>
    %957 = vector.extract_strided_slice %1 {offsets = [0, 14], sizes = [16, 1], strides = [1, 1]} : vector<16x15xf32> to vector<16x1xf32>
    %958 = vector.broadcast %957 : vector<16x1xf32> to vector<16x128xf32>
    %959 = arith.addf %956, %958 : vector<16x128xf32>
    %cst_144 = arith.constant 0.000000e+00 : f32
    %960 = vector.broadcast %cst_144 : f32 to vector<16x128xf32>
    %961 = arith.maximumf %959, %960 : vector<16x128xf32>
    %962 = vector.extract_strided_slice %2 {offsets = [0, 224], sizes = [16, 16], strides = [1, 1]} : vector<16x240xf32> to vector<16x16xf32>
    %963 = arith.truncf %962 : vector<16x16xf32> to vector<16x16xbf16>
    %964 = arith.truncf %961 : vector<16x128xf32> to vector<16x128xbf16>
    %cst_145 = arith.constant dense<0.000000e+00> : vector<16x128xf32>
    %965 = tpu.matmul %963, %964, %cst_145 {dimension_numbers = #tpu.dot_dimension_numbers<[1], [0], [0], [1], [0, 0, 1, 1], [], []>} : vector<16x16xbf16>, vector<16x128xbf16>, vector<16x128xf32> -> vector<16x128xf32>
    %966 = vector.extract_strided_slice %3 {offsets = [0, 14], sizes = [16, 1], strides = [1, 1]} : vector<16x15xf32> to vector<16x1xf32>
    %967 = vector.broadcast %966 : vector<16x1xf32> to vector<16x128xf32>
    %968 = arith.addf %965, %967 : vector<16x128xf32>
    %c0_146 = arith.constant 0 : index
    %c0_147 = arith.constant 0 : index
    %969 = vector.load %arg8[%c0_146, %c0_147] : memref<128x512xf32, #tpu.memory_space<vmem>>, vector<128x512xf32>
    %cst_148 = arith.constant dense<0.000000e+00> : vector<16x512xf32>
    %970 = tpu.matmul %968, %969, %cst_148 {dimension_numbers = #tpu.dot_dimension_numbers<[1], [0], [0], [1], [0, 0, 1, 1], [], []>} : vector<16x128xf32>, vector<128x512xf32>, vector<16x512xf32> -> vector<16x512xf32>
    %971 = vector.extract_strided_slice %0 {offsets = [0, 54], sizes = [16, 1], strides = [1, 1]} : vector<16x135xf32> to vector<16x1xf32>
    %cst_149 = arith.constant 0.000000e+00 : f32
    %972 = vector.broadcast %cst_149 : f32 to vector<16x9xf32>
    %973 = vector.extract_strided_slice %434 {offsets = [0, 0], sizes = [16, 119], strides = [1, 1]} : vector<16x128xf32> to vector<16x119xf32>
    %974 = tpu.concatenate %972, %973 in 1 : vector<16x9xf32>, vector<16x119xf32> -> vector<16x128xf32>
    %975 = vector.broadcast %106 : vector<1x128xf32> to vector<16x128xf32>
    %976 = arith.mulf %974, %975 : vector<16x128xf32>
    %977 = vector.broadcast %971 : vector<16x1xf32> to vector<16x128xf32>
    %978 = arith.mulf %976, %977 : vector<16x128xf32>
    %979 = vector.extract_strided_slice %0 {offsets = [0, 55], sizes = [16, 1], strides = [1, 1]} : vector<16x135xf32> to vector<16x1xf32>
    %cst_150 = arith.constant 0.000000e+00 : f32
    %980 = vector.broadcast %cst_150 : f32 to vector<16x8xf32>
    %981 = vector.extract_strided_slice %434 {offsets = [0, 0], sizes = [16, 120], strides = [1, 1]} : vector<16x128xf32> to vector<16x120xf32>
    %982 = tpu.concatenate %980, %981 in 1 : vector<16x8xf32>, vector<16x120xf32> -> vector<16x128xf32>
    %983 = vector.broadcast %101 : vector<1x128xf32> to vector<16x128xf32>
    %984 = arith.mulf %982, %983 : vector<16x128xf32>
    %985 = vector.broadcast %979 : vector<16x1xf32> to vector<16x128xf32>
    %986 = arith.mulf %984, %985 : vector<16x128xf32>
    %987 = arith.addf %978, %986 : vector<16x128xf32>
    %988 = vector.extract_strided_slice %0 {offsets = [0, 56], sizes = [16, 1], strides = [1, 1]} : vector<16x135xf32> to vector<16x1xf32>
    %cst_151 = arith.constant 0.000000e+00 : f32
    %989 = vector.broadcast %cst_151 : f32 to vector<16x7xf32>
    %990 = vector.extract_strided_slice %434 {offsets = [0, 0], sizes = [16, 121], strides = [1, 1]} : vector<16x128xf32> to vector<16x121xf32>
    %991 = tpu.concatenate %989, %990 in 1 : vector<16x7xf32>, vector<16x121xf32> -> vector<16x128xf32>
    %992 = vector.broadcast %107 : vector<1x128xf32> to vector<16x128xf32>
    %993 = arith.mulf %991, %992 : vector<16x128xf32>
    %994 = vector.broadcast %988 : vector<16x1xf32> to vector<16x128xf32>
    %995 = arith.mulf %993, %994 : vector<16x128xf32>
    %996 = arith.addf %987, %995 : vector<16x128xf32>
    %997 = vector.extract_strided_slice %0 {offsets = [0, 57], sizes = [16, 1], strides = [1, 1]} : vector<16x135xf32> to vector<16x1xf32>
    %cst_152 = arith.constant 0.000000e+00 : f32
    %998 = vector.broadcast %cst_152 : f32 to vector<16x1xf32>
    %999 = vector.extract_strided_slice %434 {offsets = [0, 0], sizes = [16, 127], strides = [1, 1]} : vector<16x128xf32> to vector<16x127xf32>
    %1000 = tpu.concatenate %998, %999 in 1 : vector<16x1xf32>, vector<16x127xf32> -> vector<16x128xf32>
    %1001 = vector.broadcast %93 : vector<1x128xf32> to vector<16x128xf32>
    %1002 = arith.mulf %1000, %1001 : vector<16x128xf32>
    %1003 = vector.broadcast %997 : vector<16x1xf32> to vector<16x128xf32>
    %1004 = arith.mulf %1002, %1003 : vector<16x128xf32>
    %1005 = arith.addf %996, %1004 : vector<16x128xf32>
    %1006 = vector.extract_strided_slice %0 {offsets = [0, 58], sizes = [16, 1], strides = [1, 1]} : vector<16x135xf32> to vector<16x1xf32>
    %1007 = vector.broadcast %1006 : vector<16x1xf32> to vector<16x128xf32>
    %1008 = arith.mulf %434, %1007 : vector<16x128xf32>
    %1009 = arith.addf %1005, %1008 : vector<16x128xf32>
    %1010 = vector.extract_strided_slice %0 {offsets = [0, 59], sizes = [16, 1], strides = [1, 1]} : vector<16x135xf32> to vector<16x1xf32>
    %cst_153 = arith.constant 0.000000e+00 : f32
    %1011 = vector.broadcast %cst_153 : f32 to vector<16x1xf32>
    %1012 = vector.extract_strided_slice %434 {offsets = [0, 1], sizes = [16, 127], strides = [1, 1]} : vector<16x128xf32> to vector<16x127xf32>
    %1013 = tpu.concatenate %1012, %1011 in 1 : vector<16x127xf32>, vector<16x1xf32> -> vector<16x128xf32>
    %1014 = vector.broadcast %97 : vector<1x128xf32> to vector<16x128xf32>
    %1015 = arith.mulf %1013, %1014 : vector<16x128xf32>
    %1016 = vector.broadcast %1010 : vector<16x1xf32> to vector<16x128xf32>
    %1017 = arith.mulf %1015, %1016 : vector<16x128xf32>
    %1018 = arith.addf %1009, %1017 : vector<16x128xf32>
    %1019 = vector.extract_strided_slice %0 {offsets = [0, 60], sizes = [16, 1], strides = [1, 1]} : vector<16x135xf32> to vector<16x1xf32>
    %cst_154 = arith.constant 0.000000e+00 : f32
    %1020 = vector.broadcast %cst_154 : f32 to vector<16x7xf32>
    %1021 = vector.extract_strided_slice %434 {offsets = [0, 7], sizes = [16, 121], strides = [1, 1]} : vector<16x128xf32> to vector<16x121xf32>
    %1022 = tpu.concatenate %1021, %1020 in 1 : vector<16x121xf32>, vector<16x7xf32> -> vector<16x128xf32>
    %1023 = vector.broadcast %108 : vector<1x128xf32> to vector<16x128xf32>
    %1024 = arith.mulf %1022, %1023 : vector<16x128xf32>
    %1025 = vector.broadcast %1019 : vector<16x1xf32> to vector<16x128xf32>
    %1026 = arith.mulf %1024, %1025 : vector<16x128xf32>
    %1027 = arith.addf %1018, %1026 : vector<16x128xf32>
    %1028 = vector.extract_strided_slice %0 {offsets = [0, 61], sizes = [16, 1], strides = [1, 1]} : vector<16x135xf32> to vector<16x1xf32>
    %cst_155 = arith.constant 0.000000e+00 : f32
    %1029 = vector.broadcast %cst_155 : f32 to vector<16x8xf32>
    %1030 = vector.extract_strided_slice %434 {offsets = [0, 8], sizes = [16, 120], strides = [1, 1]} : vector<16x128xf32> to vector<16x120xf32>
    %1031 = tpu.concatenate %1030, %1029 in 1 : vector<16x120xf32>, vector<16x8xf32> -> vector<16x128xf32>
    %1032 = vector.broadcast %105 : vector<1x128xf32> to vector<16x128xf32>
    %1033 = arith.mulf %1031, %1032 : vector<16x128xf32>
    %1034 = vector.broadcast %1028 : vector<16x1xf32> to vector<16x128xf32>
    %1035 = arith.mulf %1033, %1034 : vector<16x128xf32>
    %1036 = arith.addf %1027, %1035 : vector<16x128xf32>
    %1037 = vector.extract_strided_slice %0 {offsets = [0, 62], sizes = [16, 1], strides = [1, 1]} : vector<16x135xf32> to vector<16x1xf32>
    %cst_156 = arith.constant 0.000000e+00 : f32
    %1038 = vector.broadcast %cst_156 : f32 to vector<16x9xf32>
    %1039 = vector.extract_strided_slice %434 {offsets = [0, 9], sizes = [16, 119], strides = [1, 1]} : vector<16x128xf32> to vector<16x119xf32>
    %1040 = tpu.concatenate %1039, %1038 in 1 : vector<16x119xf32>, vector<16x9xf32> -> vector<16x128xf32>
    %1041 = vector.broadcast %109 : vector<1x128xf32> to vector<16x128xf32>
    %1042 = arith.mulf %1040, %1041 : vector<16x128xf32>
    %1043 = vector.broadcast %1037 : vector<16x1xf32> to vector<16x128xf32>
    %1044 = arith.mulf %1042, %1043 : vector<16x128xf32>
    %1045 = arith.addf %1036, %1044 : vector<16x128xf32>
    %1046 = vector.extract_strided_slice %1 {offsets = [0, 6], sizes = [16, 1], strides = [1, 1]} : vector<16x15xf32> to vector<16x1xf32>
    %1047 = vector.broadcast %1046 : vector<16x1xf32> to vector<16x128xf32>
    %1048 = arith.addf %1045, %1047 : vector<16x128xf32>
    %cst_157 = arith.constant 0.000000e+00 : f32
    %1049 = vector.broadcast %cst_157 : f32 to vector<16x128xf32>
    %1050 = arith.maximumf %1048, %1049 : vector<16x128xf32>
    %1051 = vector.extract_strided_slice %2 {offsets = [0, 96], sizes = [16, 16], strides = [1, 1]} : vector<16x240xf32> to vector<16x16xf32>
    %1052 = arith.truncf %1051 : vector<16x16xf32> to vector<16x16xbf16>
    %1053 = arith.truncf %1050 : vector<16x128xf32> to vector<16x128xbf16>
    %cst_158 = arith.constant dense<0.000000e+00> : vector<16x128xf32>
    %1054 = tpu.matmul %1052, %1053, %cst_158 {dimension_numbers = #tpu.dot_dimension_numbers<[1], [0], [0], [1], [0, 0, 1, 1], [], []>} : vector<16x16xbf16>, vector<16x128xbf16>, vector<16x128xf32> -> vector<16x128xf32>
    %1055 = vector.extract_strided_slice %3 {offsets = [0, 6], sizes = [16, 1], strides = [1, 1]} : vector<16x15xf32> to vector<16x1xf32>
    %1056 = vector.broadcast %1055 : vector<16x1xf32> to vector<16x128xf32>
    %1057 = arith.addf %1054, %1056 : vector<16x128xf32>
    %1058 = vector.extract_strided_slice %0 {offsets = [0, 63], sizes = [16, 1], strides = [1, 1]} : vector<16x135xf32> to vector<16x1xf32>
    %cst_159 = arith.constant 0.000000e+00 : f32
    %1059 = vector.broadcast %cst_159 : f32 to vector<16x9xf32>
    %1060 = vector.extract_strided_slice %1057 {offsets = [0, 0], sizes = [16, 119], strides = [1, 1]} : vector<16x128xf32> to vector<16x119xf32>
    %1061 = tpu.concatenate %1059, %1060 in 1 : vector<16x9xf32>, vector<16x119xf32> -> vector<16x128xf32>
    %1062 = vector.broadcast %106 : vector<1x128xf32> to vector<16x128xf32>
    %1063 = arith.mulf %1061, %1062 : vector<16x128xf32>
    %1064 = vector.broadcast %1058 : vector<16x1xf32> to vector<16x128xf32>
    %1065 = arith.mulf %1063, %1064 : vector<16x128xf32>
    %1066 = vector.extract_strided_slice %0 {offsets = [0, 64], sizes = [16, 1], strides = [1, 1]} : vector<16x135xf32> to vector<16x1xf32>
    %cst_160 = arith.constant 0.000000e+00 : f32
    %1067 = vector.broadcast %cst_160 : f32 to vector<16x8xf32>
    %1068 = vector.extract_strided_slice %1057 {offsets = [0, 0], sizes = [16, 120], strides = [1, 1]} : vector<16x128xf32> to vector<16x120xf32>
    %1069 = tpu.concatenate %1067, %1068 in 1 : vector<16x8xf32>, vector<16x120xf32> -> vector<16x128xf32>
    %1070 = vector.broadcast %101 : vector<1x128xf32> to vector<16x128xf32>
    %1071 = arith.mulf %1069, %1070 : vector<16x128xf32>
    %1072 = vector.broadcast %1066 : vector<16x1xf32> to vector<16x128xf32>
    %1073 = arith.mulf %1071, %1072 : vector<16x128xf32>
    %1074 = arith.addf %1065, %1073 : vector<16x128xf32>
    %1075 = vector.extract_strided_slice %0 {offsets = [0, 65], sizes = [16, 1], strides = [1, 1]} : vector<16x135xf32> to vector<16x1xf32>
    %cst_161 = arith.constant 0.000000e+00 : f32
    %1076 = vector.broadcast %cst_161 : f32 to vector<16x7xf32>
    %1077 = vector.extract_strided_slice %1057 {offsets = [0, 0], sizes = [16, 121], strides = [1, 1]} : vector<16x128xf32> to vector<16x121xf32>
    %1078 = tpu.concatenate %1076, %1077 in 1 : vector<16x7xf32>, vector<16x121xf32> -> vector<16x128xf32>
    %1079 = vector.broadcast %107 : vector<1x128xf32> to vector<16x128xf32>
    %1080 = arith.mulf %1078, %1079 : vector<16x128xf32>
    %1081 = vector.broadcast %1075 : vector<16x1xf32> to vector<16x128xf32>
    %1082 = arith.mulf %1080, %1081 : vector<16x128xf32>
    %1083 = arith.addf %1074, %1082 : vector<16x128xf32>
    %1084 = vector.extract_strided_slice %0 {offsets = [0, 66], sizes = [16, 1], strides = [1, 1]} : vector<16x135xf32> to vector<16x1xf32>
    %cst_162 = arith.constant 0.000000e+00 : f32
    %1085 = vector.broadcast %cst_162 : f32 to vector<16x1xf32>
    %1086 = vector.extract_strided_slice %1057 {offsets = [0, 0], sizes = [16, 127], strides = [1, 1]} : vector<16x128xf32> to vector<16x127xf32>
    %1087 = tpu.concatenate %1085, %1086 in 1 : vector<16x1xf32>, vector<16x127xf32> -> vector<16x128xf32>
    %1088 = vector.broadcast %93 : vector<1x128xf32> to vector<16x128xf32>
    %1089 = arith.mulf %1087, %1088 : vector<16x128xf32>
    %1090 = vector.broadcast %1084 : vector<16x1xf32> to vector<16x128xf32>
    %1091 = arith.mulf %1089, %1090 : vector<16x128xf32>
    %1092 = arith.addf %1083, %1091 : vector<16x128xf32>
    %1093 = vector.extract_strided_slice %0 {offsets = [0, 67], sizes = [16, 1], strides = [1, 1]} : vector<16x135xf32> to vector<16x1xf32>
    %1094 = vector.broadcast %1093 : vector<16x1xf32> to vector<16x128xf32>
    %1095 = arith.mulf %1057, %1094 : vector<16x128xf32>
    %1096 = arith.addf %1092, %1095 : vector<16x128xf32>
    %1097 = vector.extract_strided_slice %0 {offsets = [0, 68], sizes = [16, 1], strides = [1, 1]} : vector<16x135xf32> to vector<16x1xf32>
    %cst_163 = arith.constant 0.000000e+00 : f32
    %1098 = vector.broadcast %cst_163 : f32 to vector<16x1xf32>
    %1099 = vector.extract_strided_slice %1057 {offsets = [0, 1], sizes = [16, 127], strides = [1, 1]} : vector<16x128xf32> to vector<16x127xf32>
    %1100 = tpu.concatenate %1099, %1098 in 1 : vector<16x127xf32>, vector<16x1xf32> -> vector<16x128xf32>
    %1101 = vector.broadcast %97 : vector<1x128xf32> to vector<16x128xf32>
    %1102 = arith.mulf %1100, %1101 : vector<16x128xf32>
    %1103 = vector.broadcast %1097 : vector<16x1xf32> to vector<16x128xf32>
    %1104 = arith.mulf %1102, %1103 : vector<16x128xf32>
    %1105 = arith.addf %1096, %1104 : vector<16x128xf32>
    %1106 = vector.extract_strided_slice %0 {offsets = [0, 69], sizes = [16, 1], strides = [1, 1]} : vector<16x135xf32> to vector<16x1xf32>
    %cst_164 = arith.constant 0.000000e+00 : f32
    %1107 = vector.broadcast %cst_164 : f32 to vector<16x7xf32>
    %1108 = vector.extract_strided_slice %1057 {offsets = [0, 7], sizes = [16, 121], strides = [1, 1]} : vector<16x128xf32> to vector<16x121xf32>
    %1109 = tpu.concatenate %1108, %1107 in 1 : vector<16x121xf32>, vector<16x7xf32> -> vector<16x128xf32>
    %1110 = vector.broadcast %108 : vector<1x128xf32> to vector<16x128xf32>
    %1111 = arith.mulf %1109, %1110 : vector<16x128xf32>
    %1112 = vector.broadcast %1106 : vector<16x1xf32> to vector<16x128xf32>
    %1113 = arith.mulf %1111, %1112 : vector<16x128xf32>
    %1114 = arith.addf %1105, %1113 : vector<16x128xf32>
    %1115 = vector.extract_strided_slice %0 {offsets = [0, 70], sizes = [16, 1], strides = [1, 1]} : vector<16x135xf32> to vector<16x1xf32>
    %cst_165 = arith.constant 0.000000e+00 : f32
    %1116 = vector.broadcast %cst_165 : f32 to vector<16x8xf32>
    %1117 = vector.extract_strided_slice %1057 {offsets = [0, 8], sizes = [16, 120], strides = [1, 1]} : vector<16x128xf32> to vector<16x120xf32>
    %1118 = tpu.concatenate %1117, %1116 in 1 : vector<16x120xf32>, vector<16x8xf32> -> vector<16x128xf32>
    %1119 = vector.broadcast %105 : vector<1x128xf32> to vector<16x128xf32>
    %1120 = arith.mulf %1118, %1119 : vector<16x128xf32>
    %1121 = vector.broadcast %1115 : vector<16x1xf32> to vector<16x128xf32>
    %1122 = arith.mulf %1120, %1121 : vector<16x128xf32>
    %1123 = arith.addf %1114, %1122 : vector<16x128xf32>
    %1124 = vector.extract_strided_slice %0 {offsets = [0, 71], sizes = [16, 1], strides = [1, 1]} : vector<16x135xf32> to vector<16x1xf32>
    %cst_166 = arith.constant 0.000000e+00 : f32
    %1125 = vector.broadcast %cst_166 : f32 to vector<16x9xf32>
    %1126 = vector.extract_strided_slice %1057 {offsets = [0, 9], sizes = [16, 119], strides = [1, 1]} : vector<16x128xf32> to vector<16x119xf32>
    %1127 = tpu.concatenate %1126, %1125 in 1 : vector<16x119xf32>, vector<16x9xf32> -> vector<16x128xf32>
    %1128 = vector.broadcast %109 : vector<1x128xf32> to vector<16x128xf32>
    %1129 = arith.mulf %1127, %1128 : vector<16x128xf32>
    %1130 = vector.broadcast %1124 : vector<16x1xf32> to vector<16x128xf32>
    %1131 = arith.mulf %1129, %1130 : vector<16x128xf32>
    %1132 = arith.addf %1123, %1131 : vector<16x128xf32>
    %1133 = vector.extract_strided_slice %1 {offsets = [0, 7], sizes = [16, 1], strides = [1, 1]} : vector<16x15xf32> to vector<16x1xf32>
    %1134 = vector.broadcast %1133 : vector<16x1xf32> to vector<16x128xf32>
    %1135 = arith.addf %1132, %1134 : vector<16x128xf32>
    %cst_167 = arith.constant 0.000000e+00 : f32
    %1136 = vector.broadcast %cst_167 : f32 to vector<16x128xf32>
    %1137 = arith.maximumf %1135, %1136 : vector<16x128xf32>
    %1138 = vector.extract_strided_slice %2 {offsets = [0, 112], sizes = [16, 16], strides = [1, 1]} : vector<16x240xf32> to vector<16x16xf32>
    %1139 = arith.truncf %1138 : vector<16x16xf32> to vector<16x16xbf16>
    %1140 = arith.truncf %1137 : vector<16x128xf32> to vector<16x128xbf16>
    %cst_168 = arith.constant dense<0.000000e+00> : vector<16x128xf32>
    %1141 = tpu.matmul %1139, %1140, %cst_168 {dimension_numbers = #tpu.dot_dimension_numbers<[1], [0], [0], [1], [0, 0, 1, 1], [], []>} : vector<16x16xbf16>, vector<16x128xbf16>, vector<16x128xf32> -> vector<16x128xf32>
    %1142 = vector.extract_strided_slice %3 {offsets = [0, 7], sizes = [16, 1], strides = [1, 1]} : vector<16x15xf32> to vector<16x1xf32>
    %1143 = vector.broadcast %1142 : vector<16x1xf32> to vector<16x128xf32>
    %1144 = arith.addf %1141, %1143 : vector<16x128xf32>
    %1145 = vector.extract_strided_slice %0 {offsets = [0, 72], sizes = [16, 1], strides = [1, 1]} : vector<16x135xf32> to vector<16x1xf32>
    %cst_169 = arith.constant 0.000000e+00 : f32
    %1146 = vector.broadcast %cst_169 : f32 to vector<16x9xf32>
    %1147 = vector.extract_strided_slice %1144 {offsets = [0, 0], sizes = [16, 119], strides = [1, 1]} : vector<16x128xf32> to vector<16x119xf32>
    %1148 = tpu.concatenate %1146, %1147 in 1 : vector<16x9xf32>, vector<16x119xf32> -> vector<16x128xf32>
    %1149 = vector.broadcast %106 : vector<1x128xf32> to vector<16x128xf32>
    %1150 = arith.mulf %1148, %1149 : vector<16x128xf32>
    %1151 = vector.broadcast %1145 : vector<16x1xf32> to vector<16x128xf32>
    %1152 = arith.mulf %1150, %1151 : vector<16x128xf32>
    %1153 = vector.extract_strided_slice %0 {offsets = [0, 73], sizes = [16, 1], strides = [1, 1]} : vector<16x135xf32> to vector<16x1xf32>
    %cst_170 = arith.constant 0.000000e+00 : f32
    %1154 = vector.broadcast %cst_170 : f32 to vector<16x8xf32>
    %1155 = vector.extract_strided_slice %1144 {offsets = [0, 0], sizes = [16, 120], strides = [1, 1]} : vector<16x128xf32> to vector<16x120xf32>
    %1156 = tpu.concatenate %1154, %1155 in 1 : vector<16x8xf32>, vector<16x120xf32> -> vector<16x128xf32>
    %1157 = vector.broadcast %101 : vector<1x128xf32> to vector<16x128xf32>
    %1158 = arith.mulf %1156, %1157 : vector<16x128xf32>
    %1159 = vector.broadcast %1153 : vector<16x1xf32> to vector<16x128xf32>
    %1160 = arith.mulf %1158, %1159 : vector<16x128xf32>
    %1161 = arith.addf %1152, %1160 : vector<16x128xf32>
    %1162 = vector.extract_strided_slice %0 {offsets = [0, 74], sizes = [16, 1], strides = [1, 1]} : vector<16x135xf32> to vector<16x1xf32>
    %cst_171 = arith.constant 0.000000e+00 : f32
    %1163 = vector.broadcast %cst_171 : f32 to vector<16x7xf32>
    %1164 = vector.extract_strided_slice %1144 {offsets = [0, 0], sizes = [16, 121], strides = [1, 1]} : vector<16x128xf32> to vector<16x121xf32>
    %1165 = tpu.concatenate %1163, %1164 in 1 : vector<16x7xf32>, vector<16x121xf32> -> vector<16x128xf32>
    %1166 = vector.broadcast %107 : vector<1x128xf32> to vector<16x128xf32>
    %1167 = arith.mulf %1165, %1166 : vector<16x128xf32>
    %1168 = vector.broadcast %1162 : vector<16x1xf32> to vector<16x128xf32>
    %1169 = arith.mulf %1167, %1168 : vector<16x128xf32>
    %1170 = arith.addf %1161, %1169 : vector<16x128xf32>
    %1171 = vector.extract_strided_slice %0 {offsets = [0, 75], sizes = [16, 1], strides = [1, 1]} : vector<16x135xf32> to vector<16x1xf32>
    %cst_172 = arith.constant 0.000000e+00 : f32
    %1172 = vector.broadcast %cst_172 : f32 to vector<16x1xf32>
    %1173 = vector.extract_strided_slice %1144 {offsets = [0, 0], sizes = [16, 127], strides = [1, 1]} : vector<16x128xf32> to vector<16x127xf32>
    %1174 = tpu.concatenate %1172, %1173 in 1 : vector<16x1xf32>, vector<16x127xf32> -> vector<16x128xf32>
    %1175 = vector.broadcast %93 : vector<1x128xf32> to vector<16x128xf32>
    %1176 = arith.mulf %1174, %1175 : vector<16x128xf32>
    %1177 = vector.broadcast %1171 : vector<16x1xf32> to vector<16x128xf32>
    %1178 = arith.mulf %1176, %1177 : vector<16x128xf32>
    %1179 = arith.addf %1170, %1178 : vector<16x128xf32>
    %1180 = vector.extract_strided_slice %0 {offsets = [0, 76], sizes = [16, 1], strides = [1, 1]} : vector<16x135xf32> to vector<16x1xf32>
    %1181 = vector.broadcast %1180 : vector<16x1xf32> to vector<16x128xf32>
    %1182 = arith.mulf %1144, %1181 : vector<16x128xf32>
    %1183 = arith.addf %1179, %1182 : vector<16x128xf32>
    %1184 = vector.extract_strided_slice %0 {offsets = [0, 77], sizes = [16, 1], strides = [1, 1]} : vector<16x135xf32> to vector<16x1xf32>
    %cst_173 = arith.constant 0.000000e+00 : f32
    %1185 = vector.broadcast %cst_173 : f32 to vector<16x1xf32>
    %1186 = vector.extract_strided_slice %1144 {offsets = [0, 1], sizes = [16, 127], strides = [1, 1]} : vector<16x128xf32> to vector<16x127xf32>
    %1187 = tpu.concatenate %1186, %1185 in 1 : vector<16x127xf32>, vector<16x1xf32> -> vector<16x128xf32>
    %1188 = vector.broadcast %97 : vector<1x128xf32> to vector<16x128xf32>
    %1189 = arith.mulf %1187, %1188 : vector<16x128xf32>
    %1190 = vector.broadcast %1184 : vector<16x1xf32> to vector<16x128xf32>
    %1191 = arith.mulf %1189, %1190 : vector<16x128xf32>
    %1192 = arith.addf %1183, %1191 : vector<16x128xf32>
    %1193 = vector.extract_strided_slice %0 {offsets = [0, 78], sizes = [16, 1], strides = [1, 1]} : vector<16x135xf32> to vector<16x1xf32>
    %cst_174 = arith.constant 0.000000e+00 : f32
    %1194 = vector.broadcast %cst_174 : f32 to vector<16x7xf32>
    %1195 = vector.extract_strided_slice %1144 {offsets = [0, 7], sizes = [16, 121], strides = [1, 1]} : vector<16x128xf32> to vector<16x121xf32>
    %1196 = tpu.concatenate %1195, %1194 in 1 : vector<16x121xf32>, vector<16x7xf32> -> vector<16x128xf32>
    %1197 = vector.broadcast %108 : vector<1x128xf32> to vector<16x128xf32>
    %1198 = arith.mulf %1196, %1197 : vector<16x128xf32>
    %1199 = vector.broadcast %1193 : vector<16x1xf32> to vector<16x128xf32>
    %1200 = arith.mulf %1198, %1199 : vector<16x128xf32>
    %1201 = arith.addf %1192, %1200 : vector<16x128xf32>
    %1202 = vector.extract_strided_slice %0 {offsets = [0, 79], sizes = [16, 1], strides = [1, 1]} : vector<16x135xf32> to vector<16x1xf32>
    %cst_175 = arith.constant 0.000000e+00 : f32
    %1203 = vector.broadcast %cst_175 : f32 to vector<16x8xf32>
    %1204 = vector.extract_strided_slice %1144 {offsets = [0, 8], sizes = [16, 120], strides = [1, 1]} : vector<16x128xf32> to vector<16x120xf32>
    %1205 = tpu.concatenate %1204, %1203 in 1 : vector<16x120xf32>, vector<16x8xf32> -> vector<16x128xf32>
    %1206 = vector.broadcast %105 : vector<1x128xf32> to vector<16x128xf32>
    %1207 = arith.mulf %1205, %1206 : vector<16x128xf32>
    %1208 = vector.broadcast %1202 : vector<16x1xf32> to vector<16x128xf32>
    %1209 = arith.mulf %1207, %1208 : vector<16x128xf32>
    %1210 = arith.addf %1201, %1209 : vector<16x128xf32>
    %1211 = vector.extract_strided_slice %0 {offsets = [0, 80], sizes = [16, 1], strides = [1, 1]} : vector<16x135xf32> to vector<16x1xf32>
    %cst_176 = arith.constant 0.000000e+00 : f32
    %1212 = vector.broadcast %cst_176 : f32 to vector<16x9xf32>
    %1213 = vector.extract_strided_slice %1144 {offsets = [0, 9], sizes = [16, 119], strides = [1, 1]} : vector<16x128xf32> to vector<16x119xf32>
    %1214 = tpu.concatenate %1213, %1212 in 1 : vector<16x119xf32>, vector<16x9xf32> -> vector<16x128xf32>
    %1215 = vector.broadcast %109 : vector<1x128xf32> to vector<16x128xf32>
    %1216 = arith.mulf %1214, %1215 : vector<16x128xf32>
    %1217 = vector.broadcast %1211 : vector<16x1xf32> to vector<16x128xf32>
    %1218 = arith.mulf %1216, %1217 : vector<16x128xf32>
    %1219 = arith.addf %1210, %1218 : vector<16x128xf32>
    %1220 = vector.extract_strided_slice %1 {offsets = [0, 8], sizes = [16, 1], strides = [1, 1]} : vector<16x15xf32> to vector<16x1xf32>
    %1221 = vector.broadcast %1220 : vector<16x1xf32> to vector<16x128xf32>
    %1222 = arith.addf %1219, %1221 : vector<16x128xf32>
    %cst_177 = arith.constant 0.000000e+00 : f32
    %1223 = vector.broadcast %cst_177 : f32 to vector<16x128xf32>
    %1224 = arith.maximumf %1222, %1223 : vector<16x128xf32>
    %1225 = vector.extract_strided_slice %2 {offsets = [0, 128], sizes = [16, 16], strides = [1, 1]} : vector<16x240xf32> to vector<16x16xf32>
    %1226 = arith.truncf %1225 : vector<16x16xf32> to vector<16x16xbf16>
    %1227 = arith.truncf %1224 : vector<16x128xf32> to vector<16x128xbf16>
    %cst_178 = arith.constant dense<0.000000e+00> : vector<16x128xf32>
    %1228 = tpu.matmul %1226, %1227, %cst_178 {dimension_numbers = #tpu.dot_dimension_numbers<[1], [0], [0], [1], [0, 0, 1, 1], [], []>} : vector<16x16xbf16>, vector<16x128xbf16>, vector<16x128xf32> -> vector<16x128xf32>
    %1229 = vector.extract_strided_slice %3 {offsets = [0, 8], sizes = [16, 1], strides = [1, 1]} : vector<16x15xf32> to vector<16x1xf32>
    %1230 = vector.broadcast %1229 : vector<16x1xf32> to vector<16x128xf32>
    %1231 = arith.addf %1228, %1230 : vector<16x128xf32>
    %1232 = vector.extract_strided_slice %0 {offsets = [0, 126], sizes = [16, 1], strides = [1, 1]} : vector<16x135xf32> to vector<16x1xf32>
    %cst_179 = arith.constant 0.000000e+00 : f32
    %1233 = vector.broadcast %cst_179 : f32 to vector<16x9xf32>
    %1234 = vector.extract_strided_slice %1231 {offsets = [0, 0], sizes = [16, 119], strides = [1, 1]} : vector<16x128xf32> to vector<16x119xf32>
    %1235 = tpu.concatenate %1233, %1234 in 1 : vector<16x9xf32>, vector<16x119xf32> -> vector<16x128xf32>
    %1236 = vector.broadcast %106 : vector<1x128xf32> to vector<16x128xf32>
    %1237 = arith.mulf %1235, %1236 : vector<16x128xf32>
    %1238 = vector.broadcast %1232 : vector<16x1xf32> to vector<16x128xf32>
    %1239 = arith.mulf %1237, %1238 : vector<16x128xf32>
    %1240 = vector.extract_strided_slice %0 {offsets = [0, 127], sizes = [16, 1], strides = [1, 1]} : vector<16x135xf32> to vector<16x1xf32>
    %cst_180 = arith.constant 0.000000e+00 : f32
    %1241 = vector.broadcast %cst_180 : f32 to vector<16x8xf32>
    %1242 = vector.extract_strided_slice %1231 {offsets = [0, 0], sizes = [16, 120], strides = [1, 1]} : vector<16x128xf32> to vector<16x120xf32>
    %1243 = tpu.concatenate %1241, %1242 in 1 : vector<16x8xf32>, vector<16x120xf32> -> vector<16x128xf32>
    %1244 = vector.broadcast %101 : vector<1x128xf32> to vector<16x128xf32>
    %1245 = arith.mulf %1243, %1244 : vector<16x128xf32>
    %1246 = vector.broadcast %1240 : vector<16x1xf32> to vector<16x128xf32>
    %1247 = arith.mulf %1245, %1246 : vector<16x128xf32>
    %1248 = arith.addf %1239, %1247 : vector<16x128xf32>
    %1249 = vector.extract_strided_slice %0 {offsets = [0, 128], sizes = [16, 1], strides = [1, 1]} : vector<16x135xf32> to vector<16x1xf32>
    %cst_181 = arith.constant 0.000000e+00 : f32
    %1250 = vector.broadcast %cst_181 : f32 to vector<16x7xf32>
    %1251 = vector.extract_strided_slice %1231 {offsets = [0, 0], sizes = [16, 121], strides = [1, 1]} : vector<16x128xf32> to vector<16x121xf32>
    %1252 = tpu.concatenate %1250, %1251 in 1 : vector<16x7xf32>, vector<16x121xf32> -> vector<16x128xf32>
    %1253 = vector.broadcast %107 : vector<1x128xf32> to vector<16x128xf32>
    %1254 = arith.mulf %1252, %1253 : vector<16x128xf32>
    %1255 = vector.broadcast %1249 : vector<16x1xf32> to vector<16x128xf32>
    %1256 = arith.mulf %1254, %1255 : vector<16x128xf32>
    %1257 = arith.addf %1248, %1256 : vector<16x128xf32>
    %1258 = vector.extract_strided_slice %0 {offsets = [0, 129], sizes = [16, 1], strides = [1, 1]} : vector<16x135xf32> to vector<16x1xf32>
    %cst_182 = arith.constant 0.000000e+00 : f32
    %1259 = vector.broadcast %cst_182 : f32 to vector<16x1xf32>
    %1260 = vector.extract_strided_slice %1231 {offsets = [0, 0], sizes = [16, 127], strides = [1, 1]} : vector<16x128xf32> to vector<16x127xf32>
    %1261 = tpu.concatenate %1259, %1260 in 1 : vector<16x1xf32>, vector<16x127xf32> -> vector<16x128xf32>
    %1262 = vector.broadcast %93 : vector<1x128xf32> to vector<16x128xf32>
    %1263 = arith.mulf %1261, %1262 : vector<16x128xf32>
    %1264 = vector.broadcast %1258 : vector<16x1xf32> to vector<16x128xf32>
    %1265 = arith.mulf %1263, %1264 : vector<16x128xf32>
    %1266 = arith.addf %1257, %1265 : vector<16x128xf32>
    %1267 = vector.extract_strided_slice %0 {offsets = [0, 130], sizes = [16, 1], strides = [1, 1]} : vector<16x135xf32> to vector<16x1xf32>
    %1268 = vector.broadcast %1267 : vector<16x1xf32> to vector<16x128xf32>
    %1269 = arith.mulf %1231, %1268 : vector<16x128xf32>
    %1270 = arith.addf %1266, %1269 : vector<16x128xf32>
    %1271 = vector.extract_strided_slice %0 {offsets = [0, 131], sizes = [16, 1], strides = [1, 1]} : vector<16x135xf32> to vector<16x1xf32>
    %cst_183 = arith.constant 0.000000e+00 : f32
    %1272 = vector.broadcast %cst_183 : f32 to vector<16x1xf32>
    %1273 = vector.extract_strided_slice %1231 {offsets = [0, 1], sizes = [16, 127], strides = [1, 1]} : vector<16x128xf32> to vector<16x127xf32>
    %1274 = tpu.concatenate %1273, %1272 in 1 : vector<16x127xf32>, vector<16x1xf32> -> vector<16x128xf32>
    %1275 = vector.broadcast %97 : vector<1x128xf32> to vector<16x128xf32>
    %1276 = arith.mulf %1274, %1275 : vector<16x128xf32>
    %1277 = vector.broadcast %1271 : vector<16x1xf32> to vector<16x128xf32>
    %1278 = arith.mulf %1276, %1277 : vector<16x128xf32>
    %1279 = arith.addf %1270, %1278 : vector<16x128xf32>
    %1280 = vector.extract_strided_slice %0 {offsets = [0, 132], sizes = [16, 1], strides = [1, 1]} : vector<16x135xf32> to vector<16x1xf32>
    %cst_184 = arith.constant 0.000000e+00 : f32
    %1281 = vector.broadcast %cst_184 : f32 to vector<16x7xf32>
    %1282 = vector.extract_strided_slice %1231 {offsets = [0, 7], sizes = [16, 121], strides = [1, 1]} : vector<16x128xf32> to vector<16x121xf32>
    %1283 = tpu.concatenate %1282, %1281 in 1 : vector<16x121xf32>, vector<16x7xf32> -> vector<16x128xf32>
    %1284 = vector.broadcast %108 : vector<1x128xf32> to vector<16x128xf32>
    %1285 = arith.mulf %1283, %1284 : vector<16x128xf32>
    %1286 = vector.broadcast %1280 : vector<16x1xf32> to vector<16x128xf32>
    %1287 = arith.mulf %1285, %1286 : vector<16x128xf32>
    %1288 = arith.addf %1279, %1287 : vector<16x128xf32>
    %1289 = vector.extract_strided_slice %0 {offsets = [0, 133], sizes = [16, 1], strides = [1, 1]} : vector<16x135xf32> to vector<16x1xf32>
    %cst_185 = arith.constant 0.000000e+00 : f32
    %1290 = vector.broadcast %cst_185 : f32 to vector<16x8xf32>
    %1291 = vector.extract_strided_slice %1231 {offsets = [0, 8], sizes = [16, 120], strides = [1, 1]} : vector<16x128xf32> to vector<16x120xf32>
    %1292 = tpu.concatenate %1291, %1290 in 1 : vector<16x120xf32>, vector<16x8xf32> -> vector<16x128xf32>
    %1293 = vector.broadcast %105 : vector<1x128xf32> to vector<16x128xf32>
    %1294 = arith.mulf %1292, %1293 : vector<16x128xf32>
    %1295 = vector.broadcast %1289 : vector<16x1xf32> to vector<16x128xf32>
    %1296 = arith.mulf %1294, %1295 : vector<16x128xf32>
    %1297 = arith.addf %1288, %1296 : vector<16x128xf32>
    %1298 = vector.extract_strided_slice %0 {offsets = [0, 134], sizes = [16, 1], strides = [1, 1]} : vector<16x135xf32> to vector<16x1xf32>
    %cst_186 = arith.constant 0.000000e+00 : f32
    %1299 = vector.broadcast %cst_186 : f32 to vector<16x9xf32>
    %1300 = vector.extract_strided_slice %1231 {offsets = [0, 9], sizes = [16, 119], strides = [1, 1]} : vector<16x128xf32> to vector<16x119xf32>
    %1301 = tpu.concatenate %1300, %1299 in 1 : vector<16x119xf32>, vector<16x9xf32> -> vector<16x128xf32>
    %1302 = vector.broadcast %109 : vector<1x128xf32> to vector<16x128xf32>
    %1303 = arith.mulf %1301, %1302 : vector<16x128xf32>
    %1304 = vector.broadcast %1298 : vector<16x1xf32> to vector<16x128xf32>
    %1305 = arith.mulf %1303, %1304 : vector<16x128xf32>
    %1306 = arith.addf %1297, %1305 : vector<16x128xf32>
    %1307 = vector.extract_strided_slice %1 {offsets = [0, 14], sizes = [16, 1], strides = [1, 1]} : vector<16x15xf32> to vector<16x1xf32>
    %1308 = vector.broadcast %1307 : vector<16x1xf32> to vector<16x128xf32>
    %1309 = arith.addf %1306, %1308 : vector<16x128xf32>
    %cst_187 = arith.constant 0.000000e+00 : f32
    %1310 = vector.broadcast %cst_187 : f32 to vector<16x128xf32>
    %1311 = arith.maximumf %1309, %1310 : vector<16x128xf32>
    %1312 = vector.extract_strided_slice %2 {offsets = [0, 224], sizes = [16, 16], strides = [1, 1]} : vector<16x240xf32> to vector<16x16xf32>
    %1313 = arith.truncf %1312 : vector<16x16xf32> to vector<16x16xbf16>
    %1314 = arith.truncf %1311 : vector<16x128xf32> to vector<16x128xbf16>
    %cst_188 = arith.constant dense<0.000000e+00> : vector<16x128xf32>
    %1315 = tpu.matmul %1313, %1314, %cst_188 {dimension_numbers = #tpu.dot_dimension_numbers<[1], [0], [0], [1], [0, 0, 1, 1], [], []>} : vector<16x16xbf16>, vector<16x128xbf16>, vector<16x128xf32> -> vector<16x128xf32>
    %1316 = vector.extract_strided_slice %3 {offsets = [0, 14], sizes = [16, 1], strides = [1, 1]} : vector<16x15xf32> to vector<16x1xf32>
    %1317 = vector.broadcast %1316 : vector<16x1xf32> to vector<16x128xf32>
    %1318 = arith.addf %1315, %1317 : vector<16x128xf32>
    %c0_189 = arith.constant 0 : index
    %c0_190 = arith.constant 0 : index
    %1319 = vector.load %arg8[%c0_189, %c0_190] : memref<128x512xf32, #tpu.memory_space<vmem>>, vector<128x512xf32>
    %cst_191 = arith.constant dense<0.000000e+00> : vector<16x512xf32>
    %1320 = tpu.matmul %1318, %1319, %cst_191 {dimension_numbers = #tpu.dot_dimension_numbers<[1], [0], [0], [1], [0, 0, 1, 1], [], []>} : vector<16x128xf32>, vector<128x512xf32>, vector<16x512xf32> -> vector<16x512xf32>
    %1321 = vector.extract_strided_slice %0 {offsets = [0, 27], sizes = [16, 1], strides = [1, 1]} : vector<16x135xf32> to vector<16x1xf32>
    %cst_192 = arith.constant 0.000000e+00 : f32
    %1322 = vector.broadcast %cst_192 : f32 to vector<16x17xf32>
    %1323 = vector.extract_strided_slice %163 {offsets = [0, 0], sizes = [16, 495], strides = [1, 1]} : vector<16x512xf32> to vector<16x495xf32>
    %1324 = tpu.concatenate %1322, %1323 in 1 : vector<16x17xf32>, vector<16x495xf32> -> vector<16x512xf32>
    %1325 = vector.broadcast %53 : vector<1x512xf32> to vector<16x512xf32>
    %1326 = arith.mulf %1324, %1325 : vector<16x512xf32>
    %1327 = vector.broadcast %1321 : vector<16x1xf32> to vector<16x512xf32>
    %1328 = arith.mulf %1326, %1327 : vector<16x512xf32>
    %1329 = vector.extract_strided_slice %0 {offsets = [0, 28], sizes = [16, 1], strides = [1, 1]} : vector<16x135xf32> to vector<16x1xf32>
    %cst_193 = arith.constant 0.000000e+00 : f32
    %1330 = vector.broadcast %cst_193 : f32 to vector<16x16xf32>
    %1331 = vector.extract_strided_slice %163 {offsets = [0, 0], sizes = [16, 496], strides = [1, 1]} : vector<16x512xf32> to vector<16x496xf32>
    %1332 = tpu.concatenate %1330, %1331 in 1 : vector<16x16xf32>, vector<16x496xf32> -> vector<16x512xf32>
    %1333 = vector.broadcast %48 : vector<1x512xf32> to vector<16x512xf32>
    %1334 = arith.mulf %1332, %1333 : vector<16x512xf32>
    %1335 = vector.broadcast %1329 : vector<16x1xf32> to vector<16x512xf32>
    %1336 = arith.mulf %1334, %1335 : vector<16x512xf32>
    %1337 = arith.addf %1328, %1336 : vector<16x512xf32>
    %1338 = vector.extract_strided_slice %0 {offsets = [0, 29], sizes = [16, 1], strides = [1, 1]} : vector<16x135xf32> to vector<16x1xf32>
    %cst_194 = arith.constant 0.000000e+00 : f32
    %1339 = vector.broadcast %cst_194 : f32 to vector<16x15xf32>
    %1340 = vector.extract_strided_slice %163 {offsets = [0, 0], sizes = [16, 497], strides = [1, 1]} : vector<16x512xf32> to vector<16x497xf32>
    %1341 = tpu.concatenate %1339, %1340 in 1 : vector<16x15xf32>, vector<16x497xf32> -> vector<16x512xf32>
    %1342 = vector.broadcast %54 : vector<1x512xf32> to vector<16x512xf32>
    %1343 = arith.mulf %1341, %1342 : vector<16x512xf32>
    %1344 = vector.broadcast %1338 : vector<16x1xf32> to vector<16x512xf32>
    %1345 = arith.mulf %1343, %1344 : vector<16x512xf32>
    %1346 = arith.addf %1337, %1345 : vector<16x512xf32>
    %1347 = vector.extract_strided_slice %0 {offsets = [0, 30], sizes = [16, 1], strides = [1, 1]} : vector<16x135xf32> to vector<16x1xf32>
    %cst_195 = arith.constant 0.000000e+00 : f32
    %1348 = vector.broadcast %cst_195 : f32 to vector<16x1xf32>
    %1349 = vector.extract_strided_slice %163 {offsets = [0, 0], sizes = [16, 511], strides = [1, 1]} : vector<16x512xf32> to vector<16x511xf32>
    %1350 = tpu.concatenate %1348, %1349 in 1 : vector<16x1xf32>, vector<16x511xf32> -> vector<16x512xf32>
    %1351 = vector.broadcast %40 : vector<1x512xf32> to vector<16x512xf32>
    %1352 = arith.mulf %1350, %1351 : vector<16x512xf32>
    %1353 = vector.broadcast %1347 : vector<16x1xf32> to vector<16x512xf32>
    %1354 = arith.mulf %1352, %1353 : vector<16x512xf32>
    %1355 = arith.addf %1346, %1354 : vector<16x512xf32>
    %1356 = vector.extract_strided_slice %0 {offsets = [0, 31], sizes = [16, 1], strides = [1, 1]} : vector<16x135xf32> to vector<16x1xf32>
    %1357 = vector.broadcast %1356 : vector<16x1xf32> to vector<16x512xf32>
    %1358 = arith.mulf %163, %1357 : vector<16x512xf32>
    %1359 = arith.addf %1355, %1358 : vector<16x512xf32>
    %1360 = vector.extract_strided_slice %0 {offsets = [0, 32], sizes = [16, 1], strides = [1, 1]} : vector<16x135xf32> to vector<16x1xf32>
    %cst_196 = arith.constant 0.000000e+00 : f32
    %1361 = vector.broadcast %cst_196 : f32 to vector<16x1xf32>
    %1362 = vector.extract_strided_slice %163 {offsets = [0, 1], sizes = [16, 511], strides = [1, 1]} : vector<16x512xf32> to vector<16x511xf32>
    %1363 = tpu.concatenate %1362, %1361 in 1 : vector<16x511xf32>, vector<16x1xf32> -> vector<16x512xf32>
    %1364 = vector.broadcast %44 : vector<1x512xf32> to vector<16x512xf32>
    %1365 = arith.mulf %1363, %1364 : vector<16x512xf32>
    %1366 = vector.broadcast %1360 : vector<16x1xf32> to vector<16x512xf32>
    %1367 = arith.mulf %1365, %1366 : vector<16x512xf32>
    %1368 = arith.addf %1359, %1367 : vector<16x512xf32>
    %1369 = vector.extract_strided_slice %0 {offsets = [0, 33], sizes = [16, 1], strides = [1, 1]} : vector<16x135xf32> to vector<16x1xf32>
    %cst_197 = arith.constant 0.000000e+00 : f32
    %1370 = vector.broadcast %cst_197 : f32 to vector<16x15xf32>
    %1371 = vector.extract_strided_slice %163 {offsets = [0, 15], sizes = [16, 497], strides = [1, 1]} : vector<16x512xf32> to vector<16x497xf32>
    %1372 = tpu.concatenate %1371, %1370 in 1 : vector<16x497xf32>, vector<16x15xf32> -> vector<16x512xf32>
    %1373 = vector.broadcast %55 : vector<1x512xf32> to vector<16x512xf32>
    %1374 = arith.mulf %1372, %1373 : vector<16x512xf32>
    %1375 = vector.broadcast %1369 : vector<16x1xf32> to vector<16x512xf32>
    %1376 = arith.mulf %1374, %1375 : vector<16x512xf32>
    %1377 = arith.addf %1368, %1376 : vector<16x512xf32>
    %1378 = vector.extract_strided_slice %0 {offsets = [0, 34], sizes = [16, 1], strides = [1, 1]} : vector<16x135xf32> to vector<16x1xf32>
    %cst_198 = arith.constant 0.000000e+00 : f32
    %1379 = vector.broadcast %cst_198 : f32 to vector<16x16xf32>
    %1380 = vector.extract_strided_slice %163 {offsets = [0, 16], sizes = [16, 496], strides = [1, 1]} : vector<16x512xf32> to vector<16x496xf32>
    %1381 = tpu.concatenate %1380, %1379 in 1 : vector<16x496xf32>, vector<16x16xf32> -> vector<16x512xf32>
    %1382 = vector.broadcast %52 : vector<1x512xf32> to vector<16x512xf32>
    %1383 = arith.mulf %1381, %1382 : vector<16x512xf32>
    %1384 = vector.broadcast %1378 : vector<16x1xf32> to vector<16x512xf32>
    %1385 = arith.mulf %1383, %1384 : vector<16x512xf32>
    %1386 = arith.addf %1377, %1385 : vector<16x512xf32>
    %1387 = vector.extract_strided_slice %0 {offsets = [0, 35], sizes = [16, 1], strides = [1, 1]} : vector<16x135xf32> to vector<16x1xf32>
    %cst_199 = arith.constant 0.000000e+00 : f32
    %1388 = vector.broadcast %cst_199 : f32 to vector<16x17xf32>
    %1389 = vector.extract_strided_slice %163 {offsets = [0, 17], sizes = [16, 495], strides = [1, 1]} : vector<16x512xf32> to vector<16x495xf32>
    %1390 = tpu.concatenate %1389, %1388 in 1 : vector<16x495xf32>, vector<16x17xf32> -> vector<16x512xf32>
    %1391 = vector.broadcast %56 : vector<1x512xf32> to vector<16x512xf32>
    %1392 = arith.mulf %1390, %1391 : vector<16x512xf32>
    %1393 = vector.broadcast %1387 : vector<16x1xf32> to vector<16x512xf32>
    %1394 = arith.mulf %1392, %1393 : vector<16x512xf32>
    %1395 = arith.addf %1386, %1394 : vector<16x512xf32>
    %1396 = vector.extract_strided_slice %1 {offsets = [0, 3], sizes = [16, 1], strides = [1, 1]} : vector<16x15xf32> to vector<16x1xf32>
    %1397 = vector.broadcast %1396 : vector<16x1xf32> to vector<16x512xf32>
    %1398 = arith.addf %1395, %1397 : vector<16x512xf32>
    %cst_200 = arith.constant 0.000000e+00 : f32
    %1399 = vector.broadcast %cst_200 : f32 to vector<16x512xf32>
    %1400 = arith.maximumf %1398, %1399 : vector<16x512xf32>
    %1401 = vector.extract_strided_slice %2 {offsets = [0, 48], sizes = [16, 16], strides = [1, 1]} : vector<16x240xf32> to vector<16x16xf32>
    %1402 = arith.truncf %1401 : vector<16x16xf32> to vector<16x16xbf16>
    %1403 = arith.truncf %1400 : vector<16x512xf32> to vector<16x512xbf16>
    %cst_201 = arith.constant dense<0.000000e+00> : vector<16x512xf32>
    %1404 = tpu.matmul %1402, %1403, %cst_201 {dimension_numbers = #tpu.dot_dimension_numbers<[1], [0], [0], [1], [0, 0, 1, 1], [], []>} : vector<16x16xbf16>, vector<16x512xbf16>, vector<16x512xf32> -> vector<16x512xf32>
    %1405 = vector.extract_strided_slice %3 {offsets = [0, 3], sizes = [16, 1], strides = [1, 1]} : vector<16x15xf32> to vector<16x1xf32>
    %1406 = vector.broadcast %1405 : vector<16x1xf32> to vector<16x512xf32>
    %1407 = arith.addf %1404, %1406 : vector<16x512xf32>
    %1408 = vector.extract_strided_slice %0 {offsets = [0, 36], sizes = [16, 1], strides = [1, 1]} : vector<16x135xf32> to vector<16x1xf32>
    %cst_202 = arith.constant 0.000000e+00 : f32
    %1409 = vector.broadcast %cst_202 : f32 to vector<16x17xf32>
    %1410 = vector.extract_strided_slice %1407 {offsets = [0, 0], sizes = [16, 495], strides = [1, 1]} : vector<16x512xf32> to vector<16x495xf32>
    %1411 = tpu.concatenate %1409, %1410 in 1 : vector<16x17xf32>, vector<16x495xf32> -> vector<16x512xf32>
    %1412 = vector.broadcast %53 : vector<1x512xf32> to vector<16x512xf32>
    %1413 = arith.mulf %1411, %1412 : vector<16x512xf32>
    %1414 = vector.broadcast %1408 : vector<16x1xf32> to vector<16x512xf32>
    %1415 = arith.mulf %1413, %1414 : vector<16x512xf32>
    %1416 = vector.extract_strided_slice %0 {offsets = [0, 37], sizes = [16, 1], strides = [1, 1]} : vector<16x135xf32> to vector<16x1xf32>
    %cst_203 = arith.constant 0.000000e+00 : f32
    %1417 = vector.broadcast %cst_203 : f32 to vector<16x16xf32>
    %1418 = vector.extract_strided_slice %1407 {offsets = [0, 0], sizes = [16, 496], strides = [1, 1]} : vector<16x512xf32> to vector<16x496xf32>
    %1419 = tpu.concatenate %1417, %1418 in 1 : vector<16x16xf32>, vector<16x496xf32> -> vector<16x512xf32>
    %1420 = vector.broadcast %48 : vector<1x512xf32> to vector<16x512xf32>
    %1421 = arith.mulf %1419, %1420 : vector<16x512xf32>
    %1422 = vector.broadcast %1416 : vector<16x1xf32> to vector<16x512xf32>
    %1423 = arith.mulf %1421, %1422 : vector<16x512xf32>
    %1424 = arith.addf %1415, %1423 : vector<16x512xf32>
    %1425 = vector.extract_strided_slice %0 {offsets = [0, 38], sizes = [16, 1], strides = [1, 1]} : vector<16x135xf32> to vector<16x1xf32>
    %cst_204 = arith.constant 0.000000e+00 : f32
    %1426 = vector.broadcast %cst_204 : f32 to vector<16x15xf32>
    %1427 = vector.extract_strided_slice %1407 {offsets = [0, 0], sizes = [16, 497], strides = [1, 1]} : vector<16x512xf32> to vector<16x497xf32>
    %1428 = tpu.concatenate %1426, %1427 in 1 : vector<16x15xf32>, vector<16x497xf32> -> vector<16x512xf32>
    %1429 = vector.broadcast %54 : vector<1x512xf32> to vector<16x512xf32>
    %1430 = arith.mulf %1428, %1429 : vector<16x512xf32>
    %1431 = vector.broadcast %1425 : vector<16x1xf32> to vector<16x512xf32>
    %1432 = arith.mulf %1430, %1431 : vector<16x512xf32>
    %1433 = arith.addf %1424, %1432 : vector<16x512xf32>
    %1434 = vector.extract_strided_slice %0 {offsets = [0, 39], sizes = [16, 1], strides = [1, 1]} : vector<16x135xf32> to vector<16x1xf32>
    %cst_205 = arith.constant 0.000000e+00 : f32
    %1435 = vector.broadcast %cst_205 : f32 to vector<16x1xf32>
    %1436 = vector.extract_strided_slice %1407 {offsets = [0, 0], sizes = [16, 511], strides = [1, 1]} : vector<16x512xf32> to vector<16x511xf32>
    %1437 = tpu.concatenate %1435, %1436 in 1 : vector<16x1xf32>, vector<16x511xf32> -> vector<16x512xf32>
    %1438 = vector.broadcast %40 : vector<1x512xf32> to vector<16x512xf32>
    %1439 = arith.mulf %1437, %1438 : vector<16x512xf32>
    %1440 = vector.broadcast %1434 : vector<16x1xf32> to vector<16x512xf32>
    %1441 = arith.mulf %1439, %1440 : vector<16x512xf32>
    %1442 = arith.addf %1433, %1441 : vector<16x512xf32>
    %1443 = vector.extract_strided_slice %0 {offsets = [0, 40], sizes = [16, 1], strides = [1, 1]} : vector<16x135xf32> to vector<16x1xf32>
    %1444 = vector.broadcast %1443 : vector<16x1xf32> to vector<16x512xf32>
    %1445 = arith.mulf %1407, %1444 : vector<16x512xf32>
    %1446 = arith.addf %1442, %1445 : vector<16x512xf32>
    %1447 = vector.extract_strided_slice %0 {offsets = [0, 41], sizes = [16, 1], strides = [1, 1]} : vector<16x135xf32> to vector<16x1xf32>
    %cst_206 = arith.constant 0.000000e+00 : f32
    %1448 = vector.broadcast %cst_206 : f32 to vector<16x1xf32>
    %1449 = vector.extract_strided_slice %1407 {offsets = [0, 1], sizes = [16, 511], strides = [1, 1]} : vector<16x512xf32> to vector<16x511xf32>
    %1450 = tpu.concatenate %1449, %1448 in 1 : vector<16x511xf32>, vector<16x1xf32> -> vector<16x512xf32>
    %1451 = vector.broadcast %44 : vector<1x512xf32> to vector<16x512xf32>
    %1452 = arith.mulf %1450, %1451 : vector<16x512xf32>
    %1453 = vector.broadcast %1447 : vector<16x1xf32> to vector<16x512xf32>
    %1454 = arith.mulf %1452, %1453 : vector<16x512xf32>
    %1455 = arith.addf %1446, %1454 : vector<16x512xf32>
    %1456 = vector.extract_strided_slice %0 {offsets = [0, 42], sizes = [16, 1], strides = [1, 1]} : vector<16x135xf32> to vector<16x1xf32>
    %cst_207 = arith.constant 0.000000e+00 : f32
    %1457 = vector.broadcast %cst_207 : f32 to vector<16x15xf32>
    %1458 = vector.extract_strided_slice %1407 {offsets = [0, 15], sizes = [16, 497], strides = [1, 1]} : vector<16x512xf32> to vector<16x497xf32>
    %1459 = tpu.concatenate %1458, %1457 in 1 : vector<16x497xf32>, vector<16x15xf32> -> vector<16x512xf32>
    %1460 = vector.broadcast %55 : vector<1x512xf32> to vector<16x512xf32>
    %1461 = arith.mulf %1459, %1460 : vector<16x512xf32>
    %1462 = vector.broadcast %1456 : vector<16x1xf32> to vector<16x512xf32>
    %1463 = arith.mulf %1461, %1462 : vector<16x512xf32>
    %1464 = arith.addf %1455, %1463 : vector<16x512xf32>
    %1465 = vector.extract_strided_slice %0 {offsets = [0, 43], sizes = [16, 1], strides = [1, 1]} : vector<16x135xf32> to vector<16x1xf32>
    %cst_208 = arith.constant 0.000000e+00 : f32
    %1466 = vector.broadcast %cst_208 : f32 to vector<16x16xf32>
    %1467 = vector.extract_strided_slice %1407 {offsets = [0, 16], sizes = [16, 496], strides = [1, 1]} : vector<16x512xf32> to vector<16x496xf32>
    %1468 = tpu.concatenate %1467, %1466 in 1 : vector<16x496xf32>, vector<16x16xf32> -> vector<16x512xf32>
    %1469 = vector.broadcast %52 : vector<1x512xf32> to vector<16x512xf32>
    %1470 = arith.mulf %1468, %1469 : vector<16x512xf32>
    %1471 = vector.broadcast %1465 : vector<16x1xf32> to vector<16x512xf32>
    %1472 = arith.mulf %1470, %1471 : vector<16x512xf32>
    %1473 = arith.addf %1464, %1472 : vector<16x512xf32>
    %1474 = vector.extract_strided_slice %0 {offsets = [0, 44], sizes = [16, 1], strides = [1, 1]} : vector<16x135xf32> to vector<16x1xf32>
    %cst_209 = arith.constant 0.000000e+00 : f32
    %1475 = vector.broadcast %cst_209 : f32 to vector<16x17xf32>
    %1476 = vector.extract_strided_slice %1407 {offsets = [0, 17], sizes = [16, 495], strides = [1, 1]} : vector<16x512xf32> to vector<16x495xf32>
    %1477 = tpu.concatenate %1476, %1475 in 1 : vector<16x495xf32>, vector<16x17xf32> -> vector<16x512xf32>
    %1478 = vector.broadcast %56 : vector<1x512xf32> to vector<16x512xf32>
    %1479 = arith.mulf %1477, %1478 : vector<16x512xf32>
    %1480 = vector.broadcast %1474 : vector<16x1xf32> to vector<16x512xf32>
    %1481 = arith.mulf %1479, %1480 : vector<16x512xf32>
    %1482 = arith.addf %1473, %1481 : vector<16x512xf32>
    %1483 = vector.extract_strided_slice %1 {offsets = [0, 4], sizes = [16, 1], strides = [1, 1]} : vector<16x15xf32> to vector<16x1xf32>
    %1484 = vector.broadcast %1483 : vector<16x1xf32> to vector<16x512xf32>
    %1485 = arith.addf %1482, %1484 : vector<16x512xf32>
    %cst_210 = arith.constant 0.000000e+00 : f32
    %1486 = vector.broadcast %cst_210 : f32 to vector<16x512xf32>
    %1487 = arith.maximumf %1485, %1486 : vector<16x512xf32>
    %1488 = vector.extract_strided_slice %2 {offsets = [0, 64], sizes = [16, 16], strides = [1, 1]} : vector<16x240xf32> to vector<16x16xf32>
    %1489 = arith.truncf %1488 : vector<16x16xf32> to vector<16x16xbf16>
    %1490 = arith.truncf %1487 : vector<16x512xf32> to vector<16x512xbf16>
    %cst_211 = arith.constant dense<0.000000e+00> : vector<16x512xf32>
    %1491 = tpu.matmul %1489, %1490, %cst_211 {dimension_numbers = #tpu.dot_dimension_numbers<[1], [0], [0], [1], [0, 0, 1, 1], [], []>} : vector<16x16xbf16>, vector<16x512xbf16>, vector<16x512xf32> -> vector<16x512xf32>
    %1492 = vector.extract_strided_slice %3 {offsets = [0, 4], sizes = [16, 1], strides = [1, 1]} : vector<16x15xf32> to vector<16x1xf32>
    %1493 = vector.broadcast %1492 : vector<16x1xf32> to vector<16x512xf32>
    %1494 = arith.addf %1491, %1493 : vector<16x512xf32>
    %1495 = vector.extract_strided_slice %0 {offsets = [0, 45], sizes = [16, 1], strides = [1, 1]} : vector<16x135xf32> to vector<16x1xf32>
    %cst_212 = arith.constant 0.000000e+00 : f32
    %1496 = vector.broadcast %cst_212 : f32 to vector<16x17xf32>
    %1497 = vector.extract_strided_slice %1494 {offsets = [0, 0], sizes = [16, 495], strides = [1, 1]} : vector<16x512xf32> to vector<16x495xf32>
    %1498 = tpu.concatenate %1496, %1497 in 1 : vector<16x17xf32>, vector<16x495xf32> -> vector<16x512xf32>
    %1499 = vector.broadcast %53 : vector<1x512xf32> to vector<16x512xf32>
    %1500 = arith.mulf %1498, %1499 : vector<16x512xf32>
    %1501 = vector.broadcast %1495 : vector<16x1xf32> to vector<16x512xf32>
    %1502 = arith.mulf %1500, %1501 : vector<16x512xf32>
    %1503 = vector.extract_strided_slice %0 {offsets = [0, 46], sizes = [16, 1], strides = [1, 1]} : vector<16x135xf32> to vector<16x1xf32>
    %cst_213 = arith.constant 0.000000e+00 : f32
    %1504 = vector.broadcast %cst_213 : f32 to vector<16x16xf32>
    %1505 = vector.extract_strided_slice %1494 {offsets = [0, 0], sizes = [16, 496], strides = [1, 1]} : vector<16x512xf32> to vector<16x496xf32>
    %1506 = tpu.concatenate %1504, %1505 in 1 : vector<16x16xf32>, vector<16x496xf32> -> vector<16x512xf32>
    %1507 = vector.broadcast %48 : vector<1x512xf32> to vector<16x512xf32>
    %1508 = arith.mulf %1506, %1507 : vector<16x512xf32>
    %1509 = vector.broadcast %1503 : vector<16x1xf32> to vector<16x512xf32>
    %1510 = arith.mulf %1508, %1509 : vector<16x512xf32>
    %1511 = arith.addf %1502, %1510 : vector<16x512xf32>
    %1512 = vector.extract_strided_slice %0 {offsets = [0, 47], sizes = [16, 1], strides = [1, 1]} : vector<16x135xf32> to vector<16x1xf32>
    %cst_214 = arith.constant 0.000000e+00 : f32
    %1513 = vector.broadcast %cst_214 : f32 to vector<16x15xf32>
    %1514 = vector.extract_strided_slice %1494 {offsets = [0, 0], sizes = [16, 497], strides = [1, 1]} : vector<16x512xf32> to vector<16x497xf32>
    %1515 = tpu.concatenate %1513, %1514 in 1 : vector<16x15xf32>, vector<16x497xf32> -> vector<16x512xf32>
    %1516 = vector.broadcast %54 : vector<1x512xf32> to vector<16x512xf32>
    %1517 = arith.mulf %1515, %1516 : vector<16x512xf32>
    %1518 = vector.broadcast %1512 : vector<16x1xf32> to vector<16x512xf32>
    %1519 = arith.mulf %1517, %1518 : vector<16x512xf32>
    %1520 = arith.addf %1511, %1519 : vector<16x512xf32>
    %1521 = vector.extract_strided_slice %0 {offsets = [0, 48], sizes = [16, 1], strides = [1, 1]} : vector<16x135xf32> to vector<16x1xf32>
    %cst_215 = arith.constant 0.000000e+00 : f32
    %1522 = vector.broadcast %cst_215 : f32 to vector<16x1xf32>
    %1523 = vector.extract_strided_slice %1494 {offsets = [0, 0], sizes = [16, 511], strides = [1, 1]} : vector<16x512xf32> to vector<16x511xf32>
    %1524 = tpu.concatenate %1522, %1523 in 1 : vector<16x1xf32>, vector<16x511xf32> -> vector<16x512xf32>
    %1525 = vector.broadcast %40 : vector<1x512xf32> to vector<16x512xf32>
    %1526 = arith.mulf %1524, %1525 : vector<16x512xf32>
    %1527 = vector.broadcast %1521 : vector<16x1xf32> to vector<16x512xf32>
    %1528 = arith.mulf %1526, %1527 : vector<16x512xf32>
    %1529 = arith.addf %1520, %1528 : vector<16x512xf32>
    %1530 = vector.extract_strided_slice %0 {offsets = [0, 49], sizes = [16, 1], strides = [1, 1]} : vector<16x135xf32> to vector<16x1xf32>
    %1531 = vector.broadcast %1530 : vector<16x1xf32> to vector<16x512xf32>
    %1532 = arith.mulf %1494, %1531 : vector<16x512xf32>
    %1533 = arith.addf %1529, %1532 : vector<16x512xf32>
    %1534 = vector.extract_strided_slice %0 {offsets = [0, 50], sizes = [16, 1], strides = [1, 1]} : vector<16x135xf32> to vector<16x1xf32>
    %cst_216 = arith.constant 0.000000e+00 : f32
    %1535 = vector.broadcast %cst_216 : f32 to vector<16x1xf32>
    %1536 = vector.extract_strided_slice %1494 {offsets = [0, 1], sizes = [16, 511], strides = [1, 1]} : vector<16x512xf32> to vector<16x511xf32>
    %1537 = tpu.concatenate %1536, %1535 in 1 : vector<16x511xf32>, vector<16x1xf32> -> vector<16x512xf32>
    %1538 = vector.broadcast %44 : vector<1x512xf32> to vector<16x512xf32>
    %1539 = arith.mulf %1537, %1538 : vector<16x512xf32>
    %1540 = vector.broadcast %1534 : vector<16x1xf32> to vector<16x512xf32>
    %1541 = arith.mulf %1539, %1540 : vector<16x512xf32>
    %1542 = arith.addf %1533, %1541 : vector<16x512xf32>
    %1543 = vector.extract_strided_slice %0 {offsets = [0, 51], sizes = [16, 1], strides = [1, 1]} : vector<16x135xf32> to vector<16x1xf32>
    %cst_217 = arith.constant 0.000000e+00 : f32
    %1544 = vector.broadcast %cst_217 : f32 to vector<16x15xf32>
    %1545 = vector.extract_strided_slice %1494 {offsets = [0, 15], sizes = [16, 497], strides = [1, 1]} : vector<16x512xf32> to vector<16x497xf32>
    %1546 = tpu.concatenate %1545, %1544 in 1 : vector<16x497xf32>, vector<16x15xf32> -> vector<16x512xf32>
    %1547 = vector.broadcast %55 : vector<1x512xf32> to vector<16x512xf32>
    %1548 = arith.mulf %1546, %1547 : vector<16x512xf32>
    %1549 = vector.broadcast %1543 : vector<16x1xf32> to vector<16x512xf32>
    %1550 = arith.mulf %1548, %1549 : vector<16x512xf32>
    %1551 = arith.addf %1542, %1550 : vector<16x512xf32>
    %1552 = vector.extract_strided_slice %0 {offsets = [0, 52], sizes = [16, 1], strides = [1, 1]} : vector<16x135xf32> to vector<16x1xf32>
    %cst_218 = arith.constant 0.000000e+00 : f32
    %1553 = vector.broadcast %cst_218 : f32 to vector<16x16xf32>
    %1554 = vector.extract_strided_slice %1494 {offsets = [0, 16], sizes = [16, 496], strides = [1, 1]} : vector<16x512xf32> to vector<16x496xf32>
    %1555 = tpu.concatenate %1554, %1553 in 1 : vector<16x496xf32>, vector<16x16xf32> -> vector<16x512xf32>
    %1556 = vector.broadcast %52 : vector<1x512xf32> to vector<16x512xf32>
    %1557 = arith.mulf %1555, %1556 : vector<16x512xf32>
    %1558 = vector.broadcast %1552 : vector<16x1xf32> to vector<16x512xf32>
    %1559 = arith.mulf %1557, %1558 : vector<16x512xf32>
    %1560 = arith.addf %1551, %1559 : vector<16x512xf32>
    %1561 = vector.extract_strided_slice %0 {offsets = [0, 53], sizes = [16, 1], strides = [1, 1]} : vector<16x135xf32> to vector<16x1xf32>
    %cst_219 = arith.constant 0.000000e+00 : f32
    %1562 = vector.broadcast %cst_219 : f32 to vector<16x17xf32>
    %1563 = vector.extract_strided_slice %1494 {offsets = [0, 17], sizes = [16, 495], strides = [1, 1]} : vector<16x512xf32> to vector<16x495xf32>
    %1564 = tpu.concatenate %1563, %1562 in 1 : vector<16x495xf32>, vector<16x17xf32> -> vector<16x512xf32>
    %1565 = vector.broadcast %56 : vector<1x512xf32> to vector<16x512xf32>
    %1566 = arith.mulf %1564, %1565 : vector<16x512xf32>
    %1567 = vector.broadcast %1561 : vector<16x1xf32> to vector<16x512xf32>
    %1568 = arith.mulf %1566, %1567 : vector<16x512xf32>
    %1569 = arith.addf %1560, %1568 : vector<16x512xf32>
    %1570 = vector.extract_strided_slice %1 {offsets = [0, 5], sizes = [16, 1], strides = [1, 1]} : vector<16x15xf32> to vector<16x1xf32>
    %1571 = vector.broadcast %1570 : vector<16x1xf32> to vector<16x512xf32>
    %1572 = arith.addf %1569, %1571 : vector<16x512xf32>
    %cst_220 = arith.constant 0.000000e+00 : f32
    %1573 = vector.broadcast %cst_220 : f32 to vector<16x512xf32>
    %1574 = arith.maximumf %1572, %1573 : vector<16x512xf32>
    %1575 = vector.extract_strided_slice %2 {offsets = [0, 80], sizes = [16, 16], strides = [1, 1]} : vector<16x240xf32> to vector<16x16xf32>
    %1576 = arith.truncf %1575 : vector<16x16xf32> to vector<16x16xbf16>
    %1577 = arith.truncf %1574 : vector<16x512xf32> to vector<16x512xbf16>
    %cst_221 = arith.constant dense<0.000000e+00> : vector<16x512xf32>
    %1578 = tpu.matmul %1576, %1577, %cst_221 {dimension_numbers = #tpu.dot_dimension_numbers<[1], [0], [0], [1], [0, 0, 1, 1], [], []>} : vector<16x16xbf16>, vector<16x512xbf16>, vector<16x512xf32> -> vector<16x512xf32>
    %1579 = vector.extract_strided_slice %3 {offsets = [0, 5], sizes = [16, 1], strides = [1, 1]} : vector<16x15xf32> to vector<16x1xf32>
    %1580 = vector.broadcast %1579 : vector<16x1xf32> to vector<16x512xf32>
    %1581 = arith.addf %1578, %1580 : vector<16x512xf32>
    %1582 = arith.addf %1581, %970 : vector<16x512xf32>
    %1583 = arith.addf %1582, %1320 : vector<16x512xf32>
    %1584 = vector.extract_strided_slice %1583 {offsets = [0, 0], sizes = [8, 512], strides = [1, 1]} : vector<16x512xf32> to vector<8x512xf32>
    %c0_222 = arith.constant 0 : index
    %c0_223 = arith.constant 0 : index
    %1585 = vector.load %arg9[%c0_222, %c0_223] : memref<8x512xf32, #tpu.memory_space<vmem>>, vector<8x512xf32>
    tpu.vector_store %arg9[%c0_222, %c0_223], %1584 {strides = array<i32>} : memref<8x512xf32, #tpu.memory_space<vmem>>, vector<8x512xf32>,
    return
  }
}

</mosaic_0001>

<bundles_post_ra>
// kernel: tpu_custom_call.1
= control target key start
LH: loop header
LB: loop body
LE: loop exit
PB: predicated region body
PF: predicated region fallthrough
CT: control target
= control target key end

     0   :  { %6 = vsyncpa [#allocation3], 0  ;;  %s118_s0 = inlined_call_operand.hbm [shape: f32[8,128], index: 0, kind: input, shape index: {}]   ;;  %s119_s1 = inlined_call_operand.hbm [shape: f32[8,128], index: 1, kind: output, shape index: {}]  }
   0x1   :  { %7 = vsyncpa [#allocation4], 0  ;;  %s13_s8 = sshll.u32 %s118_s0, 4  ;;  %s99_s9 = smov [#allocation2]   ;;  %s14_s8 = int_to_ptr.hbm [resolvable:$true] %s13_s8 }
   0x2   :  { %s15_s10 = sshll.u32 %s99_s9, 4  ;;  %s16_s10 = int_to_ptr.vmem [resolvable:$true] %s15_s10 }
   0x3   :  { %18 = dma.hbm_to_vmem [thread:$0]  %s14_s8, 128, %s16_s10, [#allocation3]  }
   0x4   :  { %95 = dma.done.wait [#allocation3], 128  }
   0x5   :  { %96 = vsyncadd [#allocation3], 4294967168  ;;  %v23_v0 = vld [vmem:[#allocation2] sm:$0xff]  ;;  %s100_s11 = smov 3   ;;  %s101_s12 = smov [#allocation5]  }
   0x6   :  { %24 = vrot.lane.b32.xlu0 %v23_v0, %s100_s11  ;;  %s32_s13 = sshll.u32 %s101_s12, 4  ;;  %s34_s16 = sshll.u32 %s119_s1, 4  ;;  %s33_s13 = int_to_ptr.vmem [resolvable:$true] %s32_s13  ;;  %s35_s16 = int_to_ptr.hbm [resolvable:$true] %s34_s16 }
  0x78   :  { %v25_v1 = vpop.permute.xlu0 %24 }
  0x79   :  { %26 = vst [vmem:[#allocation5] sm:$0xff] %v25_v1 }
  0x7a   :  { %37 = dma.vmem_to_hbm [thread:$0]  %s33_s13, 128, %s35_s16, [#allocation4]  }
  0x7b   :  { %97 = dma.done.wait [#allocation4], 128  }
  0x7c   :  { %98 = vsyncadd [#allocation4], 4294967168 }
  0x7d   :  { %42 = vsyncpa [#allocation3], 1 }
  0x7e   :  { %43 = vsyncpa [#allocation4], 1 }

// kernel: forward.1
= control target key start
LH: loop header
LB: loop body
LE: loop exit
PB: predicated region body
PF: predicated region fallthrough
CT: control target
= control target key end

     0   :  { %14 = vsyncpa [#allocation3], 0  ;;  %s10767_s0 = inlined_call_operand.vmem [shape: f32[16,512], index: 0, kind: input, shape index: {}]   ;;  %s10768_s1 = inlined_call_operand.vmem [shape: f32[16,135], index: 1, kind: input, shape index: {}]   ;;  %s10769_s2 = inlined_call_operand.vmem [shape: f32[16,15], index: 2, kind: input, shape index: {}]   ;;  %s10770_s3 = inlined_call_operand.vmem [shape: f32[16,240], index: 3, kind: input, shape index: {}]   ;;  %s10771_s4 = inlined_call_operand.vmem [shape: f32[16,15], index: 4, kind: input, shape index: {}]   ;;  %s10772_s5 = inlined_call_operand.hbm [shape: f32[512,128], index: 5, kind: input, shape index: {}]   ;;  %s10773_s6 = inlined_call_operand.vmem [shape: f32[128,32], index: 6, kind: input, shape index: {}]   ;;  %s10774_s7 = inlined_call_operand.vmem [shape: f32[32,128], index: 7, kind: input, shape index: {}]   ;;  %s10775_s8 = inlined_call_operand.hbm [shape: f32[128,512], index: 8, kind: input, shape index: {}]   ;;  %s10776_s9 = inlined_call_operand.vmem [shape: f32[8,512], index: 9, kind: output, shape index: {}]  }
   0x1   :  { %s30_s11 = sshll.u32 %s10772_s5, 4  ;;  %s31_s11 = int_to_ptr.hbm [resolvable:$true] %s30_s11 }
   0x2   :  { %15 = vsyncpa [#allocation5], 0  ;;  %s6339_s12 = smov [#allocation2]   ;;  %s47_s16 = sshll.u32 %s10775_s8, 4  ;;  %s48_s16 = int_to_ptr.hbm [resolvable:$true] %s47_s16 }
   0x3   :  { %s32_s13 = sshll.u32 %s6339_s12, 4  ;;  %s6340_s17 = smov 128   ;;  %s33_s13 = int_to_ptr.vmem [resolvable:$true] %s32_s13 }
   0x4   :  { %s6341_s18 = smov 8   ;;  %s6342_s19 = smov [#allocation4]  }
   0x5   :  { %38 = dma.hbm_to_vmem [thread:$0]  %s31_s11, 8192, %s33_s13, [#allocation3], %s6340_s17, %s6340_s17, %s6341_s18  }
   0x6   :  { %s49_s20 = sshll.u32 %s6342_s19, 4  ;;  %s6343_s21 = smov 512   ;;  %s50_s20 = int_to_ptr.vmem [resolvable:$true] %s49_s20 }
   0x7   :  { %s6344_s22 = smov 32  }
   0x8   :  { %55 = dma.hbm_to_vmem [thread:$0]  %s48_s16, 8192, %s50_s20, [#allocation5], %s6343_s21, %s6343_s21, %s6344_s22  }
   0x9   :  { %6335 = dma.done.wait [#allocation3], 8192  }
   0xa   :  { %6336 = vsyncadd [#allocation3], 4294959104 }
   0xb   :  { %6337 = dma.done.wait [#allocation5], 8192  }
   0xc   :  { %6338 = vsyncadd [#allocation5], 4294959104  ;;  %v316_v0 = vld [vmem:[%s10767_s0 + $0x30] sm:$0xff]  ;;  %v6566_v2 = vld [vmem:[%s10767_s0] sm:$0xff]  ;;  %s6345_s27 = smov 127   ;;  %vm406_vm0 = vcmask 1039360  }
   0xd   :  { %v6561_v1 = vld [vmem:[%s10767_s0 + $0x10] sm:$0xff]  ;;  %402 = vrot.lane.b32.xlu2 %v316_v0, %s6345_s27  ;;  %390 = vrot.lane.b32.xlu1 %v6566_v2, %s6345_s27  ;;  %v317_v3 = vld [vmem:[%s10767_s0 + $0x38] sm:$0xff]  ;;  %s6346_s17 = smov 112   ;;  %v363_v19 = vld [vmem:[#allocation2 + $0x168] sm:$0xff]  ;;  %vm10827_vm1 = vcmask 916480   ;;  %s6355_s23 = smov 7  }
   0xe   :  { %394 = vrot.lane.b32.xlu0 %v6561_v1, %s6345_s27  ;;  %v6579_v4 = vld [vmem:[%s10767_s0 + $0x18] sm:$0xff]  ;;  %v6584_v5 = vld [vmem:[%s10767_s0 + $0x8] sm:$0xff]  ;;  %v6594_v6 = vld [vmem:[%s10767_s0 + $0x20] sm:$0xff]  ;;  %s6356_s8 = smov 9   ;;  %s6357_s24 = smov 121   ;;  %vm580_vm4 = vcmask 72704  }
   0xf   :  { %v6599_v7 = vld [vmem:[%s10767_s0 + $0x28] sm:$0xff]  ;;  %v365_v15 = vld [vmem:[#allocation2 + $0x178] sm:$0xff]  ;;  %v364_v17 = vld [vmem:[#allocation2 + $0x170] sm:$0xff]  ;;  %s6358_s25 = smov 1   ;;  %s6359_s26 = smov 120   ;;  %vm603_vm5 = vcmask 64512  }
  0x10   :  { %v381_v16 = vld [vmem:[#allocation2 + $0x1f8] sm:$0xff]  ;;  %526 = vmatpush.msra.mxu2 %v365_v15  ;;  %v380_v18 = vld [vmem:[#allocation2 + $0x1f0] sm:$0xff]  ;;  %v379_v20 = vld [vmem:[#allocation2 + $0x1e8] sm:$0xff]  ;;  %s6360_s28 = smov 119   ;;  %vm626_vm7 = vcmask 56320   ;;  %vm649_vm8 = vcmask 7168  }
  0x11   :  { %549 = vmatpush.msra.mxu3 %v381_v16  ;;  %v362_v21 = vld [vmem:[#allocation2 + $0x160] sm:$0xff]  ;;  %v361_v23 = vld [vmem:[#allocation2 + $0x158] sm:$0xff]  ;;  %v360_v25 = vld [vmem:[#allocation2 + $0x150] sm:$0xff]  ;;  %vm706_vm10 = vcmask 990208   ;;  %vm729_vm11 = vcmask 982016   ;;  %vm752_vm12 = vcmask 973824  }
  0x12   :  { %527 = vmatpush.msra.mxu2 %v364_v17  ;;  %v378_v22 = vld [vmem:[#allocation2 + $0x1e0] sm:$0xff]  ;;  %v377_v24 = vld [vmem:[#allocation2 + $0x1d8] sm:$0xff]  ;;  %v376_v26 = vld [vmem:[#allocation2 + $0x1d0] sm:$0xff]  ;;  %vm795_vm13 = vcmask 130048   ;;  %s6381_s30 = smov 96   ;;  %s6390_s5 = smov 4  }
  0x13   :  { %550 = vmatpush.msra.mxu3 %v380_v18  ;;  %v333_v27 = vld [vmem:[#allocation2 + $0x78] sm:$0xff]  ;;  %v359_v31 = vld [vmem:[#allocation2 + $0x148] sm:$0xff]  ;;  %v358_v33 = vld [vmem:[#allocation2 + $0x140] sm:$0xff]  ;;  %s6391_s29 = smov 5   ;;  %s6392_s10 = smov 125  }
  0x14   :  { %528 = vmatpush.msra.mxu2 %v363_v19  ;;  %v349_v28 = vld [vmem:[#allocation2 + $0xf8] sm:$0xff]  ;;  %v375_v32 = vld [vmem:[#allocation2 + $0x1c8] sm:$0xff]  ;;  %480 = vmatpush.msra.mxu0 %v333_v27  ;;  %v374_v34 = vld [vmem:[#allocation2 + $0x1c0] sm:$0xff]  ;;  %s6393_s11 = smov 124   ;;  %s6396_s12 = smov 123  }
  0x15   :  { %404 = vrot.lane.b32.xlu2 %v317_v3, %s6345_s27  ;;  %392 = vrot.lane.b32.xlu1 %v6584_v5, %s6345_s27  ;;  %v357_v35 = vld [vmem:[#allocation2 + $0x138] sm:$0xff]  ;;  %v356_v37 = vld [vmem:[#allocation2 + $0x130] sm:$0xff]  ;;  %v355_v43 = vld [vmem:[#allocation2 + $0x128] sm:$0xff]  ;;  %s6415_s19 = smov 80   ;;  %s6425_s13 = smov 64  }
  0x16   :  { %396 = vrot.lane.b32.xlu0 %v6579_v4, %s6345_s27  ;;  %551 = vmatpush.msra.mxu3 %v379_v20  ;;  %v373_v36 = vld [vmem:[#allocation2 + $0x1b8] sm:$0xff]  ;;  %v372_v39 = vld [vmem:[#allocation2 + $0x1b0] sm:$0xff]  ;;  %v371_v46 = vld [vmem:[#allocation2 + $0x1a8] sm:$0xff]  ;;  %s6435_s14 = smov 48   ;;  %s6469_s20 = smov 15  }
  0x17   :  { %529 = vmatpush.msra.mxu2 %v362_v21  ;;  %503 = vmatpush.msra.mxu1 %v349_v28  ;;  %v354_v49 = vld [vmem:[#allocation2 + $0x120] sm:$0xff]  ;;  %v353_v54 = vld [vmem:[#allocation2 + $0x118] sm:$0xff]  ;;  %v328_v18 = vld [vmem:[#allocation2 + $0x50] sm:$0xff] }
  0x18   :  { %552 = vmatpush.msra.mxu3 %v378_v22  ;;  %v370_v52 = vld [vmem:[#allocation2 + $0x1a0] sm:$0xff]  ;;  %v369_v56 = vld [vmem:[#allocation2 + $0x198] sm:$0xff]  ;;  %v344_v19 = vld [vmem:[#allocation2 + $0xd0] sm:$0xff] }
  0x19   :  { %530 = vmatpush.msra.mxu2 %v361_v23  ;;  %v366_v15 = vld [vmem:[#allocation2 + $0x180] sm:$0xff]  ;;  %v329_v16 = vld [vmem:[#allocation2 + $0x58] sm:$0xff]  ;;  %v327_v20 = vld [vmem:[#allocation2 + $0x48] sm:$0xff] }
  0x1a   :  { %553 = vmatpush.msra.mxu3 %v377_v24  ;;  %v345_v17 = vld [vmem:[#allocation2 + $0xd8] sm:$0xff]  ;;  %v343_v21 = vld [vmem:[#allocation2 + $0xc8] sm:$0xff]  ;;  %v326_v22 = vld [vmem:[#allocation2 + $0x40] sm:$0xff] }
  0x1b   :  { %531 = vmatpush.msra.mxu2 %v360_v25  ;;  %v342_v23 = vld [vmem:[#allocation2 + $0xc0] sm:$0xff]  ;;  %v325_v24 = vld [vmem:[#allocation2 + $0x38] sm:$0xff]  ;;  %v340_v27 = vld [vmem:[#allocation2 + $0xb0] sm:$0xff] }
  0x1c   :  { %554 = vmatpush.msra.mxu3 %v376_v26  ;;  %v341_v25 = vld [vmem:[#allocation2 + $0xb8] sm:$0xff]  ;;  %v324_v26 = vld [vmem:[#allocation2 + $0x30] sm:$0xff]  ;;  %v323_v28 = vld [vmem:[#allocation2 + $0x28] sm:$0xff] }
  0x1d   :  { %400 = vrot.lane.b32.xlu1 %v6599_v7, %s6345_s27  ;;  %532 = vmatpush.msra.mxu2 %v359_v31  ;;  %v338_v31 = vld [vmem:[#allocation2 + $0xa0] sm:$0xff] }
  0x1e   :  { %398 = vrot.lane.b32.xlu0 %v6594_v6, %s6345_s27  ;;  %555 = vmatpush.msra.mxu3 %v375_v32  ;;  %v321_v32 = vld [vmem:[#allocation2 + $0x18] sm:$0xff] }
  0x1f   :  { %533 = vmatpush.msra.mxu2 %v358_v33  ;;  %v337_v33 = vld [vmem:[#allocation2 + $0x98] sm:$0xff] }
  0x20   :  { %556 = vmatpush.msra.mxu3 %v374_v34  ;;  %v320_v34 = vld [vmem:[#allocation2 + $0x10] sm:$0xff] }
  0x21   :  { %534 = vmatpush.msra.mxu2 %v357_v35  ;;  %v336_v35 = vld [vmem:[#allocation2 + $0x90] sm:$0xff] }
  0x22   :  { %557 = vmatpush.msra.mxu3 %v373_v36  ;;  %v319_v36 = vld [vmem:[#allocation2 + $0x8] sm:$0xff] }
  0x23   :  { %535 = vmatpush.msra.mxu2 %v356_v37  ;;  %v335_v37 = vld [vmem:[#allocation2 + $0x88] sm:$0xff] }
  0x24   :  { %558 = vmatpush.msra.mxu3 %v372_v39  ;;  %v334_v39 = vld [vmem:[#allocation2 + $0x80] sm:$0xff] }
  0x25   :  { %536 = vmatpush.msra.mxu2 %v355_v43 }
  0x26   :  { %559 = vmatpush.msra.mxu3 %v371_v46  ;;  %v10793_v46 = vmov 0  }
  0x27   :  { %537 = vmatpush.msra.mxu2 %v354_v49  ;;  %5894 = vset.pattern.permute.xlu0 %v10793_v46 }
  0x28   :  { %560 = vmatpush.msra.mxu3 %v370_v52  ;;  %5895 = vset.pattern.permute.xlu1 %v10793_v46 }
  0x29   :  { %538 = vmatpush.msra.mxu2 %v353_v54 }
  0x2a   :  { %561 = vmatpush.msra.mxu3 %v369_v56 }
  0x67   :  { %v6605_v8 = vpop.permute.xlu2 %402 }
  0x6f   :  { %v405_v9 = vpop.permute.xlu2 %404 }
  0x70   :  { %v6609_v10 = vsel %vm406_vm0, %v6605_v8, %v405_v9  ;;  %v6612_v11 = vsel %vm406_vm0, %v405_v9, 0.0  ;;  %v330_v9 = vld [vmem:[#allocation2 + $0x60] sm:$0xff] }
  0x71   :  { %10943 = vst [vmem:[#allocation8_spill] sm:$0xff] %v6609_v10  ;;  %v6615_v12 = vmax.f32 %v316_v0, %v6609_v10  ;;  %v6618_v13 = vmax.f32 %v317_v3, %v6612_v11  ;;  %v332_v0 = vld [vmem:[#allocation2 + $0x70] sm:$0xff] }
  0x72   :  { %10944 = vst [vmem:[#allocation9_spill] sm:$0xff] %v6612_v11  ;;  %481 = vmatpush.msra.mxu0 %v332_v0  ;;  %v368_v3 = vld [vmem:[#allocation2 + $0x190] sm:$0xff] }
  0x73   :  { %v5884_v14 = vpack.i.bf16 %v6618_v13, %v6615_v12  ;;  %562 = vmatpush.msra.mxu3 %v368_v3  ;;  %v6690_v0 = vld [vmem:[%s10768_s1 + $0x10] sm:$0xff]  ;;  %v10787_v3 = vmov 3  }
  0x75   :  { %5885 = vrot.lane.b32.xlu1 %v5884_v14, %s6346_s17  ;;  %v350_v14 = vld [vmem:[#allocation2 + $0x100] sm:$0xff] }
  0x7d   :  { %592 = vperm.xlu1 %5895, %v6690_v0  }
  0x7f   :  { %v391_v30 = vpop.permute.xlu1 %390 }
  0x80   :  { %v395_v29 = vpop.permute.xlu0 %394 }
  0x87   :  { %v393_v42 = vpop.permute.xlu1 %392 }
  0x88   :  { %v397_v38 = vpop.permute.xlu0 %396  ;;  %v6638_v47 = vsel %vm406_vm0, %v391_v30, %v393_v42  ;;  %v6641_v48 = vsel %vm406_vm0, %v393_v42, %v395_v29  ;;  %v322_v30 = vld [vmem:[#allocation2 + $0x20] sm:$0xff] }
  0x89   :  { %v6624_v40 = vsel %vm406_vm0, %v395_v29, %v397_v38  ;;  %v6627_v41 = vsel %vm406_vm0, %v397_v38, 0.0  ;;  %10947 = vst [vmem:[#allocation12_spill] sm:$0xff] %v6638_v47  ;;  %v6645_v50 = vmax.f32 %v6566_v2, %v6638_v47  ;;  %v6649_v51 = vmax.f32 %v6584_v5, %v6641_v48  ;;  %v352_v2 = vld [vmem:[#allocation2 + $0x110] sm:$0xff]  ;;  %v347_v5 = vld [vmem:[#allocation2 + $0xe8] sm:$0xff]  ;;  %v318_v38 = vld [vmem:[#allocation2] sm:$0xff] }
  0x8a   :  { %10945 = vst [vmem:[#allocation10_spill] sm:$0xff] %v6624_v40  ;;  %v6631_v44 = vmax.f32 %v6561_v1, %v6624_v40  ;;  %v6635_v45 = vmax.f32 %v6579_v4, %v6627_v41  ;;  %v348_v1 = vld [vmem:[#allocation2 + $0xf0] sm:$0xff]  ;;  %v331_v4 = vld [vmem:[#allocation2 + $0x68] sm:$0xff]  ;;  %539 = vmatpush.msra.mxu2 %v352_v2  ;;  %v6678_v42 = vld [vmem:[%s10768_s1] sm:$0xff] }
  0x8b   :  { %10946 = vst [vmem:[#allocation11_spill] sm:$0xff] %v6627_v41  ;;  %v5879_v55 = vpack.i.bf16 %v6649_v51, %v6645_v50  ;;  %504 = vmatpush.msra.mxu1 %v348_v1  ;;  %482 = vmatpush.msra.mxu0 %v331_v4  ;;  %v339_v29 = vld [vmem:[#allocation2 + $0xa8] sm:$0xff]  ;;  %v10791_v1 = vmov 1  }
  0x8c   :  { %10948 = vst [vmem:[#allocation13_spill] sm:$0xff] %v6641_v48  ;;  %v5874_v53 = vpack.i.bf16 %v6635_v45, %v6631_v44  ;;  %5896 = vset.pattern.permute.xlu2 %v10791_v1  ;;  %5897 = vset.pattern.permute.xlu1 %v10791_v1 }
  0x8d   :  { %5880 = vrot.lane.b32.xlu0 %v5879_v55, %s6346_s17  ;;  %505 = vmatpush.msra.mxu1 %v347_v5  ;;  %v10807_v5 = vmov 2  }
  0x8e   :  { %5875 = vrot.lane.b32.xlu2 %v5874_v53, %s6346_s17  ;;  %483 = vmatpush.msra.mxu0 %v330_v9 }
  0x8f   :  { %v401_v58 = vpop.permute.xlu1 %400  ;;  %613 = vperm.xlu1 %5897, %v6690_v0  }
  0x90   :  { %v399_v57 = vpop.permute.xlu0 %398  ;;  %v6662_v60 = vsel %vm406_vm0, %v401_v58, %v6605_v8  ;;  %v367_v8 = vld [vmem:[#allocation2 + $0x188] sm:$0xff]  ;;  %484 = vmatpush.msra.mxu0 %v329_v16 }
  0x91   :  { %v6658_v59 = vsel %vm406_vm0, %v399_v57, %v401_v58  ;;  %10950 = vst [vmem:[#allocation15_spill] sm:$0xff] %v6662_v60  ;;  %v6670_v62 = vmax.f32 %v6599_v7, %v6662_v60  ;;  %v346_v7 = vld [vmem:[#allocation2 + $0xe0] sm:$0xff]  ;;  %563 = vmatpush.msra.mxu3 %v367_v8 }
  0x92   :  { %10949 = vst [vmem:[#allocation14_spill] sm:$0xff] %v6658_v59  ;;  %v6666_v61 = vmax.f32 %v6594_v6, %v6658_v59  ;;  %v351_v6 = vld [vmem:[#allocation2 + $0x108] sm:$0xff]  ;;  %506 = vmatpush.msra.mxu1 %v346_v7  ;;  %485 = vmatpush.msra.mxu0 %v328_v18 }
  0x93   :  { %540 = vmatpush.msra.mxu2 %v351_v6  ;;  %564 = vmatpush.msra.mxu3 %v366_v15  ;;  %v10785_v6 = vmov 4  }
  0x94   :  { %v5889_v63 = vpack.i.bf16 %v6670_v62, %v6666_v61  ;;  %507 = vmatpush.msra.mxu1 %v345_v17  ;;  %486 = vmatpush.msra.mxu0 %v327_v20 }
  0x95   :  { %541 = vmatpush.msra.mxu2 %v350_v14  ;;  %587 = vperm.xlu0 %5894, %v6678_v42  }
  0x96   :  { %5890 = vrot.lane.b32.xlu2 %v5889_v63, %s6346_s17  ;;  %508 = vmatpush.msra.mxu1 %v344_v19 }
  0x97   :  { %487 = vmatpush.msra.mxu0 %v326_v22  ;;  %5898 = vset.pattern.permute.xlu1 %v10807_v5 }
  0x98   :  { %509 = vmatpush.msra.mxu1 %v343_v21  ;;  %632 = vperm.xlu1 %5898, %v6678_v42  }
  0x99   :  { %488 = vmatpush.msra.mxu0 %v325_v24  ;;  %v10779_v24 = vmov 7  }
  0x9a   :  { %510 = vmatpush.msra.mxu1 %v342_v23 }
  0x9b   :  { %489 = vmatpush.msra.mxu0 %v324_v26 }
  0x9c   :  { %511 = vmatpush.msra.mxu1 %v341_v25 }
  0x9d   :  { %490 = vmatpush.msra.mxu0 %v323_v28  ;;  %5900 = vset.pattern.permute.xlu0 %v10787_v3 }
  0x9e   :  { %512 = vmatpush.msra.mxu1 %v340_v27  ;;  %609 = vperm.xlu2 %5896, %v6678_v42  }
  0x9f   :  { %491 = vmatpush.msra.mxu0 %v322_v30  ;;  %655 = vperm.xlu0 %5900, %v6678_v42  }
  0xa0   :  { %513 = vmatpush.msra.mxu1 %v339_v29  ;;  %5901 = vset.pattern.permute.xlu1 %v10787_v3 }
  0xa1   :  { %492 = vmatpush.msra.mxu0 %v321_v32  ;;  %659 = vperm.xlu1 %5901, %v6690_v0  }
  0xa2   :  { %514 = vmatpush.msra.mxu1 %v338_v31 }
  0xa3   :  { %493 = vmatpush.msra.mxu0 %v320_v34 }
  0xa4   :  { %515 = vmatpush.msra.mxu1 %v337_v33 }
  0xa5   :  { %494 = vmatpush.msra.mxu0 %v319_v36  ;;  %v10777_v36 = vmov 8  }
  0xa6   :  { %516 = vmatpush.msra.mxu1 %v336_v35  ;;  %5899 = vset.pattern.permute.xlu2 %v10807_v5 }
  0xa7   :  { %495 = vmatpush.msra.mxu0 %v318_v38  ;;  %5903 = vset.pattern.permute.xlu0 %v10785_v6 }
  0xa8   :  { %517 = vmatpush.msra.mxu1 %v335_v37  ;;  %636 = vperm.xlu2 %5899, %v6690_v0   ;;  %v6777_v37 = vld [vmem:[%s10769_s2] sm:$0xff] }
  0xa9   :  { %671 = vperm.xlu0 %5903, %v6690_v0  }
  0xaa   :  { %518 = vmatpush.msra.mxu1 %v334_v39  ;;  %v6784_v39 = vld [vmem:[%s10771_s4] sm:$0xff] }
  0xb0   :  { %5902 = vset.pattern.permute.xlu2 %v10785_v6 }
  0xb1   :  { %667 = vperm.xlu2 %5902, %v6678_v42  }
  0xe7   :  { %v5886_v53 = vpop.permute.xlu1 %5885 }
  0xe8   :  { %v5876_v43 = vpop.permute.xlu2 %5875  ;;  %v5888_v58 = vunpack.i.h.bf16 %v5886_v53  ;;  %v5887_v63 = vunpack.i.l.bf16 %v5886_v53 }
  0xe9   :  { %v5878_v49 = vunpack.i.h.bf16 %v5876_v43  ;;  %v5877_v52 = vunpack.i.l.bf16 %v5876_v43  ;;  %v6789_v43 = vld [vmem:[%s10769_s2 + $0x8] sm:$0xff] }
  0xea   :  { %v461_v2 = vsel %vm10827_vm1, %v5887_v63, %v5888_v58 }
  0xeb   :  { %v458_v54 = vsel %vm10827_vm1, %v5877_v52, %v5878_v49  ;;  %v470_v55 = vsel %vm10827_vm1, %v5878_v49, 0.0 }
  0xec   :  { %v474_v56 = vmax.f32 %v6631_v44, %v458_v54  ;;  %v475_v57 = vmax.f32 %v6635_v45, %v470_v55  ;;  %v471_v44 = vsel %vm10827_vm1, %v5888_v58, 0.0  ;;  %v478_v45 = vmax.f32 %v6615_v12, %v461_v2 }
  0xed   :  { %v479_v4 = vmax.f32 %v6618_v13, %v471_v44 }
  0xee   :  { %542 = vmatmul.f32.vlgmr.msra.gmra.mxu2 %v474_v56  ;;  %565 = vmatmul.f32.vlgmr.msra.gmra.mxu3 %v475_v57 }
  0xef   :  { %v6792_v49 = vpop.permute.xlu1 %592 }
  0xf0   :  { %v5891_v9 = vpop.permute.xlu2 %5890 }
  0xf1   :  { %v5893_v17 = vunpack.i.h.bf16 %v5891_v9  ;;  %v5892_v18 = vunpack.i.l.bf16 %v5891_v9 }
  0xf3   :  { %v459_v19 = vsel %vm10827_vm1, %v5892_v18, %v5893_v17  ;;  %v460_v20 = vsel %vm10827_vm1, %v5893_v17, %v5887_v63 }
  0xf4   :  { %v476_v21 = vmax.f32 %v6666_v61, %v459_v19  ;;  %v477_v22 = vmax.f32 %v6670_v62, %v460_v20 }
  0xf6   :  { %545 = vmatmul.f32.gmra.mxu2 %v478_v45  ;;  %568 = vmatmul.f32.gmra.mxu3 %v479_v4 }
  0xf8   :  { %v610_v38 = vpop.permute.xlu2 %609 }
  0xff   :  { %v5881_v8 = vpop.permute.xlu0 %5880 }
 0x100   :  { %v5883_v12 = vunpack.i.h.bf16 %v5881_v8  ;;  %v5882_v13 = vunpack.i.l.bf16 %v5881_v8 }
 0x101   :  { %v6798_v53 = vpop.permute.xlu1 %613 }
 0x102   :  { %v456_v7 = vsel %vm10827_vm1, %v5882_v13, %v5883_v12  ;;  %v457_v14 = vsel %vm10827_vm1, %v5883_v12, %v5877_v52  ;;  %v6796_v52 = vpop.permute.xlu2 %636  ;;  %vm1511_vm1 = vcmask 220160  }
 0x103   :  { %v472_v15 = vmax.f32 %v6645_v50, %v456_v7  ;;  %v473_v16 = vmax.f32 %v6649_v51, %v457_v14  ;;  %v10783_v50 = vmov 5   ;;  %v10781_v51 = vmov 6  }
 0x104   :  { %5905 = vset.pattern.permute.xlu2 %v10783_v50  ;;  %5904 = vset.pattern.permute.xlu1 %v10783_v50  ;;  %v77_v7 = vlaneseq }
 0x105   :  { %496 = vmatmul.f32.vlgmr.msra.gmra.mxu0 %v472_v15  ;;  %519 = vmatmul.f32.vlgmr.msra.gmra.mxu1 %v473_v16 }
 0x106   :  { %693 = vperm.xlu2 %5905, %v6690_v0   ;;  %689 = vperm.xlu1 %5904, %v6678_v42   ;;  %v6818_v16 = vand.u32 127, %v77_v7 }
 0x107   :  { %5907 = vset.pattern.permute.xlu0 %v10781_v51  ;;  %v588_v57 = vpop.permute.xlu0 %587 }
 0x108   :  { %10951 = vst [vmem:[#allocation16_spill] sm:$0xff] %v6818_v16  ;;  %v258_v17 = vand.u32 63, %v6818_v16  ;;  %v246_v18 = vand.u32 7, %v6818_v16 }
 0x10a   :  { %v633_v55 = vpop.permute.xlu1 %632  ;;  %vm272_vm2 = vcmp.ge.s32.totalorder %v258_v17, 8  ;;  %vm266_vm3 = vcmp.ge.s32.totalorder %v246_v18, 1  ;;  %vm269_vm6 = vcmp.lt.s32.totalorder %v246_v18, 7  ;;  %vm275_vm9 = vcmp.lt.s32.totalorder %v258_v17, 56 }
 0x10b   :  { %v6800_v54 = vpop.permute.xlu2 %667 }
 0x10d   :  { %499 = vmatmul.f32.gmra.mxu0 %v476_v21  ;;  %522 = vmatmul.f32.gmra.mxu1 %v477_v22  ;;  %v10803_v21 = vmov 0.0  }
 0x10e   :  { %5906 = vset.pattern.permute.xlu2 %v10781_v51  ;;  %5908 = vset.pattern.permute.xlu1 %v10779_v24  ;;  %v6823_v22 = vsel %vm272_vm2, 1.0, %v10803_v21  ;;  %vm1341_vm2 = vcmask 39936  }
 0x10f   :  { %712 = vperm.xlu2 %5906, %v6678_v42   ;;  %10952 = vst [vmem:[#allocation17_spill] sm:$0xff] %v6823_v22 }
 0x111   :  { %v6808_v2 = vpop.permute.xlu0 %655 }
 0x113   :  { %v6804_v58 = vpop.permute.xlu1 %659 }
 0x117   :  { %5909 = vset.pattern.permute.xlu2 %v10779_v24 }
 0x11b   :  { %v6812_v4 = vpop.permute.xlu0 %671 }
 0x160   :  { %v6802_v56 = vpop.permute.xlu2 %693 }
 0x169   :  { %v6806_v63 = vpop.permute.xlu2 %712 }
 0x171   :  { %v543_v25 = vpop.f32.mrf.mxu2  ;;  %v566_v27 = vpop.f32.mrf.mxu3 }
 0x178   :  { %v6810_v44 = vpop.permute.xlu1 %689 }
 0x179   :  { %v546_v32 = vpop.f32.mrf.mxu2  ;;  %v569_v34 = vpop.f32.mrf.mxu3 }
 0x182   :  { %v497_v61 = vpop.f32.mrf.mxu0  ;;  %v520_v62 = vpop.f32.mrf.mxu1 }
 0x183   :  { %v521_v23 = vadd.f32 %v520_v62, %v497_v61  ;;  %v6826_v61 = vsel %vm266_vm3, 1.0, %v10803_v21  ;;  %vm1362_vm3 = vcmask 31744  }
 0x185   :  { %v544_v26 = vadd.f32 %v543_v25, %v521_v23  ;;  %v6830_v23 = vmul.f32 %v6823_v22, %v6826_v61 }
 0x187   :  { %v6730_v28 = vadd.f32 %v566_v27, %v544_v26  ;;  %10953 = vst [vmem:[#allocation18_spill] sm:$0xff] %v6830_v23  ;;  %v10801_v27 = vmov 10  }
 0x189   :  { %620 = vrot.lane.b32.xlu1 %v6730_v28, %s6355_s23  ;;  %597 = vrot.lane.b32.xlu2 %v6730_v28, %s6341_s18 }
 0x18a   :  { %574 = vrot.lane.b32.xlu0 %v6730_v28, %s6356_s8  ;;  %v500_v29 = vpop.f32.mrf.mxu0  ;;  %v523_v30 = vpop.f32.mrf.mxu1 }
 0x18b   :  { %v524_v31 = vadd.f32 %v523_v30, %v500_v29 }
 0x18d   :  { %v547_v33 = vadd.f32 %v546_v32, %v524_v31  ;;  %v6840_v31 = vsel %vm269_vm6, 1.0, %v10803_v21 }
 0x18f   :  { %v6744_v35 = vadd.f32 %v569_v34, %v547_v33  ;;  %v6845_v33 = vmul.f32 %v6823_v22, %v6840_v31 }
 0x191   :  { %700 = vrot.lane.b32.xlu1 %v6730_v28, %s6357_s24  ;;  %643 = vrot.lane.b32.xlu2 %v6730_v28, %s6358_s25  ;;  %10954 = vst [vmem:[#allocation19_spill] sm:$0xff] %v6845_v33 }
 0x192   :  { %723 = vrot.lane.b32.xlu0 %v6730_v28, %s6359_s26 }
 0x199   :  { %576 = vrot.lane.b32.xlu1 %v6744_v35, %s6356_s8  ;;  %678 = vrot.lane.b32.xlu2 %v6730_v28, %s6345_s27 }
 0x19a   :  { %599 = vrot.lane.b32.xlu0 %v6744_v35, %s6341_s18 }
 0x1a1   :  { %746 = vrot.lane.b32.xlu1 %v6730_v28, %s6360_s28  ;;  %622 = vrot.lane.b32.xlu2 %v6744_v35, %s6355_s23 }
 0x1a2   :  { %645 = vrot.lane.b32.xlu0 %v6744_v35, %s6358_s25 }
 0x1a9   :  { %735 = vperm.xlu1 %5908, %v6678_v42   ;;  %739 = vperm.xlu2 %5909, %v6690_v0  }
 0x1aa   :  { %716 = vperm.xlu0 %5907, %v6690_v0  }
 0x1b1   :  { %680 = vrot.lane.b32.xlu1 %v6744_v35, %s6345_s27  ;;  %702 = vrot.lane.b32.xlu2 %v6744_v35, %s6357_s24 }
 0x1b2   :  { %5910 = vset.pattern.permute.xlu0 %v10777_v36  ;;  %5911 = vset.pattern.permute.xlu1 %v10777_v36 }
 0x1b3   :  { %758 = vperm.xlu0 %5910, %v6678_v42   ;;  %5912 = vset.pattern.permute.xlu2 %v10793_v46 }
 0x1b9   :  { %725 = vrot.lane.b32.xlu1 %v6744_v35, %s6359_s26  ;;  %748 = vrot.lane.b32.xlu2 %v6744_v35, %s6360_s28 }
 0x1bb   :  { %5914 = vset.pattern.permute.xlu0 %v10793_v46 }
 0x1c1   :  { %762 = vperm.xlu1 %5911, %v6690_v0   ;;  %771 = vperm.xlu2 %5912, %v6777_v37  }
 0x1c9   :  { %5913 = vset.pattern.permute.xlu1 %v10793_v46  ;;  %787 = vperm.xlu2 %5912, %v6784_v39  }
 0x1ca   :  { %776 = vperm.xlu1 %5913, %v6789_v43  }
 0x1d2   :  { %5917 = vset.pattern.permute.xlu1 %v10801_v27 }
 0x1d3   :  { %846 = vperm.xlu1 %5917, %v6678_v42  }
 0x1e3   :  { %v598_v45 = vpop.permute.xlu2 %597 }
 0x1e4   :  { %v604_v29 = vsel %vm603_vm5, 0.0, %v598_v45 }
 0x1e5   :  { %v606_v32 = vmul.f32 %v6823_v22, %v604_v29 }
 0x1e7   :  { %v616_v24 = vmul.f32 %v610_v38, %v606_v32 }
 0x1eb   :  { %v644_v12 = vpop.permute.xlu2 %643 }
 0x1ec   :  { %v650_v51 = vsel %vm649_vm8, 0.0, %v644_v12 }
 0x1f3   :  { %v679_v14 = vpop.permute.xlu2 %678 }
 0x1f4   :  { %v684_v17 = vsel %vm406_vm0, %v679_v14, 0.0 }
 0x1fb   :  { %v621_v8 = vpop.permute.xlu1 %620  ;;  %v623_v20 = vpop.permute.xlu2 %622 }
 0x1fc   :  { %v575_v13 = vpop.permute.xlu0 %574  ;;  %v627_v34 = vsel %vm626_vm7, 0.0, %v621_v8 }
 0x1fd   :  { %v581_v26 = vsel %vm580_vm4, 0.0, %v575_v13  ;;  %v629_v29 = vmul.f32 %v627_v34, %v6845_v33 }
 0x1fe   :  { %v583_v30 = vmul.f32 %v581_v26, %v6830_v23 }
 0x1ff   :  { %v639_v3 = vmul.f32 %v633_v55, %v629_v29 }
 0x200   :  { %v595_v13 = vmul.f32 %v588_v57, %v583_v30  ;;  %v10799_v57 = vmov 11   ;;  %v652_v30 = vmul.f32 %v6826_v61, %v650_v51  ;;  %v6868_v51 = vsel %vm275_vm9, 1.0, %v10803_v21 }
 0x201   :  { %5920 = vset.pattern.permute.xlu1 %v10799_v57  ;;  %10955 = vst [vmem:[#allocation20_spill] sm:$0xff] %v6868_v51  ;;  %vm1385_vm9 = vcmask 23552  }
 0x202   :  { %v618_v50 = vadd.f32 %v616_v24, %v595_v13  ;;  %872 = vperm.xlu1 %5920, %v6690_v0   ;;  %v662_v34 = vmul.f32 %v6808_v2, %v652_v30  ;;  %v6883_v2 = vmul.f32 %v6868_v51, %v6826_v61  ;;  %v10797_v30 = vmov 12  }
 0x203   :  { %v6814_v9 = vpop.permute.xlu1 %700  ;;  %v6848_v7 = vpop.permute.xlu2 %739 }
 0x204   :  { %v6816_v15 = vpop.permute.xlu0 %723  ;;  %10956 = vst [vmem:[#allocation21_spill] sm:$0xff] %v6883_v2  ;;  %v707_v29 = vsel %vm706_vm10, %v6814_v9, 0.0 }
 0x20a   :  { %5922 = vset.pattern.permute.xlu1 %v10797_v30 }
 0x20b   :  { %v577_v19 = vpop.permute.xlu1 %576  ;;  %v703_v55 = vpop.permute.xlu2 %702  ;;  %894 = vperm.xlu1 %5922, %v6690_v0  }
 0x20c   :  { %v600_v62 = vpop.permute.xlu0 %599  ;;  %v582_v18 = vsel %vm580_vm4, 0.0, %v577_v19  ;;  %v628_v19 = vsel %vm626_vm7, 0.0, %v623_v20  ;;  %v686_v20 = vmul.f32 %v6840_v31, %v684_v17 }
 0x20d   :  { %v605_v26 = vsel %vm603_vm5, 0.0, %v600_v62  ;;  %v584_v6 = vmul.f32 %v582_v18, %v6830_v23  ;;  %v641_v62 = vadd.f32 %v639_v3, %v618_v50  ;;  %v630_v13 = vmul.f32 %v628_v19, %v6845_v33  ;;  %v6875_v3 = vld [vmem:[%s10771_s4 + $0x8] sm:$0xff] }
 0x20e   :  { %v607_v8 = vmul.f32 %v6823_v22, %v605_v26  ;;  %792 = vperm.xlu0 %5914, %v6875_v3   ;;  %v696_v9 = vmul.f32 %v6810_v44, %v686_v20 }
 0x20f   :  { %v596_v24 = vmul.f32 %v6792_v49, %v584_v6  ;;  %v664_v6 = vadd.f32 %v662_v34, %v641_v62  ;;  %v10805_v49 = vmov 9   ;;  %v640_v26 = vmul.f32 %v6796_v52, %v630_v13 }
 0x210   :  { %v617_v12 = vmul.f32 %v6798_v53, %v607_v8  ;;  %5915 = vset.pattern.permute.xlu2 %v10805_v49  ;;  %v674_v53 = vmul.f32 %v6800_v54, %v6730_v28  ;;  %v709_v62 = vmul.f32 %v707_v29, %v6883_v2  ;;  %v730_v52 = vsel %vm729_vm11, %v6816_v15, 0.0 }
 0x211   :  { %826 = vperm.xlu2 %5915, %v6678_v42   ;;  %v732_v13 = vmul.f32 %v6868_v51, %v730_v52 }
 0x212   :  { %v619_v50 = vadd.f32 %v617_v12, %v596_v24  ;;  %v676_v54 = vadd.f32 %v674_v53, %v664_v6  ;;  %v675_v12 = vmul.f32 %v6812_v4, %v6744_v35  ;;  %v719_v44 = vmul.f32 %v6806_v63, %v709_v62 }
 0x213   :  { %v6832_v25 = vpop.permute.xlu1 %746  ;;  %v708_v6 = vsel %vm706_vm10, %v703_v55, 0.0 }
 0x214   :  { %v646_v36 = vpop.permute.xlu0 %645  ;;  %v642_v28 = vadd.f32 %v640_v26, %v619_v50  ;;  %v698_v17 = vadd.f32 %v696_v9, %v676_v54  ;;  %v710_v63 = vmul.f32 %v708_v6, %v6883_v2  ;;  %v6369_v6 = vmov 15  }
 0x215   :  { %v651_v38 = vsel %vm649_vm8, 0.0, %v646_v36 }
 0x216   :  { %v653_v18 = vmul.f32 %v6826_v61, %v651_v38  ;;  %5916 = vset.pattern.permute.xlu0 %v10805_v49  ;;  %v721_v55 = vadd.f32 %v719_v44, %v698_v17 }
 0x217   :  { %830 = vperm.xlu0 %5916, %v6690_v0  }
 0x218   :  { %v663_v8 = vmul.f32 %v6804_v58, %v653_v18  ;;  %v6901_v58 = vmul.f32 %v6868_v51, %v6840_v31  ;;  %v749_v18 = vpop.permute.xlu2 %748 }
 0x219   :  { %5918 = vset.pattern.permute.xlu2 %v10801_v27 }
 0x21a   :  { %10957 = vst [vmem:[#allocation22_spill] sm:$0xff] %v6901_v58  ;;  %v665_v24 = vadd.f32 %v663_v8, %v642_v28  ;;  %850 = vperm.xlu2 %5918, %v6690_v0  }
 0x21b   :  { %v6850_v45 = vpop.permute.xlu1 %735 }
 0x21c   :  { %v717_v36 = vpop.permute.xlu0 %716  ;;  %v742_v4 = vmul.f32 %v6850_v45, %v732_v13 }
 0x21d   :  { %v720_v28 = vmul.f32 %v717_v36, %v710_v63 }
 0x21e   :  { %v744_v8 = vadd.f32 %v742_v4, %v721_v55 }
 0x21f   :  { %5919 = vset.pattern.permute.xlu0 %v10799_v57 }
 0x220   :  { %v772_v52 = vpop.permute.xlu2 %771  ;;  %868 = vperm.xlu0 %5919, %v6678_v42  }
 0x222   :  { %5921 = vset.pattern.permute.xlu2 %v10797_v30 }
 0x223   :  { %v681_v32 = vpop.permute.xlu1 %680  ;;  %890 = vperm.xlu2 %5921, %v6678_v42  }
 0x224   :  { %v685_v14 = vsel %vm406_vm0, %v681_v32, 0.0  ;;  %v753_v32 = vsel %vm752_vm12, %v6832_v25, 0.0  ;;  %v677_v25 = vadd.f32 %v675_v12, %v665_v24 }
 0x225   :  { %v687_v19 = vmul.f32 %v6840_v31, %v685_v14  ;;  %v759_v50 = vpop.permute.xlu0 %758  ;;  %v755_v35 = vmul.f32 %v753_v32, %v6901_v58  ;;  %v10795_v14 = vmov 13  }
 0x226   :  { %5923 = vset.pattern.permute.xlu1 %v10795_v14 }
 0x227   :  { %v697_v15 = vmul.f32 %v6802_v56, %v687_v19  ;;  %v754_v56 = vsel %vm752_vm12, %v749_v18, 0.0  ;;  %v765_v26 = vmul.f32 %v759_v50, %v755_v35  ;;  %902 = vperm.xlu1 %5923, %v6678_v42   ;;  %v73_v18 = vld [vmem:[%s10770_s3 + $0x10] sm:$0xff]  ;;  %v6370_v50 = vmov 16  }
 0x228   :  { %v756_v45 = vmul.f32 %v754_v56, %v6901_v58  ;;  %v788_v35 = vpop.permute.xlu2 %787 }
 0x229   :  { %v699_v20 = vadd.f32 %v697_v15, %v677_v25  ;;  %v767_v19 = vadd.f32 %v765_v26, %v744_v8  ;;  %v10789_v15 = vmov 14  }
 0x22a   :  { %5926 = vset.pattern.permute.xlu0 %v10789_v15 }
 0x22b   :  { %v726_v38 = vpop.permute.xlu1 %725  ;;  %v722_v62 = vadd.f32 %v720_v28, %v699_v20  ;;  %v779_v24 = vadd.f32 %v772_v52, %v767_v19  ;;  %5924 = vset.pattern.permute.xlu2 %v10795_v14  ;;  %928 = vperm.xlu0 %5926, %v6690_v0  }
 0x22c   :  { %v731_v34 = vsel %vm729_vm11, %v726_v38, 0.0  ;;  %906 = vperm.xlu2 %5924, %v6690_v0  }
 0x22d   :  { %v733_v53 = vmul.f32 %v6868_v51, %v731_v34  ;;  %v781_v36 = vmax.f32 %v779_v24, 0.0 }
 0x22f   :  { %v743_v54 = vmul.f32 %v6848_v7, %v733_v53  ;;  %v71_v7 = vld [vmem:[%s10770_s3] sm:$0xff]  ;;  %5927 = vset.pattern.permute.xlu1 %v6369_v6  ;;  %v6371_v53 = vmov 17  }
 0x230   :  { %v6936_v44 = vpack.c.bf16 %v73_v18, %v71_v7  ;;  %946 = vperm.xlu1 %5927, %v6678_v42  }
 0x231   :  { %v745_v9 = vadd.f32 %v743_v54, %v722_v62 }
 0x232   :  { %10958 = vst [vmem:[#allocation23_spill] sm:$0xff] %v6936_v44 }
 0x233   :  { %v763_v29 = vpop.permute.xlu1 %762  ;;  %5930 = vset.pattern.permute.xlu0 %v6370_v50 }
 0x234   :  { %v766_v38 = vmul.f32 %v763_v29, %v756_v45  ;;  %5925 = vset.pattern.permute.xlu2 %v10789_v15 }
 0x235   :  { %924 = vperm.xlu2 %5925, %v6678_v42  }
 0x236   :  { %v768_v12 = vadd.f32 %v766_v38, %v745_v9 }
 0x238   :  { %5931 = vset.pattern.permute.xlu1 %v6371_v53 }
 0x23c   :  { %v777_v32 = vpop.permute.xlu1 %776 }
 0x23d   :  { %v780_v34 = vadd.f32 %v777_v32, %v768_v12  ;;  %5928 = vset.pattern.permute.xlu2 %v6369_v6 }
 0x23e   :  { %950 = vperm.xlu2 %5928, %v6690_v0  }
 0x23f   :  { %v782_v13 = vmax.f32 %v780_v34, 0.0 }
 0x241   :  { %v784_v17 = vpack.c.bf16 %v782_v13, %v781_v36 }
 0x243   :  { %806 = vmatpush.bf16.msrb.mxu0 %v784_v17 }
 0x245   :  { %v847_v29 = vpop.permute.xlu1 %846 }
 0x246   :  { %5689 = vmatmul.msk.bf16.vlgmr.msrb.gmra.mxu0 %vm795_vm13, %v6936_v44  ;;  %5929 = vset.pattern.permute.xlu2 %v6370_v50 }
 0x247   :  { %968 = vperm.xlu2 %5929, %v6678_v42  }
 0x24f   :  { %5932 = vset.pattern.permute.xlu2 %v6371_v53 }
 0x26b   :  { %v827_v20 = vpop.permute.xlu2 %826 }
 0x274   :  { %v851_v26 = vpop.permute.xlu2 %850  ;;  %v873_v8 = vpop.permute.xlu1 %872 }
 0x27d   :  { %v891_v45 = vpop.permute.xlu2 %890  ;;  %v895_v54 = vpop.permute.xlu1 %894 }
 0x280   :  { %v793_v56 = vpop.permute.xlu0 %792 }
 0x286   :  { %v6995_v28 = vpop.permute.xlu2 %906 }
 0x289   :  { %v831_v62 = vpop.permute.xlu0 %830 }
 0x28f   :  { %v6997_v19 = vpop.permute.xlu2 %924 }
 0x292   :  { %v869_v24 = vpop.permute.xlu0 %868 }
 0x298   :  { %v6999_v52 = vpop.permute.xlu2 %950 }
 0x299   :  { %v903_v38 = vpop.permute.xlu1 %902 }
 0x29d   :  { %v7005_v34 = vpop.permute.xlu0 %928 }
 0x2a1   :  { %v7003_v12 = vpop.permute.xlu2 %968 }
 0x2a2   :  { %v7001_v9 = vpop.permute.xlu1 %946 }
 0x2c3   :  { %v808_v4 = vpop.f32.mrf.mxu0 }
 0x2c4   :  { %v6948_v25 = vadd.f32 %v808_v4, %v788_v35 }
 0x2c6   :  { %913 = vrot.lane.b32.xlu2 %v6948_v25, %s6345_s27  ;;  %857 = vrot.lane.b32.xlu0 %v6948_v25, %s6355_s23 }
 0x2c7   :  { %815 = vrot.lane.b32.xlu1 %v6948_v25, %s6356_s8 }
 0x2cb   :  { %v810_v63 = vpop.f32.mrf.mxu0 }
 0x2cc   :  { %v6956_v55 = vadd.f32 %v810_v63, %v793_v56 }
 0x2ce   :  { %935 = vrot.lane.b32.xlu0 %v6948_v25, %s6357_s24  ;;  %817 = vrot.lane.b32.xlu2 %v6956_v55, %s6356_s8 }
 0x2cf   :  { %835 = vrot.lane.b32.xlu1 %v6948_v25, %s6341_s18 }
 0x2d6   :  { %979 = vrot.lane.b32.xlu0 %v6948_v25, %s6360_s28  ;;  %837 = vrot.lane.b32.xlu2 %v6956_v55, %s6341_s18 }
 0x2d7   :  { %879 = vrot.lane.b32.xlu1 %v6948_v25, %s6358_s25 }
 0x2de   :  { %915 = vrot.lane.b32.xlu0 %v6956_v55, %s6345_s27  ;;  %881 = vrot.lane.b32.xlu2 %v6956_v55, %s6358_s25 }
 0x2df   :  { %957 = vrot.lane.b32.xlu1 %v6948_v25, %s6359_s26 }
 0x2e6   :  { %972 = vperm.xlu0 %5930, %v6690_v0   ;;  %959 = vrot.lane.b32.xlu2 %v6956_v55, %s6359_s26 }
 0x2e7   :  { %859 = vrot.lane.b32.xlu1 %v6956_v55, %s6355_s23 }
 0x2ee   :  { %994 = vperm.xlu2 %5932, %v6690_v0   ;;  %1023 = vrot.lane.b32.xlu0 %v6936_v44, %s6346_s17 }
 0x2ef   :  { %990 = vperm.xlu1 %5931, %v6678_v42  }
 0x2f6   :  { %5934 = vset.pattern.permute.xlu2 %v10791_v1 }
 0x2f7   :  { %937 = vrot.lane.b32.xlu1 %v6956_v55, %s6357_s24  ;;  %1006 = vperm.xlu2 %5934, %v6789_v43  }
 0x2f8   :  { %5933 = vset.pattern.permute.xlu1 %v10791_v1 }
 0x2ff   :  { %981 = vrot.lane.b32.xlu1 %v6956_v55, %s6360_s28  ;;  %1019 = vperm.xlu2 %5934, %v6875_v3  }
 0x307   :  { %1002 = vperm.xlu1 %5933, %v6777_v37  }
 0x30f   :  { %1015 = vperm.xlu1 %5933, %v6784_v39  }
 0x320   :  { %v914_v36 = vpop.permute.xlu2 %913 }
 0x328   :  { %v818_v18 = vpop.permute.xlu2 %817 }
 0x329   :  { %v822_v63 = vsel %vm580_vm4, 0.0, %v818_v18 }
 0x32a   :  { %v824_v27 = vmul.f32 %v822_v63, %v6830_v23 }
 0x32c   :  { %v834_v60 = vmul.f32 %v831_v62, %v824_v27 }
 0x330   :  { %v838_v50 = vpop.permute.xlu2 %837 }
 0x331   :  { %v842_v53 = vsel %vm603_vm5, 0.0, %v838_v50 }
 0x332   :  { %v844_v1 = vmul.f32 %v6823_v22, %v842_v53 }
 0x338   :  { %v858_v7 = vpop.permute.xlu0 %857 }
 0x339   :  { %v816_v32 = vpop.permute.xlu1 %815  ;;  %v863_v50 = vsel %vm626_vm7, 0.0, %v858_v7 }
 0x33a   :  { %v821_v56 = vsel %vm580_vm4, 0.0, %v816_v32  ;;  %v865_v5 = vmul.f32 %v863_v50, %v6845_v33 }
 0x33b   :  { %v823_v30 = vmul.f32 %v821_v56, %v6830_v23 }
 0x33c   :  { %v875_v47 = vmul.f32 %v869_v24, %v865_v5 }
 0x33d   :  { %v833_v49 = vmul.f32 %v827_v20, %v823_v30  ;;  %v6373_v30 = vmov 19   ;;  %v919_v20 = vsel %vm406_vm0, %v914_v36, 0.0 }
 0x33e   :  { %5937 = vset.pattern.permute.xlu2 %v6373_v30 }
 0x33f   :  { %1075 = vperm.xlu2 %5937, %v6678_v42  }
 0x340   :  { %v936_v6 = vpop.permute.xlu0 %935 }
 0x341   :  { %v836_v13 = vpop.permute.xlu1 %835 }
 0x342   :  { %v841_v4 = vsel %vm603_vm5, 0.0, %v836_v13  ;;  %v882_v13 = vpop.permute.xlu2 %881 }
 0x343   :  { %v843_v15 = vmul.f32 %v6823_v22, %v841_v4  ;;  %v854_v4 = vmul.f32 %v851_v26, %v844_v1  ;;  %v886_v53 = vsel %vm649_vm8, 0.0, %v882_v13  ;;  %v6372_v1 = vmov 18  }
 0x344   :  { %v888_v48 = vmul.f32 %v6826_v61, %v886_v53  ;;  %5935 = vset.pattern.permute.xlu0 %v6372_v1  ;;  %5936 = vset.pattern.permute.xlu1 %v6372_v1 }
 0x345   :  { %v853_v21 = vmul.f32 %v847_v29, %v843_v15  ;;  %v856_v63 = vadd.f32 %v854_v4, %v834_v60  ;;  %1055 = vperm.xlu0 %5935, %v6678_v42   ;;  %1059 = vperm.xlu1 %5936, %v6690_v0  }
 0x346   :  { %v898_v26 = vmul.f32 %v895_v54, %v888_v48  ;;  %v941_v48 = vsel %vm706_vm10, %v936_v6, 0.0  ;;  %v6375_v6 = vmov 20  }
 0x347   :  { %v855_v59 = vadd.f32 %v853_v21, %v833_v49  ;;  %v910_v49 = vmul.f32 %v6995_v28, %v6956_v55  ;;  %v6374_v28 = vmov 21   ;;  %5940 = vset.pattern.permute.xlu2 %v6375_v6 }
 0x348   :  { %v7013_v46 = vpop.permute.xlu0 %979  ;;  %1101 = vperm.xlu2 %5940, %v6690_v0  }
 0x349   :  { %v880_v17 = vpop.permute.xlu1 %879  ;;  %v877_v15 = vadd.f32 %v875_v47, %v855_v59  ;;  %v909_v47 = vmul.f32 %v903_v38, %v6948_v25  ;;  %v921_v59 = vmul.f32 %v6840_v31, %v919_v20  ;;  %v943_v38 = vmul.f32 %v941_v48, %v6883_v2 }
 0x34a   :  { %v885_v32 = vsel %vm649_vm8, 0.0, %v880_v17  ;;  %v960_v60 = vpop.permute.xlu2 %959  ;;  %v6377_v48 = vmov 23  }
 0x34b   :  { %v887_v56 = vmul.f32 %v6826_v61, %v885_v32  ;;  %v931_v25 = vmul.f32 %v6997_v19, %v921_v59  ;;  %v964_v13 = vsel %vm729_vm11, %v960_v60, 0.0  ;;  %v985_v19 = vsel %vm752_vm12, %v7013_v46, 0.0 }
 0x34c   :  { %v966_v4 = vmul.f32 %v6868_v51, %v964_v13 }
 0x34d   :  { %v897_v17 = vmul.f32 %v891_v45, %v887_v56  ;;  %5941 = vset.pattern.permute.xlu0 %v6374_v28  ;;  %5938 = vset.pattern.permute.xlu1 %v6373_v30 }
 0x34e   :  { %1119 = vperm.xlu0 %5941, %v6678_v42   ;;  %1079 = vperm.xlu1 %5938, %v6690_v0  }
 0x34f   :  { %v899_v21 = vadd.f32 %v897_v17, %v877_v15 }
 0x350   :  { %v916_v41 = vpop.permute.xlu0 %915 }
 0x351   :  { %v958_v35 = vpop.permute.xlu1 %957  ;;  %v920_v27 = vsel %vm406_vm0, %v916_v41, 0.0 }
 0x352   :  { %v922_v29 = vmul.f32 %v6840_v31, %v920_v27  ;;  %v963_v41 = vsel %vm729_vm11, %v958_v35, 0.0  ;;  %v995_v35 = vpop.permute.xlu2 %994 }
 0x353   :  { %v965_v50 = vmul.f32 %v6868_v51, %v963_v41 }
 0x354   :  { %v932_v36 = vmul.f32 %v7005_v34, %v922_v29 }
 0x356   :  { %5939 = vset.pattern.permute.xlu1 %v6375_v6 }
 0x357   :  { %1097 = vperm.xlu1 %5939, %v6678_v42  }
 0x359   :  { %v860_v14 = vpop.permute.xlu1 %859 }
 0x35a   :  { %v864_v57 = vsel %vm626_vm7, 0.0, %v860_v14 }
 0x35b   :  { %v866_v18 = vmul.f32 %v864_v57, %v6845_v33 }
 0x35d   :  { %v876_v14 = vmul.f32 %v873_v8, %v866_v18  ;;  %v911_v8 = vadd.f32 %v909_v47, %v899_v21  ;;  %v973_v18 = vpop.permute.xlu0 %972  ;;  %v1007_v21 = vpop.permute.xlu2 %1006 }
 0x35e   :  { %v976_v15 = vmul.f32 %v973_v18, %v966_v4 }
 0x35f   :  { %v878_v57 = vadd.f32 %v876_v14, %v856_v63  ;;  %v933_v32 = vadd.f32 %v931_v25, %v911_v8  ;;  %v987_v14 = vmul.f32 %v985_v19, %v6901_v58  ;;  %v975_v63 = vmul.f32 %v7003_v12, %v965_v50  ;;  %5942 = vset.pattern.permute.xlu1 %v6374_v28 }
 0x360   :  { %1123 = vperm.xlu1 %5942, %v6690_v0   ;;  %v6379_v8 = vmov 25  }
 0x361   :  { %v991_v7 = vpop.permute.xlu1 %990  ;;  %v900_v5 = vadd.f32 %v898_v26, %v878_v57  ;;  %v6376_v26 = vmov 22  }
 0x362   :  { %v997_v1 = vmul.f32 %v991_v7, %v987_v14  ;;  %5944 = vset.pattern.permute.xlu0 %v6376_v26  ;;  %5943 = vset.pattern.permute.xlu2 %v6376_v26 }
 0x363   :  { %v912_v62 = vadd.f32 %v910_v49, %v900_v5  ;;  %1135 = vperm.xlu0 %5944, %v6690_v0   ;;  %1131 = vperm.xlu2 %5943, %v6678_v42  }
 0x365   :  { %v934_v34 = vadd.f32 %v932_v36, %v912_v62  ;;  %v1024_v29 = vpop.permute.xlu0 %1023  ;;  %v1020_v25 = vpop.permute.xlu2 %1019  ;;  %v6380_v36 = vmov 26  }
 0x368   :  { %5945 = vset.pattern.permute.xlu1 %v6377_v48 }
 0x369   :  { %v938_v45 = vpop.permute.xlu1 %937  ;;  %1153 = vperm.xlu1 %5945, %v6678_v42  }
 0x36a   :  { %v942_v54 = vsel %vm706_vm10, %v938_v45, 0.0  ;;  %v6378_v45 = vmov 24  }
 0x36b   :  { %v944_v24 = vmul.f32 %v942_v54, %v6883_v2  ;;  %5946 = vset.pattern.permute.xlu2 %v6377_v48  ;;  %5948 = vset.pattern.permute.xlu0 %v6378_v45 }
 0x36c   :  { %1157 = vperm.xlu2 %5946, %v6690_v0  }
 0x36d   :  { %v954_v55 = vmul.f32 %v6999_v52, %v944_v24  ;;  %v953_v52 = vmul.f32 %v7001_v9, %v943_v38 }
 0x36f   :  { %v956_v53 = vadd.f32 %v954_v55, %v934_v34  ;;  %v955_v57 = vadd.f32 %v953_v52, %v933_v32  ;;  %v7102_v55 = vld [vmem:[%s10768_s1] sm:$0xff] }
 0x371   :  { %v982_v56 = vpop.permute.xlu1 %981  ;;  %v978_v9 = vadd.f32 %v976_v15, %v956_v53  ;;  %v977_v20 = vadd.f32 %v975_v63, %v955_v57  ;;  %5949 = vset.pattern.permute.xlu1 %v6379_v8 }
 0x372   :  { %v986_v17 = vsel %vm752_vm12, %v982_v56, 0.0 }
 0x373   :  { %v988_v46 = vmul.f32 %v986_v17, %v6901_v58  ;;  %v999_v12 = vadd.f32 %v997_v1, %v977_v20 }
 0x374   :  { %5947 = vset.pattern.permute.xlu2 %v6378_v45 }
 0x375   :  { %v998_v30 = vmul.f32 %v995_v35, %v988_v46  ;;  %1175 = vperm.xlu2 %5947, %v6678_v42  }
 0x377   :  { %v1000_v60 = vadd.f32 %v998_v30, %v978_v9 }
 0x379   :  { %v1010_v27 = vadd.f32 %v1007_v21, %v1000_v60  ;;  %v1003_v5 = vpop.permute.xlu1 %1002 }
 0x37a   :  { %v1009_v47 = vadd.f32 %v1003_v5, %v999_v12 }
 0x37b   :  { %v1012_v7 = vmax.f32 %v1010_v27, 0.0 }
 0x37c   :  { %v1011_v59 = vmax.f32 %v1009_v47, 0.0 }
 0x37d   :  { %5950 = vset.pattern.permute.xlu2 %v6379_v8 }
 0x37e   :  { %v1013_v49 = vpack.c.bf16 %v1012_v7, %v1011_v59 }
 0x380   :  { %1035 = vmatpush.bf16.msrb.mxu1 %v1013_v49 }
 0x381   :  { %v1016_v54 = vpop.permute.xlu1 %1015 }
 0x383   :  { %5690 = vmatmul.msk.bf16.vlgmr.msrb.gmra.mxu1 %vm795_vm13, %v1024_v29 }
 0x399   :  { %v1076_v28 = vpop.permute.xlu2 %1075 }
 0x3a2   :  { %v1102_v13 = vpop.permute.xlu2 %1101 }
 0x3b7   :  { %v1060_v6 = vpop.permute.xlu1 %1059 }
 0x3bd   :  { %v1132_v35 = vpop.permute.xlu2 %1131 }
 0x3c0   :  { %v1080_v50 = vpop.permute.xlu1 %1079 }
 0x3c6   :  { %v7119_v32 = vpop.permute.xlu2 %1157 }
 0x3cf   :  { %v7121_v19 = vpop.permute.xlu2 %1175 }
 0x400   :  { %v1037_v41 = vpop.f32.mrf.mxu1 }
 0x401   :  { %v7064_v62 = vadd.f32 %v1037_v41, %v1016_v54 }
 0x403   :  { %1086 = vrot.lane.b32.xlu1 %v7064_v62, %s6355_s23  ;;  %1064 = vrot.lane.b32.xlu2 %v7064_v62, %s6341_s18 }
 0x404   :  { %1044 = vrot.lane.b32.xlu0 %v7064_v62, %s6356_s8 }
 0x408   :  { %v1039_v24 = vpop.f32.mrf.mxu1 }
 0x409   :  { %v7078_v38 = vadd.f32 %v1039_v24, %v1020_v25 }
 0x40b   :  { %1164 = vrot.lane.b32.xlu1 %v7064_v62, %s6357_s24  ;;  %1108 = vrot.lane.b32.xlu2 %v7064_v62, %s6358_s25 }
 0x40c   :  { %1186 = vrot.lane.b32.xlu0 %v7064_v62, %s6359_s26 }
 0x413   :  { %1046 = vrot.lane.b32.xlu1 %v7078_v38, %s6356_s8  ;;  %1142 = vrot.lane.b32.xlu2 %v7064_v62, %s6345_s27 }
 0x414   :  { %1066 = vrot.lane.b32.xlu0 %v7078_v38, %s6341_s18 }
 0x41b   :  { %1208 = vrot.lane.b32.xlu1 %v7064_v62, %s6360_s28  ;;  %1088 = vrot.lane.b32.xlu2 %v7078_v38, %s6355_s23 }
 0x41c   :  { %1110 = vrot.lane.b32.xlu0 %v7078_v38, %s6358_s25 }
 0x423   :  { %1197 = vperm.xlu1 %5949, %v6678_v42   ;;  %1201 = vperm.xlu2 %5950, %v6690_v0   ;;  %v10959_v42 = vmov 2  }
 0x424   :  { %1179 = vperm.xlu0 %5948, %v6690_v0  }
 0x42b   :  { %1144 = vrot.lane.b32.xlu1 %v7078_v38, %s6345_s27  ;;  %1166 = vrot.lane.b32.xlu2 %v7078_v38, %s6357_s24 }
 0x42c   :  { %5951 = vset.pattern.permute.xlu0 %v6380_v36  ;;  %5952 = vset.pattern.permute.xlu1 %v6380_v36 }
 0x42d   :  { %1219 = vperm.xlu0 %5951, %v7102_v55   ;;  %5953 = vset.pattern.permute.xlu2 %v10959_v42 }
 0x433   :  { %1188 = vrot.lane.b32.xlu1 %v7078_v38, %s6359_s26  ;;  %1210 = vrot.lane.b32.xlu2 %v7078_v38, %s6360_s28 }
 0x435   :  { %5955 = vset.pattern.permute.xlu0 %v10959_v42 }
 0x436   :  { %1244 = vperm.xlu0 %5955, %v6784_v39   ;;  %v1098_v39 = vpop.permute.xlu1 %1097 }
 0x43b   :  { %1223 = vperm.xlu1 %5952, %v6690_v0   ;;  %1231 = vperm.xlu2 %5953, %v6777_v37   ;;  %v1056_v0 = vpop.permute.xlu0 %1055 }
 0x43e   :  { %v1124_v37 = vpop.permute.xlu1 %1123 }
 0x443   :  { %5954 = vset.pattern.permute.xlu1 %v10959_v42  ;;  %1251 = vrot.lane.b32.xlu2 %v6936_v44, %s6381_s30  ;;  %v1120_v34 = vpop.permute.xlu0 %1119 }
 0x444   :  { %1235 = vperm.xlu1 %5954, %v6789_v43  }
 0x446   :  { %v1154_v52 = vpop.permute.xlu1 %1153 }
 0x44b   :  { %v1136_v4 = vpop.permute.xlu0 %1135 }
 0x44c   :  { %1248 = vperm.xlu1 %5954, %v6875_v3  }
 0x45d   :  { %v1065_v18 = vpop.permute.xlu2 %1064 }
 0x45e   :  { %v1070_v30 = vsel %vm603_vm5, 0.0, %v1065_v18 }
 0x45f   :  { %v1072_v20 = vmul.f32 %v6823_v22, %v1070_v30 }
 0x461   :  { %v1082_v7 = vmul.f32 %v1076_v28, %v1072_v20 }
 0x465   :  { %v1109_v56 = vpop.permute.xlu2 %1108 }
 0x466   :  { %v1114_v49 = vsel %vm649_vm8, 0.0, %v1109_v56 }
 0x467   :  { %v1116_v8 = vmul.f32 %v6826_v61, %v1114_v49 }
 0x469   :  { %v1126_v18 = vmul.f32 %v1120_v34, %v1116_v8 }
 0x46d   :  { %v1143_v63 = vpop.permute.xlu2 %1142 }
 0x475   :  { %v1087_v53 = vpop.permute.xlu1 %1086  ;;  %v1089_v57 = vpop.permute.xlu2 %1088 }
 0x476   :  { %v1045_v14 = vpop.permute.xlu0 %1044  ;;  %v1092_v26 = vsel %vm626_vm7, 0.0, %v1087_v53  ;;  %v1093_v41 = vsel %vm626_vm7, 0.0, %v1089_v57 }
 0x477   :  { %v1050_v1 = vsel %vm580_vm4, 0.0, %v1045_v14  ;;  %v1094_v59 = vmul.f32 %v1092_v26, %v6845_v33  ;;  %v1095_v53 = vmul.f32 %v1093_v41, %v6845_v33 }
 0x478   :  { %v1052_v9 = vmul.f32 %v1050_v1, %v6830_v23 }
 0x479   :  { %v1104_v54 = vmul.f32 %v1098_v39, %v1094_v59  ;;  %v1138_v39 = vmul.f32 %v1132_v35, %v7064_v62 }
 0x47a   :  { %v1062_v60 = vmul.f32 %v1056_v0, %v1052_v9 }
 0x47c   :  { %v1084_v48 = vadd.f32 %v1082_v7, %v1062_v60 }
 0x47d   :  { %v1165_v43 = vpop.permute.xlu1 %1164  ;;  %v7128_v21 = vpop.permute.xlu2 %1201 }
 0x47e   :  { %v1187_v17 = vpop.permute.xlu0 %1186  ;;  %v1106_v25 = vadd.f32 %v1104_v54, %v1084_v48 }
 0x480   :  { %v1128_v1 = vadd.f32 %v1126_v18, %v1106_v25 }
 0x482   :  { %v1140_v26 = vadd.f32 %v1138_v39, %v1128_v1 }
 0x485   :  { %v1047_v3 = vpop.permute.xlu1 %1046  ;;  %v1167_v56 = vpop.permute.xlu2 %1166 }
 0x486   :  { %v1067_v15 = vpop.permute.xlu0 %1066  ;;  %v1051_v27 = vsel %vm580_vm4, 0.0, %v1047_v3  ;;  %v1148_v3 = vsel %vm406_vm0, %v1143_v63, 0.0 }
 0x487   :  { %v1071_v5 = vsel %vm603_vm5, 0.0, %v1067_v15  ;;  %v1053_v29 = vmul.f32 %v1051_v27, %v6830_v23  ;;  %v1150_v9 = vmul.f32 %v6840_v31, %v1148_v3 }
 0x488   :  { %v1073_v45 = vmul.f32 %v6823_v22, %v1071_v5  ;;  %v1192_v5 = vsel %vm729_vm11, %v1187_v17, 0.0 }
 0x489   :  { %v1063_v36 = vmul.f32 %v1060_v6, %v1053_v29  ;;  %v1105_v6 = vmul.f32 %v1102_v13, %v1095_v53  ;;  %v1139_v13 = vmul.f32 %v1136_v4, %v7078_v38  ;;  %v1171_v29 = vsel %vm706_vm10, %v1167_v56, 0.0 }
 0x48a   :  { %v1083_v0 = vmul.f32 %v1080_v50, %v1073_v45  ;;  %v1170_v50 = vsel %vm706_vm10, %v1165_v43, 0.0  ;;  %v1194_v43 = vmul.f32 %v6868_v51, %v1192_v5  ;;  %v1173_v38 = vmul.f32 %v1171_v29, %v6883_v2  ;;  %v1285_v5 = vld [vmem:[%s10773_s6 + $0x78] sm:$0xff]  ;;  %v1274_v29 = vld [vmem:[%s10773_s6 + $0x20] sm:$0xff] }
 0x48b   :  { %v1172_v63 = vmul.f32 %v1170_v50, %v6883_v2  ;;  %1310 = vmatpush.msrb.mxu3 %v1285_v5  ;;  %v6427_v2 = vmov 118  }
 0x48c   :  { %v1085_v30 = vadd.f32 %v1083_v0, %v1063_v36 }
 0x48d   :  { %v1209_v46 = vpop.permute.xlu1 %1208  ;;  %v1182_v48 = vmul.f32 %v7121_v19, %v1172_v63 }
 0x48e   :  { %v1111_v47 = vpop.permute.xlu0 %1110  ;;  %v1107_v20 = vadd.f32 %v1105_v6, %v1085_v30  ;;  %v1214_v62 = vsel %vm752_vm12, %v1209_v46, 0.0 }
 0x48f   :  { %v1115_v24 = vsel %vm649_vm8, 0.0, %v1111_v47  ;;  %v1160_v47 = vmul.f32 %v1154_v52, %v1150_v9  ;;  %v1216_v52 = vmul.f32 %v1214_v62, %v6901_v58  ;;  %v1282_v62 = vld [vmem:[%s10773_s6 + $0x60] sm:$0xff] }
 0x490   :  { %v1117_v14 = vmul.f32 %v6826_v61, %v1115_v24 }
 0x491   :  { %v1162_v59 = vadd.f32 %v1160_v47, %v1140_v26  ;;  %v1284_v47 = vld [vmem:[%s10773_s6 + $0x70] sm:$0xff] }
 0x492   :  { %v1127_v34 = vmul.f32 %v1124_v37, %v1117_v14  ;;  %v1211_v37 = vpop.permute.xlu2 %1210  ;;  %1311 = vmatpush.msrb.mxu3 %v1284_v47 }
 0x493   :  { %v1215_v54 = vsel %vm752_vm12, %v1211_v37, 0.0  ;;  %v1184_v4 = vadd.f32 %v1182_v48, %v1162_v59  ;;  %v1278_v37 = vld [vmem:[%s10773_s6 + $0x40] sm:$0xff]  ;;  %v1277_v59 = vld [vmem:[%s10773_s6 + $0x38] sm:$0xff]  ;;  %v1275_v48 = vld [vmem:[%s10773_s6 + $0x28] sm:$0xff] }
 0x494   :  { %v1129_v7 = vadd.f32 %v1127_v34, %v1107_v20 }
 0x495   :  { %v1198_v12 = vpop.permute.xlu1 %1197 }
 0x496   :  { %v1180_v15 = vpop.permute.xlu0 %1179  ;;  %v1204_v17 = vmul.f32 %v1198_v12, %v1194_v43  ;;  %v1141_v8 = vadd.f32 %v1139_v13, %v1129_v7  ;;  %v1283_v7 = vld [vmem:[%s10773_s6 + $0x68] sm:$0xff]  ;;  %v1280_v13 = vld [vmem:[%s10773_s6 + $0x50] sm:$0xff] }
 0x497   :  { %v1183_v36 = vmul.f32 %v1180_v15, %v1173_v38  ;;  %1312 = vmatpush.msrb.mxu3 %v1283_v7  ;;  %v1279_v43 = vld [vmem:[%s10773_s6 + $0x48] sm:$0xff]  ;;  %v1270_v38 = vld [vmem:[%s10773_s6] sm:$0xff] }
 0x498   :  { %v1206_v19 = vadd.f32 %v1204_v17, %v1184_v4  ;;  %v6382_v4 = vmov 82   ;;  %v7325_v7 = vld [vmem:[%s10771_s4] sm:$0xff] }
 0x499   :  { %1313 = vmatpush.msrb.mxu3 %v1282_v62  ;;  %5958 = vset.pattern.permute.xlu0 %v6382_v4  ;;  %v7331_v62 = vld [vmem:[%s10771_s4 + $0x8] sm:$0xff] }
 0x49a   :  { %v1232_v53 = vpop.permute.xlu2 %1231 }
 0x49d   :  { %v1145_v28 = vpop.permute.xlu1 %1144 }
 0x49e   :  { %v1149_v57 = vsel %vm406_vm0, %v1145_v28, 0.0 }
 0x49f   :  { %v1151_v60 = vmul.f32 %v6840_v31, %v1149_v57  ;;  %v1220_v45 = vpop.permute.xlu0 %1219 }
 0x4a0   :  { %v1226_v24 = vmul.f32 %v1220_v45, %v1216_v52  ;;  %v1273_v45 = vld [vmem:[%s10773_s6 + $0x18] sm:$0xff]  ;;  %v1272_v52 = vld [vmem:[%s10773_s6 + $0x10] sm:$0xff] }
 0x4a1   :  { %v1161_v49 = vmul.f32 %v7119_v32, %v1151_v60  ;;  %v1217_v32 = vmul.f32 %v1215_v54, %v6901_v58  ;;  %v1271_v54 = vld [vmem:[%s10773_s6 + $0x8] sm:$0xff] }
 0x4a2   :  { %v1228_v28 = vadd.f32 %v1226_v24, %v1206_v19  ;;  %v1252_v6 = vpop.permute.xlu2 %1251  ;;  %v7236_v24 = vld [vmem:[%s10768_s1 + $0x10] sm:$0xff] }
 0x4a3   :  { %v1163_v41 = vadd.f32 %v1161_v49, %v1141_v8  ;;  %v1276_v49 = vld [vmem:[%s10773_s6 + $0x30] sm:$0xff] }
 0x4a4   :  { %v1238_v14 = vadd.f32 %v1232_v53, %v1228_v28  ;;  %v6386_v28 = vmov 84  }
 0x4a5   :  { %v1189_v27 = vpop.permute.xlu1 %1188  ;;  %v1185_v12 = vadd.f32 %v1183_v36, %v1163_v41  ;;  %v6383_v41 = vmov 81  }
 0x4a6   :  { %v1193_v35 = vsel %vm729_vm11, %v1189_v27, 0.0  ;;  %v1240_v39 = vmax.f32 %v1238_v14, 0.0  ;;  %5956 = vset.pattern.permute.xlu1 %v6383_v41  ;;  %5957 = vset.pattern.permute.xlu2 %v6383_v41 }
 0x4a7   :  { %v1195_v46 = vmul.f32 %v6868_v51, %v1193_v35  ;;  %v1281_v35 = vld [vmem:[%s10773_s6 + $0x58] sm:$0xff]  ;;  %s6389_s6 = smov 3  }
 0x4a8   :  { %v1245_v50 = vpop.permute.xlu0 %1244  ;;  %1314 = vmatpush.msrb.mxu3 %v1281_v35 }
 0x4a9   :  { %v1205_v0 = vmul.f32 %v7128_v21, %v1195_v46 }
 0x4aa   :  { %1315 = vmatpush.msrb.mxu3 %v1280_v13 }
 0x4ab   :  { %v1207_v56 = vadd.f32 %v1205_v0, %v1185_v12  ;;  %v6388_v12 = vmov 87  }
 0x4ac   :  { %1316 = vmatpush.msrb.mxu3 %v1279_v43 }
 0x4ad   :  { %v1224_v25 = vpop.permute.xlu1 %1223 }
 0x4ae   :  { %v1227_v18 = vmul.f32 %v1224_v25, %v1217_v32  ;;  %1317 = vmatpush.msrb.mxu3 %v1278_v37  ;;  %v6384_v25 = vmov 83   ;;  %v6385_v32 = vmov 85  }
 0x4b0   :  { %v1229_v3 = vadd.f32 %v1227_v18, %v1207_v56  ;;  %1318 = vmatpush.msrb.mxu3 %v1277_v59  ;;  %v6387_v18 = vmov 86  }
 0x4b2   :  { %1319 = vmatpush.msrb.mxu3 %v1276_v49 }
 0x4b4   :  { %1320 = vmatpush.msrb.mxu3 %v1275_v48 }
 0x4b6   :  { %v1236_v1 = vpop.permute.xlu1 %1235  ;;  %1321 = vmatpush.msrb.mxu3 %v1274_v29 }
 0x4b7   :  { %v1239_v30 = vadd.f32 %v1236_v1, %v1229_v3  ;;  %v6394_v1 = vmov 89  }
 0x4b8   :  { %1322 = vmatpush.msrb.mxu3 %v1273_v45 }
 0x4b9   :  { %v1241_v57 = vmax.f32 %v1239_v30, 0.0  ;;  %v6395_v30 = vmov 88  }
 0x4ba   :  { %1323 = vmatpush.msrb.mxu3 %v1272_v52 }
 0x4bb   :  { %v1242_v9 = vpack.c.bf16 %v1241_v57, %v1240_v39  ;;  %v10962_v57 = vmov 9  }
 0x4bc   :  { %1324 = vmatpush.msrb.mxu3 %v1271_v54 }
 0x4bd   :  { %1263 = vmatpush.bf16.msrb.mxu2 %v1242_v9  ;;  %v72_v9 = vld [vmem:[%s10770_s3 + $0x8] sm:$0xff] }
 0x4be   :  { %v1249_v21 = vpop.permute.xlu1 %1248  ;;  %1325 = vmatpush.msrb.mxu3 %v1270_v38 }
 0x4c0   :  { %5691 = vmatmul.msk.bf16.vlgmr.msrb.gmra.mxu2 %vm795_vm13, %v1252_v6  ;;  %v74_v6 = vld [vmem:[%s10770_s3 + $0x18] sm:$0xff] }
 0x543   :  { %v1265_v15 = vpop.f32.mrf.mxu2 }
 0x544   :  { %v7163_v34 = vadd.f32 %v1265_v15, %v1245_v50  ;;  %v7292_v50 = vpack.c.bf16 %v74_v6, %v72_v9 }
 0x546   :  { %1288 = vrot.lane.b32.xlu2 %v7163_v34, %s6345_s27  ;;  %10963 = vst [vmem:[#allocation26_spill] sm:$0xff] %v7292_v50 }
 0x54b   :  { %v1267_v20 = vpop.f32.mrf.mxu2 }
 0x54c   :  { %v7167_v26 = vadd.f32 %v1267_v20, %v1249_v21 }
 0x54e   :  { %1290 = vrot.lane.b32.xlu1 %v7167_v26, %s6345_s27 }
 0x556   :  { %1347 = vperm.xlu1 %5956, %v7102_v55  }
 0x55e   :  { %5959 = vset.pattern.permute.xlu1 %v6382_v4 }
 0x55f   :  { %1372 = vperm.xlu1 %5959, %v7236_v24  }
 0x567   :  { %5962 = vset.pattern.permute.xlu1 %v6386_v28 }
 0x568   :  { %1413 = vperm.xlu1 %5962, %v7102_v55  }
 0x570   :  { %5965 = vset.pattern.permute.xlu1 %v6385_v32 }
 0x571   :  { %1429 = vperm.xlu1 %5965, %v7236_v24  }
 0x579   :  { %5968 = vset.pattern.permute.xlu1 %v6388_v12 }
 0x57a   :  { %1471 = vperm.xlu1 %5968, %v7102_v55  }
 0x582   :  { %5972 = vset.pattern.permute.xlu1 %v6394_v1 }
 0x5a0   :  { %v1289_v60 = vpop.permute.xlu2 %1288 }
 0x5a1   :  { %v7172_v27 = vsel %vm406_vm0, %v1289_v60, 0.0  ;;  %v7310_v60 = vld [vmem:[%s10769_s2] sm:$0xff] }
 0x5a2   :  { %10960 = vst [vmem:[#allocation24_spill] sm:$0xff] %v7172_v27  ;;  %v1296_v63 = vmax.f32 %v7163_v34, %v7172_v27 }
 0x5a4   :  { %1300 = vrot.lane.b32.xlu2 %v1296_v63, %s6359_s26 }
 0x5ac   :  { %1351 = vperm.xlu2 %5957, %v7236_v24  }
 0x5b4   :  { %5960 = vset.pattern.permute.xlu2 %v6384_v25 }
 0x5b5   :  { %1391 = vperm.xlu2 %5960, %v7102_v55  }
 0x5bd   :  { %5963 = vset.pattern.permute.xlu2 %v6386_v28  ;;  %v10965_v28 = vmov 0.0  }
 0x5be   :  { %1417 = vperm.xlu2 %5963, %v7236_v24  }
 0x5c0   :  { %v1291_v17 = vpop.permute.xlu1 %1290 }
 0x5c1   :  { %v7220_v8 = vsel %vm406_vm0, %v1291_v17, 0.0 }
 0x5c2   :  { %10961 = vst [vmem:[#allocation25_spill] sm:$0xff] %v7220_v8  ;;  %v1297_v46 = vmax.f32 %v7167_v26, %v7220_v8 }
 0x5c4   :  { %1302 = vrot.lane.b32.xlu0 %v1297_v46, %s6359_s26 }
 0x5c6   :  { %5966 = vset.pattern.permute.xlu2 %v6387_v18 }
 0x5c7   :  { %1448 = vperm.xlu2 %5966, %v7102_v55  }
 0x5c8   :  { %v1348_v20 = vpop.permute.xlu1 %1347 }
 0x5cc   :  { %1368 = vperm.xlu0 %5958, %v7102_v55  }
 0x5cf   :  { %5969 = vset.pattern.permute.xlu2 %v6388_v12 }
 0x5d0   :  { %1475 = vperm.xlu2 %5969, %v7236_v24  }
 0x5d1   :  { %v1373_v47 = vpop.permute.xlu1 %1372 }
 0x5d4   :  { %5961 = vset.pattern.permute.xlu0 %v6384_v25  ;;  %v7353_v25 = vand.u32 15, %v6818_v16 }
 0x5d5   :  { %1395 = vperm.xlu0 %5961, %v7236_v24  }
 0x5d6   :  { %10964 = vst [vmem:[#allocation27_spill] sm:$0xff] %v7353_v25  ;;  %vm300_vm14 = vcmp.ge.s32.totalorder %v7353_v25, 4 }
 0x5d8   :  { %5970 = vset.pattern.permute.xlu2 %v6395_v30 }
 0x5da   :  { %v7336_v13 = vpop.permute.xlu1 %1413 }
 0x5dd   :  { %5964 = vset.pattern.permute.xlu0 %v6385_v32  ;;  %v286_v32 = vand.u32 3, %v6818_v16 }
 0x5de   :  { %1425 = vperm.xlu0 %5964, %v7102_v55  }
 0x5df   :  { %vm294_vm15 = vcmp.ge.s32.totalorder %v286_v32, 1  ;;  %vm297_vm6 = vcmp.lt.s32.totalorder %v286_v32, 3 }
 0x5e0   :  { %v7363_v12 = vsel %vm294_vm15, 1.0, %v10965_v28  ;;  %vm1442_vm15 = vcmask 252928  }
 0x5e3   :  { %v7340_v37 = vpop.permute.xlu1 %1429 }
 0x5e6   :  { %5967 = vset.pattern.permute.xlu0 %v6387_v18  ;;  %v7360_v18 = vsel %vm300_vm14, 1.0, %v10965_v28  ;;  %vm303_vm14 = vcmp.lt.s32.totalorder %v7353_v25, 12 }
 0x5e7   :  { %1452 = vperm.xlu0 %5967, %v7236_v24  }
 0x5ec   :  { %v7342_v49 = vpop.permute.xlu1 %1471 }
 0x5ef   :  { %5971 = vset.pattern.permute.xlu0 %v6395_v30  ;;  %v7373_v30 = vsel %vm297_vm6, 1.0, %v10965_v28  ;;  %vm1465_vm6 = vcmask 236544  }
 0x5fe   :  { %v1301_v19 = vpop.permute.xlu2 %1300 }
 0x5ff   :  { %v1306_v36 = vsel %vm729_vm11, %v1301_v19, 0.0 }
 0x600   :  { %v1308_v0 = vmax.f32 %v1296_v63, %v1306_v36  ;;  %v7317_v63 = vld [vmem:[%s10769_s2 + $0x8] sm:$0xff] }
 0x602   :  { %1326 = vmatmul.f32.vlgmr.msrb.gmra.mxu3 %v1308_v0 }
 0x606   :  { %v7300_v15 = vpop.permute.xlu2 %1351 }
 0x60f   :  { %v7305_v21 = vpop.permute.xlu2 %1391 }
 0x618   :  { %v7320_v5 = vpop.permute.xlu2 %1417 }
 0x621   :  { %v7334_v35 = vpop.permute.xlu2 %1448 }
 0x62a   :  { %v7338_v43 = vpop.permute.xlu2 %1475 }
 0x636   :  { %v1303_v53 = vpop.permute.xlu0 %1302 }
 0x637   :  { %v1307_v56 = vsel %vm729_vm11, %v1303_v53, 0.0  ;;  %v7367_v53 = vmul.f32 %v7360_v18, %v7363_v12 }
 0x638   :  { %v1309_v14 = vmax.f32 %v1297_v46, %v1307_v56 }
 0x63a   :  { %1329 = vmatmul.f32.gmra.mxu3 %v1309_v14 }
 0x63e   :  { %v1369_v59 = vpop.permute.xlu0 %1368 }
 0x647   :  { %v1396_v29 = vpop.permute.xlu0 %1395 }
 0x650   :  { %v7344_v17 = vpop.permute.xlu0 %1425 }
 0x659   :  { %v7348_v38 = vpop.permute.xlu0 %1452 }
 0x685   :  { %v7252_v3 = vpop.f32.mrf.mxu3 }
 0x686   :  { %1379 = vrot.lane.b32.xlu2 %v7252_v3, %s6389_s6  ;;  %1356 = vrot.lane.b32.xlu0 %v7252_v3, %s6390_s5 }
 0x687   :  { %1335 = vrot.lane.b32.xlu1 %v7252_v3, %s6391_s29 }
 0x68e   :  { %1402 = vrot.lane.b32.xlu2 %v7252_v3, %s6358_s25 }
 0x68f   :  { %1436 = vrot.lane.b32.xlu1 %v7252_v3, %s6345_s27 }
 0x696   :  { %1459 = vrot.lane.b32.xlu2 %v7252_v3, %s6392_s10 }
 0x697   :  { %1482 = vrot.lane.b32.xlu1 %v7252_v3, %s6393_s11 }
 0x6bd   :  { %v7268_v39 = vpop.f32.mrf.mxu3 }
 0x6be   :  { %1381 = vrot.lane.b32.xlu0 %v7268_v39, %s6389_s6  ;;  %1358 = vrot.lane.b32.xlu1 %v7268_v39, %s6390_s5 }
 0x6bf   :  { %1337 = vrot.lane.b32.xlu2 %v7268_v39, %s6391_s29 }
 0x6c6   :  { %1505 = vrot.lane.b32.xlu0 %v7252_v3, %s6396_s12  ;;  %1517 = vperm.xlu1 %5972, %v7102_v55  }
 0x6c7   :  { %1494 = vperm.xlu2 %5970, %v7102_v55  }
 0x6ce   :  { %1498 = vperm.xlu0 %5971, %v7236_v24   ;;  %1404 = vrot.lane.b32.xlu1 %v7268_v39, %s6358_s25 }
 0x6cf   :  { %1438 = vrot.lane.b32.xlu2 %v7268_v39, %s6345_s27  ;;  %5974 = vset.pattern.permute.xlu1 %v10962_v57 }
 0x6d0   :  { %5973 = vset.pattern.permute.xlu2 %v6394_v1 }
 0x6d6   :  { %1461 = vrot.lane.b32.xlu1 %v7268_v39, %s6392_s10  ;;  %1551 = vrot.lane.b32.xlu0 %v7292_v50, %s6346_s17 }
 0x6d7   :  { %1484 = vrot.lane.b32.xlu2 %v7268_v39, %s6393_s11 }
 0x6de   :  { %1507 = vrot.lane.b32.xlu1 %v7268_v39, %s6396_s12 }
 0x6df   :  { %1521 = vperm.xlu2 %5973, %v7236_v24  }
 0x6e0   :  { %v1380_v48 = vpop.permute.xlu2 %1379 }
 0x6e6   :  { %1529 = vperm.xlu1 %5974, %v7310_v60  }
 0x6e7   :  { %5975 = vset.pattern.permute.xlu2 %v10962_v57 }
 0x6e8   :  { %1533 = vperm.xlu2 %5975, %v7317_v63   ;;  %v1403_v52 = vpop.permute.xlu2 %1402 }
 0x6ee   :  { %1543 = vperm.xlu1 %5974, %v7325_v7  }
 0x6f0   :  { %1547 = vperm.xlu2 %5975, %v7331_v62   ;;  %v7346_v54 = vpop.permute.xlu2 %1459 }
 0x6f8   :  { %v1357_v19 = vpop.permute.xlu0 %1356 }
 0x6f9   :  { %v1336_v45 = vpop.permute.xlu1 %1335  ;;  %v1363_v14 = vsel %vm1362_vm3, 0.0, %v1357_v19  ;;  %v1386_v19 = vsel %vm1385_vm9, 0.0, %v1380_v48 }
 0x6fa   :  { %v1342_v56 = vsel %vm1341_vm2, 0.0, %v1336_v45  ;;  %v1365_v9 = vmul.f32 %v7360_v18, %v1363_v14  ;;  %v7383_v45 = vmul.f32 %v7360_v18, %v7373_v30 }
 0x6fb   :  { %v1344_v57 = vmul.f32 %v1342_v56, %v7367_v53 }
 0x6fc   :  { %v1375_v16 = vmul.f32 %v1369_v59, %v1365_v9  ;;  %v6397_v9 = vmov 90  }
 0x6fd   :  { %v1354_v10 = vmul.f32 %v1348_v20, %v1344_v57  ;;  %5976 = vset.pattern.permute.xlu0 %v6397_v9  ;;  %5977 = vset.pattern.permute.xlu1 %v6397_v9 }
 0x6fe   :  { %1583 = vperm.xlu0 %5976, %v7102_v55   ;;  %1587 = vperm.xlu1 %5977, %v7236_v24  }
 0x6ff   :  { %v1377_v58 = vadd.f32 %v1375_v16, %v1354_v10 }
 0x701   :  { %v1437_v46 = vpop.permute.xlu1 %1436 }
 0x702   :  { %v1443_v10 = vsel %vm1442_vm15, %v1437_v46, 0.0 }
 0x709   :  { %v7350_v41 = vpop.permute.xlu1 %1482 }
 0x719   :  { %v1338_v4 = vpop.permute.xlu2 %1337 }
 0x71a   :  { %v1343_v6 = vsel %vm1341_vm2, 0.0, %v1338_v4  ;;  %v1388_v4 = vmul.f32 %v1386_v19, %v7383_v45  ;;  %v1433_v19 = vmul.f32 %v7340_v37, %v7268_v39 }
 0x71c   :  { %v1398_v20 = vmul.f32 %v7305_v21, %v1388_v4 }
 0x721   :  { %v7357_v0 = vpop.permute.xlu2 %1494 }
 0x729   :  { %v1439_v56 = vpop.permute.xlu2 %1438 }
 0x730   :  { %v1359_v36 = vpop.permute.xlu1 %1358  ;;  %v1382_v40 = vpop.permute.xlu0 %1381 }
 0x731   :  { %v1364_v1 = vsel %vm1362_vm3, 0.0, %v1359_v36  ;;  %v1345_v36 = vmul.f32 %v1343_v6, %v7367_v53  ;;  %v1387_v14 = vsel %vm1385_vm9, 0.0, %v1382_v40 }
 0x732   :  { %v1366_v32 = vmul.f32 %v7360_v18, %v1364_v1  ;;  %v1408_v1 = vsel %vm649_vm8, 0.0, %v1403_v52  ;;  %v1389_v44 = vmul.f32 %v1387_v14, %v7383_v45  ;;  %v1400_v52 = vadd.f32 %v1398_v20, %v1377_v58 }
 0x733   :  { %v1355_v27 = vmul.f32 %v7300_v15, %v1345_v36  ;;  %v1410_v59 = vmul.f32 %v7363_v12, %v1408_v1  ;;  %v6398_v15 = vmov 91   ;;  %v1444_v58 = vsel %vm1442_vm15, %v1439_v56, 0.0 }
 0x734   :  { %v1376_v8 = vmul.f32 %v1373_v47, %v1366_v32  ;;  %v1399_v47 = vmul.f32 %v1396_v29, %v1389_v44  ;;  %5978 = vset.pattern.permute.xlu2 %v6398_v15  ;;  %v1485_v44 = vpop.permute.xlu2 %1484  ;;  %v1446_v32 = vmul.f32 %v7373_v30, %v1444_v58  ;;  %5979 = vset.pattern.permute.xlu1 %v6398_v15 }
 0x735   :  { %1603 = vperm.xlu2 %5978, %v7102_v55   ;;  %1607 = vperm.xlu1 %5979, %v7236_v24  }
 0x736   :  { %v1378_v48 = vadd.f32 %v1376_v8, %v1355_v27  ;;  %v1420_v8 = vmul.f32 %v7336_v13, %v1410_v59  ;;  %v1445_v13 = vmul.f32 %v7373_v30, %v1443_v10  ;;  %v1456_v37 = vmul.f32 %v7348_v38, %v1446_v32 }
 0x738   :  { %v7379_v11 = vpop.permute.xlu1 %1517  ;;  %v1401_v16 = vadd.f32 %v1399_v47, %v1378_v48  ;;  %v1506_v21 = vpop.permute.xlu0 %1505  ;;  %v1422_v46 = vadd.f32 %v1420_v8, %v1400_v52  ;;  %v1455_v1 = vmul.f32 %v7334_v35, %v1445_v13 }
 0x739   :  { %v1512_v20 = vsel %vm1511_vm1, %v1506_v21, 0.0 }
 0x740   :  { %v1405_v51 = vpop.permute.xlu1 %1404  ;;  %v1499_v9 = vpop.permute.xlu0 %1498 }
 0x741   :  { %v1409_v40 = vsel %vm649_vm8, 0.0, %v1405_v51  ;;  %v7405_v51 = vsel %vm303_vm14, 1.0, %v10965_v28  ;;  %vm1488_vm14 = vcmask 228352  }
 0x742   :  { %v1411_v57 = vmul.f32 %v7363_v12, %v1409_v40  ;;  %v7414_v6 = vmul.f32 %v7405_v51, %v7363_v12  ;;  %v7426_v48 = vmul.f32 %v7405_v51, %v7373_v30  ;;  %v1489_v39 = vsel %vm1488_vm14, %v7350_v41, 0.0 }
 0x743   :  { %v6400_v40 = vmov 92   ;;  %v1490_v35 = vsel %vm1488_vm14, %v1485_v44, 0.0  ;;  %v1491_v52 = vmul.f32 %v7405_v51, %v1489_v39 }
 0x744   :  { %v1421_v27 = vmul.f32 %v7320_v5, %v1411_v57  ;;  %v1432_v5 = vmul.f32 %v7344_v17, %v7252_v3  ;;  %v1466_v3 = vsel %vm1465_vm6, %v7346_v54, 0.0  ;;  %v6399_v54 = vmov 93   ;;  %5981 = vset.pattern.permute.xlu2 %v6400_v40  ;;  %v1522_v57 = vpop.permute.xlu2 %1521  ;;  %5980 = vset.pattern.permute.xlu1 %v6400_v40 }
 0x745   :  { %5982 = vset.pattern.permute.xlu0 %v6399_v54  ;;  %v1468_v47 = vmul.f32 %v1466_v3, %v7414_v6  ;;  %1629 = vperm.xlu2 %5981, %v7236_v24   ;;  %v1492_v10 = vmul.f32 %v7405_v51, %v1490_v35  ;;  %v1501_v58 = vmul.f32 %v7357_v0, %v1491_v52 }
 0x746   :  { %v1423_v29 = vadd.f32 %v1421_v27, %v1401_v16  ;;  %v1434_v4 = vadd.f32 %v1432_v5, %v1422_v46  ;;  %1647 = vperm.xlu0 %5982, %v7102_v55   ;;  %1625 = vperm.xlu1 %5980, %v7102_v55  }
 0x747   :  { %v1478_v8 = vmul.f32 %v7342_v49, %v1468_v47  ;;  %v1502_v21 = vmul.f32 %v1499_v9, %v1492_v10 }
 0x748   :  { %v1462_v36 = vpop.permute.xlu1 %1461  ;;  %v1435_v17 = vadd.f32 %v1433_v19, %v1423_v29  ;;  %v1457_v38 = vadd.f32 %v1455_v1, %v1434_v4  ;;  %v6401_v19 = vmov 94   ;;  %v6402_v1 = vmov 95   ;;  %v1552_v39 = vpop.permute.xlu0 %1551 }
 0x749   :  { %v1467_v56 = vsel %vm1465_vm6, %v1462_v36, 0.0 }
 0x74a   :  { %v1469_v14 = vmul.f32 %v1467_v56, %v7414_v6  ;;  %v1458_v41 = vadd.f32 %v1456_v37, %v1435_v17  ;;  %v1480_v29 = vadd.f32 %v1478_v8, %v1457_v38  ;;  %v6403_v37 = vmov 96  }
 0x74b   :  { %v10966_v38 = vmov 10  }
 0x74c   :  { %v1479_v59 = vmul.f32 %v7338_v43, %v1469_v14  ;;  %v1514_v43 = vmul.f32 %v1512_v20, %v7426_v48  ;;  %v1503_v32 = vadd.f32 %v1501_v58, %v1480_v29  ;;  %v1534_v49 = vpop.permute.xlu2 %1533  ;;  %v6404_v20 = vmov 97  }
 0x74d   :  { %5984 = vset.pattern.permute.xlu2 %v6401_v19 }
 0x74e   :  { %v1481_v16 = vadd.f32 %v1479_v59, %v1458_v41  ;;  %v1524_v5 = vmul.f32 %v7379_v11, %v1514_v43  ;;  %5985 = vset.pattern.permute.xlu0 %v6401_v19  ;;  %1659 = vperm.xlu2 %5984, %v7102_v55   ;;  %v6405_v41 = vmov 98  }
 0x74f   :  { %1663 = vperm.xlu0 %5985, %v7236_v24   ;;  %5983 = vset.pattern.permute.xlu1 %v6399_v54 }
 0x750   :  { %v1508_v27 = vpop.permute.xlu1 %1507  ;;  %v1504_v13 = vadd.f32 %v1502_v21, %v1481_v16  ;;  %v1526_v0 = vadd.f32 %v1524_v5, %v1503_v32  ;;  %1651 = vperm.xlu1 %5983, %v7236_v24  }
 0x751   :  { %v1513_v44 = vsel %vm1511_vm1, %v1508_v27, 0.0 }
 0x752   :  { %v1515_v15 = vmul.f32 %v1513_v44, %v7426_v48 }
 0x754   :  { %v1525_v46 = vmul.f32 %v1522_v57, %v1515_v15  ;;  %v1548_v35 = vpop.permute.xlu2 %1547 }
 0x756   :  { %v1527_v36 = vadd.f32 %v1525_v46, %v1504_v13  ;;  %5987 = vset.pattern.permute.xlu2 %v6402_v1 }
 0x757   :  { %1685 = vperm.xlu2 %5987, %v7236_v24   ;;  %5989 = vset.pattern.permute.xlu0 %v6403_v37 }
 0x758   :  { %v1537_v56 = vadd.f32 %v1534_v49, %v1527_v36  ;;  %v1530_v3 = vpop.permute.xlu1 %1529  ;;  %5986 = vset.pattern.permute.xlu1 %v6402_v1 }
 0x759   :  { %v1536_v17 = vadd.f32 %v1530_v3, %v1526_v0  ;;  %1681 = vperm.xlu1 %5986, %v7102_v55  }
 0x75a   :  { %v1539_v11 = vmax.f32 %v1537_v56, 0.0 }
 0x75b   :  { %v1538_v14 = vmax.f32 %v1536_v17, 0.0 }
 0x75d   :  { %v1541_v4 = vpack.c.bf16 %v1539_v11, %v1538_v14 }
 0x75f   :  { %1563 = vmatpush.bf16.msra.mxu0 %v1541_v4  ;;  %5988 = vset.pattern.permute.xlu2 %v6403_v37 }
 0x760   :  { %1703 = vperm.xlu2 %5988, %v7102_v55   ;;  %v1544_v59 = vpop.permute.xlu1 %1543 }
 0x761   :  { %5990 = vset.pattern.permute.xlu1 %v6404_v20 }
 0x762   :  { %5692 = vmatmul.msk.bf16.vlgmr.msra.gmra.mxu0 %vm795_vm13, %v1552_v39 }
 0x768   :  { %5991 = vset.pattern.permute.xlu2 %v6404_v20 }
 0x770   :  { %v1584_v8 = vpop.permute.xlu0 %1583 }
 0x78f   :  { %v1604_v52 = vpop.permute.xlu2 %1603 }
 0x79f   :  { %v7503_v43 = vpop.permute.xlu2 %1629 }
 0x7a8   :  { %v1660_v10 = vpop.permute.xlu2 %1659 }
 0x7b1   :  { %v7506_v27 = vpop.permute.xlu2 %1685 }
 0x7b8   :  { %v1648_v21 = vpop.permute.xlu0 %1647 }
 0x7ba   :  { %v7508_v44 = vpop.permute.xlu2 %1703 }
 0x7c1   :  { %v7512_v5 = vpop.permute.xlu0 %1663 }
 0x7df   :  { %v1565_v40 = vpop.f32.mrf.mxu0 }
 0x7e0   :  { %v7454_v47 = vadd.f32 %v1565_v40, %v1544_v59 }
 0x7e2   :  { %1614 = vrot.lane.b32.xlu1 %v7454_v47, %s6389_s6  ;;  %1592 = vrot.lane.b32.xlu2 %v7454_v47, %s6390_s5 }
 0x7e3   :  { %1572 = vrot.lane.b32.xlu0 %v7454_v47, %s6391_s29 }
 0x7e7   :  { %v1567_v54 = vpop.f32.mrf.mxu0 }
 0x7e8   :  { %v7468_v57 = vadd.f32 %v1567_v54, %v1548_v35 }
 0x7ea   :  { %1692 = vrot.lane.b32.xlu1 %v7454_v47, %s6392_s10  ;;  %1636 = vrot.lane.b32.xlu2 %v7454_v47, %s6358_s25 }
 0x7eb   :  { %1714 = vrot.lane.b32.xlu0 %v7454_v47, %s6393_s11 }
 0x7f2   :  { %1574 = vrot.lane.b32.xlu1 %v7468_v57, %s6391_s29  ;;  %1670 = vrot.lane.b32.xlu2 %v7454_v47, %s6345_s27 }
 0x7f3   :  { %1594 = vrot.lane.b32.xlu0 %v7468_v57, %s6390_s5 }
 0x7fa   :  { %1736 = vrot.lane.b32.xlu1 %v7454_v47, %s6396_s12  ;;  %1616 = vrot.lane.b32.xlu2 %v7468_v57, %s6389_s6 }
 0x7fb   :  { %1638 = vrot.lane.b32.xlu0 %v7468_v57, %s6358_s25 }
 0x802   :  { %1725 = vperm.xlu1 %5990, %v7102_v55   ;;  %1729 = vperm.xlu2 %5991, %v7236_v24  }
 0x803   :  { %1707 = vperm.xlu0 %5989, %v7236_v24  }
 0x80a   :  { %1672 = vrot.lane.b32.xlu1 %v7468_v57, %s6345_s27  ;;  %1694 = vrot.lane.b32.xlu2 %v7468_v57, %s6392_s10 }
 0x80b   :  { %5992 = vset.pattern.permute.xlu0 %v6405_v41  ;;  %5993 = vset.pattern.permute.xlu1 %v6405_v41 }
 0x80c   :  { %1747 = vperm.xlu0 %5992, %v7102_v55   ;;  %5994 = vset.pattern.permute.xlu2 %v10966_v38  ;;  %v1588_v55 = vpop.permute.xlu1 %1587 }
 0x812   :  { %1716 = vrot.lane.b32.xlu1 %v7468_v57, %s6393_s11  ;;  %1738 = vrot.lane.b32.xlu2 %v7468_v57, %s6396_s12 }
 0x814   :  { %5996 = vset.pattern.permute.xlu0 %v10966_v38  ;;  %v1608_v9 = vpop.permute.xlu1 %1607 }
 0x815   :  { %1772 = vperm.xlu0 %5996, %v7325_v7  }
 0x81a   :  { %1751 = vperm.xlu1 %5993, %v7236_v24   ;;  %1759 = vperm.xlu2 %5994, %v7310_v60  }
 0x81c   :  { %v1626_v16 = vpop.permute.xlu1 %1625 }
 0x822   :  { %5995 = vset.pattern.permute.xlu1 %v10966_v38  ;;  %1779 = vrot.lane.b32.xlu2 %v7292_v50, %s6381_s30 }
 0x823   :  { %1763 = vperm.xlu1 %5995, %v7317_v63  }
 0x824   :  { %v1652_v58 = vpop.permute.xlu1 %1651 }
 0x82b   :  { %1776 = vperm.xlu1 %5995, %v7331_v62  }
 0x82c   :  { %v7510_v15 = vpop.permute.xlu1 %1681 }
 0x83c   :  { %v1593_v29 = vpop.permute.xlu2 %1592 }
 0x83d   :  { %v1598_v14 = vsel %vm1362_vm3, 0.0, %v1593_v29 }
 0x83e   :  { %v1600_v1 = vmul.f32 %v7360_v18, %v1598_v14 }
 0x840   :  { %v1610_v41 = vmul.f32 %v1604_v52, %v1600_v1 }
 0x844   :  { %v1637_v13 = vpop.permute.xlu2 %1636 }
 0x845   :  { %v1642_v29 = vsel %vm649_vm8, 0.0, %v1637_v13 }
 0x84c   :  { %v1671_v36 = vpop.permute.xlu2 %1670 }
 0x854   :  { %v1615_v46 = vpop.permute.xlu1 %1614  ;;  %v1617_v56 = vpop.permute.xlu2 %1616 }
 0x855   :  { %v1573_v32 = vpop.permute.xlu0 %1572  ;;  %v1620_v39 = vsel %vm1385_vm9, 0.0, %v1615_v46 }
 0x856   :  { %v1578_v11 = vsel %vm1341_vm2, 0.0, %v1573_v32  ;;  %v1622_v38 = vmul.f32 %v1620_v39, %v7383_v45  ;;  %v1676_v39 = vsel %vm1442_vm15, %v1671_v36, 0.0 }
 0x857   :  { %v1580_v4 = vmul.f32 %v1578_v11, %v7367_v53 }
 0x858   :  { %v1632_v14 = vmul.f32 %v1626_v16, %v1622_v38  ;;  %v6406_v16 = vmov 99  }
 0x859   :  { %v1590_v37 = vmul.f32 %v1584_v8, %v1580_v4  ;;  %v1644_v8 = vmul.f32 %v7363_v12, %v1642_v29  ;;  %v1621_v4 = vsel %vm1385_vm9, 0.0, %v1617_v56  ;;  %5997 = vset.pattern.permute.xlu0 %v6406_v16  ;;  %v6407_v56 = vmov 100   ;;  %5998 = vset.pattern.permute.xlu1 %v6406_v16 }
 0x85a   :  { %v1623_v13 = vmul.f32 %v1621_v4, %v7383_v45  ;;  %5999 = vset.pattern.permute.xlu2 %v6407_v56  ;;  %1815 = vperm.xlu1 %5998, %v7236_v24  }
 0x85b   :  { %v1612_v32 = vadd.f32 %v1610_v41, %v1590_v37  ;;  %v1654_v1 = vmul.f32 %v1648_v21, %v1644_v8 }
 0x85c   :  { %v1693_v19 = vpop.permute.xlu1 %1692  ;;  %v7519_v20 = vpop.permute.xlu2 %1729 }
 0x85d   :  { %v1715_v49 = vpop.permute.xlu0 %1714  ;;  %v1634_v28 = vadd.f32 %v1632_v14, %v1612_v32  ;;  %v1698_v21 = vsel %vm1465_vm6, %v1693_v19, 0.0 }
 0x85e   :  { %v1700_v14 = vmul.f32 %v1698_v21, %v7414_v6  ;;  %v1720_v4 = vsel %vm1488_vm14, %v1715_v49, 0.0 }
 0x85f   :  { %v1656_v41 = vadd.f32 %v1654_v1, %v1634_v28  ;;  %v1666_v28 = vmul.f32 %v1660_v10, %v7454_v47  ;;  %v1722_v19 = vmul.f32 %v7405_v51, %v1720_v4 }
 0x861   :  { %v1668_v32 = vadd.f32 %v1666_v28, %v1656_v41 }
 0x862   :  { %6000 = vset.pattern.permute.xlu1 %v6407_v56  ;;  %v6410_v56 = vmov 103  }
 0x863   :  { %1835 = vperm.xlu1 %6000, %v7236_v24  }
 0x864   :  { %v1575_v0 = vpop.permute.xlu1 %1574  ;;  %v1695_v37 = vpop.permute.xlu2 %1694 }
 0x865   :  { %v1595_v3 = vpop.permute.xlu0 %1594  ;;  %v1579_v40 = vsel %vm1341_vm2, 0.0, %v1575_v0  ;;  %v1699_v1 = vsel %vm1465_vm6, %v1695_v37, 0.0 }
 0x866   :  { %v1599_v54 = vsel %vm1362_vm3, 0.0, %v1595_v3  ;;  %v1581_v11 = vmul.f32 %v1579_v40, %v7367_v53 }
 0x867   :  { %v1601_v46 = vmul.f32 %v7360_v18, %v1599_v54 }
 0x868   :  { %v1591_v3 = vmul.f32 %v1588_v55, %v1581_v11 }
 0x869   :  { %v1611_v25 = vmul.f32 %v1608_v9, %v1601_v46  ;;  %v7540_v9 = vld [vmem:[%s10768_s1] sm:$0xff] }
 0x86a   :  { %1811 = vperm.xlu0 %5997, %v7540_v9   ;;  %1831 = vperm.xlu2 %5999, %v7540_v9  }
 0x86b   :  { %v1613_v29 = vadd.f32 %v1611_v25, %v1591_v3  ;;  %v1633_v25 = vmul.f32 %v7503_v43, %v1623_v13  ;;  %v6409_v13 = vmov 101  }
 0x86c   :  { %v1737_v17 = vpop.permute.xlu1 %1736  ;;  %6001 = vset.pattern.permute.xlu1 %v6409_v13 }
 0x86d   :  { %v1639_v35 = vpop.permute.xlu0 %1638  ;;  %v1635_v38 = vadd.f32 %v1633_v25, %v1613_v29  ;;  %v1742_v47 = vsel %vm1511_vm1, %v1737_v17, 0.0  ;;  %v6408_v17 = vmov 102   ;;  %1853 = vperm.xlu1 %6001, %v7540_v9  }
 0x86e   :  { %v1643_v0 = vsel %vm649_vm8, 0.0, %v1639_v35  ;;  %v1678_v35 = vmul.f32 %v7373_v30, %v1676_v39  ;;  %v1744_v49 = vmul.f32 %v1742_v47, %v7426_v48  ;;  %v6411_v47 = vmov 104  }
 0x86f   :  { %v1645_v40 = vmul.f32 %v7363_v12, %v1643_v0  ;;  %v1739_v0 = vpop.permute.xlu2 %1738 }
 0x870   :  { %v1688_v8 = vmul.f32 %v7510_v15, %v1678_v35  ;;  %v1710_v15 = vmul.f32 %v7508_v44, %v1700_v14  ;;  %v1701_v44 = vmul.f32 %v1699_v1, %v7414_v6 }
 0x871   :  { %v1655_v36 = vmul.f32 %v1652_v58, %v1645_v40  ;;  %v1667_v58 = vmul.f32 %v7512_v5, %v7468_v57 }
 0x872   :  { %v1690_v3 = vadd.f32 %v1688_v8, %v1668_v32  ;;  %6003 = vset.pattern.permute.xlu0 %v6408_v17  ;;  %6002 = vset.pattern.permute.xlu2 %v6409_v13 }
 0x873   :  { %v1657_v43 = vadd.f32 %v1655_v36, %v1635_v38  ;;  %1875 = vperm.xlu0 %6003, %v7540_v9   ;;  %1857 = vperm.xlu2 %6002, %v7236_v24  }
 0x874   :  { %v7521_v59 = vpop.permute.xlu1 %1725  ;;  %v1712_v37 = vadd.f32 %v1710_v15, %v1690_v3 }
 0x875   :  { %v1708_v54 = vpop.permute.xlu0 %1707  ;;  %v1732_v40 = vmul.f32 %v7521_v59, %v1722_v19  ;;  %v1669_v57 = vadd.f32 %v1667_v58, %v1657_v43  ;;  %6004 = vset.pattern.permute.xlu1 %v6408_v17  ;;  %v6413_v58 = vmov 106  }
 0x876   :  { %1879 = vperm.xlu1 %6004, %v7236_v24  }
 0x877   :  { %v1734_v35 = vadd.f32 %v1732_v40, %v1712_v37  ;;  %v1760_v38 = vpop.permute.xlu2 %1759 }
 0x87b   :  { %6006 = vset.pattern.permute.xlu0 %v6410_v56  ;;  %6005 = vset.pattern.permute.xlu2 %v6410_v56 }
 0x87c   :  { %v1673_v52 = vpop.permute.xlu1 %1672  ;;  %1891 = vperm.xlu0 %6006, %v7236_v24   ;;  %1887 = vperm.xlu2 %6005, %v7540_v9  }
 0x87d   :  { %v1677_v55 = vsel %vm1442_vm15, %v1673_v52, 0.0 }
 0x87e   :  { %v1679_v11 = vmul.f32 %v7373_v30, %v1677_v55  ;;  %v1748_v39 = vpop.permute.xlu0 %1747  ;;  %v1711_v55 = vmul.f32 %v1708_v54, %v1701_v44  ;;  %6007 = vset.pattern.permute.xlu1 %v6411_v47 }
 0x87f   :  { %v1754_v29 = vmul.f32 %v1748_v39, %v1744_v49  ;;  %v1780_v43 = vpop.permute.xlu2 %1779  ;;  %1909 = vperm.xlu1 %6007, %v7540_v9   ;;  %v6414_v49 = vmov 107   ;;  %v10967_v39 = vmov 11  }
 0x880   :  { %v1689_v52 = vmul.f32 %v7506_v27, %v1679_v11  ;;  %v1743_v27 = vsel %vm1511_vm1, %v1739_v0, 0.0 }
 0x881   :  { %v1745_v59 = vmul.f32 %v1743_v27, %v7426_v48  ;;  %v1756_v25 = vadd.f32 %v1754_v29, %v1734_v35 }
 0x882   :  { %v1691_v41 = vadd.f32 %v1689_v52, %v1669_v57 }
 0x883   :  { %v1766_v11 = vadd.f32 %v1760_v38, %v1756_v25 }
 0x884   :  { %v1717_v46 = vpop.permute.xlu1 %1716  ;;  %v1713_v36 = vadd.f32 %v1711_v55, %v1691_v41  ;;  %6008 = vset.pattern.permute.xlu2 %v6411_v47 }
 0x885   :  { %v1721_v10 = vsel %vm1488_vm14, %v1717_v46, 0.0  ;;  %1913 = vperm.xlu2 %6008, %v7236_v24  }
 0x886   :  { %v1723_v5 = vmul.f32 %v7405_v51, %v1721_v10  ;;  %v6412_v10 = vmov 105  }
 0x887   :  { %6010 = vset.pattern.permute.xlu0 %v6412_v10  ;;  %6011 = vset.pattern.permute.xlu1 %v6413_v58  ;;  %v1773_v19 = vpop.permute.xlu0 %1772 }
 0x888   :  { %v1733_v28 = vmul.f32 %v7519_v20, %v1723_v5  ;;  %v1768_v20 = vmax.f32 %v1766_v11, 0.0 }
 0x88a   :  { %v1735_v32 = vadd.f32 %v1733_v28, %v1713_v36 }
 0x88c   :  { %v1752_v16 = vpop.permute.xlu1 %1751 }
 0x88d   :  { %v1755_v21 = vmul.f32 %v1752_v16, %v1745_v59  ;;  %6009 = vset.pattern.permute.xlu2 %v6412_v10 }
 0x88e   :  { %1931 = vperm.xlu2 %6009, %v7540_v9  }
 0x88f   :  { %v1757_v46 = vadd.f32 %v1755_v21, %v1735_v32 }
 0x895   :  { %v1764_v8 = vpop.permute.xlu1 %1763 }
 0x896   :  { %v1767_v54 = vadd.f32 %v1764_v8, %v1757_v46  ;;  %6012 = vset.pattern.permute.xlu2 %v6413_v58 }
 0x898   :  { %v1769_v14 = vmax.f32 %v1767_v54, 0.0 }
 0x89a   :  { %v1770_v4 = vpack.c.bf16 %v1769_v14, %v1768_v20 }
 0x89c   :  { %1791 = vmatpush.bf16.msra.mxu1 %v1770_v4 }
 0x89d   :  { %v1777_v52 = vpop.permute.xlu1 %1776 }
 0x89f   :  { %5693 = vmatmul.msk.bf16.vlgmr.msra.gmra.mxu1 %vm795_vm13, %v1780_v43 }
 0x8c4   :  { %v1832_v17 = vpop.permute.xlu2 %1831 }
 0x8cc   :  { %v1816_v40 = vpop.permute.xlu1 %1815 }
 0x8cd   :  { %v1858_v13 = vpop.permute.xlu2 %1857 }
 0x91c   :  { %v1793_v0 = vpop.f32.mrf.mxu1 }
 0x91d   :  { %v7578_v3 = vadd.f32 %v1793_v0, %v1773_v19 }
 0x91f   :  { %1942 = vrot.lane.b32.xlu0 %v7578_v3, %s6393_s11  ;;  %1842 = vrot.lane.b32.xlu1 %v7578_v3, %s6389_s6 }
 0x920   :  { %1800 = vrot.lane.b32.xlu2 %v7578_v3, %s6391_s29 }
 0x924   :  { %v1795_v15 = vpop.f32.mrf.mxu1 }
 0x925   :  { %v7586_v1 = vadd.f32 %v1795_v15, %v1777_v52 }
 0x927   :  { %1822 = vrot.lane.b32.xlu0 %v7586_v1, %s6390_s5  ;;  %1920 = vrot.lane.b32.xlu1 %v7578_v3, %s6392_s10 }
 0x928   :  { %1820 = vrot.lane.b32.xlu2 %v7578_v3, %s6390_s5 }
 0x92f   :  { %1866 = vrot.lane.b32.xlu0 %v7586_v1, %s6358_s25  ;;  %1802 = vrot.lane.b32.xlu1 %v7586_v1, %s6391_s29 }
 0x930   :  { %1864 = vrot.lane.b32.xlu2 %v7578_v3, %s6358_s25 }
 0x937   :  { %1935 = vperm.xlu0 %6010, %v7236_v24   ;;  %1964 = vrot.lane.b32.xlu1 %v7578_v3, %s6396_s12 }
 0x938   :  { %1898 = vrot.lane.b32.xlu2 %v7578_v3, %s6345_s27 }
 0x93f   :  { %6013 = vset.pattern.permute.xlu0 %v6414_v49  ;;  %1953 = vperm.xlu1 %6011, %v7540_v9  }
 0x940   :  { %1844 = vrot.lane.b32.xlu2 %v7586_v1, %s6389_s6  ;;  %1975 = vperm.xlu0 %6013, %v7540_v9  }
 0x947   :  { %1900 = vrot.lane.b32.xlu1 %v7586_v1, %s6345_s27 }
 0x948   :  { %1957 = vperm.xlu2 %6012, %v7236_v24   ;;  %6014 = vset.pattern.permute.xlu1 %v6414_v49 }
 0x949   :  { %6017 = vset.pattern.permute.xlu0 %v10967_v39 }
 0x94a   :  { %2000 = vperm.xlu0 %6017, %v7325_v7   ;;  %v7625_v7 = vpop.permute.xlu2 %1887 }
 0x94f   :  { %1944 = vrot.lane.b32.xlu1 %v7586_v1, %s6393_s11 }
 0x950   :  { %1922 = vrot.lane.b32.xlu2 %v7586_v1, %s6392_s10 }
 0x951   :  { %6015 = vset.pattern.permute.xlu2 %v10967_v39 }
 0x952   :  { %v7630_v57 = vpop.permute.xlu2 %1913 }
 0x957   :  { %1979 = vperm.xlu1 %6014, %v7236_v24   ;;  %v1836_v24 = vpop.permute.xlu1 %1835 }
 0x958   :  { %1966 = vrot.lane.b32.xlu2 %v7586_v1, %s6396_s12 }
 0x95a   :  { %v7632_v27 = vpop.permute.xlu2 %1931 }
 0x95f   :  { %6016 = vset.pattern.permute.xlu1 %v10967_v39  ;;  %v1854_v5 = vpop.permute.xlu1 %1853 }
 0x960   :  { %1987 = vperm.xlu2 %6015, %v7310_v60   ;;  %1991 = vperm.xlu1 %6016, %v7317_v63   ;;  %v1812_v60 = vpop.permute.xlu0 %1811 }
 0x967   :  { %v7634_v44 = vpop.permute.xlu1 %1879 }
 0x968   :  { %2004 = vperm.xlu1 %6016, %v7331_v62   ;;  %2007 = vrot.lane.b32.xlu2 %v7292_v50, %s6415_s19  ;;  %v1876_v29 = vpop.permute.xlu0 %1875 }
 0x96f   :  { %v7636_v41 = vpop.permute.xlu1 %1909 }
 0x970   :  { %v7638_v59 = vpop.permute.xlu0 %1891 }
 0x97a   :  { %v1801_v37 = vpop.permute.xlu2 %1800 }
 0x97b   :  { %v1806_v56 = vsel %vm1341_vm2, 0.0, %v1801_v37 }
 0x97c   :  { %v1808_v20 = vmul.f32 %v1806_v56, %v7367_v53 }
 0x97e   :  { %v1818_v0 = vmul.f32 %v1812_v60, %v1808_v20  ;;  %v6417_v20 = vmov 109  }
 0x97f   :  { %6020 = vset.pattern.permute.xlu2 %v6417_v20 }
 0x980   :  { %2059 = vperm.xlu2 %6020, %v7540_v9  }
 0x982   :  { %v1821_v63 = vpop.permute.xlu2 %1820 }
 0x983   :  { %v1826_v32 = vsel %vm1362_vm3, 0.0, %v1821_v63 }
 0x984   :  { %v1828_v46 = vmul.f32 %v7360_v18, %v1826_v32 }
 0x986   :  { %v1838_v43 = vmul.f32 %v1832_v17, %v1828_v46 }
 0x988   :  { %v1840_v39 = vadd.f32 %v1838_v43, %v1818_v0 }
 0x98a   :  { %v1865_v62 = vpop.permute.xlu2 %1864 }
 0x98b   :  { %v1870_v58 = vsel %vm649_vm8, 0.0, %v1865_v62 }
 0x98c   :  { %v1872_v37 = vmul.f32 %v7363_v12, %v1870_v58 }
 0x98e   :  { %v1882_v62 = vmul.f32 %v1876_v29, %v1872_v37 }
 0x991   :  { %v1843_v16 = vpop.permute.xlu1 %1842  ;;  %v1943_v28 = vpop.permute.xlu0 %1942 }
 0x992   :  { %v1899_v55 = vpop.permute.xlu2 %1898  ;;  %v1848_v11 = vsel %vm1385_vm9, 0.0, %v1843_v16 }
 0x993   :  { %v1850_v14 = vmul.f32 %v1848_v11, %v7383_v45  ;;  %v1904_v60 = vsel %vm1442_vm15, %v1899_v55, 0.0  ;;  %v7671_v55 = vld [vmem:[%s10768_s1 + $0x10] sm:$0xff] }
 0x995   :  { %v1860_v52 = vmul.f32 %v1854_v5, %v1850_v14 }
 0x997   :  { %v1862_v16 = vadd.f32 %v1860_v52, %v1840_v39 }
 0x999   :  { %v1921_v35 = vpop.permute.xlu1 %1920  ;;  %v1823_v38 = vpop.permute.xlu0 %1822  ;;  %v1884_v11 = vadd.f32 %v1882_v62, %v1862_v16 }
 0x99a   :  { %v1845_v21 = vpop.permute.xlu2 %1844  ;;  %v1827_v47 = vsel %vm1362_vm3, 0.0, %v1823_v38 }
 0x99b   :  { %v1829_v15 = vmul.f32 %v7360_v18, %v1827_v47  ;;  %v1849_v49 = vsel %vm1385_vm9, 0.0, %v1845_v21 }
 0x99d   :  { %v1839_v38 = vmul.f32 %v1836_v24, %v1829_v15  ;;  %v1926_v24 = vsel %vm1465_vm6, %v1921_v35, 0.0  ;;  %v1895_v15 = vmul.f32 %v7638_v59, %v7586_v1 }
 0x99e   :  { %v1928_v43 = vmul.f32 %v1926_v24, %v7414_v6 }
 0x9a1   :  { %v1803_v25 = vpop.permute.xlu1 %1802  ;;  %v1867_v19 = vpop.permute.xlu0 %1866 }
 0x9a2   :  { %v1807_v8 = vsel %vm1341_vm2, 0.0, %v1803_v25  ;;  %v7647_v54 = vpop.permute.xlu2 %1957  ;;  %v1851_v25 = vmul.f32 %v1849_v49, %v7383_v45  ;;  %v1871_v32 = vsel %vm649_vm8, 0.0, %v1867_v19 }
 0x9a3   :  { %v1809_v10 = vmul.f32 %v1807_v8, %v7367_v53  ;;  %v1873_v21 = vmul.f32 %v7363_v12, %v1871_v32  ;;  %v6416_v8 = vmov 108  }
 0x9a4   :  { %v1861_v46 = vmul.f32 %v1858_v13, %v1851_v25  ;;  %6018 = vset.pattern.permute.xlu0 %v6416_v8  ;;  %v1894_v13 = vmul.f32 %v7625_v7, %v7578_v3  ;;  %6019 = vset.pattern.permute.xlu1 %v6416_v8  ;;  %v1948_v3 = vsel %vm1488_vm14, %v1943_v28, 0.0  ;;  %v6418_v25 = vmov 111  }
 0x9a5   :  { %v1819_v63 = vmul.f32 %v1816_v40, %v1809_v10  ;;  %v1906_v40 = vmul.f32 %v7373_v30, %v1904_v60  ;;  %2039 = vperm.xlu0 %6018, %v7540_v9   ;;  %2043 = vperm.xlu1 %6019, %v7671_v55   ;;  %v1883_v10 = vmul.f32 %v7634_v44, %v1873_v21 }
 0x9a6   :  { %v1896_v35 = vadd.f32 %v1894_v13, %v1884_v11  ;;  %v1938_v44 = vmul.f32 %v7632_v27, %v1928_v43 }
 0x9a7   :  { %v1841_v5 = vadd.f32 %v1839_v38, %v1819_v63  ;;  %v1916_v0 = vmul.f32 %v7636_v41, %v1906_v40  ;;  %v1950_v63 = vmul.f32 %v7405_v51, %v1948_v3  ;;  %v6419_v38 = vmov 110  }
 0x9a8   :  { %6023 = vset.pattern.permute.xlu2 %v6419_v38  ;;  %v6423_v3 = vmov 115  }
 0x9a9   :  { %v7640_v36 = vpop.permute.xlu1 %1964  ;;  %v1936_v14 = vpop.permute.xlu0 %1935  ;;  %v1863_v29 = vadd.f32 %v1861_v46, %v1841_v5  ;;  %v1918_v37 = vadd.f32 %v1916_v0, %v1896_v35  ;;  %2085 = vperm.xlu2 %6023, %v7671_v55   ;;  %v6422_v0 = vmov 114  }
 0x9aa   :  { %v1923_v56 = vpop.permute.xlu2 %1922  ;;  %v1970_v41 = vsel %vm1511_vm1, %v7640_v36, 0.0 }
 0x9ab   :  { %v1885_v7 = vadd.f32 %v1883_v10, %v1863_v29  ;;  %v1927_v52 = vsel %vm1465_vm6, %v1923_v56, 0.0  ;;  %v1972_v36 = vmul.f32 %v1970_v41, %v7426_v48  ;;  %v1940_v32 = vadd.f32 %v1938_v44, %v1918_v37 }
 0x9ac   :  { %v1929_v28 = vmul.f32 %v1927_v52, %v7414_v6  ;;  %v10968_v44 = vmov 12  }
 0x9ad   :  { %6024 = vset.pattern.permute.xlu0 %v6418_v25  ;;  %v1897_v59 = vadd.f32 %v1895_v15, %v1885_v7  ;;  %6021 = vset.pattern.permute.xlu1 %v6417_v20  ;;  %v6420_v20 = vmov 112  }
 0x9ae   :  { %2103 = vperm.xlu0 %6024, %v7540_v9   ;;  %2063 = vperm.xlu1 %6021, %v7671_v55   ;;  %v1939_v60 = vmul.f32 %v1936_v14, %v1929_v28 }
 0x9b1   :  { %v1954_v4 = vpop.permute.xlu1 %1953  ;;  %6026 = vset.pattern.permute.xlu2 %v6420_v20 }
 0x9b2   :  { %v1967_v49 = vpop.permute.xlu2 %1966  ;;  %v1960_v1 = vmul.f32 %v1954_v4, %v1950_v63  ;;  %2115 = vperm.xlu2 %6026, %v7540_v9   ;;  %v6424_v63 = vmov 116  }
 0x9b3   :  { %v1971_v27 = vsel %vm1511_vm1, %v1967_v49, 0.0 }
 0x9b4   :  { %v1962_v4 = vadd.f32 %v1960_v1, %v1940_v32  ;;  %v1973_v5 = vmul.f32 %v1971_v27, %v7426_v48  ;;  %v7766_v1 = vld [vmem:[%s10769_s2 + $0x8] sm:$0xff] }
 0x9b6   :  { %6027 = vset.pattern.permute.xlu0 %v6420_v20  ;;  %6022 = vset.pattern.permute.xlu1 %v6419_v38  ;;  %v7760_v38 = vld [vmem:[%s10769_s2] sm:$0xff] }
 0x9b7   :  { %2119 = vperm.xlu0 %6027, %v7671_v55   ;;  %2081 = vperm.xlu1 %6022, %v7540_v9  }
 0x9b9   :  { %v1901_v17 = vpop.permute.xlu1 %1900 }
 0x9ba   :  { %v1905_v47 = vsel %vm1442_vm15, %v1901_v17, 0.0  ;;  %v1988_v40 = vpop.permute.xlu2 %1987 }
 0x9bb   :  { %v1907_v58 = vmul.f32 %v7373_v30, %v1905_v47 }
 0x9bd   :  { %v1917_v16 = vmul.f32 %v7630_v57, %v1907_v58  ;;  %v1976_v57 = vpop.permute.xlu0 %1975  ;;  %v6421_v58 = vmov 113  }
 0x9be   :  { %v1982_v11 = vmul.f32 %v1976_v57, %v1972_v36  ;;  %6029 = vset.pattern.permute.xlu2 %v6421_v58 }
 0x9bf   :  { %v1919_v56 = vadd.f32 %v1917_v16, %v1897_v59  ;;  %2141 = vperm.xlu2 %6029, %v7671_v55   ;;  %6025 = vset.pattern.permute.xlu1 %v6418_v25  ;;  %v7743_v16 = vld [vmem:[%s10771_s4] sm:$0xff] }
 0x9c0   :  { %v1984_v24 = vadd.f32 %v1982_v11, %v1962_v4  ;;  %2107 = vperm.xlu1 %6025, %v7671_v55   ;;  %6031 = vset.pattern.permute.xlu0 %v6422_v0 }
 0x9c1   :  { %v1945_v19 = vpop.permute.xlu1 %1944  ;;  %v1941_v8 = vadd.f32 %v1939_v60, %v1919_v56 }
 0x9c2   :  { %v1949_v39 = vsel %vm1488_vm14, %v1945_v19, 0.0  ;;  %v1994_v13 = vadd.f32 %v1988_v40, %v1984_v24  ;;  %v2008_v19 = vpop.permute.xlu2 %2007 }
 0x9c3   :  { %v1951_v17 = vmul.f32 %v7405_v51, %v1949_v39 }
 0x9c5   :  { %v1961_v46 = vmul.f32 %v7647_v54, %v1951_v17  ;;  %v1996_v54 = vmax.f32 %v1994_v13, 0.0  ;;  %v2001_v7 = vpop.permute.xlu0 %2000  ;;  %v7774_v17 = vld [vmem:[%s10771_s4 + $0x8] sm:$0xff] }
 0x9c7   :  { %v1963_v47 = vadd.f32 %v1961_v46, %v1941_v8  ;;  %6030 = vset.pattern.permute.xlu2 %v6422_v0 }
 0x9c8   :  { %6028 = vset.pattern.permute.xlu1 %v6421_v58  ;;  %2159 = vperm.xlu2 %6030, %v7540_v9  }
 0x9c9   :  { %v1980_v62 = vpop.permute.xlu1 %1979  ;;  %2137 = vperm.xlu1 %6028, %v7540_v9  }
 0x9ca   :  { %v1983_v21 = vmul.f32 %v1980_v62, %v1973_v5 }
 0x9cc   :  { %v1985_v14 = vadd.f32 %v1983_v21, %v1963_v47 }
 0x9d0   :  { %6033 = vset.pattern.permute.xlu2 %v6423_v3 }
 0x9d1   :  { %6032 = vset.pattern.permute.xlu1 %v6423_v3 }
 0x9d2   :  { %v1992_v29 = vpop.permute.xlu1 %1991 }
 0x9d3   :  { %v1995_v35 = vadd.f32 %v1992_v29, %v1985_v14 }
 0x9d5   :  { %v1997_v43 = vmax.f32 %v1995_v35, 0.0 }
 0x9d7   :  { %v1998_v10 = vpack.c.bf16 %v1997_v43, %v1996_v54  ;;  %v6426_v54 = vmov 117  }
 0x9d9   :  { %2019 = vmatpush.bf16.msra.mxu2 %v1998_v10 }
 0x9da   :  { %v2005_v49 = vpop.permute.xlu1 %2004  ;;  %v2060_v41 = vpop.permute.xlu2 %2059 }
 0x9dc   :  { %5694 = vmatmul.msk.bf16.vlgmr.msra.gmra.mxu2 %vm795_vm13, %v2008_v19 }
 0xa03   :  { %v7752_v28 = vpop.permute.xlu2 %2085 }
 0xa0c   :  { %v7769_v59 = vpop.permute.xlu2 %2115 }
 0xa17   :  { %v2044_v25 = vpop.permute.xlu1 %2043  ;;  %v2040_v60 = vpop.permute.xlu0 %2039 }
 0xa19   :  { %v7779_v57 = vpop.permute.xlu2 %2141 }
 0xa20   :  { %v2064_v27 = vpop.permute.xlu1 %2063  ;;  %v2104_v11 = vpop.permute.xlu0 %2103 }
 0xa22   :  { %v7781_v32 = vpop.permute.xlu2 %2159 }
 0xa29   :  { %v2082_v36 = vpop.permute.xlu1 %2081  ;;  %v7787_v8 = vpop.permute.xlu0 %2119 }
 0xa32   :  { %v7783_v56 = vpop.permute.xlu1 %2107 }
 0xa3b   :  { %v7785_v4 = vpop.permute.xlu1 %2137 }
 0xa5f   :  { %v2021_v52 = vpop.f32.mrf.mxu2 }
 0xa60   :  { %v7705_v15 = vadd.f32 %v2021_v52, %v2001_v7 }
 0xa62   :  { %2170 = vrot.lane.b32.xlu0 %v7705_v15, %s6393_s11  ;;  %2070 = vrot.lane.b32.xlu1 %v7705_v15, %s6389_s6 }
 0xa63   :  { %2028 = vrot.lane.b32.xlu2 %v7705_v15, %s6391_s29 }
 0xa67   :  { %v2023_v39 = vpop.f32.mrf.mxu2 }
 0xa68   :  { %v7713_v37 = vadd.f32 %v2023_v39, %v2005_v49 }
 0xa6a   :  { %2050 = vrot.lane.b32.xlu0 %v7713_v37, %s6390_s5  ;;  %2148 = vrot.lane.b32.xlu1 %v7705_v15, %s6392_s10 }
 0xa6b   :  { %2048 = vrot.lane.b32.xlu2 %v7705_v15, %s6390_s5 }
 0xa72   :  { %2094 = vrot.lane.b32.xlu0 %v7713_v37, %s6358_s25  ;;  %2030 = vrot.lane.b32.xlu1 %v7713_v37, %s6391_s29 }
 0xa73   :  { %2092 = vrot.lane.b32.xlu2 %v7705_v15, %s6358_s25 }
 0xa7a   :  { %2163 = vperm.xlu0 %6031, %v7671_v55   ;;  %2192 = vrot.lane.b32.xlu1 %v7705_v15, %s6396_s12 }
 0xa7b   :  { %2126 = vrot.lane.b32.xlu2 %v7705_v15, %s6345_s27 }
 0xa82   :  { %6034 = vset.pattern.permute.xlu0 %v6424_v63  ;;  %2181 = vperm.xlu1 %6032, %v7540_v9  }
 0xa83   :  { %2072 = vrot.lane.b32.xlu2 %v7713_v37, %s6389_s6  ;;  %2203 = vperm.xlu0 %6034, %v7540_v9  }
 0xa8a   :  { %2128 = vrot.lane.b32.xlu1 %v7713_v37, %s6345_s27 }
 0xa8b   :  { %2185 = vperm.xlu2 %6033, %v7671_v55   ;;  %6035 = vset.pattern.permute.xlu1 %v6424_v63 }
 0xa8c   :  { %6038 = vset.pattern.permute.xlu0 %v10968_v44 }
 0xa8d   :  { %2228 = vperm.xlu0 %6038, %v7743_v16  }
 0xa92   :  { %2172 = vrot.lane.b32.xlu1 %v7713_v37, %s6393_s11 }
 0xa93   :  { %2150 = vrot.lane.b32.xlu2 %v7713_v37, %s6392_s10 }
 0xa94   :  { %6036 = vset.pattern.permute.xlu2 %v10968_v44 }
 0xa95   :  { %6040 = vset.pattern.permute.xlu0 %v6426_v54 }
 0xa96   :  { %2271 = vperm.xlu0 %6040, %v7671_v55  }
 0xa9a   :  { %2207 = vperm.xlu1 %6035, %v7671_v55  }
 0xa9b   :  { %2194 = vrot.lane.b32.xlu2 %v7713_v37, %s6396_s12 }
 0xa9e   :  { %6041 = vset.pattern.permute.xlu0 %v6427_v2 }
 0xa9f   :  { %2287 = vperm.xlu0 %6041, %v7540_v9  }
 0xaa2   :  { %6037 = vset.pattern.permute.xlu1 %v10968_v44 }
 0xaa3   :  { %2215 = vperm.xlu2 %6036, %v7760_v38   ;;  %2219 = vperm.xlu1 %6037, %v7766_v1  }
 0xaab   :  { %2232 = vperm.xlu1 %6037, %v7774_v17   ;;  %2235 = vrot.lane.b32.xlu2 %v7292_v50, %s6425_s13 }
 0xaac   :  { %6039 = vset.pattern.permute.xlu2 %v6426_v54 }
 0xab3   :  { %2267 = vperm.xlu2 %6039, %v7540_v9   ;;  %6042 = vset.pattern.permute.xlu1 %v6427_v2 }
 0xab4   :  { %2291 = vperm.xlu1 %6042, %v7671_v55  }
 0xabd   :  { %v2029_v62 = vpop.permute.xlu2 %2028 }
 0xabe   :  { %v2034_v43 = vsel %vm1341_vm2, 0.0, %v2029_v62 }
 0xabf   :  { %v2036_v19 = vmul.f32 %v2034_v43, %v7367_v53 }
 0xac1   :  { %v2046_v62 = vmul.f32 %v2040_v60, %v2036_v19 }
 0xac5   :  { %v2049_v5 = vpop.permute.xlu2 %2048 }
 0xac6   :  { %v2054_v35 = vsel %vm1362_vm3, 0.0, %v2049_v5 }
 0xac7   :  { %v2056_v58 = vmul.f32 %v7360_v18, %v2054_v35 }
 0xac9   :  { %v2066_v49 = vmul.f32 %v2060_v41, %v2056_v58 }
 0xacb   :  { %v2068_v54 = vadd.f32 %v2066_v49, %v2046_v62  ;;  %v6428_v49 = vmov 119  }
 0xacc   :  { %6043 = vset.pattern.permute.xlu2 %v6428_v49  ;;  %6044 = vset.pattern.permute.xlu0 %v6428_v49 }
 0xacd   :  { %v2093_v21 = vpop.permute.xlu2 %2092  ;;  %2309 = vperm.xlu2 %6043, %v7540_v9   ;;  %2313 = vperm.xlu0 %6044, %v7671_v55  }
 0xace   :  { %v2098_v63 = vsel %vm649_vm8, 0.0, %v2093_v21 }
 0xacf   :  { %v2100_v43 = vmul.f32 %v7363_v12, %v2098_v63 }
 0xad4   :  { %v2071_v46 = vpop.permute.xlu1 %2070  ;;  %v7789_v47 = vpop.permute.xlu0 %2170 }
 0xad5   :  { %v2127_v24 = vpop.permute.xlu2 %2126  ;;  %v2076_v10 = vsel %vm1385_vm9, 0.0, %v2071_v46 }
 0xad6   :  { %v2078_v0 = vmul.f32 %v2076_v10, %v7383_v45 }
 0xad8   :  { %v2088_v5 = vmul.f32 %v2082_v36, %v2078_v0 }
 0xada   :  { %v2090_v41 = vadd.f32 %v2088_v5, %v2068_v54 }
 0xadc   :  { %v2149_v40 = vpop.permute.xlu1 %2148  ;;  %v2051_v29 = vpop.permute.xlu0 %2050 }
 0xadd   :  { %v2073_v13 = vpop.permute.xlu2 %2072  ;;  %v2055_v39 = vsel %vm1362_vm3, 0.0, %v2051_v29  ;;  %v2110_v29 = vmul.f32 %v2104_v11, %v2100_v43 }
 0xade   :  { %v2057_v35 = vmul.f32 %v7360_v18, %v2055_v39  ;;  %v2122_v39 = vmul.f32 %v7769_v59, %v7705_v15 }
 0xae0   :  { %v2067_v36 = vmul.f32 %v2064_v27, %v2057_v35  ;;  %v2154_v27 = vsel %vm1465_vm6, %v2149_v40, 0.0  ;;  %v2176_v40 = vsel %vm1488_vm14, %v7789_v47, 0.0 }
 0xae1   :  { %v2156_v5 = vmul.f32 %v2154_v27, %v7414_v6 }
 0xae4   :  { %v2031_v20 = vpop.permute.xlu1 %2030  ;;  %v2095_v46 = vpop.permute.xlu0 %2094 }
 0xae5   :  { %v2035_v3 = vsel %vm1341_vm2, 0.0, %v2031_v20  ;;  %v7802_v7 = vpop.permute.xlu2 %2185  ;;  %v2077_v20 = vsel %vm1385_vm9, 0.0, %v2073_v13  ;;  %v2099_v58 = vsel %vm649_vm8, 0.0, %v2095_v46 }
 0xae6   :  { %v2037_v44 = vmul.f32 %v2035_v3, %v7367_v53  ;;  %v2079_v60 = vmul.f32 %v2077_v20, %v7383_v45  ;;  %v2112_v3 = vadd.f32 %v2110_v29, %v2090_v41  ;;  %v2101_v2 = vmul.f32 %v7363_v12, %v2099_v58 }
 0xae7   :  { %v2123_v20 = vmul.f32 %v7787_v8, %v7713_v37 }
 0xae8   :  { %v2047_v10 = vmul.f32 %v2044_v25, %v2037_v44  ;;  %v2132_v25 = vsel %vm1442_vm15, %v2127_v24, 0.0  ;;  %v2089_v13 = vmul.f32 %v7752_v28, %v2079_v60  ;;  %v2124_v24 = vadd.f32 %v2122_v39, %v2112_v3 }
 0xae9   :  { %v2134_v44 = vmul.f32 %v7373_v30, %v2132_v25  ;;  %v6429_v28 = vmov 120   ;;  %v2111_v46 = vmul.f32 %v7783_v56, %v2101_v2  ;;  %v2178_v60 = vmul.f32 %v7405_v51, %v2176_v40 }
 0xaea   :  { %v2069_v0 = vadd.f32 %v2067_v36, %v2047_v10  ;;  %6045 = vset.pattern.permute.xlu1 %v6429_v28  ;;  %v2166_v36 = vmul.f32 %v7781_v32, %v2156_v5  ;;  %6046 = vset.pattern.permute.xlu2 %v6429_v28  ;;  %v6430_v25 = vmov 121  }
 0xaeb   :  { %2331 = vperm.xlu1 %6045, %v7540_v9   ;;  %v2144_v35 = vmul.f32 %v7785_v4, %v2134_v44  ;;  %2335 = vperm.xlu2 %6046, %v7671_v55  }
 0xaec   :  { %v7791_v14 = vpop.permute.xlu1 %2192  ;;  %v2164_v63 = vpop.permute.xlu0 %2163  ;;  %v2091_v62 = vadd.f32 %v2089_v13, %v2069_v0  ;;  %6047 = vset.pattern.permute.xlu0 %v6430_v25 }
 0xaed   :  { %v2151_v19 = vpop.permute.xlu2 %2150  ;;  %v2146_v41 = vadd.f32 %v2144_v35, %v2124_v24  ;;  %v2198_v47 = vsel %vm1511_vm1, %v7791_v14, 0.0  ;;  %2343 = vperm.xlu0 %6047, %v7540_v9   ;;  %v6431_v24 = vmov 122   ;;  %v6432_v35 = vmov 123  }
 0xaee   :  { %v2113_v54 = vadd.f32 %v2111_v46, %v2091_v62  ;;  %v2155_v43 = vsel %vm1465_vm6, %v2151_v19, 0.0  ;;  %v2200_v32 = vmul.f32 %v2198_v47, %v7426_v48 }
 0xaef   :  { %v2157_v4 = vmul.f32 %v2155_v43, %v7414_v6  ;;  %v2168_v0 = vadd.f32 %v2166_v36, %v2146_v41  ;;  %v6434_v43 = vmov 125  }
 0xaf0   :  { %v2125_v58 = vadd.f32 %v2123_v20, %v2113_v54  ;;  %v6433_v54 = vmov 124  }
 0xaf1   :  { %v2167_v14 = vmul.f32 %v2164_v63, %v2157_v4 }
 0xaf3   :  { %6048 = vset.pattern.permute.xlu1 %v6430_v25  ;;  %6049 = vset.pattern.permute.xlu2 %v6431_v24 }
 0xaf4   :  { %v7804_v52 = vpop.permute.xlu1 %2181  ;;  %2347 = vperm.xlu1 %6048, %v7671_v55   ;;  %2365 = vperm.xlu2 %6049, %v7540_v9  }
 0xaf5   :  { %v2195_v10 = vpop.permute.xlu2 %2194  ;;  %v2188_v29 = vmul.f32 %v7804_v52, %v2178_v60  ;;  %v2204_v19 = vpop.permute.xlu0 %2203  ;;  %6050 = vset.pattern.permute.xlu0 %v6431_v24 }
 0xaf6   :  { %v2199_v8 = vsel %vm1511_vm1, %v2195_v10, 0.0  ;;  %v2210_v2 = vmul.f32 %v2204_v19, %v2200_v32  ;;  %2369 = vperm.xlu0 %6050, %v7671_v55  }
 0xaf7   :  { %v2190_v52 = vadd.f32 %v2188_v29, %v2168_v0  ;;  %v2201_v13 = vmul.f32 %v2199_v8, %v7426_v48 }
 0xaf9   :  { %v2212_v44 = vadd.f32 %v2210_v2, %v2190_v52 }
 0xafc   :  { %v2129_v21 = vpop.permute.xlu1 %2128  ;;  %6052 = vset.pattern.permute.xlu2 %v6432_v35  ;;  %6051 = vset.pattern.permute.xlu1 %v6432_v35 }
 0xafd   :  { %v2133_v11 = vsel %vm1442_vm15, %v2129_v21, 0.0  ;;  %2391 = vperm.xlu2 %6052, %v7671_v55   ;;  %2387 = vperm.xlu1 %6051, %v7540_v9  }
 0xafe   :  { %v2135_v15 = vmul.f32 %v7373_v30, %v2133_v11  ;;  %v2216_v11 = vpop.permute.xlu2 %2215  ;;  %6054 = vset.pattern.permute.xlu0 %v6433_v54 }
 0xaff   :  { %v2222_v63 = vadd.f32 %v2216_v11, %v2212_v44  ;;  %v2229_v20 = vpop.permute.xlu0 %2228 }
 0xb00   :  { %v2145_v21 = vmul.f32 %v7779_v57, %v2135_v15 }
 0xb01   :  { %v2224_v15 = vmax.f32 %v2222_v63, 0.0 }
 0xb02   :  { %v2147_v57 = vadd.f32 %v2145_v21, %v2125_v58  ;;  %v10969_v21 = vmov 13  }
 0xb04   :  { %v2173_v59 = vpop.permute.xlu1 %2172  ;;  %v2169_v27 = vadd.f32 %v2167_v14, %v2147_v57 }
 0xb05   :  { %v2177_v56 = vsel %vm1488_vm14, %v2173_v59, 0.0  ;;  %6053 = vset.pattern.permute.xlu2 %v6433_v54  ;;  %6055 = vset.pattern.permute.xlu1 %v6434_v43 }
 0xb06   :  { %v2179_v37 = vmul.f32 %v7405_v51, %v2177_v56  ;;  %2409 = vperm.xlu2 %6053, %v7540_v9  }
 0xb08   :  { %v2189_v49 = vmul.f32 %v7802_v7, %v2179_v37  ;;  %v2236_v7 = vpop.permute.xlu2 %2235  ;;  %v2272_v14 = vpop.permute.xlu0 %2271 }
 0xb0a   :  { %v2191_v62 = vadd.f32 %v2189_v49, %v2169_v27 }
 0xb0c   :  { %v2208_v3 = vpop.permute.xlu1 %2207 }
 0xb0d   :  { %v2211_v39 = vmul.f32 %v2208_v3, %v2201_v13 }
 0xb0e   :  { %6056 = vset.pattern.permute.xlu2 %v6434_v43 }
 0xb0f   :  { %v2213_v28 = vadd.f32 %v2211_v39, %v2191_v62 }
 0xb10   :  { %v2268_v47 = vpop.permute.xlu2 %2267 }
 0xb11   :  { %v2288_v49 = vpop.permute.xlu0 %2287 }
 0xb15   :  { %v2220_v5 = vpop.permute.xlu1 %2219 }
 0xb16   :  { %v2223_v46 = vadd.f32 %v2220_v5, %v2213_v28 }
 0xb18   :  { %v2225_v59 = vmax.f32 %v2223_v46, 0.0 }
 0xb1a   :  { %v2226_v40 = vpack.c.bf16 %v2225_v59, %v2224_v15 }
 0xb1c   :  { %2247 = vmatpush.bf16.msrb.mxu0 %v2226_v40 }
 0xb1d   :  { %v2233_v60 = vpop.permute.xlu1 %2232 }
 0xb1f   :  { %5695 = vmatmul.msk.bf16.vlgmr.msrb.gmra.mxu0 %vm795_vm13, %v2236_v7 }
 0xb26   :  { %v2292_v29 = vpop.permute.xlu1 %2291 }
 0xb3f   :  { %v2314_v11 = vpop.permute.xlu0 %2313 }
 0xb5d   :  { %v2332_v37 = vpop.permute.xlu1 %2331 }
 0xb5f   :  { %v2344_v24 = vpop.permute.xlu0 %2343 }
 0xb66   :  { %v2348_v19 = vpop.permute.xlu1 %2347 }
 0xb6f   :  { %v7911_v0 = vpop.permute.xlu1 %2387 }
 0xb9c   :  { %v2249_v10 = vpop.f32.mrf.mxu0 }
 0xb9d   :  { %v7858_v56 = vadd.f32 %v2249_v10, %v2229_v20 }
 0xb9f   :  { %2420 = vrot.lane.b32.xlu0 %v7858_v56, %s6396_s12  ;;  %2276 = vrot.lane.b32.xlu1 %v7858_v56, %s6390_s5 }
 0xba0   :  { %2256 = vrot.lane.b32.xlu2 %v7858_v56, %s6391_s29 }
 0xba4   :  { %v2251_v41 = vpop.f32.mrf.mxu0 }
 0xba5   :  { %v7877_v36 = vadd.f32 %v2251_v41, %v2233_v60  ;;  %v2370_v41 = vpop.permute.xlu0 %2369 }
 0xba7   :  { %2298 = vrot.lane.b32.xlu1 %v7858_v56, %s6389_s6  ;;  %2413 = vperm.xlu0 %6054, %v7671_v55  }
 0xba8   :  { %2320 = vrot.lane.b32.xlu2 %v7858_v56, %s6358_s25 }
 0xbaf   :  { %2354 = vrot.lane.b32.xlu1 %v7858_v56, %s6345_s27  ;;  %2463 = vrot.lane.b32.xlu0 %v7292_v50, %s6435_s14 }
 0xbb0   :  { %2376 = vrot.lane.b32.xlu2 %v7858_v56, %s6392_s10 }
 0xbb7   :  { %2398 = vrot.lane.b32.xlu1 %v7858_v56, %s6393_s11 }
 0xbb8   :  { %2278 = vrot.lane.b32.xlu2 %v7877_v36, %s6390_s5 }
 0xbbf   :  { %2431 = vperm.xlu1 %6055, %v7540_v9   ;;  %v2310_v9 = vpop.permute.xlu2 %2309 }
 0xbc0   :  { %2300 = vrot.lane.b32.xlu2 %v7877_v36, %s6389_s6 }
 0xbc7   :  { %2258 = vrot.lane.b32.xlu1 %v7877_v36, %s6391_s29  ;;  %v2336_v4 = vpop.permute.xlu2 %2335 }
 0xbc8   :  { %2356 = vrot.lane.b32.xlu2 %v7877_v36, %s6345_s27  ;;  %6057 = vset.pattern.permute.xlu1 %v10969_v21 }
 0xbcf   :  { %2322 = vrot.lane.b32.xlu1 %v7877_v36, %s6358_s25  ;;  %v7904_v58 = vpop.permute.xlu2 %2365 }
 0xbd0   :  { %2400 = vrot.lane.b32.xlu2 %v7877_v36, %s6393_s11  ;;  %s6466_s11 = smov 17  }
 0xbd7   :  { %2378 = vrot.lane.b32.xlu1 %v7877_v36, %s6392_s10  ;;  %v7907_v8 = vpop.permute.xlu2 %2391 }
 0xbd8   :  { %2435 = vperm.xlu2 %6056, %v7671_v55  }
 0xbdf   :  { %2422 = vrot.lane.b32.xlu1 %v7877_v36, %s6396_s12  ;;  %v7909_v32 = vpop.permute.xlu2 %2409 }
 0xbe0   :  { %6058 = vset.pattern.permute.xlu2 %v10969_v21 }
 0xbe1   :  { %2447 = vperm.xlu2 %6058, %v7766_v1  }
 0xbe7   :  { %2443 = vperm.xlu1 %6057, %v7760_v38  }
 0xbe9   :  { %2460 = vperm.xlu2 %6058, %v7774_v17  }
 0xbef   :  { %2456 = vperm.xlu1 %6057, %v7743_v16  }
 0xbfa   :  { %v2257_v57 = vpop.permute.xlu2 %2256 }
 0xbfb   :  { %v2262_v15 = vsel %vm1341_vm2, 0.0, %v2257_v57 }
 0xbfc   :  { %v2264_v10 = vmul.f32 %v2262_v15, %v7367_v53 }
 0xc02   :  { %v2321_v25 = vpop.permute.xlu2 %2320 }
 0xc0a   :  { %v2377_v13 = vpop.permute.xlu2 %2376 }
 0xc11   :  { %v2277_v3 = vpop.permute.xlu1 %2276 }
 0xc12   :  { %v2279_v39 = vpop.permute.xlu2 %2278  ;;  %v2282_v28 = vsel %vm1362_vm3, 0.0, %v2277_v3 }
 0xc13   :  { %v2283_v63 = vsel %vm1362_vm3, 0.0, %v2279_v39  ;;  %v2284_v35 = vmul.f32 %v7360_v18, %v2282_v28  ;;  %v2326_v39 = vsel %vm649_vm8, 0.0, %v2321_v25 }
 0xc14   :  { %v2285_v59 = vmul.f32 %v7360_v18, %v2283_v63 }
 0xc15   :  { %v2294_v3 = vmul.f32 %v2288_v49, %v2284_v35 }
 0xc16   :  { %v2295_v21 = vmul.f32 %v2292_v29, %v2285_v59  ;;  %v2328_v29 = vmul.f32 %v7363_v12, %v2326_v39 }
 0xc19   :  { %v2299_v52 = vpop.permute.xlu1 %2298 }
 0xc1a   :  { %v2301_v62 = vpop.permute.xlu2 %2300  ;;  %v2304_v40 = vsel %vm1385_vm9, 0.0, %v2299_v52 }
 0xc1b   :  { %v2305_v54 = vsel %vm1385_vm9, 0.0, %v2301_v62  ;;  %v2306_v60 = vmul.f32 %v2304_v40, %v7383_v45  ;;  %v2338_v40 = vmul.f32 %v2332_v37, %v2328_v29  ;;  %v2350_v37 = vmul.f32 %v2344_v24, %v7858_v56 }
 0xc1c   :  { %v2307_v57 = vmul.f32 %v2305_v54, %v7383_v45  ;;  %v2484_v45 = vld [vmem:[%s10774_s7 + $0x10] sm:$0xff]  ;;  %v2351_v54 = vmul.f32 %v2348_v19, %v7877_v36 }
 0xc1e   :  { %v2317_v62 = vmul.f32 %v2314_v11, %v2307_v57 }
 0xc21   :  { %v2355_v2 = vpop.permute.xlu1 %2354 }
 0xc22   :  { %v2357_v43 = vpop.permute.xlu2 %2356 }
 0xc23   :  { %v2361_v11 = vsel %vm1442_vm15, %v2357_v43, 0.0 }
 0xc29   :  { %v2399_v27 = vpop.permute.xlu1 %2398 }
 0xc2a   :  { %v2401_v15 = vpop.permute.xlu2 %2400 }
 0xc31   :  { %v7913_v44 = vpop.permute.xlu1 %2431 }
 0xc39   :  { %v2259_v5 = vpop.permute.xlu1 %2258 }
 0xc3a   :  { %v2263_v46 = vsel %vm1341_vm2, 0.0, %v2259_v5  ;;  %v2274_v5 = vmul.f32 %v2268_v47, %v2264_v10  ;;  %v2360_v47 = vsel %vm1442_vm15, %v2355_v2, 0.0  ;;  %vm3809_vm2 = vcmask 138240  }
 0xc3b   :  { %v2265_v7 = vmul.f32 %v2263_v46, %v7367_v53  ;;  %v2316_v46 = vmul.f32 %v2310_v9, %v2306_v60  ;;  %v2485_v53 = vld [vmem:[%s10774_s7 + $0x18] sm:$0xff]  ;;  %v2362_v35 = vmul.f32 %v7373_v30, %v2360_v47  ;;  %v2404_v60 = vsel %vm1488_vm14, %v2399_v27, 0.0 }
 0xc3c   :  { %v2296_v25 = vadd.f32 %v2294_v3, %v2274_v5  ;;  %2505 = vmatpush.msrb.mxu2 %v2485_v53  ;;  %v2405_v3 = vsel %vm1488_vm14, %v2401_v15, 0.0  ;;  %vm3930_vm14 = vcmask 121856  }
 0xc3d   :  { %v2275_v20 = vmul.f32 %v2272_v14, %v2265_v7  ;;  %v2421_v7 = vpop.permute.xlu0 %2420  ;;  %v2372_v57 = vmul.f32 %v7904_v58, %v2362_v35  ;;  %v7971_v35 = vld [vmem:[%s10768_s1] sm:$0xff] }
 0xc3e   :  { %v2318_v28 = vadd.f32 %v2316_v46, %v2296_v25  ;;  %2506 = vmatpush.msrb.mxu2 %v2484_v45  ;;  %v2426_v27 = vsel %vm1511_vm1, %v2421_v7, 0.0  ;;  %v6436_v7 = vmov 126  }
 0xc3f   :  { %v2297_v52 = vadd.f32 %v2295_v21, %v2275_v20  ;;  %6060 = vset.pattern.permute.xlu0 %v6436_v7  ;;  %6059 = vset.pattern.permute.xlu2 %v6436_v7 }
 0xc40   :  { %v2340_v10 = vadd.f32 %v2338_v40, %v2318_v28  ;;  %2533 = vperm.xlu0 %6060, %v7671_v55   ;;  %2529 = vperm.xlu2 %6059, %v7971_v35  }
 0xc41   :  { %v2323_v63 = vpop.permute.xlu1 %2322  ;;  %v2319_v9 = vadd.f32 %v2317_v62, %v2297_v52  ;;  %v2406_v52 = vmul.f32 %v7405_v51, %v2404_v60 }
 0xc42   :  { %v2327_v18 = vsel %vm649_vm8, 0.0, %v2323_v63  ;;  %v2352_v39 = vadd.f32 %v2350_v37, %v2340_v10  ;;  %v2407_v63 = vmul.f32 %v7405_v51, %v2405_v3  ;;  %v7983_v10 = vld [vmem:[%s10768_s1 + $0x8] sm:$0xff]  ;;  %v10973_v37 = vmov 4  }
 0xc43   :  { %v2329_v14 = vmul.f32 %v7363_v12, %v2327_v18  ;;  %v2363_v12 = vmul.f32 %v7373_v30, %v2361_v11 }
 0xc44   :  { %v2374_v46 = vadd.f32 %v2372_v57, %v2352_v39  ;;  %v10974_v57 = vmov 5  }
 0xc45   :  { %v2339_v49 = vmul.f32 %v2336_v4, %v2329_v14  ;;  %v2382_v4 = vsel %vm1465_vm6, %v2377_v13, 0.0  ;;  %v2373_v36 = vmul.f32 %v2370_v41, %v2363_v12  ;;  %v2436_v13 = vpop.permute.xlu2 %2435  ;;  %v2414_v56 = vpop.permute.xlu0 %2413  ;;  %v2428_v41 = vmul.f32 %v2426_v27, %v7426_v48 }
 0xc46   :  { %v2384_v19 = vmul.f32 %v2382_v4, %v7414_v6  ;;  %v2417_v62 = vmul.f32 %v2414_v56, %v2407_v63  ;;  %v6437_v12 = vmov 127   ;;  %v10972_v4 = vmov 3  }
 0xc47   :  { %v2341_v59 = vadd.f32 %v2339_v49, %v2319_v9  ;;  %v2438_v53 = vmul.f32 %v7913_v44, %v2428_v41  ;;  %v2482_v44 = vld [vmem:[%s10774_s7] sm:$0xff]  ;;  %6061 = vset.pattern.permute.xlu1 %v6437_v12  ;;  %v6438_v27 = vmov 54  }
 0xc48   :  { %v2394_v18 = vmul.f32 %v7911_v0, %v2384_v19  ;;  %2549 = vperm.xlu1 %6061, %v7971_v35   ;;  %6062 = vset.pattern.permute.xlu2 %v6437_v12 }
 0xc49   :  { %v2379_v20 = vpop.permute.xlu1 %2378  ;;  %v2353_v43 = vadd.f32 %v2351_v54, %v2341_v59  ;;  %v68_v54 = vld [vmem:[%s10768_s1 + $0x18] sm:$0xff]  ;;  %2553 = vperm.xlu2 %6062, %v7671_v55  }
 0xc4a   :  { %v2383_v2 = vsel %vm1465_vm6, %v2379_v20, 0.0  ;;  %v2396_v45 = vadd.f32 %v2394_v18, %v2374_v46  ;;  %v10970_v20 = vmov 0   ;;  %v6439_v46 = vmov 56  }
 0xc4b   :  { %v2385_v21 = vmul.f32 %v2383_v2, %v7414_v6  ;;  %v2375_v5 = vadd.f32 %v2373_v36, %v2353_v43  ;;  %6064 = vset.pattern.permute.xlu0 %v10970_v20  ;;  %v10971_v2 = vmov 1  }
 0xc4c   :  { %2577 = vperm.xlu0 %6064, %v68_v54  }
 0xc4d   :  { %v2395_v30 = vmul.f32 %v7907_v8, %v2385_v21  ;;  %v2416_v8 = vmul.f32 %v7909_v32, %v2406_v52  ;;  %v2448_v9 = vpop.permute.xlu2 %2447  ;;  %v2464_v40 = vpop.permute.xlu0 %2463  ;;  %v10976_v52 = vmov 14  }
 0xc4f   :  { %v2397_v24 = vadd.f32 %v2395_v30, %v2375_v5  ;;  %v2418_v25 = vadd.f32 %v2416_v8, %v2396_v45  ;;  %v10975_v30 = vmov 6  }
 0xc50   :  { %6065 = vset.pattern.permute.xlu1 %v10971_v2 }
 0xc51   :  { %v2423_v58 = vpop.permute.xlu1 %2422  ;;  %v2419_v29 = vadd.f32 %v2417_v62, %v2397_v24  ;;  %v2440_v49 = vadd.f32 %v2438_v53, %v2418_v25  ;;  %2595 = vperm.xlu1 %6065, %v7983_v10   ;;  %6063 = vset.pattern.permute.xlu2 %v10970_v20  ;;  %v6440_v24 = vmov 55   ;;  %v6444_v25 = vmov 59  }
 0xc52   :  { %v2427_v6 = vsel %vm1511_vm1, %v2423_v58, 0.0  ;;  %2572 = vperm.xlu2 %6063, %v7983_v10   ;;  %vm2486_vm1 = vcmask 261120   ;;  %v6441_v58 = vmov 58   ;;  %v6446_v20 = vmov 62  }
 0xc53   :  { %v2429_v14 = vmul.f32 %v2427_v6, %v7426_v48  ;;  %v2483_v48 = vld [vmem:[%s10774_s7 + $0x8] sm:$0xff]  ;;  %s6456_s7 = smov 16  }
 0xc54   :  { %2507 = vmatpush.msrb.mxu2 %v2483_v48  ;;  %6067 = vset.pattern.permute.xlu0 %v10959_v42 }
 0xc55   :  { %v2439_v51 = vmul.f32 %v2436_v13, %v2429_v14  ;;  %2607 = vperm.xlu0 %6067, %v7983_v10   ;;  %v6442_v14 = vmov 57  }
 0xc56   :  { %2508 = vmatpush.msrb.mxu2 %v2482_v44 }
 0xc57   :  { %v2441_v47 = vadd.f32 %v2439_v51, %v2419_v29  ;;  %v6443_v51 = vmov 61  }
 0xc59   :  { %v2451_v28 = vadd.f32 %v2448_v9, %v2441_v47  ;;  %v2444_v0 = vpop.permute.xlu1 %2443  ;;  %6068 = vset.pattern.permute.xlu1 %v10959_v42  ;;  %v2461_v42 = vpop.permute.xlu2 %2460 }
 0xc5a   :  { %v2450_v11 = vadd.f32 %v2444_v0, %v2440_v49  ;;  %2611 = vperm.xlu1 %6068, %v68_v54   ;;  %6066 = vset.pattern.permute.xlu2 %v10971_v2  ;;  %v6445_v0 = vmov 60  }
 0xc5b   :  { %v2453_v15 = vmax.f32 %v2451_v28, 0.0  ;;  %2599 = vperm.xlu2 %6066, %v68_v54  }
 0xc5c   :  { %v2452_v59 = vmax.f32 %v2450_v11, 0.0 }
 0xc5d   :  { %6070 = vset.pattern.permute.xlu0 %v10972_v4 }
 0xc5e   :  { %v2454_v32 = vpack.c.bf16 %v2453_v15, %v2452_v59  ;;  %2633 = vperm.xlu0 %6070, %v68_v54  }
 0xc60   :  { %2475 = vmatpush.bf16.msrb.mxu1 %v2454_v32 }
 0xc61   :  { %v2457_v60 = vpop.permute.xlu1 %2456 }
 0xc62   :  { %6071 = vset.pattern.permute.xlu1 %v10973_v37 }
 0xc63   :  { %5696 = vmatmul.msk.bf16.vlgmr.msrb.gmra.mxu1 %vm795_vm13, %v2464_v40  ;;  %2651 = vperm.xlu1 %6071, %v7983_v10  }
 0xc64   :  { %6069 = vset.pattern.permute.xlu2 %v10972_v4 }
 0xc65   :  { %2629 = vperm.xlu2 %6069, %v7983_v10  }
 0xc66   :  { %6074 = vset.pattern.permute.xlu0 %v10974_v57 }
 0xc6b   :  { %6075 = vset.pattern.permute.xlu1 %v10975_v30 }
 0xc6d   :  { %6072 = vset.pattern.permute.xlu2 %v10973_v37  ;;  %v8270_v37 = vld [vmem:[#allocation4 + $0x140] sm:$0xff] }
 0xc6e   :  { %2655 = vperm.xlu2 %6072, %v68_v54  }
 0xc76   :  { %6073 = vset.pattern.permute.xlu2 %v10974_v57  ;;  %v8267_v57 = vld [vmem:[#allocation4 + $0x160] sm:$0xff] }
 0xc77   :  { %2673 = vperm.xlu2 %6073, %v7983_v10  }
 0xc7f   :  { %6076 = vset.pattern.permute.xlu2 %v10975_v30 }
 0xc9a   :  { %v8034_v13 = vpop.permute.xlu2 %2529 }
 0xc9b   :  { %10977 = vst [vmem:[#allocation28_spill] sm:$0xff] %v8034_v13 }
 0xca3   :  { %v8043_v63 = vpop.permute.xlu2 %2553 }
 0xca4   :  { %10978 = vst [vmem:[#allocation29_spill] sm:$0xff] %v8043_v63 }
 0xcac   :  { %v8053_v5 = vpop.permute.xlu2 %2572 }
 0xcad   :  { %10979 = vst [vmem:[#allocation30_spill] sm:$0xff] %v8053_v5 }
 0xcb2   :  { %v8097_v62 = vpop.permute.xlu0 %2533 }
 0xcb3   :  { %10987 = vst [vmem:[#allocation38_spill] sm:$0xff] %v8097_v62 }
 0xcb5   :  { %v8060_v56 = vpop.permute.xlu2 %2599 }
 0xcb6   :  { %10980 = vst [vmem:[#allocation31_spill] sm:$0xff] %v8060_v56 }
 0xcba   :  { %v8067_v18 = vpop.permute.xlu1 %2549 }
 0xcbb   :  { %10981 = vst [vmem:[#allocation32_spill] sm:$0xff] %v8067_v18 }
 0xcbe   :  { %v8105_v29 = vpop.permute.xlu0 %2577 }
 0xcbf   :  { %v8069_v41 = vpop.permute.xlu2 %2629  ;;  %10989 = vst [vmem:[#allocation40_spill] sm:$0xff] %v8105_v29 }
 0xcc0   :  { %10982 = vst [vmem:[#allocation33_spill] sm:$0xff] %v8069_v41 }
 0xcc7   :  { %v8113_v49 = vpop.permute.xlu0 %2607 }
 0xcc8   :  { %v8082_v8 = vpop.permute.xlu2 %2655  ;;  %10990 = vst [vmem:[#allocation41_spill] sm:$0xff] %v8113_v49 }
 0xcc9   :  { %10984 = vst [vmem:[#allocation35_spill] sm:$0xff] %v8082_v8 }
 0xcd0   :  { %v8119_v11 = vpop.permute.xlu0 %2633 }
 0xcd1   :  { %10991 = vst [vmem:[#allocation42_spill] sm:$0xff] %v8119_v11 }
 0xce0   :  { %v2477_v43 = vpop.f32.mrf.mxu1 }
 0xce1   :  { %v2478_v21 = vadd.f32 %v2477_v43, %v2457_v60 }
 0xce3   :  { %5697 = vmatmul.msk.f32.vlgmr.msrb.gmra.mxu2 %vm2486_vm1, %v2478_v21 }
 0xce8   :  { %v2479_v3 = vpop.f32.mrf.mxu1 }
 0xce9   :  { %v2480_v36 = vadd.f32 %v2479_v3, %v2461_v42 }
 0xceb   :  { %5698 = vmatmul.msk.f32.gmra.mxu2 %vm2486_vm1, %v2480_v36 }
 0xd66   :  { %v8004_v19 = vpop.f32.mrf.mxu2 }
 0xd67   :  { %2618 = vrot.lane.b32.xlu2 %v8004_v19, %s6345_s27  ;;  %2538 = vrot.lane.b32.xlu1 %v8004_v19, %s6341_s18 }
 0xd68   :  { %2518 = vrot.lane.b32.xlu0 %v8004_v19, %s6356_s8 }
 0xd6e   :  { %v8012_v39 = vpop.f32.mrf.mxu2 }
 0xd6f   :  { %2584 = vrot.lane.b32.xlu1 %v8004_v19, %s6358_s25  ;;  %2540 = vrot.lane.b32.xlu2 %v8012_v39, %s6341_s18 }
 0xd70   :  { %2560 = vrot.lane.b32.xlu0 %v8004_v19, %s6355_s23 }
 0xd77   :  { %2640 = vrot.lane.b32.xlu1 %v8004_v19, %s6357_s24  ;;  %2586 = vrot.lane.b32.xlu2 %v8012_v39, %s6358_s25 }
 0xd78   :  { %2662 = vrot.lane.b32.xlu0 %v8004_v19, %s6359_s26 }
 0xd7f   :  { %2684 = vrot.lane.b32.xlu1 %v8004_v19, %s6360_s28  ;;  %2642 = vrot.lane.b32.xlu2 %v8012_v39, %s6357_s24 }
 0xd80   :  { %2677 = vperm.xlu0 %6074, %v68_v54  }
 0xd87   :  { %2699 = vperm.xlu2 %6076, %v68_v54   ;;  %2520 = vrot.lane.b32.xlu1 %v8012_v39, %s6356_s8 }
 0xd88   :  { %6077 = vset.pattern.permute.xlu0 %v10976_v52 }
 0xd89   :  { %2707 = vperm.xlu0 %6077, %v7760_v38  }
 0xd8f   :  { %2686 = vrot.lane.b32.xlu2 %v8012_v39, %s6360_s28  ;;  %2562 = vrot.lane.b32.xlu1 %v8012_v39, %s6355_s23 }
 0xd90   :  { %6079 = vset.pattern.permute.xlu2 %v10976_v52 }
 0xd91   :  { %2898 = vrot.lane.b32.xlu0 %v7163_v34, %s6356_s8 }
 0xd92   :  { %6081 = vset.pattern.permute.xlu0 %v6438_v27 }
 0xd97   :  { %2720 = vperm.xlu2 %6079, %v7743_v16   ;;  %2620 = vrot.lane.b32.xlu1 %v8012_v39, %s6345_s27 }
 0xd99   :  { %2913 = vperm.xlu0 %6081, %v7671_v55  }
 0xd9f   :  { %2727 = vrot.lane.b32.xlu2 %v7292_v50, %s6344_s22  ;;  %2664 = vrot.lane.b32.xlu1 %v8012_v39, %s6359_s26 }
 0xda0   :  { %6080 = vset.pattern.permute.xlu2 %v6438_v27 }
 0xda1   :  { %2940 = vrot.lane.b32.xlu0 %v7163_v34, %s6355_s23 }
 0xda2   :  { %6085 = vset.pattern.permute.xlu0 %v6439_v46 }
 0xda7   :  { %2909 = vperm.xlu2 %6080, %v7971_v35   ;;  %2695 = vperm.xlu1 %6075, %v7983_v10  }
 0xda9   :  { %2955 = vperm.xlu0 %6085, %v7671_v55   ;;  %v8074_v55 = vld [vmem:[%s10768_s1 + $0x10] sm:$0xff] }
 0xdaf   :  { %2920 = vrot.lane.b32.xlu2 %v7167_v26, %s6341_s18  ;;  %6078 = vset.pattern.permute.xlu1 %v10976_v52 }
 0xdb0   :  { %2711 = vperm.xlu1 %6078, %v7766_v1   ;;  %6083 = vset.pattern.permute.xlu2 %v6440_v24  ;;  %v8080_v1 = vpop.permute.xlu1 %2595 }
 0xdb1   :  { %6088 = vset.pattern.permute.xlu0 %v6441_v58  ;;  %10983 = vst [vmem:[#allocation34_spill] sm:$0xff] %v8080_v1 }
 0xdb2   :  { %2985 = vperm.xlu0 %6088, %v7971_v35  }
 0xdb7   :  { %2933 = vperm.xlu2 %6083, %v8074_v55  }
 0xdb8   :  { %2724 = vperm.xlu1 %6078, %v7774_v17   ;;  %v8089_v6 = vpop.permute.xlu1 %2611  ;;  %v8091_v17 = vpop.permute.xlu2 %2673 }
 0xdb9   :  { %10985 = vst [vmem:[#allocation36_spill] sm:$0xff] %v8089_v6 }
 0xdba   :  { %3012 = vrot.lane.b32.xlu0 %v7167_v26, %s6357_s24  ;;  %10986 = vst [vmem:[#allocation37_spill] sm:$0xff] %v8091_v17 }
 0xdbb   :  { %6095 = vset.pattern.permute.xlu0 %v6443_v51 }
 0xdbf   :  { %6084 = vset.pattern.permute.xlu2 %v6439_v46 }
 0xdc0   :  { %2951 = vperm.xlu2 %6084, %v7971_v35   ;;  %2900 = vrot.lane.b32.xlu1 %v7167_v26, %s6356_s8  ;;  %v8099_v53 = vpop.permute.xlu1 %2651 }
 0xdc1   :  { %6082 = vset.pattern.permute.xlu1 %v6440_v24  ;;  %10988 = vst [vmem:[#allocation39_spill] sm:$0xff] %v8099_v53  ;;  %v8103_v45 = vpop.permute.xlu2 %2618 }
 0xdc2   :  { %3032 = vrot.lane.b32.xlu0 %v7163_v34, %s6359_s26 }
 0xdc8   :  { %2964 = vrot.lane.b32.xlu2 %v7167_v26, %s6358_s25  ;;  %2918 = vrot.lane.b32.xlu1 %v7163_v34, %s6341_s18 }
 0xdc9   :  { %6087 = vset.pattern.permute.xlu2 %v6442_v14  ;;  %v2541_v9 = vpop.permute.xlu2 %2540 }
 0xdca   :  { %3047 = vperm.xlu0 %6095, %v8074_v55   ;;  %v2545_v52 = vsel %vm603_vm5, 0.0, %v2541_v9 }
 0xdd0   :  { %2977 = vperm.xlu2 %6087, %v8074_v55   ;;  %2929 = vperm.xlu1 %6082, %v7971_v35  }
 0xdd1   :  { %v2587_v15 = vpop.permute.xlu2 %2586 }
 0xdd2   :  { %6098 = vset.pattern.permute.xlu0 %v10975_v30 }
 0xdd3   :  { %3077 = vperm.xlu0 %6098, %v7760_v38  }
 0xdd8   :  { %6090 = vset.pattern.permute.xlu2 %v6444_v25  ;;  %2942 = vrot.lane.b32.xlu1 %v7167_v26, %s6355_s23 }
 0xdd9   :  { %v2539_v47 = vpop.permute.xlu1 %2538  ;;  %2999 = vperm.xlu2 %6090, %v7971_v35   ;;  %6086 = vset.pattern.permute.xlu1 %v6442_v14  ;;  %v8123_v32 = vpop.permute.xlu2 %2642 }
 0xdda   :  { %v2519_v38 = vpop.permute.xlu0 %2518  ;;  %v2544_v7 = vsel %vm603_vm5, 0.0, %v2539_v47 }
 0xddb   :  { %v2524_v54 = vsel %vm580_vm4, 0.0, %v2519_v38  ;;  %v2546_v2 = vmul.f32 %v6823_v22, %v2544_v7 }
 0xddc   :  { %v2526_v60 = vmul.f32 %v2524_v54, %v6830_v23 }
 0xddd   :  { %v2556_v42 = vmul.f32 %v8067_v18, %v2546_v2 }
 0xdde   :  { %v2536_v3 = vmul.f32 %v8034_v13, %v2526_v60  ;;  %v8310_v13 = vld [vmem:[#allocation4 + $0x60] sm:$0xff] }
 0xde0   :  { %2962 = vrot.lane.b32.xlu1 %v7163_v34, %s6358_s25 }
 0xde1   :  { %v2585_v28 = vpop.permute.xlu1 %2584  ;;  %3010 = vrot.lane.b32.xlu2 %v7163_v34, %s6357_s24  ;;  %v8131_v12 = vpop.permute.xlu2 %2699 }
 0xde2   :  { %6093 = vset.pattern.permute.xlu2 %v6445_v0  ;;  %v2561_v48 = vpop.permute.xlu0 %2560  ;;  %10992 = vst [vmem:[#allocation43_spill] sm:$0xff] %v8131_v12  ;;  %v2590_v27 = vsel %vm649_vm8, 0.0, %v2585_v28 }
 0xde3   :  { %v2566_v10 = vsel %vm626_vm7, 0.0, %v2561_v48  ;;  %v2592_v47 = vmul.f32 %v6826_v61, %v2590_v27  ;;  %v2591_v48 = vsel %vm649_vm8, 0.0, %v2587_v15 }
 0xde4   :  { %v2568_v43 = vmul.f32 %v2566_v10, %v6845_v33  ;;  %v2624_v10 = vsel %vm406_vm0, %v8103_v45, 0.0  ;;  %v2593_v2 = vmul.f32 %v6826_v61, %v2591_v48  ;;  %v2614_v45 = vmul.f32 %v8113_v49, %v8004_v19 }
 0xde6   :  { %v2580_v24 = vmul.f32 %v8053_v5, %v2568_v43  ;;  %v2603_v27 = vmul.f32 %v8060_v56, %v2593_v2  ;;  %v8295_v56 = vld [vmem:[#allocation4 + $0xa0] sm:$0xff]  ;;  %v2805_v5 = vld [vmem:[#allocation4 + $0x1d8] sm:$0xff] }
 0xde8   :  { %2973 = vperm.xlu1 %6086, %v7971_v35  }
 0xde9   :  { %v2641_v59 = vpop.permute.xlu1 %2640  ;;  %3025 = vperm.xlu2 %6093, %v8074_v55   ;;  %v2687_v14 = vpop.permute.xlu2 %2686 }
 0xdea   :  { %v2646_v15 = vsel %vm706_vm10, %v2641_v59, 0.0 }
 0xdf0   :  { %6089 = vset.pattern.permute.xlu1 %v6441_v58 }
 0xdf1   :  { %v8125_v40 = vpop.permute.xlu1 %2684  ;;  %6094 = vset.pattern.permute.xlu2 %v6443_v51  ;;  %2989 = vperm.xlu1 %6089, %v8074_v55   ;;  %v2547_v51 = vmul.f32 %v6823_v22, %v2545_v52  ;;  %v8170_v52 = vpop.permute.xlu2 %2720 }
 0xdf2   :  { %3043 = vperm.xlu2 %6094, %v7971_v35   ;;  %10993 = vst [vmem:[#allocation44_spill] sm:$0xff] %v8170_v52 }
 0xdf9   :  { %6091 = vset.pattern.permute.xlu1 %v6444_v25  ;;  %v2521_v44 = vpop.permute.xlu1 %2520  ;;  %v2558_v25 = vadd.f32 %v2556_v42, %v2536_v3  ;;  %v2626_v3 = vmul.f32 %v6840_v31, %v2624_v10 }
 0xdfa   :  { %3056 = vrot.lane.b32.xlu2 %v7167_v26, %s6360_s28  ;;  %3003 = vperm.xlu1 %6091, %v8074_v55   ;;  %v2525_v21 = vsel %vm580_vm4, 0.0, %v2521_v44  ;;  %v2602_v44 = vmul.f32 %v8080_v1, %v2592_v47  ;;  %v2615_v47 = vmul.f32 %v8089_v6, %v8012_v39  ;;  %v10995_v39 = vld [vmem:[#allocation20_spill] sm:$0xff] }
 0xdfb   :  { %6097 = vset.pattern.permute.xlu2 %v6446_v20  ;;  %v2527_v58 = vmul.f32 %v2525_v21, %v6830_v23  ;;  %v2582_v28 = vadd.f32 %v2580_v24, %v2558_v25  ;;  %v2663_v21 = vpop.permute.xlu0 %2662  ;;  %v10994_v24 = vld [vmem:[#allocation21_spill] sm:$0xff]  ;;  %v2636_v59 = vmul.f32 %v8069_v41, %v2626_v3 }
 0xdfc   :  { %v2668_v19 = vsel %vm729_vm11, %v2663_v21, 0.0  ;;  %v10997_v21 = vld [vmem:[#allocation22_spill] sm:$0xff]  ;;  %v8303_v41 = vld [vmem:[#allocation4 + $0x1c8] sm:$0xff] }
 0xdfd   :  { %v2537_v38 = vmul.f32 %v8097_v62, %v2527_v58  ;;  %v2604_v60 = vadd.f32 %v2602_v44, %v2582_v28  ;;  %v2648_v58 = vmul.f32 %v2646_v15, %v10994_v24  ;;  %v2670_v44 = vmul.f32 %v10995_v39, %v2668_v19  ;;  %v8301_v62 = vld [vmem:[#allocation4 + $0x80] sm:$0xff]  ;;  %11005 = vst [vmem:[#allocation49_spill] sm:$0xff] %v8303_v41 }
 0xdfe   :  { %v2691_v15 = vsel %vm752_vm12, %v2687_v14, 0.0 }
 0xe01   :  { %v2563_v36 = vpop.permute.xlu1 %2562 }
 0xe02   :  { %v2567_v46 = vsel %vm626_vm7, 0.0, %v2563_v36  ;;  %3069 = vperm.xlu2 %6097, %v8074_v55   ;;  %6092 = vset.pattern.permute.xlu1 %v6445_v0  ;;  %v2557_v0 = vmul.f32 %v8043_v63, %v2547_v51  ;;  %v2809_v63 = vld [vmem:[#allocation4 + $0x1f8] sm:$0xff] }
 0xe03   :  { %3021 = vperm.xlu1 %6092, %v7971_v35   ;;  %v2569_v9 = vmul.f32 %v2567_v46, %v6845_v33  ;;  %v2616_v46 = vadd.f32 %v2614_v45, %v2604_v60  ;;  %v8197_v2 = vpop.permute.xlu0 %2677  ;;  %v8201_v45 = vpop.permute.xlu2 %2727 }
 0xe04   :  { %v2559_v43 = vadd.f32 %v2557_v0, %v2537_v38  ;;  %v2658_v38 = vmul.f32 %v8099_v53, %v2648_v58  ;;  %10996 = vst [vmem:[#allocation21_spill] sm:$0xff] %v8197_v2  ;;  %v2693_v58 = vmul.f32 %v2691_v15, %v10997_v21  ;;  %v8298_v53 = vld [vmem:[#allocation4 + $0x1e8] sm:$0xff] }
 0xe05   :  { %v2581_v7 = vmul.f32 %v8105_v29, %v2569_v9  ;;  %v2638_v28 = vadd.f32 %v2636_v59, %v2616_v46  ;;  %10998 = vst [vmem:[#allocation20_spill] sm:$0xff] %v8201_v45  ;;  %v2808_v29 = vld [vmem:[#allocation4 + $0x1f0] sm:$0xff]  ;;  %2832 = vmatpush.msra.mxu1 %v8298_v53 }
 0xe06   :  { %11004 = vst [vmem:[#allocation48_spill] sm:$0xff] %v8298_v53  ;;  %2854 = vmatpush.msra.mxu2 %v2808_v29 }
 0xe07   :  { %v2583_v36 = vadd.f32 %v2581_v7, %v2559_v43  ;;  %v2690_v7 = vsel %vm752_vm12, %v8125_v40, 0.0  ;;  %v2660_v60 = vadd.f32 %v2658_v38, %v2638_v28  ;;  %2833 = vmatpush.msra.mxu1 %v8303_v41  ;;  %v2797_v41 = vld [vmem:[#allocation4 + $0x198] sm:$0xff] }
 0xe09   :  { %v2621_v54 = vpop.permute.xlu1 %2620  ;;  %v2605_v51 = vadd.f32 %v2603_v27, %v2583_v36  ;;  %v2680_v36 = vmul.f32 %v8091_v17, %v2670_v44 }
 0xe0a   :  { %6100 = vset.pattern.permute.xlu2 %v10975_v30  ;;  %v2625_v42 = vsel %vm406_vm0, %v2621_v54, 0.0 }
 0xe0b   :  { %3034 = vrot.lane.b32.xlu1 %v7167_v26, %s6359_s26  ;;  %3090 = vperm.xlu2 %6100, %v7743_v16   ;;  %v2627_v16 = vmul.f32 %v6840_v31, %v2625_v42  ;;  %v2617_v54 = vadd.f32 %v2615_v47, %v2605_v51  ;;  %v2692_v42 = vmul.f32 %v2690_v7, %v10997_v21 }
 0xe0c   :  { %6096 = vset.pattern.permute.xlu1 %v6446_v20  ;;  %v2647_v20 = vsel %vm706_vm10, %v8123_v32, 0.0  ;;  %v8189_v32 = vld [vmem:[%s10771_s4 + $0x8] sm:$0xff]  ;;  %v2703_v51 = vmul.f32 %v8131_v12, %v2693_v58 }
 0xe0d   :  { %v2637_v48 = vmul.f32 %v8119_v11, %v2627_v16  ;;  %v2649_v0 = vmul.f32 %v2647_v20, %v10994_v24  ;;  %v2682_v16 = vadd.f32 %v2680_v36, %v2660_v60 }
 0xe0f   :  { %v2639_v43 = vadd.f32 %v2637_v48, %v2617_v54  ;;  %v2659_v3 = vmul.f32 %v8082_v8, %v2649_v0  ;;  %v8224_v48 = vld [vmem:[%s10769_s2 + $0x8] sm:$0xff]  ;;  %v8285_v8 = vld [vmem:[#allocation4 + $0xe0] sm:$0xff] }
 0xe11   :  { %v2665_v25 = vpop.permute.xlu1 %2664  ;;  %v2661_v59 = vadd.f32 %v2659_v3, %v2639_v43 }
 0xe12   :  { %v2669_v9 = vsel %vm729_vm11, %v2665_v25, 0.0  ;;  %v8212_v25 = vpop.permute.xlu0 %2707 }
 0xe13   :  { %3054 = vrot.lane.b32.xlu1 %v7163_v34, %s6360_s28  ;;  %3094 = vperm.xlu2 %6100, %v8189_v32   ;;  %v2671_v10 = vmul.f32 %v10995_v39, %v2669_v9  ;;  %11000 = vst [vmem:[#allocation45_spill] sm:$0xff] %v8212_v25  ;;  %v8215_v9 = vpop.permute.xlu2 %2909 }
 0xe15   :  { %v2681_v27 = vmul.f32 %v8197_v2, %v2671_v10 }
 0xe17   :  { %v2683_v14 = vadd.f32 %v2681_v27, %v2661_v59 }
 0xe19   :  { %v8206_v40 = vpop.permute.xlu1 %2695  ;;  %v2705_v47 = vadd.f32 %v2703_v51, %v2683_v14 }
 0xe1a   :  { %10999 = vst [vmem:[#allocation22_spill] sm:$0xff] %v8206_v40  ;;  %v2702_v46 = vmul.f32 %v8206_v40, %v2692_v42  ;;  %v2899_v36 = vpop.permute.xlu0 %2898  ;;  %v8287_v40 = vld [vmem:[#allocation4 + $0xc0] sm:$0xff] }
 0xe1b   :  { %3065 = vperm.xlu1 %6096, %v7971_v35   ;;  %v8229_v10 = vpop.permute.xlu2 %2920  ;;  %v2904_v11 = vsel %vm580_vm4, 0.0, %v2899_v36  ;;  %v2804_v36 = vld [vmem:[#allocation4 + $0x1d0] sm:$0xff] }
 0xe1c   :  { %v2704_v20 = vadd.f32 %v2702_v46, %v2682_v16  ;;  %2855 = vmatpush.msra.mxu2 %v2804_v36  ;;  %v8324_v36 = vld [vmem:[#allocation4 + $0x40] sm:$0xff] }
 0xe1e   :  { %v2714_v19 = vadd.f32 %v8212_v25, %v2704_v20  ;;  %v8277_v25 = vld [vmem:[#allocation4 + $0x100] sm:$0xff] }
 0xe20   :  { %v2716_v0 = vmax.f32 %v2714_v19, 0.0  ;;  %v8251_v19 = vld [vmem:[#allocation4 + $0x1e0] sm:$0xff] }
 0xe21   :  { %2810 = vmatpush.msra.mxu0 %v8251_v19 }
 0xe22   :  { %v8217_v28 = vpop.permute.xlu1 %2711  ;;  %v8243_v58 = vpop.permute.xlu0 %2913 }
 0xe23   :  { %11001 = vst [vmem:[#allocation46_spill] sm:$0xff] %v8217_v28  ;;  %v2715_v38 = vadd.f32 %v8217_v28, %v2705_v47  ;;  %6099 = vset.pattern.permute.xlu1 %v10975_v30  ;;  %v11003_v30 = vld [vmem:[#allocation23_spill] sm:$0xff]  ;;  %v8235_v43 = vpop.permute.xlu2 %2933  ;;  %v8254_v47 = vld [vmem:[#allocation4 + $0x1c0] sm:$0xff] }
 0xe24   :  { %3081 = vperm.xlu1 %6099, %v8224_v48   ;;  %2811 = vmatpush.msra.mxu0 %v8254_v47  ;;  %v8274_v28 = vld [vmem:[#allocation4 + $0x120] sm:$0xff] }
 0xe25   :  { %v2717_v44 = vmax.f32 %v2715_v38, 0.0  ;;  %v8257_v38 = vld [vmem:[#allocation4 + $0x1a0] sm:$0xff] }
 0xe26   :  { %2812 = vmatpush.msra.mxu0 %v8257_v38 }
 0xe27   :  { %v2718_v7 = vpack.c.bf16 %v2717_v44, %v2716_v0  ;;  %v8262_v44 = vld [vmem:[#allocation4 + $0x180] sm:$0xff] }
 0xe28   :  { %2813 = vmatpush.msra.mxu0 %v8262_v44 }
 0xe29   :  { %2739 = vmatpush.bf16.msra.mxu3 %v2718_v7 }
 0xe2a   :  { %v8227_v54 = vpop.permute.xlu1 %2724  ;;  %v2941_v14 = vpop.permute.xlu0 %2940  ;;  %2814 = vmatpush.msra.mxu0 %v8267_v57 }
 0xe2b   :  { %11002 = vst [vmem:[#allocation47_spill] sm:$0xff] %v8227_v54  ;;  %v8237_v42 = vpop.permute.xlu2 %2951  ;;  %v2946_v29 = vsel %vm626_vm7, 0.0, %v2941_v14  ;;  %v8331_v14 = vld [vmem:[#allocation4 + $0x188] sm:$0xff] }
 0xe2c   :  { %5699 = vmatmul.msk.bf16.vlgmr.msra.gmra.mxu3 %vm795_vm13, %v8201_v45  ;;  %3097 = vrot.lane.b32.xlu1 %v11003_v30, %s6344_s22  ;;  %11007 = vst [vmem:[#allocation51_spill] sm:$0xff] %v8331_v14 }
 0xe2d   :  { %2815 = vmatpush.msra.mxu0 %v8270_v37  ;;  %2876 = vmatpush.msrb.mxu3 %v2809_v63  ;;  %v2801_v63 = vld [vmem:[#allocation4 + $0x1b8] sm:$0xff] }
 0xe2f   :  { %2816 = vmatpush.msra.mxu0 %v8274_v28  ;;  %2877 = vmatpush.msrb.mxu3 %v2805_v5 }
 0xe31   :  { %2817 = vmatpush.msra.mxu0 %v8277_v25  ;;  %2878 = vmatpush.msrb.mxu3 %v2801_v63  ;;  %v2792_v63 = vld [vmem:[#allocation4 + $0x170] sm:$0xff] }
 0xe32   :  { %v2901_v60 = vpop.permute.xlu1 %2900  ;;  %v8264_v7 = vpop.permute.xlu0 %2955 }
 0xe33   :  { %v8239_v27 = vpop.permute.xlu2 %2964  ;;  %2818 = vmatpush.msra.mxu0 %v8285_v8  ;;  %v2905_v18 = vsel %vm580_vm4, 0.0, %v2901_v60  ;;  %2879 = vmatpush.msrb.mxu3 %v2797_v41 }
 0xe35   :  { %2819 = vmatpush.msra.mxu0 %v8287_v40 }
 0xe37   :  { %2820 = vmatpush.msra.mxu0 %v8295_v56 }
 0xe39   :  { %2821 = vmatpush.msra.mxu0 %v8301_v62 }
 0xe3a   :  { %v2919_v15 = vpop.permute.xlu1 %2918  ;;  %v8283_v2 = vpop.permute.xlu0 %2985 }
 0xe3b   :  { %v8245_v59 = vpop.permute.xlu2 %2977  ;;  %v2924_v6 = vsel %vm603_vm5, 0.0, %v2919_v15  ;;  %v2906_v15 = vmul.f32 %v2904_v11, %v6830_v23  ;;  %2822 = vmatpush.msra.mxu0 %v8310_v13  ;;  %v2800_v11 = vld [vmem:[#allocation4 + $0x1b0] sm:$0xff] }
 0xe3c   :  { %v2926_v49 = vmul.f32 %v6823_v22, %v2924_v6  ;;  %v8316_v6 = vld [vmem:[#allocation4 + $0x1a8] sm:$0xff]  ;;  %2856 = vmatpush.msra.mxu2 %v2800_v11  ;;  %v8335_v11 = vld [vmem:[#allocation4 + $0x20] sm:$0xff] }
 0xe3d   :  { %11006 = vst [vmem:[#allocation50_spill] sm:$0xff] %v8316_v6  ;;  %2834 = vmatpush.msra.mxu1 %v8316_v6  ;;  %v2916_v5 = vmul.f32 %v8215_v9, %v2906_v15  ;;  %2823 = vmatpush.msra.mxu0 %v8324_v36  ;;  %v2793_v6 = vld [vmem:[#allocation4 + $0x178] sm:$0xff] }
 0xe3e   :  { %2880 = vmatpush.msrb.mxu3 %v2793_v6  ;;  %v2969_v6 = vsel %vm649_vm8, 0.0, %v8239_v27 }
 0xe3f   :  { %2835 = vmatpush.msra.mxu1 %v8331_v14  ;;  %2824 = vmatpush.msra.mxu0 %v8335_v11  ;;  %v2971_v27 = vmul.f32 %v6826_v61, %v2969_v6  ;;  %v8383_v6 = vld [vmem:[#allocation4 + $0xa8] sm:$0xff] }
 0xe42   :  { %v2930_v3 = vpop.permute.xlu1 %2929  ;;  %v8318_v50 = vpop.permute.xlu0 %3012 }
 0xe43   :  { %v8249_v51 = vpop.permute.xlu2 %2999  ;;  %v2936_v4 = vmul.f32 %v2930_v3, %v2926_v49  ;;  %v2925_v49 = vsel %vm603_vm5, 0.0, %v8229_v10  ;;  %v2907_v3 = vmul.f32 %v2905_v18, %v6830_v23  ;;  %v8340_v18 = vld [vmem:[#allocation4 + $0x168] sm:$0xff] }
 0xe44   :  { %11008 = vst [vmem:[#allocation52_spill] sm:$0xff] %v8340_v18  ;;  %v2927_v23 = vmul.f32 %v6823_v22, %v2925_v49  ;;  %2836 = vmatpush.msra.mxu1 %v8340_v18  ;;  %v2789_v49 = vld [vmem:[#allocation4 + $0x158] sm:$0xff]  ;;  %v2784_v18 = vld [vmem:[#allocation4 + $0x130] sm:$0xff] }
 0xe45   :  { %v2938_v9 = vadd.f32 %v2936_v4, %v2916_v5  ;;  %v8348_v4 = vld [vmem:[#allocation4 + $0x148] sm:$0xff]  ;;  %2881 = vmatpush.msrb.mxu3 %v2789_v49 }
 0xe46   :  { %11009 = vst [vmem:[#allocation53_spill] sm:$0xff] %v8348_v4  ;;  %2837 = vmatpush.msra.mxu1 %v8348_v4  ;;  %v2937_v22 = vmul.f32 %v8235_v43, %v2927_v23  ;;  %v2776_v23 = vld [vmem:[#allocation4 + $0xf0] sm:$0xff]  ;;  %v11011_v49 = vld [vmem:[#allocation25_spill] sm:$0xff] }
 0xe4a   :  { %v8241_v46 = vpop.permute.xlu1 %2942  ;;  %v3033_v43 = vpop.permute.xlu0 %3032 }
 0xe4b   :  { %v8272_v45 = vpop.permute.xlu2 %3010  ;;  %v2947_v53 = vsel %vm626_vm7, 0.0, %v8241_v46  ;;  %v2796_v46 = vld [vmem:[#allocation4 + $0x190] sm:$0xff] }
 0xe4c   :  { %2857 = vmatpush.msra.mxu2 %v2796_v46  ;;  %v2949_v15 = vmul.f32 %v2947_v53, %v6845_v33  ;;  %v8346_v46 = vld [vmem:[#allocation4] sm:$0xff]  ;;  %v2788_v53 = vld [vmem:[#allocation4 + $0x150] sm:$0xff] }
 0xe4d   :  { %2825 = vmatpush.msra.mxu0 %v8346_v46 }
 0xe4e   :  { %2858 = vmatpush.msra.mxu2 %v2792_v63  ;;  %v2785_v63 = vld [vmem:[#allocation4 + $0x138] sm:$0xff] }
 0xe4f   :  { %2882 = vmatpush.msrb.mxu3 %v2785_v63  ;;  %v2773_v63 = vld [vmem:[#allocation4 + $0xd8] sm:$0xff] }
 0xe50   :  { %2859 = vmatpush.msra.mxu2 %v2788_v53  ;;  %v8364_v53 = vld [vmem:[#allocation4 + $0xe8] sm:$0xff] }
 0xe52   :  { %v2963_v16 = vpop.permute.xlu1 %2962  ;;  %2860 = vmatpush.msra.mxu2 %v2784_v18 }
 0xe53   :  { %v8293_v17 = vpop.permute.xlu2 %3025  ;;  %v2968_v60 = vsel %vm649_vm8, 0.0, %v2963_v16  ;;  %v2948_v16 = vmul.f32 %v2946_v29, %v6845_v33  ;;  %v8354_v33 = vld [vmem:[#allocation4 + $0x128] sm:$0xff] }
 0xe54   :  { %v2970_v10 = vmul.f32 %v6826_v61, %v2968_v60  ;;  %v2917_v60 = vmul.f32 %v8243_v58, %v2907_v3  ;;  %v8359_v58 = vld [vmem:[#allocation4 + $0x108] sm:$0xff]  ;;  %2838 = vmatpush.msra.mxu1 %v8354_v33  ;;  %v2781_v3 = vld [vmem:[#allocation4 + $0x118] sm:$0xff] }
 0xe55   :  { %v2958_v41 = vmul.f32 %v8237_v42, %v2948_v16  ;;  %v2959_v42 = vmul.f32 %v8264_v7, %v2949_v15  ;;  %v3016_v7 = vsel %vm706_vm10, %v8272_v45, 0.0  ;;  %v2992_v15 = vmul.f32 %v8283_v2, %v7163_v34  ;;  %2883 = vmatpush.msrb.mxu3 %v2781_v3  ;;  %v2768_v3 = vld [vmem:[#allocation4 + $0xb0] sm:$0xff] }
 0xe56   :  { %2839 = vmatpush.msra.mxu1 %v8359_v58  ;;  %v2997_v45 = vmul.f32 %v6840_v31, %v11011_v49  ;;  %v3048_v49 = vpop.permute.xlu0 %3047 }
 0xe57   :  { %v2960_v16 = vadd.f32 %v2958_v41, %v2938_v9  ;;  %v2777_v9 = vld [vmem:[#allocation4 + $0xf8] sm:$0xff]  ;;  %v2772_v41 = vld [vmem:[#allocation4 + $0xd0] sm:$0xff] }
 0xe58   :  { %2840 = vmatpush.msra.mxu1 %v8364_v53  ;;  %2884 = vmatpush.msrb.mxu3 %v2777_v9  ;;  %v3017_v9 = vsel %vm706_vm10, %v8318_v50, 0.0  ;;  %v2761_v50 = vld [vmem:[#allocation4 + $0x78] sm:$0xff] }
 0xe5a   :  { %v8247_v20 = vpop.permute.xlu1 %2973  ;;  %2885 = vmatpush.msrb.mxu3 %v2773_v63 }
 0xe5b   :  { %v8343_v29 = vpop.permute.xlu2 %3043  ;;  %v2980_v5 = vmul.f32 %v8247_v20, %v2970_v10  ;;  %v2780_v20 = vld [vmem:[#allocation4 + $0x110] sm:$0xff]  ;;  %v2939_v10 = vadd.f32 %v2937_v22, %v2917_v60  ;;  %v8372_v22 = vld [vmem:[#allocation4 + $0xc8] sm:$0xff]  ;;  %v11010_v60 = vld [vmem:[#allocation24_spill] sm:$0xff] }
 0xe5c   :  { %2861 = vmatpush.msra.mxu2 %v2780_v20  ;;  %v3018_v20 = vmul.f32 %v3016_v7, %v10994_v24  ;;  %2841 = vmatpush.msra.mxu1 %v8372_v22 }
 0xe5d   :  { %v2982_v4 = vadd.f32 %v2980_v5, %v2960_v16  ;;  %v2961_v18 = vadd.f32 %v2959_v42, %v2939_v10  ;;  %v2996_v5 = vmul.f32 %v6840_v31, %v11010_v60  ;;  %v2981_v16 = vmul.f32 %v8245_v59, %v2971_v27 }
 0xe5e   :  { %2862 = vmatpush.msra.mxu2 %v2776_v23  ;;  %v2769_v23 = vld [vmem:[#allocation4 + $0xb8] sm:$0xff]  ;;  %2842 = vmatpush.msra.mxu1 %v8383_v6 }
 0xe5f   :  { %v2994_v34 = vadd.f32 %v2992_v15, %v2982_v4  ;;  %v3006_v59 = vmul.f32 %v8249_v51, %v2996_v5  ;;  %v2983_v27 = vadd.f32 %v2981_v16, %v2961_v18  ;;  %v2765_v15 = vld [vmem:[#allocation4 + $0x98] sm:$0xff]  ;;  %2886 = vmatpush.msrb.mxu3 %v2769_v23  ;;  %v2760_v5 = vld [vmem:[#allocation4 + $0x70] sm:$0xff] }
 0xe60   :  { %2863 = vmatpush.msra.mxu2 %v2772_v41 }
 0xe61   :  { %v3008_v51 = vadd.f32 %v3006_v59, %v2994_v34  ;;  %2887 = vmatpush.msrb.mxu3 %v2765_v15  ;;  %v2756_v34 = vld [vmem:[#allocation4 + $0x50] sm:$0xff]  ;;  %v2753_v15 = vld [vmem:[#allocation4 + $0x38] sm:$0xff] }
 0xe62   :  { %2864 = vmatpush.msra.mxu2 %v2768_v3 }
 0xe63   :  { %v8259_v0 = vpop.permute.xlu1 %2989  ;;  %v3057_v10 = vpop.permute.xlu2 %3056  ;;  %2888 = vmatpush.msrb.mxu3 %v2761_v50 }
 0xe64   :  { %v2993_v2 = vmul.f32 %v8259_v0, %v7167_v26  ;;  %v8390_v26 = vld [vmem:[#allocation4 + $0x88] sm:$0xff]  ;;  %v2764_v0 = vld [vmem:[#allocation4 + $0x90] sm:$0xff] }
 0xe65   :  { %2843 = vmatpush.msra.mxu1 %v8390_v26  ;;  %2865 = vmatpush.msra.mxu2 %v2764_v0 }
 0xe66   :  { %v2995_v41 = vadd.f32 %v2993_v2, %v2983_v27  ;;  %v3061_v27 = vsel %vm752_vm12, %v3057_v10, 0.0 }
 0xe67   :  { %2866 = vmatpush.msra.mxu2 %v2760_v5  ;;  %v3063_v10 = vmul.f32 %v3061_v27, %v10997_v21  ;;  %v3078_v5 = vpop.permute.xlu0 %3077 }
 0xe69   :  { %2867 = vmatpush.msra.mxu2 %v2756_v34 }
 0xe6c   :  { %v8280_v12 = vpop.permute.xlu1 %3003 }
 0xe6d   :  { %v3007_v4 = vmul.f32 %v8280_v12, %v2997_v45 }
 0xe6f   :  { %v3009_v63 = vadd.f32 %v3007_v4, %v2995_v41  ;;  %v3070_v41 = vpop.permute.xlu2 %3069 }
 0xe75   :  { %v8307_v1 = vpop.permute.xlu1 %3021 }
 0xe76   :  { %v3028_v7 = vmul.f32 %v8307_v1, %v3018_v20  ;;  %v8398_v1 = vld [vmem:[#allocation4 + $0x68] sm:$0xff] }
 0xe77   :  { %v8403_v20 = vld [vmem:[#allocation4 + $0x48] sm:$0xff]  ;;  %2844 = vmatpush.msra.mxu1 %v8398_v1 }
 0xe78   :  { %v3030_v16 = vadd.f32 %v3028_v7, %v3008_v51  ;;  %v2749_v51 = vld [vmem:[#allocation4 + $0x18] sm:$0xff] }
 0xe79   :  { %2845 = vmatpush.msra.mxu1 %v8403_v20 }
 0xe7d   :  { %v3035_v14 = vpop.permute.xlu1 %3034 }
 0xe7e   :  { %v3039_v60 = vsel %vm729_vm11, %v3035_v14, 0.0  ;;  %v3038_v14 = vsel %vm729_vm11, %v3033_v43, 0.0  ;;  %v3019_v43 = vmul.f32 %v3017_v9, %v10994_v24  ;;  %v8411_v9 = vld [vmem:[#allocation4 + $0x28] sm:$0xff] }
 0xe7f   :  { %v3041_v18 = vmul.f32 %v10995_v39, %v3039_v60  ;;  %v3040_v45 = vmul.f32 %v10995_v39, %v3038_v14  ;;  %v2752_v14 = vld [vmem:[#allocation4 + $0x30] sm:$0xff]  ;;  %2846 = vmatpush.msra.mxu1 %v8411_v9 }
 0xe80   :  { %v3029_v3 = vmul.f32 %v8293_v17, %v3019_v43  ;;  %2868 = vmatpush.msra.mxu2 %v2752_v14  ;;  %v8414_v17 = vld [vmem:[#allocation4 + $0x8] sm:$0xff] }
 0xe81   :  { %v3050_v60 = vmul.f32 %v8343_v29, %v3040_v45  ;;  %v3051_v23 = vmul.f32 %v3048_v49, %v3041_v18  ;;  %v2748_v29 = vld [vmem:[#allocation4 + $0x10] sm:$0xff]  ;;  %2847 = vmatpush.msra.mxu1 %v8414_v17  ;;  %v3073_v49 = vmul.f32 %v3070_v41, %v3063_v10 }
 0xe82   :  { %v3031_v7 = vadd.f32 %v3029_v3, %v3009_v63  ;;  %2869 = vmatpush.msra.mxu2 %v2748_v29  ;;  %v6448_v3 = vmov 64   ;;  %v11016_v29 = vmov 7  }
 0xe83   :  { %v3052_v0 = vadd.f32 %v3050_v60, %v3030_v16  ;;  %6103 = vset.pattern.permute.xlu1 %v6448_v3  ;;  %v6449_v60 = vmov 65  }
 0xe84   :  { %v3053_v18 = vadd.f32 %v3051_v23, %v3031_v7  ;;  %3149 = vperm.xlu1 %6103, %v7971_v35   ;;  %v6450_v23 = vmov 66  }
 0xe85   :  { %v3055_v42 = vpop.permute.xlu1 %3054 }
 0xe86   :  { %v3060_v12 = vsel %vm752_vm12, %v3055_v42, 0.0  ;;  %v2757_v42 = vld [vmem:[#allocation4 + $0x58] sm:$0xff]  ;;  %v3075_v43 = vadd.f32 %v3073_v49, %v3053_v18 }
 0xe87   :  { %v3062_v2 = vmul.f32 %v3060_v12, %v10997_v21  ;;  %2889 = vmatpush.msrb.mxu3 %v2757_v42  ;;  %v6447_v42 = vmov 63  }
 0xe88   :  { %6102 = vset.pattern.permute.xlu0 %v6447_v42  ;;  %6101 = vset.pattern.permute.xlu2 %v6447_v42 }
 0xe89   :  { %2890 = vmatpush.msrb.mxu3 %v2753_v15  ;;  %3133 = vperm.xlu0 %6102, %v8074_v55  }
 0xe8a   :  { %3129 = vperm.xlu2 %6101, %v7971_v35  }
 0xe8b   :  { %2891 = vmatpush.msrb.mxu3 %v2749_v51  ;;  %v8499_v51 = vld [vmem:[%s10769_s2] sm:$0xff] }
 0xe8c   :  { %6107 = vset.pattern.permute.xlu1 %v6450_v23 }
 0xe8d   :  { %v3066_v59 = vpop.permute.xlu1 %3065  ;;  %3193 = vperm.xlu1 %6107, %v7971_v35  }
 0xe8e   :  { %v3072_v4 = vmul.f32 %v3066_v59, %v3062_v2  ;;  %v6451_v59 = vmov 67  }
 0xe90   :  { %v3074_v12 = vadd.f32 %v3072_v4, %v3052_v0  ;;  %v6452_v0 = vmov 68  }
 0xe91   :  { %6106 = vset.pattern.permute.xlu0 %v6449_v60 }
 0xe92   :  { %v3084_v50 = vadd.f32 %v3078_v5, %v3074_v12  ;;  %3175 = vperm.xlu0 %6106, %v8074_v55   ;;  %6104 = vset.pattern.permute.xlu2 %v6448_v3 }
 0xe93   :  { %3153 = vperm.xlu2 %6104, %v8074_v55  }
 0xe94   :  { %v3086_v16 = vmax.f32 %v3084_v50, 0.0 }
 0xe95   :  { %6110 = vset.pattern.permute.xlu1 %v6451_v59 }
 0xe96   :  { %v3082_v45 = vpop.permute.xlu1 %3081  ;;  %3209 = vperm.xlu1 %6110, %v8074_v55  }
 0xe97   :  { %v3085_v63 = vadd.f32 %v3082_v45, %v3075_v43 }
 0xe99   :  { %v3087_v34 = vmax.f32 %v3085_v63, 0.0 }
 0xe9a   :  { %6109 = vset.pattern.permute.xlu0 %v6451_v59 }
 0xe9b   :  { %v3088_v2 = vpack.c.bf16 %v3087_v34, %v3086_v16  ;;  %3205 = vperm.xlu0 %6109, %v7971_v35   ;;  %6105 = vset.pattern.permute.xlu2 %v6449_v60 }
 0xe9c   :  { %3171 = vperm.xlu2 %6105, %v7971_v35  }
 0xe9d   :  { %3109 = vmatpush.bf16.msrb.mxu0 %v3088_v2 }
 0xe9e   :  { %v3098_v35 = vpop.permute.xlu1 %3097 }
 0xea3   :  { %6112 = vset.pattern.permute.xlu0 %v6452_v0 }
 0xea4   :  { %6108 = vset.pattern.permute.xlu2 %v6450_v23  ;;  %3231 = vperm.xlu0 %6112, %v8074_v55  }
 0xea5   :  { %3197 = vperm.xlu2 %6108, %v8074_v55  }
 0xead   :  { %6111 = vset.pattern.permute.xlu2 %v6452_v0 }
 0xeaf   :  { %v2741_v27 = vpop.f32.mrf.mxu3 }
 0xeb0   :  { %v2742_v4 = vadd.f32 %v2741_v27, %v8170_v52 }
 0xeb2   :  { %2826 = vmatmul.f32.vlgmr.msra.gmra.mxu0 %v2742_v4  ;;  %2848 = vmatmul.f32.vlgmr.msra.gmra.mxu1 %v2742_v4 }
 0xeb3   :  { %2870 = vmatmul.f32.vlgmr.msra.gmra.mxu2 %v2742_v4  ;;  %2892 = vmatmul.f32.vlgmr.msrb.gmra.mxu3 %v2742_v4 }
 0xeb4   :  { %3705 = vmatpush.msra.mxu0 %v8251_v19  ;;  %v8441_v19 = vld [vmem:[%s10768_s1] sm:$0xff] }
 0xeb5   :  { %3227 = vperm.xlu2 %6111, %v8441_v19  }
 0xeb6   :  { %3706 = vmatpush.msra.mxu0 %v8254_v47  ;;  %v3091_v47 = vpop.permute.xlu2 %3090 }
 0xeb7   :  { %v2743_v7 = vpop.f32.mrf.mxu3 }
 0xeb8   :  { %v2744_v14 = vadd.f32 %v2743_v7, %v8227_v54  ;;  %3707 = vmatpush.msra.mxu0 %v8257_v38 }
 0xeba   :  { %2829 = vmatmul.f32.gmra.mxu0 %v2744_v14  ;;  %2851 = vmatmul.f32.gmra.mxu1 %v2744_v14 }
 0xebb   :  { %2873 = vmatmul.f32.gmra.mxu2 %v2744_v14  ;;  %2895 = vmatmul.f32.gmra.mxu3 %v2744_v14 }
 0xebc   :  { %3708 = vmatpush.msra.mxu0 %v8262_v44 }
 0xebe   :  { %3709 = vmatpush.msra.mxu0 %v8267_v57  ;;  %v6454_v57 = vmov 70  }
 0xebf   :  { %6116 = vset.pattern.permute.xlu0 %v6454_v57 }
 0xec0   :  { %3710 = vmatpush.msra.mxu0 %v8270_v37  ;;  %v6453_v37 = vmov 69  }
 0xec1   :  { %6114 = vset.pattern.permute.xlu2 %v6453_v37  ;;  %6113 = vset.pattern.permute.xlu1 %v6453_v37 }
 0xec2   :  { %5700 = vmatmul.msk.bf16.vlgmr.msrb.gmra.mxu0 %vm795_vm13, %v3098_v35  ;;  %3253 = vperm.xlu2 %6114, %v8074_v55  }
 0xec3   :  { %3711 = vmatpush.msra.mxu0 %v8274_v28  ;;  %3249 = vperm.xlu1 %6113, %v8441_v19   ;;  %v6455_v28 = vmov 71  }
 0xec5   :  { %3712 = vmatpush.msra.mxu0 %v8277_v25 }
 0xec7   :  { %3713 = vmatpush.msra.mxu0 %v8285_v8 }
 0xec9   :  { %3714 = vmatpush.msra.mxu0 %v8287_v40 }
 0xeca   :  { %6115 = vset.pattern.permute.xlu2 %v6454_v57 }
 0xecb   :  { %3715 = vmatpush.msra.mxu0 %v8295_v56  ;;  %3271 = vperm.xlu2 %6115, %v8441_v19  }
 0xecc   :  { %6117 = vset.pattern.permute.xlu1 %v6455_v28 }
 0xecd   :  { %3716 = vmatpush.msra.mxu0 %v8301_v62 }
 0xecf   :  { %3717 = vmatpush.msra.mxu0 %v8310_v13 }
 0xed1   :  { %3718 = vmatpush.msra.mxu0 %v8324_v36 }
 0xed3   :  { %3719 = vmatpush.msra.mxu0 %v8335_v11  ;;  %6118 = vset.pattern.permute.xlu2 %v6455_v28 }
 0xed5   :  { %3720 = vmatpush.msra.mxu0 %v8346_v46  ;;  %v3095_v46 = vpop.permute.xlu2 %3094 }
 0xee4   :  { %v3130_v10 = vpop.permute.xlu2 %3129 }
 0xeed   :  { %v3154_v18 = vpop.permute.xlu2 %3153 }
 0xef6   :  { %v3172_v12 = vpop.permute.xlu2 %3171  ;;  %v3150_v5 = vpop.permute.xlu1 %3149 }
 0xefb   :  { %v3134_v63 = vpop.permute.xlu0 %3133 }
 0xeff   :  { %v8523_v49 = vpop.permute.xlu2 %3197  ;;  %v3194_v50 = vpop.permute.xlu1 %3193 }
 0xf04   :  { %v3176_v2 = vpop.permute.xlu0 %3175 }
 0xf08   :  { %v8527_v45 = vpop.permute.xlu1 %3209 }
 0xf0d   :  { %v3206_v3 = vpop.permute.xlu0 %3205 }
 0xf0f   :  { %v8525_v43 = vpop.permute.xlu2 %3227 }
 0xf1c   :  { %v8529_v16 = vpop.permute.xlu2 %3253 }
 0xf25   :  { %v8533_v42 = vpop.permute.xlu2 %3271 }
 0xf2f   :  { %v8457_v56 = vpop.f32.mrf.mxu0  ;;  %v8459_v13 = vpop.f32.mrf.mxu1 }
 0xf30   :  { %11012 = vst [vmem:[#allocation24_spill] sm:$0xff] %v8457_v56 }
 0xf31   :  { %11013 = vst [vmem:[#allocation25_spill] sm:$0xff] %v8459_v13 }
 0xf35   :  { %v8531_v34 = vpop.permute.xlu1 %3249 }
 0xf36   :  { %v8461_v8 = vpop.f32.mrf.mxu2  ;;  %v8463_v62 = vpop.f32.mrf.mxu3 }
 0xf37   :  { %11014 = vst [vmem:[#allocation54_spill] sm:$0xff] %v8461_v8  ;;  %v2830_v40 = vpop.f32.mrf.mxu0  ;;  %v2852_v25 = vpop.f32.mrf.mxu1 }
 0xf38   :  { %11015 = vst [vmem:[#allocation55_spill] sm:$0xff] %v8463_v62  ;;  %v11017_v25 = vld [vmem:[#allocation17_spill] sm:$0xff] }
 0xf3e   :  { %v2874_v38 = vpop.f32.mrf.mxu2  ;;  %v2896_v44 = vpop.f32.mrf.mxu3 }
 0xf3f   :  { %v3111_v36 = vpop.f32.mrf.mxu0  ;;  %v11019_v44 = vld [vmem:[#allocation19_spill] sm:$0xff] }
 0xf40   :  { %v8465_v11 = vadd.f32 %v3111_v36, %v3091_v47  ;;  %v11018_v47 = vld [vmem:[#allocation18_spill] sm:$0xff] }
 0xf42   :  { %3216 = vrot.lane.b32.xlu2 %v8465_v11, %s6345_s27  ;;  %3138 = vrot.lane.b32.xlu1 %v8465_v11, %s6341_s18 }
 0xf43   :  { %3118 = vrot.lane.b32.xlu0 %v8465_v11, %s6356_s8 }
 0xf47   :  { %v3113_v15 = vpop.f32.mrf.mxu0 }
 0xf48   :  { %v8473_v41 = vadd.f32 %v3113_v15, %v3095_v46 }
 0xf4a   :  { %3140 = vrot.lane.b32.xlu2 %v8473_v41, %s6341_s18  ;;  %3182 = vrot.lane.b32.xlu1 %v8465_v11, %s6358_s25 }
 0xf4b   :  { %3160 = vrot.lane.b32.xlu0 %v8465_v11, %s6355_s23 }
 0xf52   :  { %3184 = vrot.lane.b32.xlu2 %v8473_v41, %s6358_s25  ;;  %3238 = vrot.lane.b32.xlu1 %v8465_v11, %s6357_s24 }
 0xf53   :  { %3260 = vrot.lane.b32.xlu0 %v8465_v11, %s6359_s26 }
 0xf5a   :  { %3240 = vrot.lane.b32.xlu2 %v8473_v41, %s6357_s24  ;;  %3282 = vrot.lane.b32.xlu1 %v8465_v11, %s6360_s28 }
 0xf5b   :  { %3275 = vperm.xlu0 %6116, %v8074_v55  }
 0xf62   :  { %3297 = vperm.xlu2 %6118, %v8074_v55   ;;  %3120 = vrot.lane.b32.xlu1 %v8473_v41, %s6356_s8  ;;  %v8512_v55 = vld [vmem:[%s10771_s4] sm:$0xff] }
 0xf63   :  { %6119 = vset.pattern.permute.xlu0 %v11016_v29 }
 0xf64   :  { %3305 = vperm.xlu0 %6119, %v8499_v51  }
 0xf6a   :  { %3284 = vrot.lane.b32.xlu2 %v8473_v41, %s6360_s28  ;;  %3162 = vrot.lane.b32.xlu1 %v8473_v41, %s6355_s23 }
 0xf6b   :  { %6121 = vset.pattern.permute.xlu2 %v11016_v29 }
 0xf72   :  { %3218 = vrot.lane.b32.xlu1 %v8473_v41, %s6345_s27  ;;  %3318 = vperm.xlu2 %6121, %v8512_v55  }
 0xf7a   :  { %3262 = vrot.lane.b32.xlu1 %v8473_v41, %s6359_s26  ;;  %3325 = vrot.lane.b32.xlu2 %v11003_v30, %s6456_s7 }
 0xf82   :  { %3293 = vperm.xlu1 %6117, %v8441_v19  }
 0xf8a   :  { %6120 = vset.pattern.permute.xlu1 %v11016_v29 }
 0xf8b   :  { %3309 = vperm.xlu1 %6120, %v8224_v48  }
 0xf93   :  { %3322 = vperm.xlu1 %6120, %v8189_v32   ;;  %v8535_v32 = vpop.permute.xlu0 %3231 }
 0xf9c   :  { %v3217_v23 = vpop.permute.xlu2 %3216 }
 0xfa4   :  { %v3141_v27 = vpop.permute.xlu2 %3140 }
 0xfa5   :  { %v3145_v62 = vsel %vm603_vm5, 0.0, %v3141_v27 }
 0xfac   :  { %v3185_v0 = vpop.permute.xlu2 %3184 }
 0xfad   :  { %v3189_v27 = vsel %vm649_vm8, 0.0, %v3185_v0 }
 0xfb4   :  { %v3139_v48 = vpop.permute.xlu1 %3138  ;;  %v3241_v15 = vpop.permute.xlu2 %3240 }
 0xfb5   :  { %v3119_v4 = vpop.permute.xlu0 %3118  ;;  %v3144_v37 = vsel %vm603_vm5, 0.0, %v3139_v48 }
 0xfb6   :  { %v3124_v57 = vsel %vm580_vm4, 0.0, %v3119_v4  ;;  %v3146_v28 = vmul.f32 %v11017_v25, %v3144_v37  ;;  %v3147_v37 = vmul.f32 %v11017_v25, %v3145_v62 }
 0xfb7   :  { %v3126_v38 = vmul.f32 %v3124_v57, %v11018_v47 }
 0xfb8   :  { %v3156_v29 = vmul.f32 %v3150_v5, %v3146_v28 }
 0xfb9   :  { %v3136_v13 = vmul.f32 %v3130_v10, %v3126_v38  ;;  %v6457_v10 = vmov 72  }
 0xfba   :  { %6123 = vset.pattern.permute.xlu0 %v6457_v10  ;;  %6122 = vset.pattern.permute.xlu2 %v6457_v10 }
 0xfbb   :  { %v3158_v57 = vadd.f32 %v3156_v29, %v3136_v13  ;;  %3357 = vperm.xlu2 %6122, %v8441_v19   ;;  %v3157_v13 = vmul.f32 %v3154_v18, %v3147_v37 }
 0xfbc   :  { %v3183_v60 = vpop.permute.xlu1 %3182  ;;  %v3298_v28 = vpop.permute.xlu2 %3297 }
 0xfbd   :  { %v3161_v14 = vpop.permute.xlu0 %3160  ;;  %v3188_v48 = vsel %vm649_vm8, 0.0, %v3183_v60 }
 0xfbe   :  { %v3166_v40 = vsel %vm626_vm7, 0.0, %v3161_v14 }
 0xfbf   :  { %v3168_v36 = vmul.f32 %v3166_v40, %v11019_v44  ;;  %v3190_v40 = vmul.f32 %v6826_v61, %v3188_v48  ;;  %v3212_v48 = vmul.f32 %v3206_v3, %v8465_v11  ;;  %v3245_v11 = vsel %vm706_vm10, %v3241_v15, 0.0 }
 0xfc0   :  { %v3247_v15 = vmul.f32 %v3245_v11, %v10994_v24 }
 0xfc1   :  { %v3178_v8 = vmul.f32 %v3172_v12, %v3168_v36  ;;  %v3200_v62 = vmul.f32 %v3194_v50, %v3190_v40  ;;  %v6458_v50 = vmov 73  }
 0xfc2   :  { %6124 = vset.pattern.permute.xlu1 %v6458_v50 }
 0xfc3   :  { %v3180_v54 = vadd.f32 %v3178_v8, %v3158_v57  ;;  %v3222_v8 = vsel %vm406_vm0, %v3217_v23, 0.0  ;;  %3377 = vperm.xlu1 %6124, %v8441_v19   ;;  %6125 = vset.pattern.permute.xlu2 %v6458_v50 }
 0xfc4   :  { %v3239_v59 = vpop.permute.xlu1 %3238 }
 0xfc5   :  { %v3202_v38 = vadd.f32 %v3200_v62, %v3180_v54  ;;  %v3244_v36 = vsel %vm706_vm10, %v3239_v59, 0.0  ;;  %v6459_v59 = vmov 74  }
 0xfc6   :  { %v3246_v54 = vmul.f32 %v3244_v36, %v10994_v24 }
 0xfc7   :  { %v3214_v23 = vadd.f32 %v3212_v48, %v3202_v38  ;;  %v3257_v38 = vmul.f32 %v8529_v16, %v3247_v15  ;;  %v11024_v15 = vld [vmem:[#allocation52_spill] sm:$0xff] }
 0xfc8   :  { %v3256_v10 = vmul.f32 %v8531_v34, %v3246_v54 }
 0xfcc   :  { %v8537_v7 = vpop.permute.xlu1 %3282 }
 0xfd4   :  { %v3121_v35 = vpop.permute.xlu1 %3120 }
 0xfd5   :  { %v3125_v46 = vsel %vm580_vm4, 0.0, %v3121_v35 }
 0xfd6   :  { %v3127_v14 = vmul.f32 %v3125_v46, %v11018_v47  ;;  %v3261_v46 = vpop.permute.xlu0 %3260 }
 0xfd7   :  { %v3266_v40 = vsel %vm729_vm11, %v3261_v46, 0.0 }
 0xfd8   :  { %v3137_v5 = vmul.f32 %v3134_v63, %v3127_v14  ;;  %v3191_v63 = vmul.f32 %v6826_v61, %v3189_v27  ;;  %v3268_v62 = vmul.f32 %v10995_v39, %v3266_v40  ;;  %v6463_v40 = vmov 78  }
 0xfda   :  { %v3159_v0 = vadd.f32 %v3157_v13, %v3137_v5  ;;  %v3285_v13 = vpop.permute.xlu2 %3284 }
 0xfdb   :  { %v3289_v34 = vsel %vm752_vm12, %v3285_v13, 0.0  ;;  %v6464_v13 = vmov 79  }
 0xfdc   :  { %v3163_v56 = vpop.permute.xlu1 %3162  ;;  %v3291_v48 = vmul.f32 %v3289_v34, %v10997_v21 }
 0xfdd   :  { %v3167_v4 = vsel %vm626_vm7, 0.0, %v3163_v56  ;;  %v8557_v56 = vld [vmem:[%s10768_s1 + $0x10] sm:$0xff] }
 0xfde   :  { %v3169_v35 = vmul.f32 %v3167_v4, %v11019_v44  ;;  %3361 = vperm.xlu0 %6123, %v8557_v56   ;;  %v3224_v4 = vmul.f32 %v6840_v31, %v3222_v8  ;;  %3381 = vperm.xlu2 %6125, %v8557_v56   ;;  %v3276_v27 = vpop.permute.xlu0 %3275  ;;  %v3301_v16 = vmul.f32 %v3298_v28, %v3291_v48 }
 0xfe0   :  { %v3179_v12 = vmul.f32 %v3176_v2, %v3169_v35  ;;  %v3201_v2 = vmul.f32 %v8523_v49, %v3191_v63  ;;  %v3234_v37 = vmul.f32 %v8525_v43, %v3224_v4  ;;  %v3213_v49 = vmul.f32 %v8527_v45, %v8473_v41 }
 0xfe1   :  { %v6460_v45 = vmov 75  }
 0xfe2   :  { %v3181_v18 = vadd.f32 %v3179_v12, %v3159_v0  ;;  %v3236_v5 = vadd.f32 %v3234_v37, %v3214_v23  ;;  %v3288_v12 = vsel %vm752_vm12, %v8537_v7, 0.0  ;;  %6128 = vset.pattern.permute.xlu1 %v6460_v45  ;;  %v3278_v0 = vmul.f32 %v8533_v42, %v3268_v62  ;;  %v3319_v54 = vpop.permute.xlu2 %3318  ;;  %v8677_v62 = vld [vmem:[%s10767_s0 + $0x10] sm:$0xff] }
 0xfe3   :  { %3421 = vperm.xlu1 %6128, %v8441_v19   ;;  %v6461_v7 = vmov 76   ;;  %v6462_v37 = vmov 77  }
 0xfe4   :  { %v3219_v60 = vpop.permute.xlu1 %3218  ;;  %v3203_v3 = vadd.f32 %v3201_v2, %v3181_v18  ;;  %v3258_v8 = vadd.f32 %v3256_v10, %v3236_v5  ;;  %v11021_v5 = vld [vmem:[#allocation49_spill] sm:$0xff]  ;;  %v11022_v10 = vld [vmem:[#allocation50_spill] sm:$0xff] }
 0xfe5   :  { %v3223_v29 = vsel %vm406_vm0, %v3219_v60, 0.0 }
 0xfe6   :  { %v3225_v14 = vmul.f32 %v6840_v31, %v3223_v29  ;;  %6127 = vset.pattern.permute.xlu0 %v6459_v59  ;;  %v3215_v60 = vadd.f32 %v3213_v49, %v3203_v3  ;;  %6126 = vset.pattern.permute.xlu2 %v6459_v59  ;;  %v3280_v18 = vadd.f32 %v3278_v0, %v3258_v8  ;;  %v3306_v23 = vpop.permute.xlu0 %3305  ;;  %v8712_v8 = vld [vmem:[%s10767_s0 + $0x20] sm:$0xff]  ;;  %v6468_v0 = vmov 28  }
 0xfe7   :  { %3403 = vperm.xlu0 %6127, %v8557_v56   ;;  %3399 = vperm.xlu2 %6126, %v8441_v19  }
 0xfe8   :  { %v3235_v43 = vmul.f32 %v8535_v32, %v3225_v14  ;;  %v3290_v32 = vmul.f32 %v3288_v12, %v10997_v21 }
 0xfea   :  { %v3237_v63 = vadd.f32 %v3235_v43, %v3215_v60  ;;  %v3326_v28 = vpop.permute.xlu2 %3325  ;;  %v11023_v43 = vld [vmem:[#allocation51_spill] sm:$0xff]  ;;  %v8694_v60 = vld [vmem:[%s10767_s0 + $0x28] sm:$0xff] }
 0xfeb   :  { %6131 = vset.pattern.permute.xlu1 %v6461_v7 }
 0xfec   :  { %v3263_v57 = vpop.permute.xlu1 %3262  ;;  %v3259_v4 = vadd.f32 %v3257_v38, %v3237_v63  ;;  %3437 = vperm.xlu1 %6131, %v8557_v56   ;;  %v8730_v38 = vld [vmem:[%s10771_s4 + $0x8] sm:$0xff] }
 0xfed   :  { %v3267_v35 = vsel %vm729_vm11, %v3263_v57, 0.0 }
 0xfee   :  { %v3269_v41 = vmul.f32 %v10995_v39, %v3267_v35  ;;  %v11020_v35 = vld [vmem:[#allocation48_spill] sm:$0xff] }
 0xfef   :  { %6130 = vset.pattern.permute.xlu0 %v6461_v7  ;;  %6129 = vset.pattern.permute.xlu2 %v6460_v45  ;;  %v8706_v45 = vld [vmem:[%s10769_s2 + $0x8] sm:$0xff] }
 0xff0   :  { %v3279_v36 = vmul.f32 %v3276_v27, %v3269_v41  ;;  %3433 = vperm.xlu0 %6130, %v8441_v19   ;;  %3425 = vperm.xlu2 %6129, %v8557_v56   ;;  %v11025_v27 = vld [vmem:[#allocation53_spill] sm:$0xff] }
 0xff2   :  { %v3281_v50 = vadd.f32 %v3279_v36, %v3259_v4  ;;  %v8736_v36 = vld [vmem:[%s10767_s0 + $0x38] sm:$0xff]  ;;  %v6470_v4 = vmov 29  }
 0xff4   :  { %v3294_v46 = vpop.permute.xlu1 %3293  ;;  %v3303_v14 = vadd.f32 %v3301_v16, %v3281_v50  ;;  %6134 = vset.pattern.permute.xlu1 %v6463_v40 }
 0xff5   :  { %v3300_v29 = vmul.f32 %v3294_v46, %v3290_v32  ;;  %3477 = vperm.xlu1 %6134, %v8441_v19   ;;  %v8723_v32 = vld [vmem:[%s10767_s0 + $0x8] sm:$0xff] }
 0xff7   :  { %v3302_v2 = vadd.f32 %v3300_v29, %v3280_v18 }
 0xff8   :  { %6133 = vset.pattern.permute.xlu0 %v6462_v37  ;;  %6132 = vset.pattern.permute.xlu2 %v6462_v37 }
 0xff9   :  { %v3312_v42 = vadd.f32 %v3306_v23, %v3302_v2  ;;  %3459 = vperm.xlu0 %6133, %v8557_v56   ;;  %3455 = vperm.xlu2 %6132, %v8441_v19  }
 0xffb   :  { %v3314_v3 = vmax.f32 %v3312_v42, 0.0 }
 0xffd   :  { %v3310_v59 = vpop.permute.xlu1 %3309 }
 0xffe   :  { %v3313_v11 = vadd.f32 %v3310_v59, %v3303_v14 }
0x1000   :  { %v3315_v57 = vmax.f32 %v3313_v11, 0.0 }
0x1001   :  { %6135 = vset.pattern.permute.xlu2 %v6463_v40  ;;  %6137 = vset.pattern.permute.xlu0 %v6464_v13 }
0x1002   :  { %v3316_v49 = vpack.c.bf16 %v3315_v57, %v3314_v3  ;;  %3481 = vperm.xlu2 %6135, %v8557_v56  }
0x1004   :  { %3337 = vmatpush.bf16.msrb.mxu1 %v3316_v49  ;;  %v6471_v49 = vmov 30  }
0x1007   :  { %5701 = vmatmul.msk.bf16.vlgmr.msrb.gmra.mxu1 %vm795_vm13, %v3326_v28 }
0x1008   :  { %3727 = vmatpush.msra.mxu1 %v11020_v35 }
0x100a   :  { %3728 = vmatpush.msra.mxu1 %v11021_v5  ;;  %6136 = vset.pattern.permute.xlu2 %v6464_v13 }
0x100b   :  { %3499 = vperm.xlu2 %6136, %v8441_v19  }
0x100c   :  { %3729 = vmatpush.msra.mxu1 %v11022_v10 }
0x100e   :  { %3730 = vmatpush.msra.mxu1 %v11023_v43 }
0x1010   :  { %3731 = vmatpush.msra.mxu1 %v11024_v15 }
0x1012   :  { %3732 = vmatpush.msra.mxu1 %v11025_v27 }
0x1014   :  { %3733 = vmatpush.msra.mxu1 %v8354_v33 }
0x1015   :  { %v8688_v12 = vpop.permute.xlu2 %3357 }
0x1016   :  { %3734 = vmatpush.msra.mxu1 %v8359_v58 }
0x1018   :  { %3735 = vmatpush.msra.mxu1 %v8364_v53  ;;  %v6465_v53 = vmov 80  }
0x1019   :  { %6139 = vset.pattern.permute.xlu2 %v6465_v53  ;;  %6138 = vset.pattern.permute.xlu1 %v6465_v53 }
0x101a   :  { %3736 = vmatpush.msra.mxu1 %v8372_v22  ;;  %v3323_v22 = vpop.permute.xlu1 %3322 }
0x101c   :  { %3737 = vmatpush.msra.mxu1 %v8383_v6 }
0x101e   :  { %3738 = vmatpush.msra.mxu1 %v8390_v26 }
0x1020   :  { %3739 = vmatpush.msra.mxu1 %v8398_v1  ;;  %v11026_v1 = vmov 8  }
0x1022   :  { %3740 = vmatpush.msra.mxu1 %v8403_v20  ;;  %v8657_v20 = vld [vmem:[%s10767_s0] sm:$0xff] }
0x1024   :  { %3741 = vmatpush.msra.mxu1 %v8411_v9  ;;  %v6467_v9 = vmov 27  }
0x1026   :  { %3742 = vmatpush.msra.mxu1 %v8414_v17  ;;  %v8668_v17 = vld [vmem:[%s10767_s0 + $0x18] sm:$0xff] }
0x1035   :  { %v8716_v63 = vpop.permute.xlu1 %3377 }
0x1038   :  { %v8699_v41 = vpop.permute.xlu2 %3381 }
0x1041   :  { %v8718_v34 = vpop.permute.xlu2 %3399 }
0x104a   :  { %v8748_v7 = vpop.permute.xlu2 %3425 }
0x1050   :  { %v8756_v48 = vpop.permute.xlu0 %3361 }
0x1053   :  { %v8760_v18 = vpop.permute.xlu2 %3455 }
0x1055   :  { %v8740_v46 = vpop.permute.xlu1 %3421 }
0x1059   :  { %v3404_v2 = vpop.permute.xlu0 %3403 }
0x105c   :  { %v8769_v23 = vpop.permute.xlu2 %3481 }
0x105e   :  { %v8750_v29 = vpop.permute.xlu1 %3437 }
0x1065   :  { %v8778_v42 = vpop.permute.xlu2 %3499 }
0x1067   :  { %v8762_v50 = vpop.permute.xlu1 %3477 }
0x1084   :  { %v3339_v33 = vpop.f32.mrf.mxu1 }
0x1085   :  { %v8618_v58 = vadd.f32 %v3339_v33, %v3319_v54  ;;  %v8776_v54 = vpop.permute.xlu0 %3433 }
0x1087   :  { %3444 = vrot.lane.b32.xlu2 %v8618_v58, %s6345_s27  ;;  %3366 = vrot.lane.b32.xlu1 %v8618_v58, %s6341_s18 }
0x1088   :  { %3346 = vrot.lane.b32.xlu0 %v8618_v58, %s6356_s8 }
0x108c   :  { %v3341_v6 = vpop.f32.mrf.mxu1 }
0x108d   :  { %v8626_v26 = vadd.f32 %v3341_v6, %v3323_v22  ;;  %v8786_v59 = vpop.permute.xlu0 %3459 }
0x108f   :  { %3368 = vrot.lane.b32.xlu2 %v8626_v26, %s6341_s18  ;;  %3410 = vrot.lane.b32.xlu1 %v8618_v58, %s6358_s25 }
0x1090   :  { %3388 = vrot.lane.b32.xlu0 %v8618_v58, %s6355_s23 }
0x1097   :  { %3412 = vrot.lane.b32.xlu2 %v8626_v26, %s6358_s25  ;;  %3466 = vrot.lane.b32.xlu1 %v8618_v58, %s6357_s24 }
0x1098   :  { %3488 = vrot.lane.b32.xlu0 %v8618_v58, %s6359_s26 }
0x109f   :  { %3468 = vrot.lane.b32.xlu2 %v8626_v26, %s6357_s24  ;;  %3510 = vrot.lane.b32.xlu1 %v8618_v58, %s6360_s28 }
0x10a0   :  { %3503 = vperm.xlu0 %6137, %v8557_v56  }
0x10a7   :  { %3512 = vrot.lane.b32.xlu2 %v8626_v26, %s6360_s28  ;;  %3348 = vrot.lane.b32.xlu1 %v8626_v26, %s6356_s8 }
0x10a8   :  { %6140 = vset.pattern.permute.xlu0 %v11026_v1 }
0x10a9   :  { %3533 = vperm.xlu0 %6140, %v8499_v51  }
0x10af   :  { %3525 = vperm.xlu2 %6139, %v8557_v56   ;;  %3390 = vrot.lane.b32.xlu1 %v8626_v26, %s6355_s23 }
0x10b1   :  { %3793 = vrot.lane.b32.xlu0 %v8657_v20, %s6466_s11 }
0x10b2   :  { %6144 = vset.pattern.permute.xlu0 %v6467_v9 }
0x10b7   :  { %6142 = vset.pattern.permute.xlu2 %v11026_v1  ;;  %3446 = vrot.lane.b32.xlu1 %v8626_v26, %s6345_s27 }
0x10b8   :  { %3546 = vperm.xlu2 %6142, %v8512_v55   ;;  %v8684_v55 = vld [vmem:[%s10767_s0 + $0x30] sm:$0xff] }
0x10b9   :  { %3799 = vrot.lane.b32.xlu0 %v8668_v17, %s6466_s11 }
0x10bf   :  { %3490 = vrot.lane.b32.xlu1 %v8626_v26, %s6359_s26 }
0x10c0   :  { %3797 = vrot.lane.b32.xlu2 %v8677_v62, %s6466_s11 }
0x10c1   :  { %6143 = vset.pattern.permute.xlu2 %v6467_v9  ;;  %3805 = vrot.lane.b32.xlu0 %v8684_v55, %s6466_s11 }
0x10c7   :  { %3521 = vperm.xlu1 %6138, %v8441_v19  }
0x10c8   :  { %3803 = vrot.lane.b32.xlu2 %v8694_v60, %s6466_s11 }
0x10c9   :  { %3839 = vperm.xlu0 %6144, %v8557_v56  }
0x10cf   :  { %6141 = vset.pattern.permute.xlu1 %v11026_v1 }
0x10d0   :  { %3835 = vperm.xlu2 %6143, %v8441_v19   ;;  %3537 = vperm.xlu1 %6141, %v8706_v45  }
0x10d1   :  { %3858 = vrot.lane.b32.xlu0 %v8712_v8, %s6456_s7 }
0x10d2   :  { %6148 = vset.pattern.permute.xlu0 %v6470_v4 }
0x10d8   :  { %3852 = vrot.lane.b32.xlu2 %v8723_v32, %s6456_s7  ;;  %3550 = vperm.xlu1 %6141, %v8730_v38  }
0x10d9   :  { %6146 = vset.pattern.permute.xlu2 %v6468_v0  ;;  %3864 = vrot.lane.b32.xlu0 %v8736_v36, %s6456_s7 }
0x10e0   :  { %3856 = vrot.lane.b32.xlu2 %v8668_v17, %s6456_s7  ;;  %3795 = vrot.lane.b32.xlu1 %v8723_v32, %s6466_s11 }
0x10e1   :  { %6145 = vset.pattern.permute.xlu1 %v6468_v0  ;;  %3914 = vrot.lane.b32.xlu0 %v8657_v20, %s6469_s20  ;;  %v3445_v11 = vpop.permute.xlu2 %3444 }
0x10e8   :  { %3862 = vrot.lane.b32.xlu2 %v8684_v55, %s6456_s7  ;;  %3801 = vrot.lane.b32.xlu1 %v8712_v8, %s6466_s11 }
0x10e9   :  { %3920 = vrot.lane.b32.xlu0 %v8668_v17, %s6469_s20  ;;  %v3369_v40 = vpop.permute.xlu2 %3368 }
0x10ea   :  { %v3373_v9 = vsel %vm603_vm5, 0.0, %v3369_v40 }
0x10f0   :  { %3895 = vperm.xlu2 %6146, %v8557_v56   ;;  %3807 = vrot.lane.b32.xlu1 %v8736_v36, %s6466_s11 }
0x10f1   :  { %3926 = vrot.lane.b32.xlu0 %v8684_v55, %s6469_s20  ;;  %v3413_v13 = vpop.permute.xlu2 %3412 }
0x10f2   :  { %v3417_v40 = vsel %vm649_vm8, 0.0, %v3413_v13 }
0x10f8   :  { %3918 = vrot.lane.b32.xlu2 %v8677_v62, %s6469_s20  ;;  %3850 = vrot.lane.b32.xlu1 %v8657_v20, %s6456_s7 }
0x10f9   :  { %v3367_v16 = vpop.permute.xlu1 %3366  ;;  %6147 = vset.pattern.permute.xlu2 %v6470_v4  ;;  %3960 = vperm.xlu0 %6148, %v8557_v56  }
0x10fa   :  { %v3347_v3 = vpop.permute.xlu0 %3346  ;;  %v3372_v5 = vsel %vm603_vm5, 0.0, %v3367_v16 }
0x10fb   :  { %v3352_v10 = vsel %vm580_vm4, 0.0, %v3347_v3  ;;  %v3374_v15 = vmul.f32 %v11017_v25, %v3372_v5 }
0x10fc   :  { %v3354_v27 = vmul.f32 %v3352_v10, %v11018_v47  ;;  %v3469_v10 = vpop.permute.xlu2 %3468 }
0x10fd   :  { %v3384_v22 = vmul.f32 %v8716_v63, %v3374_v15 }
0x10fe   :  { %v3364_v6 = vmul.f32 %v8688_v12, %v3354_v27  ;;  %v6472_v27 = vmov 31  }
0x1100   :  { %3924 = vrot.lane.b32.xlu2 %v8694_v60, %s6469_s20  ;;  %3854 = vrot.lane.b32.xlu1 %v8677_v62, %s6456_s7 }
0x1101   :  { %v3411_v14 = vpop.permute.xlu1 %3410  ;;  %3987 = vrot.lane.b32.xlu0 %v8712_v8, %s6358_s25 }
0x1102   :  { %v3389_v28 = vpop.permute.xlu0 %3388  ;;  %v3416_v0 = vsel %vm649_vm8, 0.0, %v3411_v14  ;;  %6151 = vset.pattern.permute.xlu0 %v6472_v27 }
0x1103   :  { %v3394_v43 = vsel %vm626_vm7, 0.0, %v3389_v28  ;;  %v3386_v28 = vadd.f32 %v3384_v22, %v3364_v6 }
0x1104   :  { %v3396_v33 = vmul.f32 %v3394_v43, %v11019_v44 }
0x1106   :  { %v3406_v16 = vmul.f32 %v8718_v34, %v3396_v33  ;;  %v3450_v33 = vsel %vm406_vm0, %v3445_v11, 0.0 }
0x1108   :  { %3956 = vperm.xlu2 %6147, %v8441_v19   ;;  %3860 = vrot.lane.b32.xlu1 %v8694_v60, %s6456_s7  ;;  %v3408_v5 = vadd.f32 %v3406_v16, %v3386_v28  ;;  %v6473_v16 = vmov 32  }
0x1109   :  { %v3467_v37 = vpop.permute.xlu1 %3466  ;;  %3993 = vrot.lane.b32.xlu0 %v8736_v36, %s6358_s25 }
0x110a   :  { %v3472_v22 = vsel %vm706_vm10, %v3467_v37, 0.0  ;;  %v3489_v6 = vpop.permute.xlu0 %3488 }
0x1110   :  { %3981 = vrot.lane.b32.xlu2 %v8723_v32, %s6358_s25  ;;  %3891 = vperm.xlu1 %6145, %v8441_v19  }
0x1111   :  { %v8796_v57 = vpop.permute.xlu1 %3510  ;;  %6150 = vset.pattern.permute.xlu2 %v6471_v49  ;;  %4044 = vperm.xlu0 %6151, %v8441_v19  }
0x1118   :  { %3985 = vrot.lane.b32.xlu2 %v8668_v17, %s6358_s25  ;;  %3916 = vrot.lane.b32.xlu1 %v8723_v32, %s6469_s20 }
0x1119   :  { %v3349_v35 = vpop.permute.xlu1 %3348  ;;  %6149 = vset.pattern.permute.xlu1 %v6471_v49  ;;  %v3375_v49 = vmul.f32 %v11017_v25, %v3373_v9 }
0x111a   :  { %v3353_v53 = vsel %vm580_vm4, 0.0, %v3349_v35  ;;  %v3418_v35 = vmul.f32 %v6826_v61, %v3416_v0  ;;  %v3474_v0 = vmul.f32 %v3472_v22, %v10994_v24 }
0x111b   :  { %v3355_v3 = vmul.f32 %v3353_v53, %v11018_v47  ;;  %v3385_v34 = vmul.f32 %v8699_v41, %v3375_v49  ;;  %v3494_v49 = vsel %vm729_vm11, %v3489_v6, 0.0 }
0x111c   :  { %v3428_v14 = vmul.f32 %v8740_v46, %v3418_v35  ;;  %v3440_v46 = vmul.f32 %v8776_v54, %v8618_v58  ;;  %v3473_v58 = vsel %vm706_vm10, %v3469_v10, 0.0  ;;  %v3441_v35 = vmul.f32 %v8750_v29, %v8626_v26 }
0x111d   :  { %v3365_v12 = vmul.f32 %v8756_v48, %v3355_v3  ;;  %v3419_v48 = vmul.f32 %v6826_v61, %v3417_v40  ;;  %v3504_v40 = vpop.permute.xlu0 %3503  ;;  %v3496_v10 = vmul.f32 %v10995_v39, %v3494_v49  ;;  %v6237_v49 = vld [vmem:[#allocation4 + $0x1b0] sm:$0xff] }
0x111e   :  { %v3430_v13 = vadd.f32 %v3428_v14, %v3408_v5  ;;  %v3484_v5 = vmul.f32 %v8762_v50, %v3474_v0 }
0x111f   :  { %v3387_v53 = vadd.f32 %v3385_v34, %v3365_v12  ;;  %v3429_v9 = vmul.f32 %v8748_v7, %v3419_v48  ;;  %v3513_v7 = vpop.permute.xlu2 %3512  ;;  %v3516_v34 = vsel %vm752_vm12, %v8796_v57, 0.0  ;;  %v3506_v50 = vmul.f32 %v8778_v42, %v3496_v10  ;;  %v6247_v10 = vld [vmem:[#allocation4 + $0x70] sm:$0xff] }
0x1120   :  { %3991 = vrot.lane.b32.xlu2 %v8684_v55, %s6358_s25  ;;  %3922 = vrot.lane.b32.xlu1 %v8712_v8, %s6469_s20  ;;  %v3442_v11 = vadd.f32 %v3440_v46, %v3430_v13  ;;  %v3518_v26 = vmul.f32 %v3516_v34, %v10997_v21  ;;  %v3517_v13 = vsel %vm752_vm12, %v3513_v7, 0.0  ;;  %v6236_v7 = vld [vmem:[#allocation4 + $0x1d0] sm:$0xff] }
0x1121   :  { %v3391_v1 = vpop.permute.xlu1 %3390  ;;  %v6248_v34 = vld [vmem:[#allocation4 + $0x50] sm:$0xff] }
0x1122   :  { %v3395_v4 = vsel %vm626_vm7, 0.0, %v3391_v1 }
0x1123   :  { %v3397_v63 = vmul.f32 %v3395_v4, %v11019_v44 }
0x1125   :  { %v3407_v43 = vmul.f32 %v3404_v2, %v3397_v63  ;;  %v3452_v2 = vmul.f32 %v6840_v31, %v3450_v33 }
0x1127   :  { %v3409_v1 = vadd.f32 %v3407_v43, %v3387_v53  ;;  %v3462_v37 = vmul.f32 %v8760_v18, %v3452_v2  ;;  %v3475_v18 = vmul.f32 %v3473_v58, %v10994_v24  ;;  %v3526_v6 = vpop.permute.xlu2 %3525 }
0x1128   :  { %4024 = vperm.xlu2 %6150, %v8557_v56   ;;  %3928 = vrot.lane.b32.xlu1 %v8736_v36, %s6469_s20 }
0x1129   :  { %v3447_v15 = vpop.permute.xlu1 %3446  ;;  %v3431_v54 = vadd.f32 %v3429_v9, %v3409_v1  ;;  %v3464_v63 = vadd.f32 %v3462_v37, %v3442_v11  ;;  %v3485_v29 = vmul.f32 %v8769_v23, %v3475_v18  ;;  %v3534_v1 = vpop.permute.xlu0 %3533  ;;  %v6244_v18 = vld [vmem:[#allocation4 + $0xd0] sm:$0xff] }
0x112a   :  { %v3451_v41 = vsel %vm406_vm0, %v3447_v15, 0.0 }
0x112b   :  { %v3453_v4 = vmul.f32 %v6840_v31, %v3451_v41  ;;  %v3443_v14 = vadd.f32 %v3441_v35, %v3431_v54  ;;  %v3486_v15 = vadd.f32 %v3484_v5, %v3464_v63  ;;  %v3519_v41 = vmul.f32 %v3517_v13, %v10997_v21  ;;  %v6235_v54 = vld [vmem:[#allocation4 + $0x1f0] sm:$0xff] }
0x112c   :  { %v6239_v35 = vld [vmem:[#allocation4 + $0x170] sm:$0xff] }
0x112d   :  { %v3463_v12 = vmul.f32 %v8786_v59, %v3453_v4  ;;  %v3508_v22 = vadd.f32 %v3506_v50, %v3486_v15  ;;  %v3529_v9 = vmul.f32 %v3526_v6, %v3519_v41  ;;  %v6240_v63 = vld [vmem:[#allocation4 + $0x150] sm:$0xff] }
0x112e   :  { %v6242_v5 = vld [vmem:[#allocation4 + $0x110] sm:$0xff] }
0x112f   :  { %v3465_v33 = vadd.f32 %v3463_v12, %v3443_v14  ;;  %v6243_v12 = vld [vmem:[#allocation4 + $0xf0] sm:$0xff]  ;;  %v3547_v15 = vpop.permute.xlu2 %3546 }
0x1130   :  { %6153 = vset.pattern.permute.xlu2 %v6473_v16  ;;  %3979 = vrot.lane.b32.xlu1 %v8657_v20, %s6358_s25  ;;  %v6249_v14 = vld [vmem:[#allocation4 + $0x30] sm:$0xff] }
0x1131   :  { %4076 = vperm.xlu2 %6153, %v8441_v19   ;;  %v3491_v3 = vpop.permute.xlu1 %3490  ;;  %v3487_v57 = vadd.f32 %v3485_v29, %v3465_v33 }
0x1132   :  { %v3495_v28 = vsel %vm729_vm11, %v3491_v3, 0.0  ;;  %v11027_v3 = vld [vmem:[#allocation26_spill] sm:$0xff] }
0x1133   :  { %v3497_v43 = vmul.f32 %v10995_v39, %v3495_v28  ;;  %v6238_v28 = vld [vmem:[#allocation4 + $0x190] sm:$0xff] }
0x1135   :  { %v3507_v59 = vmul.f32 %v3504_v40, %v3497_v43  ;;  %v6245_v40 = vld [vmem:[#allocation4 + $0xb0] sm:$0xff] }
0x1136   :  { %v6250_v43 = vld [vmem:[#allocation4 + $0x10] sm:$0xff] }
0x1137   :  { %v3509_v46 = vadd.f32 %v3507_v59, %v3487_v57 }
0x1138   :  { %3983 = vrot.lane.b32.xlu1 %v8677_v62, %s6358_s25 }
0x1139   :  { %v3522_v48 = vpop.permute.xlu1 %3521  ;;  %v3531_v11 = vadd.f32 %v3529_v9, %v3509_v46 }
0x113a   :  { %v3528_v53 = vmul.f32 %v3522_v48, %v3518_v26 }
0x113c   :  { %v3530_v2 = vadd.f32 %v3528_v53, %v3508_v22  ;;  %v8888_v53 = vpop.permute.xlu0 %3793 }
0x113e   :  { %v3540_v23 = vadd.f32 %v3534_v1, %v3530_v2 }
0x1140   :  { %3989 = vrot.lane.b32.xlu1 %v8694_v60, %s6358_s25  ;;  %v3542_v4 = vmax.f32 %v3540_v23, 0.0 }
0x1142   :  { %v3538_v42 = vpop.permute.xlu1 %3537 }
0x1143   :  { %v3541_v0 = vadd.f32 %v3538_v42, %v3531_v11 }
0x1144   :  { %v8894_v6 = vpop.permute.xlu0 %3799 }
0x1145   :  { %v3543_v37 = vmax.f32 %v3541_v0, 0.0 }
0x1147   :  { %v3544_v58 = vpack.c.bf16 %v3543_v37, %v3542_v4 }
0x1148   :  { %4020 = vperm.xlu1 %6149, %v8441_v19   ;;  %v6241_v19 = vld [vmem:[#allocation4 + $0x130] sm:$0xff] }
0x1149   :  { %3563 = vmatpush.bf16.msrb.mxu2 %v3544_v58 }
0x114a   :  { %v3551_v26 = vpop.permute.xlu1 %3550 }
0x114c   :  { %5702 = vmatmul.msk.bf16.vlgmr.msrb.gmra.mxu2 %vm795_vm13, %v11027_v3  ;;  %v8908_v9 = vpop.permute.xlu0 %3805  ;;  %v6474_v3 = vmov 33  }
0x114d   :  { %3749 = vmatpush.msra.mxu2 %v6235_v54  ;;  %6156 = vset.pattern.permute.xlu2 %v6474_v3 }
0x114f   :  { %3750 = vmatpush.msra.mxu2 %v6236_v7 }
0x1150   :  { %6152 = vset.pattern.permute.xlu1 %v6472_v27  ;;  %v6246_v27 = vld [vmem:[#allocation4 + $0x90] sm:$0xff] }
0x1151   :  { %3751 = vmatpush.msra.mxu2 %v6237_v49  ;;  %4048 = vperm.xlu1 %6152, %v8557_v56  }
0x1152   :  { %v8880_v50 = vpop.permute.xlu1 %3795 }
0x1153   :  { %3752 = vmatpush.msra.mxu2 %v6238_v28 }
0x1154   :  { %v8922_v4 = vpop.permute.xlu0 %3839 }
0x1155   :  { %3753 = vmatpush.msra.mxu2 %v6239_v35 }
0x1157   :  { %3754 = vmatpush.msra.mxu2 %v6240_v63 }
0x1159   :  { %3755 = vmatpush.msra.mxu2 %v6241_v19  ;;  %6154 = vset.pattern.permute.xlu1 %v6473_v16  ;;  %v8874_v16 = vpop.permute.xlu2 %3797 }
0x115a   :  { %v8884_v48 = vpop.permute.xlu1 %3801 }
0x115b   :  { %3756 = vmatpush.msra.mxu2 %v6242_v5 }
0x115c   :  { %v8940_v54 = vpop.permute.xlu0 %3858 }
0x115d   :  { %3757 = vmatpush.msra.mxu2 %v6243_v12  ;;  %v6476_v12 = vmov 34  }
0x115e   :  { %6158 = vset.pattern.permute.xlu0 %v6476_v12 }
0x115f   :  { %3758 = vmatpush.msra.mxu2 %v6244_v18 }
0x1161   :  { %3759 = vmatpush.msra.mxu2 %v6245_v40  ;;  %v8876_v33 = vpop.permute.xlu2 %3803 }
0x1162   :  { %v8890_v57 = vpop.permute.xlu1 %3807 }
0x1163   :  { %3760 = vmatpush.msra.mxu2 %v6246_v27 }
0x1164   :  { %v8952_v28 = vpop.permute.xlu0 %3864 }
0x1165   :  { %3761 = vmatpush.msra.mxu2 %v6247_v10 }
0x1167   :  { %3762 = vmatpush.msra.mxu2 %v6248_v34  ;;  %v8992_v34 = vld [vmem:[%s10768_s1] sm:$0xff] }
0x1168   :  { %11032 = vst [vmem:[#allocation49_spill] sm:$0xff] %v8992_v34 }
0x1169   :  { %3763 = vmatpush.msra.mxu2 %v6249_v14  ;;  %v8878_v29 = vpop.permute.xlu2 %3835 }
0x116a   :  { %v8896_v46 = vpop.permute.xlu1 %3850 }
0x116b   :  { %3764 = vmatpush.msra.mxu2 %v6250_v43 }
0x116c   :  { %v8963_v19 = vpop.permute.xlu0 %3914 }
0x1171   :  { %v8882_v59 = vpop.permute.xlu2 %3852 }
0x1172   :  { %v8910_v23 = vpop.permute.xlu1 %3854 }
0x1174   :  { %v8975_v40 = vpop.permute.xlu0 %3920 }
0x1179   :  { %v8886_v13 = vpop.permute.xlu2 %3856 }
0x117a   :  { %v8930_v37 = vpop.permute.xlu1 %3860 }
0x117c   :  { %v8997_v14 = vpop.permute.xlu0 %3926 }
0x1181   :  { %v8892_v22 = vpop.permute.xlu2 %3862 }
0x1182   :  { %v8942_v7 = vpop.permute.xlu1 %3891 }
0x1189   :  { %v8906_v1 = vpop.permute.xlu2 %3895 }
0x118a   :  { %v8954_v35 = vpop.permute.xlu1 %3916 }
0x1191   :  { %v8918_v42 = vpop.permute.xlu2 %3918 }
0x1192   :  { %v8965_v5 = vpop.permute.xlu1 %3922 }
0x1199   :  { %v8932_v58 = vpop.permute.xlu2 %3924 }
0x119a   :  { %v8983_v27 = vpop.permute.xlu1 %3928 }
0x119b   :  { %11030 = vst [vmem:[#allocation19_spill] sm:$0xff] %v8983_v27 }
0x11a1   :  { %v8948_v49 = vpop.permute.xlu2 %3956 }
0x11a2   :  { %v8999_v43 = vpop.permute.xlu1 %3979 }
0x11a3   :  { %11033 = vst [vmem:[#allocation50_spill] sm:$0xff] %v8999_v43 }
0x11a9   :  { %v8961_v63 = vpop.permute.xlu2 %3981 }
0x11aa   :  { %11028 = vst [vmem:[#allocation17_spill] sm:$0xff] %v8961_v63 }
0x11b1   :  { %v8973_v18 = vpop.permute.xlu2 %3985 }
0x11b2   :  { %11029 = vst [vmem:[#allocation18_spill] sm:$0xff] %v8973_v18 }
0x11b9   :  { %v8985_v10 = vpop.permute.xlu2 %3991 }
0x11ba   :  { %11031 = vst [vmem:[#allocation48_spill] sm:$0xff] %v8985_v10 }
0x11cf   :  { %v3565_v41 = vpop.f32.mrf.mxu2 }
0x11d0   :  { %v8898_v2 = vadd.f32 %v3565_v41, %v3547_v15  ;;  %v9005_v15 = vpop.permute.xlu2 %4024  ;;  %v9010_v41 = vpop.permute.xlu1 %3983 }
0x11d1   :  { %11034 = vst [vmem:[#allocation51_spill] sm:$0xff] %v9005_v15  ;;  %v6477_v15 = vmov 35  }
0x11d2   :  { %3598 = vrot.lane.b32.xlu0 %v8898_v2, %s6355_s23  ;;  %3584 = vrot.lane.b32.xlu1 %v8898_v2, %s6341_s18  ;;  %11036 = vst [vmem:[#allocation53_spill] sm:$0xff] %v9010_v41 }
0x11d3   :  { %3572 = vrot.lane.b32.xlu2 %v8898_v2, %s6356_s8 }
0x11d7   :  { %v3567_v11 = vpop.f32.mrf.mxu2 }
0x11d8   :  { %v8920_v0 = vadd.f32 %v3567_v11, %v3551_v26  ;;  %v9008_v26 = vpop.permute.xlu0 %3960  ;;  %v9018_v11 = vpop.permute.xlu2 %4076 }
0x11d9   :  { %11035 = vst [vmem:[#allocation52_spill] sm:$0xff] %v9008_v26  ;;  %v9022_v52 = vpop.permute.xlu1 %3989 }
0x11da   :  { %3644 = vrot.lane.b32.xlu0 %v8898_v2, %s6357_s24  ;;  %3630 = vrot.lane.b32.xlu1 %v8898_v2, %s6345_s27  ;;  %11037 = vst [vmem:[#allocation26_spill] sm:$0xff] %v9018_v11 }
0x11db   :  { %3612 = vrot.lane.b32.xlu2 %v8898_v2, %s6358_s25  ;;  %11039 = vst [vmem:[#allocation57_spill] sm:$0xff] %v9022_v52 }
0x11e1   :  { %v9037_v11 = vpop.permute.xlu1 %4020 }
0x11e2   :  { %3574 = vrot.lane.b32.xlu0 %v8920_v0, %s6356_s8  ;;  %3672 = vrot.lane.b32.xlu1 %v8898_v2, %s6360_s28  ;;  %11042 = vst [vmem:[#allocation59_spill] sm:$0xff] %v9037_v11 }
0x11e3   :  { %3658 = vrot.lane.b32.xlu2 %v8898_v2, %s6359_s26 }
0x11ea   :  { %3614 = vrot.lane.b32.xlu0 %v8920_v0, %s6358_s25  ;;  %3600 = vrot.lane.b32.xlu1 %v8920_v0, %s6355_s23 }
0x11eb   :  { %3586 = vrot.lane.b32.xlu2 %v8920_v0, %s6341_s18  ;;  %s6475_s18 = smov 113  }
0x11f2   :  { %3660 = vrot.lane.b32.xlu0 %v8920_v0, %s6359_s26  ;;  %3646 = vrot.lane.b32.xlu1 %v8920_v0, %s6357_s24  ;;  %s6478_s24 = smov 111  }
0x11f3   :  { %3632 = vrot.lane.b32.xlu2 %v8920_v0, %s6345_s27 }
0x11fa   :  { %4101 = vrot.lane.b32.xlu0 %v8723_v32, %s6475_s18  ;;  %4080 = vperm.xlu1 %6154, %v8557_v56  }
0x11fb   :  { %3674 = vrot.lane.b32.xlu2 %v8920_v0, %s6360_s28 }
0x1202   :  { %4107 = vrot.lane.b32.xlu0 %v8712_v8, %s6475_s18  ;;  %4103 = vrot.lane.b32.xlu1 %v8677_v62, %s6475_s18 }
0x1203   :  { %4099 = vrot.lane.b32.xlu2 %v8657_v20, %s6475_s18  ;;  %6155 = vset.pattern.permute.xlu1 %v6474_v3  ;;  %v9020_v3 = vpop.permute.xlu0 %3987 }
0x1204   :  { %11038 = vst [vmem:[#allocation56_spill] sm:$0xff] %v9020_v3 }
0x120a   :  { %4113 = vrot.lane.b32.xlu0 %v8736_v36, %s6475_s18  ;;  %4109 = vrot.lane.b32.xlu1 %v8694_v60, %s6475_s18 }
0x120b   :  { %4105 = vrot.lane.b32.xlu2 %v8668_v17, %s6475_s18  ;;  %v9029_v26 = vpop.permute.xlu0 %3993 }
0x120c   :  { %11040 = vst [vmem:[#allocation58_spill] sm:$0xff] %v9029_v26  ;;  %v9047_v26 = vpop.permute.xlu1 %4048 }
0x120d   :  { %11044 = vst [vmem:[#allocation61_spill] sm:$0xff] %v9047_v26 }
0x1212   :  { %4164 = vrot.lane.b32.xlu0 %v8657_v20, %s6346_s17  ;;  %4141 = vperm.xlu1 %6155, %v8992_v34  }
0x1213   :  { %4111 = vrot.lane.b32.xlu2 %v8684_v55, %s6475_s18 }
0x121a   :  { %4170 = vrot.lane.b32.xlu0 %v8668_v17, %s6346_s17  ;;  %4166 = vrot.lane.b32.xlu1 %v8723_v32, %s6346_s17 }
0x121b   :  { %4145 = vperm.xlu2 %6156, %v8557_v56   ;;  %6159 = vset.pattern.permute.xlu1 %v6477_v15 }
0x1222   :  { %4176 = vrot.lane.b32.xlu0 %v8684_v55, %s6346_s17  ;;  %4172 = vrot.lane.b32.xlu1 %v8712_v8, %s6346_s17 }
0x1223   :  { %4168 = vrot.lane.b32.xlu2 %v8677_v62, %s6346_s17 }
0x1224   :  { %6157 = vset.pattern.permute.xlu2 %v6476_v12  ;;  %v11041_v12 = vmov 3  }
0x122a   :  { %4209 = vperm.xlu0 %6158, %v8557_v56   ;;  %4178 = vrot.lane.b32.xlu1 %v8736_v36, %s6346_s17 }
0x122b   :  { %4174 = vrot.lane.b32.xlu2 %v8694_v60, %s6346_s17 }
0x122d   :  { %v3573_v10 = vpop.permute.xlu2 %3572 }
0x1232   :  { %4236 = vrot.lane.b32.xlu0 %v8712_v8, %s6478_s24  ;;  %4228 = vrot.lane.b32.xlu1 %v8657_v20, %s6478_s24  ;;  %v9045_v8 = vpop.permute.xlu0 %4044 }
0x1233   :  { %4205 = vperm.xlu2 %6157, %v8992_v34   ;;  %6161 = vset.pattern.permute.xlu0 %v11041_v12  ;;  %11043 = vst [vmem:[#allocation60_spill] sm:$0xff] %v9045_v8 }
0x1235   :  { %v3613_v52 = vpop.permute.xlu2 %3612 }
0x123a   :  { %4242 = vrot.lane.b32.xlu0 %v8736_v36, %s6478_s24  ;;  %4232 = vrot.lane.b32.xlu1 %v8677_v62, %s6478_s24 }
0x123b   :  { %4230 = vrot.lane.b32.xlu2 %v8723_v32, %s6478_s24  ;;  %v3578_v32 = vsel %vm580_vm4, 0.0, %v3573_v10 }
0x123c   :  { %6160 = vset.pattern.permute.xlu2 %v6477_v15  ;;  %v3580_v15 = vmul.f32 %v3578_v32, %v11018_v47 }
0x123d   :  { %v3659_v20 = vpop.permute.xlu2 %3658 }
0x1242   :  { %4238 = vrot.lane.b32.xlu1 %v8694_v60, %s6478_s24  ;;  %4294 = vperm.xlu0 %6161, %v8499_v51   ;;  %v11045_v51 = vld [vmem:[#allocation32_spill] sm:$0xff] }
0x1243   :  { %4234 = vrot.lane.b32.xlu2 %v8668_v17, %s6478_s24 }
0x1244   :  { %v3585_v36 = vpop.permute.xlu1 %3584  ;;  %v3599_v11 = vpop.permute.xlu0 %3598 }
0x1245   :  { %v3590_v62 = vsel %vm603_vm5, 0.0, %v3585_v36  ;;  %v3587_v18 = vpop.permute.xlu2 %3586  ;;  %v3604_v60 = vsel %vm626_vm7, 0.0, %v3599_v11  ;;  %v11046_v36 = vld [vmem:[#allocation28_spill] sm:$0xff] }
0x1246   :  { %v3592_v8 = vmul.f32 %v11017_v25, %v3590_v62  ;;  %v3582_v3 = vmul.f32 %v3580_v15, %v11046_v36  ;;  %v3606_v10 = vmul.f32 %v3604_v60, %v11019_v44  ;;  %v3618_v62 = vsel %vm649_vm8, 0.0, %v3613_v52  ;;  %v11048_v52 = vld [vmem:[#allocation34_spill] sm:$0xff] }
0x1247   :  { %v3620_v32 = vmul.f32 %v6826_v61, %v3618_v62  ;;  %v11050_v62 = vld [vmem:[#allocation33_spill] sm:$0xff] }
0x1248   :  { %v3594_v17 = vmul.f32 %v3592_v8, %v11045_v51 }
0x124a   :  { %4270 = vperm.xlu1 %6159, %v8992_v34   ;;  %v3596_v63 = vadd.f32 %v3594_v17, %v3582_v3  ;;  %v11047_v34 = vld [vmem:[#allocation30_spill] sm:$0xff]  ;;  %v3622_v3 = vmul.f32 %v3620_v32, %v11048_v52  ;;  %v3591_v17 = vsel %vm603_vm5, 0.0, %v3587_v18 }
0x124b   :  { %4240 = vrot.lane.b32.xlu2 %v8684_v55, %s6478_s24  ;;  %v3608_v43 = vmul.f32 %v3606_v10, %v11047_v34  ;;  %v11051_v18 = vld [vmem:[#allocation38_spill] sm:$0xff] }
0x124c   :  { %v3631_v26 = vpop.permute.xlu1 %3630  ;;  %v3645_v41 = vpop.permute.xlu0 %3644 }
0x124d   :  { %v3633_v27 = vpop.permute.xlu2 %3632  ;;  %v3610_v55 = vadd.f32 %v3608_v43, %v3596_v63  ;;  %v3636_v15 = vsel %vm406_vm0, %v3631_v26, 0.0  ;;  %v3650_v43 = vsel %vm706_vm10, %v3645_v41, 0.0 }
0x124e   :  { %v3638_v34 = vmul.f32 %v6840_v31, %v3636_v15  ;;  %v3637_v52 = vsel %vm406_vm0, %v3633_v27, 0.0 }
0x124f   :  { %v3624_v36 = vadd.f32 %v3622_v3, %v3610_v55  ;;  %v3652_v3 = vmul.f32 %v3650_v43, %v10994_v24  ;;  %v11057_v43 = vld [vmem:[#allocation31_spill] sm:$0xff] }
0x1250   :  { %v3640_v32 = vmul.f32 %v3638_v34, %v11050_v62  ;;  %v3639_v62 = vmul.f32 %v6840_v31, %v3637_v52  ;;  %v11060_v31 = vld [vmem:[#allocation42_spill] sm:$0xff] }
0x1252   :  { %6162 = vset.pattern.permute.xlu1 %v11041_v12 }
0x1253   :  { %4298 = vperm.xlu1 %6162, %v8706_v45   ;;  %4274 = vperm.xlu2 %6160, %v8557_v56   ;;  %v3593_v45 = vmul.f32 %v11017_v25, %v3591_v17  ;;  %v11049_v56 = vld [vmem:[#allocation41_spill] sm:$0xff]  ;;  %v9088_v25 = vld [vmem:[%s10771_s4] sm:$0xff] }
0x1254   :  { %v3673_v11 = vpop.permute.xlu1 %3672  ;;  %v3575_v8 = vpop.permute.xlu0 %3574  ;;  %v3626_v63 = vmul.f32 %v8898_v2, %v11049_v56  ;;  %11052 = vst [vmem:[#allocation32_spill] sm:$0xff] %v9088_v25  ;;  %v11053_v2 = vld [vmem:[#allocation29_spill] sm:$0xff]  ;;  %v11055_v56 = vld [vmem:[#allocation40_spill] sm:$0xff] }
0x1255   :  { %v3675_v51 = vpop.permute.xlu2 %3674  ;;  %v3579_v60 = vsel %vm580_vm4, 0.0, %v3575_v8  ;;  %v3678_v34 = vsel %vm752_vm12, %v3673_v11, 0.0 }
0x1256   :  { %v3581_v10 = vmul.f32 %v3579_v60, %v11018_v47  ;;  %v3628_v26 = vadd.f32 %v3626_v63, %v3624_v36  ;;  %v3664_v47 = vsel %vm729_vm11, %v3659_v20, 0.0  ;;  %v3680_v27 = vmul.f32 %v3678_v34, %v10997_v21 }
0x1257   :  { %v3666_v20 = vmul.f32 %v10995_v39, %v3664_v47 }
0x1258   :  { %v3583_v55 = vmul.f32 %v3581_v10, %v11051_v18  ;;  %v3642_v10 = vadd.f32 %v3640_v32, %v3628_v26  ;;  %v11056_v18 = vld [vmem:[#allocation39_spill] sm:$0xff] }
0x125b   :  { %4326 = vperm.xlu1 %6162, %v8730_v38   ;;  %6163 = vset.pattern.permute.xlu2 %v11041_v12  ;;  %v3595_v38 = vmul.f32 %v3593_v45, %v11053_v2 }
0x125c   :  { %v3601_v8 = vpop.permute.xlu1 %3600  ;;  %v3615_v15 = vpop.permute.xlu0 %3614  ;;  %4322 = vperm.xlu2 %6163, %v9088_v25  }
0x125d   :  { %v3605_v41 = vsel %vm626_vm7, 0.0, %v3601_v8  ;;  %v3619_v12 = vsel %vm649_vm8, 0.0, %v3615_v15  ;;  %v9095_v60 = vpop.permute.xlu2 %4099  ;;  %v3597_v45 = vadd.f32 %v3595_v38, %v3583_v55  ;;  %v3654_v8 = vmul.f32 %v3652_v3, %v11056_v18 }
0x125e   :  { %11054 = vst [vmem:[#allocation28_spill] sm:$0xff] %v9095_v60  ;;  %v3607_v17 = vmul.f32 %v3605_v41, %v11019_v44  ;;  %v3621_v36 = vmul.f32 %v6826_v61, %v3619_v12  ;;  %v11058_v44 = vld [vmem:[#allocation37_spill] sm:$0xff]  ;;  %v11059_v12 = vld [vmem:[#allocation36_spill] sm:$0xff]  ;;  %v3641_v55 = vmul.f32 %v3639_v62, %v11060_v31  ;;  %v3679_v38 = vsel %vm752_vm12, %v3675_v51, 0.0  ;;  %v11062_v62 = vld [vmem:[#allocation35_spill] sm:$0xff] }
0x125f   :  { %v3668_v41 = vmul.f32 %v3666_v20, %v11058_v44  ;;  %v3656_v61 = vadd.f32 %v3654_v8, %v3642_v10  ;;  %v3627_v11 = vmul.f32 %v8920_v0, %v11059_v12 }
0x1260   :  { %v3609_v63 = vmul.f32 %v3607_v17, %v11055_v56  ;;  %v3623_v2 = vmul.f32 %v3621_v36, %v11057_v43  ;;  %v11061_v36 = vld [vmem:[#allocation22_spill] sm:$0xff]  ;;  %v3681_v56 = vmul.f32 %v3679_v38, %v10997_v21 }
0x1261   :  { %v3682_v34 = vmul.f32 %v3680_v27, %v11061_v36  ;;  %v11068_v21 = vld [vmem:[#allocation46_spill] sm:$0xff] }
0x1262   :  { %v3611_v15 = vadd.f32 %v3609_v63, %v3597_v45  ;;  %v3670_v45 = vadd.f32 %v3668_v41, %v3656_v61 }
0x1264   :  { %v3625_v47 = vadd.f32 %v3623_v2, %v3611_v15  ;;  %v3647_v26 = vpop.permute.xlu1 %3646  ;;  %v3661_v32 = vpop.permute.xlu0 %3660  ;;  %4329 = vrot.lane.b32.xlu2 %v11003_v30, %s6415_s19  ;;  %v3684_v51 = vadd.f32 %v3682_v34, %v3670_v45  ;;  %v11063_v15 = vld [vmem:[#allocation21_spill] sm:$0xff]  ;;  %v11064_v2 = vld [vmem:[#allocation43_spill] sm:$0xff] }
0x1265   :  { %v3651_v52 = vsel %vm706_vm10, %v3647_v26, 0.0  ;;  %v3665_v3 = vsel %vm729_vm11, %v3661_v32, 0.0  ;;  %v9117_v17 = vpop.permute.xlu2 %4105  ;;  %v3683_v44 = vmul.f32 %v3681_v56, %v11064_v2  ;;  %v6253_v45 = vld [vmem:[#allocation4 + $0x1f8] sm:$0xff] }
0x1266   :  { %v3629_v20 = vadd.f32 %v3627_v11, %v3625_v47  ;;  %v3653_v0 = vmul.f32 %v3651_v52, %v10994_v24  ;;  %v3667_v10 = vmul.f32 %v10995_v39, %v3665_v3  ;;  %v11067_v24 = vld [vmem:[#allocation45_spill] sm:$0xff]  ;;  %v11069_v47 = vld [vmem:[#allocation16_spill] sm:$0xff]  ;;  %v6258_v30 = vld [vmem:[#allocation4 + $0x158] sm:$0xff] }
0x1267   :  { %v3686_v11 = vadd.f32 %v3684_v51, %v11067_v24  ;;  %v80_v32 = vadd.s32 256, %v11069_v47  ;;  %v9136_v38 = vadd.s32 384, %v11069_v47  ;;  %v134_v52 = vand.u32 255, %v11069_v47  ;;  %v11073_v51 = vld [vmem:[#allocation20_spill] sm:$0xff] }
0x1268   :  { %v3643_v63 = vadd.f32 %v3641_v55, %v3629_v20  ;;  %v3655_v18 = vmul.f32 %v3653_v0, %v11062_v62  ;;  %v3669_v43 = vmul.f32 %v3667_v10, %v11063_v15  ;;  %v9144_v20 = vadd.s32 128, %v11069_v47  ;;  %v6254_v15 = vld [vmem:[#allocation4 + $0x1d8] sm:$0xff] }
0x1269   :  { %v3688_v31 = vmax.f32 %v3686_v11, 0.0  ;;  %v100_v0 = vand.u32 15, %v80_v32  ;;  %v107_v10 = vand.u32 15, %v9136_v38  ;;  %v148_v56 = vand.u32 255, %v80_v32  ;;  %v6255_v11 = vld [vmem:[#allocation4 + $0x1b8] sm:$0xff] }
0x126a   :  { %v3657_v8 = vadd.f32 %v3655_v18, %v3643_v63  ;;  %v11071_v63 = vld [vmem:[#allocation27_spill] sm:$0xff]  ;;  %vm202_vm5 = vcmp.ge.s32.totalorder %v134_v52, 16  ;;  %v93_v62 = vand.u32 15, %v9144_v20 }
0x126b   :  { %vm178_vm4 = vcmp.ge.s32.totalorder %v11071_v63, 1  ;;  %vm9153_vm7 = vcmp.lt.s32.totalorder %v100_v0, 15  ;;  %vm193_vm10 = vcmp.lt.s32.totalorder %v107_v10, 15  ;;  %vm180_vm11 = vcmp.ge.s32.totalorder %v100_v0, 1  ;;  %v6256_v32 = vld [vmem:[#allocation4 + $0x198] sm:$0xff] }
0x126c   :  { %v3671_v12 = vadd.f32 %v3669_v43, %v3657_v8  ;;  %v9126_v26 = vpop.permute.xlu1 %4080  ;;  %v9128_v27 = vpop.permute.xlu0 %4101  ;;  %v11076_v43 = vmov 0.0   ;;  %vm204_vm12 = vcmp.ge.s32.totalorder %v148_v56, 16  ;;  %vm181_vm3 = vcmp.ge.s32.totalorder %v107_v10, 1  ;;  %v11080_v56 = vld [vmem:[#allocation8_spill] sm:$0xff] }
0x126d   :  { %11065 = vst [vmem:[#allocation30_spill] sm:$0xff] %v9126_v26  ;;  %v9131_v41 = vpop.permute.xlu2 %4111  ;;  %v9158_v2 = vsel %vm178_vm4, 1.0, %v11076_v43  ;;  %vm190_vm9 = vcmp.lt.s32.totalorder %v11071_v63, 15  ;;  %vm191_vm15 = vcmp.lt.s32.totalorder %v93_v62, 15  ;;  %v9189_v52 = vsel %vm181_vm3, 1.0, %v11076_v43 }
0x126e   :  { %11066 = vst [vmem:[#allocation34_spill] sm:$0xff] %v9128_v27  ;;  %v3685_v39 = vadd.f32 %v3683_v44, %v3671_v12  ;;  %v9161_v44 = vsel %vm202_vm5, 1.0, %v11076_v43  ;;  %v9195_v0 = vsel %vm190_vm9, 1.0, %v11076_v43  ;;  %v9198_v10 = vsel %vm191_vm15, 1.0, %v11076_v43  ;;  %v11094_v27 = vld [vmem:[#allocation15_spill] sm:$0xff] }
0x126f   :  { %v9181_v47 = vmul.f32 %v9161_v44, %v9158_v2  ;;  %11079 = vst [vmem:[#allocation40_spill] sm:$0xff] %v9195_v0  ;;  %vm179_vm6 = vcmp.ge.s32.totalorder %v93_v62, 1  ;;  %vm4115_vm5 = vcmask 924672   ;;  %vm4244_vm3 = vcmask 908288  }
0x1270   :  { %v3687_v61 = vadd.f32 %v3685_v39, %v11068_v21  ;;  %v9171_v39 = vsel %vm9153_vm7, 1.0, %v11076_v43  ;;  %v9174_v21 = vsel %vm193_vm10, 1.0, %v11076_v43  ;;  %vm11127_vm7 = vcmask 916480  }
0x1271   :  { %11077 = vst [vmem:[#allocation38_spill] sm:$0xff] %v9181_v47  ;;  %v9202_v63 = vmul.f32 %v9171_v39, %v11080_v56  ;;  %v3814_v56 = vsel %vm3809_vm2, %v8876_v33, %v8908_v9  ;;  %vm11128_vm10 = vmmov %vm11127_vm7 }
0x1272   :  { %v3689_v55 = vmax.f32 %v3687_v61, 0.0  ;;  %v9177_v61 = vsel %vm180_vm11, 1.0, %v11076_v43  ;;  %vm11131_vm11 = vmmov %vm11127_vm7 }
0x1273   :  { %11081 = vst [vmem:[#allocation39_spill] sm:$0xff] %v9202_v63  ;;  %v11090_v63 = vld [vmem:[#allocation14_spill] sm:$0xff]  ;;  %vm11133_vm9 = vmmov %vm11127_vm7 }
0x1274   :  { %v9139_v3 = vpop.permute.xlu1 %4103  ;;  %v9141_v36 = vpop.permute.xlu0 %4107  ;;  %v3690_v34 = vpack.c.bf16 %v3689_v55, %v3688_v31  ;;  %v9184_v31 = vsel %vm204_vm12, 1.0, %v11076_v43  ;;  %v3824_v55 = vsel %vm3809_vm2, 0.0, %v8888_v53  ;;  %vm11132_vm12 = vmmov %vm11127_vm7 }
0x1275   :  { %11070 = vst [vmem:[#allocation41_spill] sm:$0xff] %v9139_v3  ;;  %v9149_v18 = vpop.permute.xlu2 %4145  ;;  %vm11134_vm15 = vmmov %vm11127_vm7 }
0x1276   :  { %3698 = vmatpush.bf16.msra.mxu3 %v3690_v34  ;;  %11072 = vst [vmem:[#allocation33_spill] sm:$0xff] %v9149_v18  ;;  %v3812_v34 = vsel %vm3809_vm2, %v8874_v16, %v8894_v6  ;;  %v9214_v6 = vmul.f32 %v9184_v31, %v9177_v61  ;;  %v11088_v18 = vld [vmem:[#allocation13_spill] sm:$0xff] }
0x1277   :  { %11078 = vst [vmem:[#allocation29_spill] sm:$0xff] %v9184_v31 }
0x1278   :  { %11085 = vst [vmem:[#allocation37_spill] sm:$0xff] %v9214_v6  ;;  %v3832_v60 = vmul.f32 %v3814_v56, %v9214_v6  ;;  %v6261_v56 = vld [vmem:[#allocation4 + $0xf8] sm:$0xff] }
0x1279   :  { %5703 = vmatmul.msk.bf16.vlgmr.msra.gmra.mxu3 %vm795_vm13, %v11073_v51  ;;  %v11082_v51 = vld [vmem:[#allocation9_spill] sm:$0xff] }
0x127a   :  { %3771 = vmatpush.msrb.mxu3 %v6253_v45  ;;  %v6257_v45 = vld [vmem:[#allocation4 + $0x178] sm:$0xff]  ;;  %v9206_v8 = vmul.f32 %v9174_v21, %v11082_v51 }
0x127b   :  { %v11086_v51 = vld [vmem:[#allocation11_spill] sm:$0xff] }
0x127c   :  { %3772 = vmatpush.msrb.mxu3 %v6254_v15  ;;  %v9163_v12 = vpop.permute.xlu1 %4109  ;;  %v9165_v24 = vpop.permute.xlu0 %4113  ;;  %11083 = vst [vmem:[#allocation31_spill] sm:$0xff] %v9206_v8  ;;  %v11084_v15 = vld [vmem:[#allocation10_spill] sm:$0xff]  ;;  %v9223_v25 = vmul.f32 %v9174_v21, %v11086_v51  ;;  %v9231_v8 = vmul.f32 %v9198_v10, %v11088_v18  ;;  %v9243_v51 = vsel %vm179_vm6, 1.0, %v11076_v43  ;;  %v3881_v18 = vsel %vm795_vm13, 0.0, %v8940_v54  ;;  %vm11136_vm6 = vmmov %vm11127_vm7 }
0x127e   :  { %3773 = vmatpush.msrb.mxu3 %v6255_v11  ;;  %v9210_v11 = vmul.f32 %v9171_v39, %v11084_v15  ;;  %v11087_v15 = vld [vmem:[#allocation12_spill] sm:$0xff] }
0x127f   :  { %v9227_v62 = vmul.f32 %v9195_v0, %v11087_v15  ;;  %v3825_v15 = vsel %vm3809_vm2, 0.0, %v8884_v48 }
0x1280   :  { %3774 = vmatpush.msrb.mxu3 %v6256_v32  ;;  %v3826_v32 = vmul.f32 %v3824_v55, %v9181_v47  ;;  %v3811_v55 = vsel %vm3809_vm2, %v8880_v50, %v8874_v16  ;;  %v6259_v16 = vld [vmem:[#allocation4 + $0x138] sm:$0xff] }
0x1282   :  { %3775 = vmatpush.msrb.mxu3 %v6257_v45  ;;  %v3829_v45 = vmul.f32 %v9189_v52, %v3812_v34  ;;  %v9236_v34 = vpop.permute.xlu2 %4168 }
0x1283   :  { %11089 = vst [vmem:[#allocation36_spill] sm:$0xff] %v9236_v34  ;;  %v3810_v34 = vsel %vm3809_vm2, %v8888_v53, %v8880_v50  ;;  %v3830_v50 = vmul.f32 %v3825_v15, %v9181_v47  ;;  %v3870_v53 = vsel %vm795_vm13, %v8930_v37, %v8892_v22  ;;  %v3848_v15 = vmul.f32 %v8922_v4, %v3832_v60  ;;  %v6262_v60 = vld [vmem:[#allocation4 + $0xd8] sm:$0xff] }
0x1284   :  { %3776 = vmatpush.msrb.mxu3 %v6258_v30  ;;  %v9240_v30 = vmul.f32 %v9195_v0, %v11090_v63  ;;  %v9249_v26 = vpop.permute.xlu1 %4141  ;;  %v9251_v3 = vpop.permute.xlu0 %4164  ;;  %v3813_v63 = vsel %vm3809_vm2, %v8884_v48, %v8876_v33  ;;  %v9272_v33 = vmul.f32 %v8878_v29, %v3829_v45  ;;  %v6260_v48 = vld [vmem:[#allocation4 + $0x118] sm:$0xff]  ;;  %v3867_v45 = vsel %vm795_vm13, %v8882_v59, %v8910_v23 }
0x1285   :  { %11092 = vst [vmem:[#allocation22_spill] sm:$0xff] %v9249_v26  ;;  %v9265_v26 = vmul.f32 %v9198_v10, %v11094_v27  ;;  %v3827_v27 = vmul.f32 %v9243_v51, %v3810_v34  ;;  %v9293_v34 = vmul.f32 %v9161_v44, %v9195_v0 }
0x1286   :  { %11091 = vst [vmem:[#allocation42_spill] sm:$0xff] %v9240_v30  ;;  %3777 = vmatpush.msrb.mxu3 %v6259_v16  ;;  %v3815_v30 = vsel %vm3809_vm2, %v8908_v9, %v8890_v57  ;;  %v3828_v16 = vmul.f32 %v3811_v55, %v9214_v6  ;;  %v3886_v57 = vmul.f32 %v9161_v44, %v3881_v18  ;;  %v3880_v55 = vsel %vm795_vm13, 0.0, %v8896_v46 }
0x1287   :  { %11093 = vst [vmem:[#allocation35_spill] sm:$0xff] %v9251_v3  ;;  %v9269_v3 = vmul.f32 %v8878_v29, %v3826_v32  ;;  %v3831_v9 = vmul.f32 %v9243_v51, %v3813_v63  ;;  %v3833_v32 = vmul.f32 %v9189_v52, %v3815_v30  ;;  %v3871_v18 = vsel %vm795_vm13, %v8892_v22, %v8952_v28 }
0x1288   :  { %11095 = vst [vmem:[#allocation21_spill] sm:$0xff] %v9265_v26  ;;  %3778 = vmatpush.msrb.mxu3 %v6260_v48  ;;  %v3844_v30 = vmul.f32 %v8878_v29, %v3828_v16  ;;  %v3888_v63 = vmul.f32 %v9184_v31, %v3870_v53  ;;  %v3945_v48 = vsel %vm3930_vm14, 0.0, %v8963_v19  ;;  %v3884_v6 = vmul.f32 %v9184_v31, %v3867_v45 }
0x1289   :  { %v3846_v22 = vmul.f32 %v8922_v4, %v3830_v50  ;;  %v3869_v28 = vsel %vm795_vm13, %v8940_v54, %v8930_v37  ;;  %v3902_v16 = vmul.f32 %v8906_v1, %v3886_v57  ;;  %v3882_v53 = vmul.f32 %v9161_v44, %v3880_v55  ;;  %v6264_v55 = vld [vmem:[#allocation4 + $0x98] sm:$0xff] }
0x128a   :  { %3779 = vmatpush.msrb.mxu3 %v6261_v56  ;;  %v3933_v56 = vsel %vm3930_vm14, %v8918_v42, %v8975_v40  ;;  %v3847_v47 = vmul.f32 %v8922_v4, %v3831_v9  ;;  %v3849_v0 = vmul.f32 %v8922_v4, %v3833_v32  ;;  %v3905_v40 = vmul.f32 %v8906_v1, %v3871_v18  ;;  %v9323_v9 = vpop.permute.xlu2 %4174 }
0x128b   :  { %v3868_v50 = vsel %vm795_vm13, %v8910_v23, %v8886_v13  ;;  %v9319_v37 = vmul.f32 %v9184_v31, %v9171_v39  ;;  %v3947_v54 = vmul.f32 %v3945_v48, %v9293_v34  ;;  %v3950_v57 = vmul.f32 %v9174_v21, %v3933_v56 }
0x128c   :  { %3780 = vmatpush.msrb.mxu3 %v6262_v60  ;;  %v9312_v26 = vpop.permute.xlu1 %4166  ;;  %v6263_v60 = vld [vmem:[#allocation4 + $0xb8] sm:$0xff]  ;;  %v9325_v4 = vpop.permute.xlu0 %4170  ;;  %v3866_v32 = vsel %vm795_vm13, %v8896_v46, %v8882_v59  ;;  %v3904_v45 = vmul.f32 %v8906_v1, %v3888_v63  ;;  %v3903_v13 = vmul.f32 %v8906_v1, %v3869_v28  ;;  %v3932_v23 = vsel %vm3930_vm14, %v8954_v35, %v8918_v42 }
0x128d   :  { %11096 = vst [vmem:[#allocation43_spill] sm:$0xff] %v9319_v37  ;;  %v3843_v18 = vmul.f32 %v8878_v29, %v3827_v27  ;;  %v9336_v48 = vadd.f32 %v3902_v16, %v3846_v22  ;;  %v3900_v56 = vmul.f32 %v8942_v7, %v3884_v6  ;;  %v3935_v59 = vsel %vm3930_vm14, %v8932_v58, %v8997_v14  ;;  %v6265_v28 = vld [vmem:[#allocation4 + $0x78] sm:$0xff] }
0x128e   :  { %3781 = vmatpush.msrb.mxu3 %v6263_v60  ;;  %v3898_v46 = vmul.f32 %v8942_v7, %v3882_v53  ;;  %v3901_v1 = vmul.f32 %v8942_v7, %v3868_v50  ;;  %v9344_v63 = vadd.f32 %v3905_v40, %v3849_v0  ;;  %v3931_v42 = vsel %vm3930_vm14, %v8963_v19, %v8954_v35  ;;  %v6266_v60 = vld [vmem:[#allocation4 + $0x58] sm:$0xff]  ;;  %v11097_v50 = vld [vmem:[#allocation50_spill] sm:$0xff] }
0x128f   :  { %v3899_v29 = vmul.f32 %v8942_v7, %v3866_v32  ;;  %v3949_v6 = vmul.f32 %v3932_v23, %v9319_v37  ;;  %v3963_v27 = vmul.f32 %v8948_v49, %v3947_v54  ;;  %v3966_v22 = vmul.f32 %v8948_v49, %v3950_v57  ;;  %v11098_v57 = vld [vmem:[#allocation17_spill] sm:$0xff]  ;;  %v6267_v23 = vld [vmem:[#allocation4 + $0x38] sm:$0xff] }
0x1290   :  { %3782 = vmatpush.msrb.mxu3 %v6264_v55  ;;  %v3912_v16 = vadd.f32 %v3904_v45, %v3848_v15  ;;  %v3911_v53 = vadd.f32 %v3903_v13, %v3847_v47  ;;  %v3946_v0 = vsel %vm3930_vm14, 0.0, %v8965_v5  ;;  %v3953_v40 = vmul.f32 %v3935_v59, %v9319_v37  ;;  %v11099_v45 = vld [vmem:[#allocation56_spill] sm:$0xff] }
0x1291   :  { %v3908_v35 = vadd.f32 %v3900_v56, %v3844_v30  ;;  %v3948_v19 = vmul.f32 %v9198_v10, %v3931_v42  ;;  %v3934_v7 = vsel %vm3930_vm14, %v8965_v5, %v8932_v58  ;;  %v4009_v54 = vsel %vm649_vm8, 0.0, %v11097_v50  ;;  %v11100_v56 = vld [vmem:[#allocation19_spill] sm:$0xff]  ;;  %v11102_v42 = vld [vmem:[#allocation18_spill] sm:$0xff] }
0x1292   :  { %3783 = vmatpush.msrb.mxu3 %v6265_v28  ;;  %v3906_v15 = vadd.f32 %v3898_v46, %v9269_v3  ;;  %v3909_v47 = vadd.f32 %v3901_v1, %v9272_v33  ;;  %v3995_v32 = vsel %vm649_vm8, %v11097_v50, %v11098_v57  ;;  %v4010_v30 = vsel %vm649_vm8, 0.0, %v11099_v45  ;;  %v11101_v46 = vld [vmem:[#allocation53_spill] sm:$0xff] }
0x1293   :  { %v3965_v58 = vmul.f32 %v8948_v49, %v3949_v6  ;;  %v3907_v5 = vadd.f32 %v3899_v29, %v3843_v18  ;;  %v3951_v55 = vmul.f32 %v3946_v0, %v9293_v34  ;;  %v3936_v3 = vsel %vm3930_vm14, %v8997_v14, %v11100_v56  ;;  %v6268_v6 = vld [vmem:[#allocation4 + $0x18] sm:$0xff]  ;;  %v11103_v0 = vld [vmem:[#allocation52_spill] sm:$0xff]  ;;  %v11104_v56 = vld [vmem:[#allocation58_spill] sm:$0xff] }
0x1294   :  { %3784 = vmatpush.msrb.mxu3 %v6266_v60  ;;  %v9369_v13 = vpop.permute.xlu1 %4172  ;;  %v3952_v33 = vmul.f32 %v9198_v10, %v3934_v7  ;;  %v4011_v59 = vmul.f32 %v9158_v2, %v4009_v54  ;;  %v3996_v1 = vsel %vm649_vm8, %v11098_v57, %v11101_v46  ;;  %v3997_v28 = vsel %vm649_vm8, %v11101_v46, %v11102_v42  ;;  %v9388_v7 = vpop.permute.xlu2 %4205  ;;  %v11105_v46 = vld [vmem:[#allocation48_spill] sm:$0xff] }
0x1295   :  { %v3964_v18 = vmul.f32 %v8948_v49, %v3948_v19  ;;  %v4012_v29 = vmul.f32 %v9243_v51, %v3995_v32  ;;  %v3969_v14 = vmul.f32 %v11103_v0, %v3953_v40  ;;  %v4015_v60 = vmul.f32 %v9158_v2, %v4010_v30  ;;  %v9390_v50 = vpop.permute.xlu0 %4176  ;;  %v11106_v30 = vld [vmem:[#allocation57_spill] sm:$0xff] }
0x1296   :  { %3785 = vmatpush.msrb.mxu3 %v6267_v23  ;;  %v3971_v54 = vadd.f32 %v3963_v27, %v3906_v15  ;;  %v3974_v57 = vadd.f32 %v3966_v22, %v3909_v47  ;;  %v3954_v23 = vmul.f32 %v9174_v21, %v3936_v3  ;;  %v4000_v42 = vsel %vm649_vm8, %v11105_v46, %v11104_v56  ;;  %v11107_v15 = vld [vmem:[#allocation59_spill] sm:$0xff] }
0x1297   :  { %v3967_v49 = vmul.f32 %v11103_v0, %v3951_v55  ;;  %v4013_v19 = vmul.f32 %v9177_v61, %v3996_v1  ;;  %v4014_v40 = vmul.f32 %v9189_v52, %v3997_v28  ;;  %v3968_v32 = vmul.f32 %v11103_v0, %v3952_v33 }
0x1298   :  { %3786 = vmatpush.msrb.mxu3 %v6268_v6  ;;  %v3973_v6 = vadd.f32 %v3965_v58, %v3908_v35  ;;  %v3998_v27 = vsel %vm649_vm8, %v11099_v45, %v11106_v30  ;;  %v3999_v22 = vsel %vm649_vm8, %v11106_v30, %v11105_v46  ;;  %v4027_v47 = vmul.f32 %v11107_v15, %v4011_v59  ;;  %v11108_v35 = vld [vmem:[#allocation51_spill] sm:$0xff] }
0x1299   :  { %v3972_v3 = vadd.f32 %v3964_v18, %v3907_v5  ;;  %v4031_v58 = vmul.f32 %v11108_v35, %v4015_v60  ;;  %v4018_v55 = vmul.f32 %v9189_v52, %v4000_v42  ;;  %v4028_v1 = vmul.f32 %v11107_v15, %v4012_v29 }
0x129a   :  { %v3970_v28 = vmul.f32 %v11103_v0, %v3954_v23  ;;  %v3977_v33 = vadd.f32 %v3969_v14, %v3912_v16  ;;  %v155_v56 = vand.u32 255, %v9136_v38  ;;  %v141_v45 = vand.u32 255, %v9144_v20  ;;  %v6269_v38 = vld [vmem:[%s10767_s0] sm:$0xff]  ;;  %v6270_v23 = vld [vmem:[%s10767_s0 + $0x8] sm:$0xff] }
0x129b   :  { %v4016_v46 = vmul.f32 %v9243_v51, %v3998_v27  ;;  %v4017_v59 = vmul.f32 %v9177_v61, %v3999_v22  ;;  %v4029_v5 = vmul.f32 %v11107_v15, %v4013_v19  ;;  %v4030_v18 = vmul.f32 %v11107_v15, %v4014_v40  ;;  %v11109_v16 = vld [vmem:[#allocation60_spill] sm:$0xff]  ;;  %v6272_v40 = vld [vmem:[%s10767_s0 + $0x18] sm:$0xff] }
0x129c   :  { %v9413_v31 = vpop.permute.xlu1 %4178  ;;  %v3975_v60 = vadd.f32 %v3967_v49, %v9336_v48  ;;  %v3976_v29 = vadd.f32 %v3968_v32, %v3911_v53  ;;  %v4035_v42 = vadd.f32 %v4027_v47, %v3971_v54  ;;  %v4051_v20 = vmul.f32 %v6269_v38, %v11109_v16  ;;  %v6271_v48 = vld [vmem:[%s10767_s0 + $0x10] sm:$0xff]  ;;  %v9433_v54 = vpop.permute.xlu2 %4230 }
0x129d   :  { %v4034_v0 = vmul.f32 %v11108_v35, %v4018_v55  ;;  %v4036_v14 = vadd.f32 %v4028_v1, %v3972_v3  ;;  %v4052_v19 = vmul.f32 %v6270_v23, %v11109_v16  ;;  %v4053_v53 = vmul.f32 %v6271_v48, %v11109_v16  ;;  %v9442_v47 = vpop.permute.xlu0 %4209  ;;  %v11110_v3 = vld [vmem:[#allocation26_spill] sm:$0xff] }
0x129e   :  { %v3978_v49 = vadd.f32 %v3970_v28, %v9344_v63  ;;  %v4054_v32 = vmul.f32 %v6272_v40, %v11109_v16  ;;  %vm217_vm1 = vcmp.lt.s32.totalorder %v155_v56, 240  ;;  %vm215_vm4 = vcmp.lt.s32.totalorder %v141_v45, 240  ;;  %v11116_v48 = vld [vmem:[#allocation34_spill] sm:$0xff]  ;;  %v11118_v40 = vld [vmem:[#allocation41_spill] sm:$0xff] }
0x129f   :  { %v4032_v30 = vmul.f32 %v11108_v35, %v4016_v46  ;;  %v4033_v27 = vmul.f32 %v11108_v35, %v4017_v59  ;;  %v4037_v22 = vadd.f32 %v4029_v5, %v3973_v6  ;;  %v4038_v15 = vadd.f32 %v4030_v18, %v3974_v57  ;;  %v11113_v46 = vld [vmem:[#allocation61_spill] sm:$0xff] }
0x12a0   :  { %v4083_v55 = vmul.f32 %v11110_v3, %v9227_v62  ;;  %v4084_v63 = vmul.f32 %v11110_v3, %v9231_v8  ;;  %v4085_v1 = vmul.f32 %v11110_v3, %v9210_v11  ;;  %v4059_v28 = vadd.f32 %v4051_v20, %v4035_v42  ;;  %v6273_v8 = vld [vmem:[%s10767_s0 + $0x20] sm:$0xff] }
0x12a1   :  { %v4060_v56 = vadd.f32 %v4052_v19, %v4036_v14  ;;  %v9451_v45 = vsel %vm217_vm1, 1.0, %v11076_v43  ;;  %v9454_v6 = vsel %vm215_vm4, 1.0, %v11076_v43  ;;  %v4086_v57 = vmul.f32 %v11110_v3, %v9223_v25  ;;  %vm11137_vm1 = vmmov %vm11136_vm6 }
0x12a2   :  { %11111 = vst [vmem:[#allocation45_spill] sm:$0xff] %v9451_v45  ;;  %v4039_v35 = vadd.f32 %v4031_v58, %v3975_v60  ;;  %v4042_v62 = vadd.f32 %v4034_v0, %v3978_v49  ;;  %v4055_v11 = vmul.f32 %v6273_v8, %v11113_v46  ;;  %v4040_v5 = vadd.f32 %v4032_v30, %v3976_v29  ;;  %v6274_v0 = vld [vmem:[%s10767_s0 + $0x28] sm:$0xff]  ;;  %vm11164_vm4 = vmmov %vm11137_vm1 }
0x12a3   :  { %11112 = vst [vmem:[#allocation46_spill] sm:$0xff] %v9454_v6  ;;  %v4041_v18 = vadd.f32 %v4033_v27, %v3977_v33  ;;  %v4061_v42 = vadd.f32 %v4053_v53, %v4037_v22  ;;  %v4062_v38 = vadd.f32 %v4054_v32, %v4038_v15  ;;  %v9466_v43 = vmul.f32 %v9451_v45, %v9189_v52  ;;  %v11117_v53 = vld [vmem:[#allocation28_spill] sm:$0xff] }
0x12a4   :  { %v9462_v59 = vpop.permute.xlu1 %4228  ;;  %v9470_v25 = vmul.f32 %v9454_v6, %v9243_v51  ;;  %v4119_v58 = vsel %vm4115_vm5, %v9141_v36, %v9163_v12  ;;  %v4091_v60 = vadd.f32 %v4083_v55, %v4059_v28  ;;  %v4120_v29 = vsel %vm4115_vm5, %v9163_v12, %v9131_v41  ;;  %v6275_v36 = vld [vmem:[%s10767_s0 + $0x30] sm:$0xff]  ;;  %v4235_v27 = vpop.permute.xlu2 %4234 }
0x12a5   :  { %11114 = vst [vmem:[#allocation16_spill] sm:$0xff] %v9466_v43  ;;  %v4121_v33 = vsel %vm4115_vm5, %v9131_v41, %v9165_v24  ;;  %v4131_v16 = vsel %vm4115_vm5, %v9165_v24, 0.0  ;;  %v4092_v20 = vadd.f32 %v4084_v63, %v4060_v56  ;;  %v4056_v14 = vmul.f32 %v6274_v0, %v11113_v46  ;;  %v6276_v41 = vld [vmem:[%s10767_s0 + $0x38] sm:$0xff]  ;;  %v11119_v63 = vld [vmem:[#allocation42_spill] sm:$0xff] }
0x12a6   :  { %11115 = vst [vmem:[#allocation27_spill] sm:$0xff] %v9470_v25  ;;  %v4057_v12 = vmul.f32 %v6275_v36, %v11113_v46  ;;  %v4058_v23 = vmul.f32 %v6276_v41, %v11113_v46  ;;  %v4063_v24 = vadd.f32 %v4055_v11, %v4039_v35  ;;  %v4130_v19 = vsel %vm4115_vm5, %v9117_v17, 0.0  ;;  %v11120_v28 = vld [vmem:[#allocation30_spill] sm:$0xff]  ;;  %v11121_v35 = vld [vmem:[#allocation21_spill] sm:$0xff]  ;;  %v11122_v46 = vld [vmem:[#allocation39_spill] sm:$0xff]  ;;  %v4237_v36 = vpop.permute.xlu0 %4236 }
0x12a7   :  { %v4116_v49 = vsel %vm4115_vm5, %v11117_v53, %v11116_v48  ;;  %v4117_v32 = vsel %vm4115_vm5, %v11116_v48, %v11118_v40  ;;  %v4136_v30 = vmul.f32 %v9158_v2, %v4119_v58  ;;  %v4118_v22 = vsel %vm4115_vm5, %v11118_v40, %v9117_v17  ;;  %v11123_v58 = vld [vmem:[#allocation31_spill] sm:$0xff] }
0x12a8   :  { %v4137_v15 = vmul.f32 %v4120_v29, %v9470_v25  ;;  %v4138_v3 = vmul.f32 %v9177_v61, %v4121_v33  ;;  %v4139_v55 = vmul.f32 %v4131_v16, %v9466_v43  ;;  %v4087_v56 = vmul.f32 %v11120_v28, %v11119_v63  ;;  %v11124_v63 = vld [vmem:[#allocation33_spill] sm:$0xff] }
0x12a9   :  { %v4088_v8 = vmul.f32 %v11120_v28, %v11121_v35  ;;  %v4089_v11 = vmul.f32 %v11120_v28, %v11122_v46  ;;  %v4090_v0 = vmul.f32 %v11120_v28, %v11123_v58  ;;  %v4064_v17 = vadd.f32 %v4056_v14, %v4040_v5 }
0x12aa   :  { %v4065_v41 = vadd.f32 %v4057_v12, %v4041_v18  ;;  %v4132_v29 = vmul.f32 %v9158_v2, %v4116_v49  ;;  %v4133_v33 = vmul.f32 %v4117_v32, %v9470_v25  ;;  %v4066_v48 = vadd.f32 %v4058_v23, %v4042_v62  ;;  %v11125_v32 = vld [vmem:[#allocation22_spill] sm:$0xff]  ;;  %v11126_v23 = vld [vmem:[#allocation36_spill] sm:$0xff] }
0x12ab   :  { %v4135_v53 = vmul.f32 %v4130_v19, %v9466_v43  ;;  %v4134_v40 = vmul.f32 %v9177_v61, %v4118_v22  ;;  %v4152_v35 = vmul.f32 %v11124_v63, %v4136_v30  ;;  %v4153_v46 = vmul.f32 %v11124_v63, %v4137_v15 }
0x12ac   :  { %v4233_v16 = vpop.permute.xlu1 %4232  ;;  %v4154_v37 = vmul.f32 %v11124_v63, %v4138_v3  ;;  %v4155_v28 = vmul.f32 %v11124_v63, %v4139_v55  ;;  %v4093_v5 = vadd.f32 %v4085_v1, %v4061_v42  ;;  %v4095_v18 = vadd.f32 %v4087_v56, %v4063_v24 }
0x12ad   :  { %v4096_v14 = vadd.f32 %v4088_v8, %v4064_v17  ;;  %v4097_v12 = vadd.f32 %v4089_v11, %v4065_v41  ;;  %v4098_v49 = vadd.f32 %v4090_v0, %v4066_v48  ;;  %v4148_v58 = vmul.f32 %v11125_v32, %v4132_v29  ;;  %v11130_v8 = vld [vmem:[#allocation35_spill] sm:$0xff] }
0x12ae   :  { %v4149_v62 = vmul.f32 %v11125_v32, %v4133_v33  ;;  %v4181_v19 = vsel %vm11127_vm7, %v9312_v26, %v11126_v23  ;;  %v4194_v30 = vsel %vm11128_vm10, %v9325_v4, 0.0  ;;  %v9533_v22 = vadd.f32 %v4152_v35, %v4095_v18  ;;  %vm11169_vm7 = vmmov %vm11137_vm1 }
0x12af   :  { %v4094_v15 = vadd.f32 %v4086_v57, %v4062_v38  ;;  %v4150_v1 = vmul.f32 %v11125_v32, %v4134_v40  ;;  %v4151_v42 = vmul.f32 %v11125_v32, %v4135_v53  ;;  %v9537_v24 = vadd.f32 %v4153_v46, %v4096_v14  ;;  %v11135_v14 = vld [vmem:[#allocation40_spill] sm:$0xff]  ;;  %vm11170_vm10 = vmmov %vm11137_vm1 }
0x12b0   :  { %v9539_v3 = vadd.f32 %v4154_v37, %v4097_v12  ;;  %v9541_v55 = vadd.f32 %v4155_v28, %v4098_v49  ;;  %v9545_v56 = vmul.f32 %v9451_v45, %v9174_v21  ;;  %v4180_v11 = vsel %vm11131_vm11, %v11130_v8, %v9312_v26  ;;  %v4241_v37 = vpop.permute.xlu2 %4240  ;;  %vm11171_vm11 = vmmov %vm11137_vm1 }
0x12b1   :  { %v4197_v57 = vmul.f32 %v9454_v6, %v4181_v19  ;;  %v4182_v38 = vsel %vm11132_vm12, %v11126_v23, %v9325_v4  ;;  %v4199_v0 = vmul.f32 %v9451_v45, %v4194_v30  ;;  %v4156_v17 = vadd.f32 %v4148_v58, %v4091_v60  ;;  %v4243_v4 = vpop.permute.xlu0 %4242  ;;  %vm11178_vm12 = vmmov %vm11137_vm1 }
0x12b2   :  { %11129 = vst [vmem:[#allocation20_spill] sm:$0xff] %v9545_v56  ;;  %v4157_v41 = vadd.f32 %v4149_v62, %v4092_v20  ;;  %v9557_v29 = vmul.f32 %v9454_v6, %v9198_v10  ;;  %v4158_v48 = vadd.f32 %v4150_v1, %v4093_v5  ;;  %v4159_v53 = vadd.f32 %v4151_v42, %v4094_v15 }
0x12b3   :  { %v4259_v26 = vsel %vm4244_vm3, %v4235_v27, 0.0  ;;  %v4245_v40 = vsel %vm4244_vm3, %v9462_v59, %v9433_v54  ;;  %v4212_v63 = vmul.f32 %v9388_v7, %v4180_v11  ;;  %v4214_v60 = vmul.f32 %v9388_v7, %v4182_v38 }
0x12b4   :  { %v4239_v33 = vpop.permute.xlu1 %4238  ;;  %v4246_v20 = vsel %vm4244_vm3, %v9433_v54, %v4233_v16  ;;  %v4247_v35 = vsel %vm4244_vm3, %v4233_v16, %v4235_v27  ;;  %v4213_v46 = vmul.f32 %v9388_v7, %v4197_v57  ;;  %v4215_v28 = vmul.f32 %v9388_v7, %v4199_v0 }
0x12b5   :  { %v4184_v5 = vsel %vm11133_vm9, %v9323_v9, %v9390_v50  ;;  %v4195_v59 = vsel %vm11134_vm15, %v9413_v31, 0.0  ;;  %v4264_v18 = vmul.f32 %v4259_v26, %v9545_v56  ;;  %v4261_v12 = vmul.f32 %v11135_v14, %v4245_v40  ;;  %vm11180_vm9 = vmmov %vm11137_vm1 }
0x12b6   :  { %v4250_v49 = vsel %vm4244_vm3, %v4241_v37, %v4243_v4  ;;  %v4260_v54 = vsel %vm4244_vm3, %v4243_v4, 0.0  ;;  %v4262_v27 = vmul.f32 %v4246_v20, %v9557_v29  ;;  %v4263_v16 = vmul.f32 %v9171_v39, %v4247_v35  ;;  %vm11189_vm15 = vmmov %vm11137_vm1 }
0x12b7   :  { %v4248_v7 = vsel %vm4244_vm3, %v4237_v36, %v4239_v33  ;;  %v4249_v32 = vsel %vm4244_vm3, %v4239_v33, %v4241_v37  ;;  %v4220_v58 = vadd.f32 %v4212_v63, %v4156_v17  ;;  %v4222_v62 = vadd.f32 %v4214_v60, %v4158_v48 }
0x12b8   :  { %v4201_v23 = vmul.f32 %v9454_v6, %v4184_v5  ;;  %v4203_v19 = vmul.f32 %v9451_v45, %v4195_v59  ;;  %v4221_v30 = vadd.f32 %v4213_v46, %v4157_v41  ;;  %v4223_v15 = vadd.f32 %v4215_v28, %v4159_v53  ;;  %v4275_v0 = vpop.permute.xlu2 %4274 }
0x12b9   :  { %v4183_v1 = vsel %vm11136_vm6, %v9369_v13, %v9323_v9  ;;  %v4185_v42 = vsel %vm11137_vm1, %v9390_v50, %v9413_v31  ;;  %v4267_v36 = vmul.f32 %v9171_v39, %v4250_v49  ;;  %v4268_v8 = vmul.f32 %v4260_v54, %v9545_v56  ;;  %v4295_v35 = vpop.permute.xlu0 %4294  ;;  %vm11190_vm6 = vmmov %vm11137_vm1 }
0x12ba   :  { %v4265_v11 = vmul.f32 %v11135_v14, %v4248_v7  ;;  %v4266_v57 = vmul.f32 %v4249_v32, %v9557_v29  ;;  %v4216_v9 = vmul.f32 %v9442_v47, %v4183_v1  ;;  %v4217_v13 = vmul.f32 %v9442_v47, %v4201_v23 }
0x12bb   :  { %v4218_v31 = vmul.f32 %v9442_v47, %v4185_v42  ;;  %v4219_v50 = vmul.f32 %v9442_v47, %v4203_v19  ;;  %v4283_v4 = vmul.f32 %v4275_v0, %v4267_v36  ;;  %v4284_v63 = vmul.f32 %v4275_v0, %v4268_v8 }
0x12bc   :  { %v4271_v38 = vpop.permute.xlu1 %4270  ;;  %v4281_v60 = vmul.f32 %v4275_v0, %v4265_v11  ;;  %v4282_v20 = vmul.f32 %v4275_v0, %v4266_v57  ;;  %v4224_v5 = vadd.f32 %v4216_v9, %v9533_v22  ;;  %v4225_v59 = vadd.f32 %v4217_v13, %v9537_v24  ;;  %v9606_v0 = vld [vmem:[%s10768_s1 + $0x10] sm:$0xff] }
0x12bd   :  { %v4277_v37 = vmul.f32 %v4271_v38, %v4261_v12  ;;  %v4278_v17 = vmul.f32 %v4271_v38, %v4262_v27  ;;  %v4279_v41 = vmul.f32 %v4271_v38, %v4263_v16  ;;  %v4280_v33 = vmul.f32 %v4271_v38, %v4264_v18  ;;  %11138 = vst [vmem:[#allocation8_spill] sm:$0xff] %v9606_v0 }
0x12be   :  { %v4226_v46 = vadd.f32 %v4218_v31, %v9539_v3  ;;  %v4227_v28 = vadd.f32 %v4219_v50, %v9541_v55  ;;  %v4289_v54 = vadd.f32 %v4281_v60, %v4224_v5  ;;  %v4290_v27 = vadd.f32 %v4282_v20, %v4225_v59  ;;  %v11140_v50 = vld [vmem:[#allocation44_spill] sm:$0xff] }
0x12bf   :  { %v4285_v48 = vadd.f32 %v4277_v37, %v4220_v58  ;;  %v4286_v53 = vadd.f32 %v4278_v17, %v4221_v30  ;;  %v4287_v26 = vadd.f32 %v4279_v41, %v4222_v62  ;;  %v4288_v40 = vadd.f32 %v4280_v33, %v4223_v15  ;;  %v11139_v37 = vld [vmem:[#allocation49_spill] sm:$0xff]  ;;  %v9613_v33 = vld [vmem:[%s10768_s1] sm:$0xff] }
0x12c0   :  { %v4291_v16 = vadd.f32 %v4283_v4, %v4226_v46  ;;  %v4292_v7 = vadd.f32 %v4284_v63, %v4227_v28  ;;  %v6479_v38 = vmov 36   ;;  %v6480_v17 = vmov 37   ;;  %v11141_v4 = vld [vmem:[#allocation47_spill] sm:$0xff]  ;;  %v11143_v5 = vld [vmem:[#allocation32_spill] sm:$0xff] }
0x12c1   :  { %v4301_v18 = vadd.f32 %v4295_v35, %v4285_v48  ;;  %v4302_v12 = vadd.f32 %v4295_v35, %v4286_v53  ;;  %v4303_v47 = vadd.f32 %v4295_v35, %v4287_v26  ;;  %v4304_v49 = vadd.f32 %v4295_v35, %v4288_v40  ;;  %6165 = vset.pattern.permute.xlu0 %v6479_v38  ;;  %v9622_v53 = vpop.permute.xlu2 %4322  ;;  %v6279_v59 = vld [vmem:[%s10769_s2] sm:$0xff] }
0x12c2   :  { %6164 = vset.pattern.permute.xlu2 %v6479_v38  ;;  %4443 = vperm.xlu0 %6165, %v9606_v0   ;;  %v6481_v41 = vmov 38   ;;  %v6482_v9 = vmov 39   ;;  %v6483_v13 = vmov 40   ;;  %v6484_v40 = vmov 41  }
0x12c3   :  { %v4309_v3 = vmax.f32 %v4301_v18, 0.0  ;;  %v4310_v30 = vmax.f32 %v4302_v12, 0.0  ;;  %v4311_v55 = vmax.f32 %v4303_v47, 0.0  ;;  %v4312_v15 = vmax.f32 %v4304_v49, 0.0  ;;  %4439 = vperm.xlu2 %6164, %v11139_v37   ;;  %6166 = vset.pattern.permute.xlu1 %v6480_v17  ;;  %v6280_v18 = vld [vmem:[%s10771_s4 + $0x8] sm:$0xff]  ;;  %v11144_v47 = vld [vmem:[#allocation23_spill] sm:$0xff] }
0x12c4   :  { %4495 = vperm.xlu1 %6166, %v9613_v33   ;;  %v6485_v20 = vmov 42   ;;  %v6486_v35 = vmov 43   ;;  %v6487_v46 = vmov 44   ;;  %v11142_v28 = vmov 4   ;;  %v6281_v12 = vld [vmem:[%s10769_s2 + $0x8] sm:$0xff] }
0x12c5   :  { %v4299_v32 = vpop.permute.xlu1 %4298  ;;  %v6488_v49 = vmov 45  }
0x12c6   :  { %v4305_v58 = vadd.f32 %v4299_v32, %v4289_v54  ;;  %v4306_v62 = vadd.f32 %v4299_v32, %v4290_v27  ;;  %v4307_v23 = vadd.f32 %v4299_v32, %v4291_v16  ;;  %v4308_v19 = vadd.f32 %v4299_v32, %v4292_v7 }
0x12c8   :  { %v4313_v22 = vmax.f32 %v4305_v58, 0.0  ;;  %v4314_v1 = vmax.f32 %v4306_v62, 0.0  ;;  %v4315_v24 = vmax.f32 %v4307_v23, 0.0  ;;  %v4316_v42 = vmax.f32 %v4308_v19, 0.0 }
0x12c9   :  { %v4330_v60 = vpop.permute.xlu2 %4329 }
0x12ca   :  { %v4317_v36 = vpack.c.bf16 %v4313_v22, %v4309_v3  ;;  %v4318_v8 = vpack.c.bf16 %v4314_v1, %v4310_v30  ;;  %v4319_v11 = vpack.c.bf16 %v4315_v24, %v4311_v55  ;;  %v4320_v57 = vpack.c.bf16 %v4316_v42, %v4312_v15  ;;  %6169 = vset.pattern.permute.xlu0 %v6481_v41 }
0x12cb   :  { %4563 = vperm.xlu0 %6169, %v9606_v0   ;;  %6167 = vset.pattern.permute.xlu2 %v6480_v17 }
0x12cc   :  { %4341 = vmatpush.bf16.msrb.mxu0 %v4317_v36  ;;  %4355 = vmatpush.bf16.msrb.mxu1 %v4318_v8 }
0x12cd   :  { %4369 = vmatpush.bf16.msrb.mxu2 %v4319_v11  ;;  %4383 = vmatpush.bf16.msra.mxu3 %v4320_v57 }
0x12ce   :  { %4499 = vperm.xlu2 %6167, %v9606_v0   ;;  %6170 = vset.pattern.permute.xlu1 %v6482_v9 }
0x12cf   :  { %4623 = vperm.xlu1 %6170, %v9613_v33  }
0x12d3   :  { %6172 = vset.pattern.permute.xlu0 %v6483_v13 }
0x12d4   :  { %4647 = vperm.xlu0 %6172, %v9613_v33  }
0x12d6   :  { %6168 = vset.pattern.permute.xlu2 %v6481_v41 }
0x12d7   :  { %4559 = vperm.xlu2 %6168, %v9613_v33   ;;  %6173 = vset.pattern.permute.xlu1 %v6483_v13 }
0x12d8   :  { %4651 = vperm.xlu1 %6173, %v9606_v0  }
0x12dc   :  { %6175 = vset.pattern.permute.xlu0 %v6484_v40 }
0x12dd   :  { %4715 = vperm.xlu0 %6175, %v9606_v0  }
0x12df   :  { %6171 = vset.pattern.permute.xlu2 %v6482_v9 }
0x12e0   :  { %4627 = vperm.xlu2 %6171, %v9606_v0   ;;  %6176 = vset.pattern.permute.xlu1 %v6485_v20 }
0x12e1   :  { %4775 = vperm.xlu1 %6176, %v9613_v33  }
0x12e5   :  { %6179 = vset.pattern.permute.xlu0 %v6486_v35 }
0x12e6   :  { %4843 = vperm.xlu0 %6179, %v9606_v0  }
0x12e8   :  { %6174 = vset.pattern.permute.xlu2 %v6484_v40 }
0x12e9   :  { %4711 = vperm.xlu2 %6174, %v9613_v33   ;;  %6180 = vset.pattern.permute.xlu1 %v6487_v46 }
0x12ea   :  { %4903 = vperm.xlu1 %6180, %v9613_v33  }
0x12ee   :  { %6184 = vset.pattern.permute.xlu0 %v11142_v28 }
0x12ef   :  { %4955 = vperm.xlu0 %6184, %v11143_v5  }
0x12f1   :  { %6177 = vset.pattern.permute.xlu2 %v6485_v20 }
0x12f2   :  { %4779 = vperm.xlu2 %6177, %v9606_v0   ;;  %6182 = vset.pattern.permute.xlu1 %v11142_v28 }
0x12f3   :  { %4927 = vperm.xlu1 %6182, %v6279_v59  }
0x12f7   :  { %6186 = vset.pattern.permute.xlu0 %v6488_v49 }
0x12fa   :  { %6178 = vset.pattern.permute.xlu2 %v6486_v35 }
0x12fb   :  { %4839 = vperm.xlu2 %6178, %v9613_v33   ;;  %4959 = vperm.xlu1 %6182, %v6280_v18  }
0x12fc   :  { %v3700_v31 = vpop.f32.mrf.mxu3 }
0x12fd   :  { %v3701_v48 = vadd.f32 %v3700_v31, %v11140_v50  ;;  %v4327_v31 = vpop.permute.xlu1 %4326 }
0x12ff   :  { %3721 = vmatmul.f32.vlgmr.msra.gmra.mxu0 %v3701_v48  ;;  %3743 = vmatmul.f32.vlgmr.msra.gmra.mxu1 %v3701_v48 }
0x1300   :  { %3765 = vmatmul.f32.vlgmr.msra.gmra.mxu2 %v3701_v48  ;;  %3787 = vmatmul.f32.vlgmr.msrb.gmra.mxu3 %v3701_v48 }
0x1303   :  { %6181 = vset.pattern.permute.xlu2 %v6487_v46 }
0x1304   :  { %v3702_v26 = vpop.f32.mrf.mxu3  ;;  %4907 = vperm.xlu2 %6181, %v9606_v0  }
0x1305   :  { %v3703_v63 = vadd.f32 %v3702_v26, %v11141_v4 }
0x1307   :  { %3724 = vmatmul.f32.gmra.mxu0 %v3703_v63  ;;  %3746 = vmatmul.f32.gmra.mxu1 %v3703_v63 }
0x1308   :  { %3768 = vmatmul.f32.gmra.mxu2 %v3703_v63  ;;  %3790 = vmatmul.f32.gmra.mxu3 %v3703_v63 }
0x130c   :  { %6183 = vset.pattern.permute.xlu2 %v11142_v28 }
0x130d   :  { %4931 = vperm.xlu2 %6183, %v6281_v12  }
0x130f   :  { %5704 = vmatmul.msk.bf16.vlgmr.msrb.gmra.mxu0 %vm795_vm13, %v4330_v60  ;;  %5705 = vmatmul.msk.bf16.vlgmr.msrb.gmra.mxu1 %vm795_vm13, %v4330_v60 }
0x1310   :  { %5706 = vmatmul.msk.bf16.vlgmr.msrb.gmra.mxu2 %vm795_vm13, %v4330_v60  ;;  %5707 = vmatmul.msk.bf16.vlgmr.msra.gmra.mxu3 %vm795_vm13, %v4330_v60 }
0x1315   :  { %4962 = vrot.lane.b32.xlu2 %v11144_v47, %s6425_s13 }
0x1316   :  { %6185 = vset.pattern.permute.xlu2 %v6488_v49 }
0x131d   :  { %5072 = vperm.xlu2 %6185, %v9613_v33   ;;  %v9657_v27 = vpop.permute.xlu2 %4439 }
0x1328   :  { %v9669_v3 = vpop.permute.xlu2 %4499 }
0x1331   :  { %v9683_v11 = vpop.permute.xlu2 %4559 }
0x1334   :  { %v9655_v54 = vpop.permute.xlu0 %4443 }
0x1336   :  { %v9718_v48 = vpop.permute.xlu1 %4495 }
0x133a   :  { %v9689_v57 = vpop.permute.xlu2 %4627 }
0x133d   :  { %v9663_v32 = vpop.permute.xlu0 %4563 }
0x1341   :  { %v9733_v26 = vpop.permute.xlu1 %4623 }
0x1343   :  { %v9694_v38 = vpop.permute.xlu2 %4711 }
0x1346   :  { %v9671_v30 = vpop.permute.xlu0 %4647 }
0x134a   :  { %v9745_v60 = vpop.permute.xlu1 %4651 }
0x134b   :  { %11153 = vst [vmem:[#allocation17_spill] sm:$0xff] %v9745_v60 }
0x134c   :  { %v9699_v17 = vpop.permute.xlu2 %4779 }
0x134d   :  { %11149 = vst [vmem:[#allocation13_spill] sm:$0xff] %v9699_v17 }
0x134f   :  { %v9765_v5 = vpop.permute.xlu0 %4715 }
0x1350   :  { %11156 = vst [vmem:[#allocation53_spill] sm:$0xff] %v9765_v5 }
0x1353   :  { %v9755_v35 = vpop.permute.xlu1 %4775 }
0x1355   :  { %v9714_v50 = vpop.permute.xlu2 %4839 }
0x135c   :  { %v9767_v59 = vpop.permute.xlu1 %4903 }
0x137c   :  { %v9659_v16 = vpop.f32.mrf.mxu0  ;;  %v9661_v7 = vpop.f32.mrf.mxu1 }
0x137d   :  { %11145 = vst [vmem:[#allocation9_spill] sm:$0xff] %v9659_v16 }
0x137e   :  { %11146 = vst [vmem:[#allocation10_spill] sm:$0xff] %v9661_v7 }
0x1383   :  { %v9665_v58 = vpop.f32.mrf.mxu2  ;;  %v9667_v62 = vpop.f32.mrf.mxu3 }
0x1384   :  { %11147 = vst [vmem:[#allocation11_spill] sm:$0xff] %v9665_v58  ;;  %v3725_v23 = vpop.f32.mrf.mxu0  ;;  %v3747_v19 = vpop.f32.mrf.mxu1 }
0x1385   :  { %11148 = vst [vmem:[#allocation12_spill] sm:$0xff] %v9667_v62  ;;  %v9781_v19 = vpop.permute.xlu0 %4843 }
0x1386   :  { %11159 = vst [vmem:[#allocation58_spill] sm:$0xff] %v9781_v19 }
0x138b   :  { %v3769_v55 = vpop.f32.mrf.mxu2  ;;  %v3791_v15 = vpop.f32.mrf.mxu3 }
0x138c   :  { %v4343_v22 = vpop.f32.mrf.mxu0  ;;  %v4357_v1 = vpop.f32.mrf.mxu1 }
0x138d   :  { %v4344_v24 = vadd.f32 %v4343_v22, %v9622_v53  ;;  %v4358_v42 = vadd.f32 %v4357_v1, %v9622_v53  ;;  %v9783_v55 = vpop.permute.xlu1 %4927 }
0x138e   :  { %11160 = vst [vmem:[#allocation48_spill] sm:$0xff] %v9783_v55 }
0x138f   :  { %v9676_v36 = vmul.f32 %v9671_v30, %v4344_v24  ;;  %v9679_v8 = vmul.f32 %v9671_v30, %v4358_v42  ;;  %4456 = vrot.lane.b32.xlu2 %v4358_v42, %s6456_s7  ;;  %4400 = vrot.lane.b32.xlu1 %v4358_v42, %s6466_s11 }
0x1390   :  { %4398 = vrot.lane.b32.xlu0 %v4344_v24, %s6466_s11 }
0x1393   :  { %v4385_v37 = vpop.f32.mrf.mxu3  ;;  %v4371_v9 = vpop.f32.mrf.mxu2 }
0x1394   :  { %v9702_v41 = vadd.f32 %v4385_v37, %v9622_v53  ;;  %v9709_v13 = vadd.f32 %v4371_v9, %v9622_v53  ;;  %v9725_v53 = vpop.permute.xlu2 %4907  ;;  %v4345_v40 = vpop.f32.mrf.mxu0 }
0x1395   :  { %11150 = vst [vmem:[#allocation14_spill] sm:$0xff] %v9725_v53  ;;  %v9737_v63 = vadd.f32 %v4345_v40, %v4327_v31  ;;  %v4359_v28 = vpop.f32.mrf.mxu1 }
0x1396   :  { %v9769_v18 = vadd.f32 %v4359_v28, %v4327_v31 }
0x1397   :  { %4584 = vrot.lane.b32.xlu2 %v4358_v42, %s6358_s25  ;;  %4454 = vrot.lane.b32.xlu1 %v4344_v24, %s6456_s7  ;;  %11152 = vst [vmem:[#allocation50_spill] sm:$0xff] %v9737_v63 }
0x1398   :  { %4518 = vrot.lane.b32.xlu0 %v4344_v24, %s6469_s20  ;;  %11157 = vst [vmem:[#allocation18_spill] sm:$0xff] %v9769_v18 }
0x139b   :  { %v4373_v49 = vpop.f32.mrf.mxu2  ;;  %v4387_v22 = vpop.f32.mrf.mxu3 }
0x139c   :  { %v9735_v4 = vpop.permute.xlu2 %4931  ;;  %v9779_v23 = vadd.f32 %v4373_v49, %v4327_v31  ;;  %v9793_v1 = vadd.f32 %v4387_v22, %v4327_v31  ;;  %v11163_v49 = vld [vmem:[#allocation38_spill] sm:$0xff] }
0x139d   :  { %11151 = vst [vmem:[#allocation15_spill] sm:$0xff] %v9735_v4 }
0x139e   :  { %11158 = vst [vmem:[#allocation52_spill] sm:$0xff] %v9779_v23 }
0x139f   :  { %4670 = vrot.lane.b32.xlu2 %v4344_v24, %s6345_s27  ;;  %4520 = vrot.lane.b32.xlu1 %v4358_v42, %s6469_s20 }
0x13a0   :  { %4798 = vrot.lane.b32.xlu0 %v4344_v24, %s6346_s17 }
0x13a4   :  { %v9747_v20 = vpop.permute.xlu2 %4962 }
0x13a5   :  { %11154 = vst [vmem:[#allocation56_spill] sm:$0xff] %v9747_v20 }
0x13a7   :  { %4736 = vrot.lane.b32.xlu2 %v4358_v42, %s6475_s18  ;;  %4582 = vrot.lane.b32.xlu1 %v4344_v24, %s6358_s25 }
0x13a8   :  { %4862 = vrot.lane.b32.xlu0 %v4344_v24, %s6478_s24 }
0x13ac   :  { %v9761_v46 = vpop.permute.xlu2 %5072 }
0x13ad   :  { %11155 = vst [vmem:[#allocation19_spill] sm:$0xff] %v9761_v46 }
0x13af   :  { %4864 = vrot.lane.b32.xlu2 %v4358_v42, %s6478_s24  ;;  %4672 = vrot.lane.b32.xlu1 %v4358_v42, %s6345_s27 }
0x13b0   :  { %4404 = vrot.lane.b32.xlu0 %v9702_v41, %s6466_s11 }
0x13b7   :  { %4402 = vrot.lane.b32.xlu2 %v9709_v13, %s6466_s11  ;;  %4734 = vrot.lane.b32.xlu1 %v4344_v24, %s6475_s18  ;;  %v9801_v24 = vpop.permute.xlu0 %4955 }
0x13b8   :  { %4524 = vrot.lane.b32.xlu0 %v9702_v41, %s6469_s20  ;;  %11161 = vst [vmem:[#allocation57_spill] sm:$0xff] %v9801_v24 }
0x13bf   :  { %4460 = vrot.lane.b32.xlu2 %v9702_v41, %s6456_s7  ;;  %4800 = vrot.lane.b32.xlu1 %v4358_v42, %s6346_s17  ;;  %v9803_v42 = vpop.permute.xlu1 %4959 }
0x13c0   :  { %4676 = vrot.lane.b32.xlu0 %v9702_v41, %s6345_s27  ;;  %11162 = vst [vmem:[#allocation59_spill] sm:$0xff] %v9803_v42 }
0x13c7   :  { %4522 = vrot.lane.b32.xlu2 %v9709_v13, %s6469_s20  ;;  %4458 = vrot.lane.b32.xlu1 %v9709_v13, %s6456_s7 }
0x13c8   :  { %4804 = vrot.lane.b32.xlu0 %v9702_v41, %s6346_s17 }
0x13cf   :  { %4588 = vrot.lane.b32.xlu2 %v9702_v41, %s6358_s25  ;;  %4586 = vrot.lane.b32.xlu1 %v9709_v13, %s6358_s25 }
0x13d0   :  { %4462 = vrot.lane.b32.xlu0 %v9737_v63, %s6456_s7 }
0x13d7   :  { %4674 = vrot.lane.b32.xlu2 %v9709_v13, %s6345_s27  ;;  %4738 = vrot.lane.b32.xlu1 %v9709_v13, %s6475_s18 }
0x13d8   :  { %4590 = vrot.lane.b32.xlu0 %v9737_v63, %s6358_s25 }
0x13df   :  { %4740 = vrot.lane.b32.xlu2 %v9702_v41, %s6475_s18  ;;  %4866 = vrot.lane.b32.xlu1 %v9709_v13, %s6478_s24 }
0x13e0   :  { %4742 = vrot.lane.b32.xlu0 %v9737_v63, %s6475_s18 }
0x13e7   :  { %4802 = vrot.lane.b32.xlu2 %v9709_v13, %s6346_s17  ;;  %4406 = vrot.lane.b32.xlu1 %v9737_v63, %s6466_s11 }
0x13e8   :  { %4872 = vrot.lane.b32.xlu0 %v9769_v18, %s6478_s24 }
0x13e9   :  { %v9777_v12 = vpop.permute.xlu2 %4456 }
0x13ef   :  { %4868 = vrot.lane.b32.xlu2 %v9702_v41, %s6478_s24  ;;  %4464 = vrot.lane.b32.xlu1 %v9769_v18, %s6456_s7 }
0x13f0   :  { %4410 = vrot.lane.b32.xlu0 %v9779_v23, %s6466_s11 }
0x13f1   :  { %v9791_v15 = vpop.permute.xlu2 %4584 }
0x13f7   :  { %4408 = vrot.lane.b32.xlu2 %v9769_v18, %s6466_s11  ;;  %4526 = vrot.lane.b32.xlu1 %v9737_v63, %s6469_s20 }
0x13f8   :  { %4468 = vrot.lane.b32.xlu0 %v9793_v1, %s6456_s7 }
0x13f9   :  { %v4671_v37 = vpop.permute.xlu2 %4670 }
0x13ff   :  { %4528 = vrot.lane.b32.xlu2 %v9769_v18, %s6469_s20  ;;  %4592 = vrot.lane.b32.xlu1 %v9769_v18, %s6358_s25 }
0x1400   :  { %4530 = vrot.lane.b32.xlu0 %v9779_v23, %s6469_s20 }
0x1401   :  { %v9811_v9 = vpop.permute.xlu1 %4400  ;;  %v9813_v31 = vpop.permute.xlu2 %4736 }
0x1402   :  { %v4399_v40 = vpop.permute.xlu0 %4398 }
0x1403   :  { %v4428_v28 = vsel %vm3809_vm2, 0.0, %v4399_v40  ;;  %v4414_v42 = vsel %vm3809_vm2, %v4399_v40, %v9811_v9 }
0x1404   :  { %v4430_v22 = vmul.f32 %v4428_v28, %v11163_v49  ;;  %v4431_v55 = vmul.f32 %v9243_v51, %v4414_v42 }
0x1406   :  { %v4446_v20 = vmul.f32 %v9657_v27, %v4430_v22 }
0x1407   :  { %4680 = vrot.lane.b32.xlu2 %v9769_v18, %s6345_s27  ;;  %4678 = vrot.lane.b32.xlu1 %v9737_v63, %s6345_s27 }
0x1408   :  { %4596 = vrot.lane.b32.xlu0 %v9793_v1, %s6358_s25 }
0x1409   :  { %v9823_v7 = vpop.permute.xlu2 %4864  ;;  %v4455_v16 = vpop.permute.xlu1 %4454 }
0x140a   :  { %v4484_v62 = vsel %vm795_vm13, 0.0, %v4455_v16  ;;  %v4519_v58 = vpop.permute.xlu0 %4518  ;;  %v4470_v28 = vsel %vm795_vm13, %v4455_v16, %v9777_v12 }
0x140b   :  { %v4486_v47 = vmul.f32 %v9161_v44, %v4484_v62  ;;  %v4548_v46 = vsel %vm3930_vm14, 0.0, %v4519_v58  ;;  %v4503_v62 = vmul.f32 %v9718_v48, %v4470_v28 }
0x140c   :  { %v4550_v24 = vmul.f32 %v4548_v46, %v9293_v34 }
0x140d   :  { %v4502_v4 = vmul.f32 %v9718_v48, %v4486_v47 }
0x140e   :  { %v4566_v19 = vmul.f32 %v9683_v11, %v4550_v24  ;;  %v4447_v24 = vmul.f32 %v9657_v27, %v4431_v55 }
0x140f   :  { %v4510_v53 = vadd.f32 %v4502_v4, %v4446_v20  ;;  %4466 = vrot.lane.b32.xlu2 %v9779_v23, %s6456_s7  ;;  %4744 = vrot.lane.b32.xlu1 %v9769_v18, %s6475_s18 }
0x1410   :  { %4682 = vrot.lane.b32.xlu0 %v9779_v23, %s6345_s27  ;;  %v4511_v40 = vadd.f32 %v4503_v62, %v4447_v24 }
0x1411   :  { %v4574_v47 = vadd.f32 %v4566_v19, %v4510_v53  ;;  %v9844_v46 = vpop.permute.xlu2 %4402  ;;  %v9846_v16 = vpop.permute.xlu1 %4520 }
0x1412   :  { %v4534_v4 = vsel %vm3930_vm14, %v4519_v58, %v9846_v16  ;;  %v4799_v20 = vpop.permute.xlu0 %4798 }
0x1413   :  { %v4551_v42 = vmul.f32 %v9198_v10, %v4534_v4 }
0x1415   :  { %v4567_v22 = vmul.f32 %v9683_v11, %v4551_v42 }
0x1417   :  { %v4575_v17 = vadd.f32 %v4567_v22, %v4511_v40  ;;  %4594 = vrot.lane.b32.xlu2 %v9779_v23, %s6358_s25  ;;  %4806 = vrot.lane.b32.xlu1 %v9737_v63, %s6346_s17 }
0x1418   :  { %4748 = vrot.lane.b32.xlu0 %v9793_v1, %s6475_s18 }
0x1419   :  { %v9859_v53 = vpop.permute.xlu2 %4460  ;;  %v4583_v58 = vpop.permute.xlu1 %4582 }
0x141a   :  { %v4598_v19 = vsel %vm649_vm8, %v4583_v58, %v9791_v15  ;;  %v4612_v55 = vsel %vm649_vm8, 0.0, %v4583_v58  ;;  %v4863_v28 = vpop.permute.xlu0 %4862 }
0x141b   :  { %v4614_v62 = vmul.f32 %v9158_v2, %v4612_v55  ;;  %v4615_v4 = vmul.f32 %v9243_v51, %v4598_v19 }
0x141d   :  { %v4630_v24 = vmul.f32 %v9733_v26, %v4614_v62  ;;  %v4631_v42 = vmul.f32 %v9733_v26, %v4615_v4 }
0x141f   :  { %v4638_v40 = vadd.f32 %v4630_v24, %v4574_v47  ;;  %v4639_v22 = vadd.f32 %v4631_v42, %v4575_v17  ;;  %4746 = vrot.lane.b32.xlu2 %v9779_v23, %s6475_s18  ;;  %4808 = vrot.lane.b32.xlu1 %v9769_v18, %s6346_s17 }
0x1420   :  { %4810 = vrot.lane.b32.xlu0 %v9779_v23, %s6346_s17 }
0x1421   :  { %v4523_v58 = vpop.permute.xlu2 %4522  ;;  %v4673_v5 = vpop.permute.xlu1 %4672  ;;  %v4662_v55 = vadd.f32 %v9676_v36, %v4638_v40  ;;  %v4663_v19 = vadd.f32 %v9679_v8, %v4639_v22  ;;  %v6489_v36 = vmov 46  }
0x1422   :  { %v4686_v62 = vsel %vm406_vm0, %v4671_v37, %v4673_v5  ;;  %v4405_v4 = vpop.permute.xlu0 %4404  ;;  %6187 = vset.pattern.permute.xlu1 %v6489_v36  ;;  %6188 = vset.pattern.permute.xlu2 %v6489_v36 }
0x1423   :  { %v4702_v17 = vmul.f32 %v11135_v14, %v4686_v62  ;;  %v4416_v47 = vsel %vm3809_vm2, %v9844_v46, %v4405_v4 }
0x1425   :  { %v4718_v24 = vmul.f32 %v9694_v38, %v4702_v17  ;;  %v4878_v17 = vsel %vm4244_vm3, %v4863_v28, %v9823_v7 }
0x1426   :  { %v4894_v36 = vmul.f32 %v11135_v14, %v4878_v17  ;;  %v4415_v17 = vsel %vm3809_vm2, %v9811_v9, %v9844_v46 }
0x1427   :  { %v4726_v42 = vadd.f32 %v4718_v24, %v4662_v55  ;;  %4812 = vrot.lane.b32.xlu2 %v9793_v1, %s6346_s17  ;;  %4870 = vrot.lane.b32.xlu1 %v9737_v63, %s6478_s24 }
0x1428   :  { %4874 = vrot.lane.b32.xlu0 %v9779_v23, %s6478_s24 }
0x1429   :  { %v4589_v8 = vpop.permute.xlu2 %4588  ;;  %v4735_v37 = vpop.permute.xlu1 %4734 }
0x142a   :  { %v4750_v40 = vsel %vm4115_vm5, %v4735_v37, %v9813_v31  ;;  %v4525_v22 = vpop.permute.xlu0 %4524 }
0x142b   :  { %v4766_v55 = vmul.f32 %v9158_v2, %v4750_v40  ;;  %v4536_v62 = vsel %vm3930_vm14, %v4523_v58, %v4525_v22 }
0x142d   :  { %v4782_v4 = vmul.f32 %v9755_v35, %v4766_v55 }
0x142f   :  { %4412 = vrot.lane.b32.xlu1 %v9793_v1, %s6466_s11  ;;  %v4790_v24 = vadd.f32 %v4782_v4, %v4726_v42  ;;  %5132 = vperm.xlu2 %6188, %v9606_v0   ;;  %v4910_v42 = vmul.f32 %v9767_v59, %v4894_v36  ;;  %v11166_v36 = vld [vmem:[#allocation37_spill] sm:$0xff] }
0x1430   :  { %5076 = vperm.xlu0 %6186, %v9606_v0  }
0x1431   :  { %v4675_v37 = vpop.permute.xlu2 %4674  ;;  %v4801_v23 = vpop.permute.xlu1 %4800 }
0x1432   :  { %v4687_v40 = vsel %vm406_vm0, %v4673_v5, %v4675_v37  ;;  %v4814_v22 = vsel %vm11164_vm4, %v4799_v20, %v4801_v23  ;;  %v4677_v55 = vpop.permute.xlu0 %4676  ;;  %v4433_v5 = vmul.f32 %v9189_v52, %v4416_v47  ;;  %vm11204_vm4 = vmmov %vm11137_vm1 }
0x1433   :  { %v4703_v18 = vmul.f32 %v9198_v10, %v4687_v40  ;;  %v4846_v28 = vmul.f32 %v9714_v50, %v4814_v22  ;;  %v4688_v60 = vsel %vm406_vm0, %v4675_v37, %v4677_v55  ;;  %v4535_v37 = vsel %vm3930_vm14, %v9846_v16, %v4523_v58 }
0x1434   :  { %v4432_v40 = vmul.f32 %v4415_v17, %v11166_v36 }
0x1435   :  { %v4719_v4 = vmul.f32 %v9694_v38, %v4703_v18  ;;  %v4854_v0 = vadd.f32 %v4846_v28, %v4790_v24  ;;  %v4553_v18 = vmul.f32 %v9174_v21, %v4536_v62  ;;  %v4449_v28 = vmul.f32 %v9657_v27, %v4433_v5 }
0x1436   :  { %v4448_v58 = vmul.f32 %v9657_v27, %v4432_v40  ;;  %v4700_v5 = vsel %vm406_vm0, %v4677_v55, 0.0  ;;  %v4704_v55 = vmul.f32 %v9171_v39, %v4688_v60  ;;  %v4657_v60 = vmul.f32 %v9671_v30, %v9702_v41 }
0x1437   :  { %v9910_v63 = vadd.f32 %v4719_v4, %v4663_v19  ;;  %v9912_v20 = vadd.f32 %v4910_v42, %v4854_v0  ;;  %4532 = vrot.lane.b32.xlu1 %v9793_v1, %s6469_s20  ;;  %v11167_v19 = vld [vmem:[#allocation43_spill] sm:$0xff]  ;;  %v11168_v42 = vld [vmem:[#allocation29_spill] sm:$0xff]  ;;  %v4569_v62 = vmul.f32 %v9683_v11, %v4553_v18 }
0x1438   :  { %v4552_v47 = vmul.f32 %v4535_v37, %v11167_v19 }
0x1439   :  { %11165 = vst [vmem:[#allocation51_spill] sm:$0xff] %v9912_v20  ;;  %v4741_v24 = vpop.permute.xlu2 %4740  ;;  %v4459_v22 = vpop.permute.xlu1 %4458 }
0x143a   :  { %v4471_v9 = vsel %vm795_vm13, %v9777_v12, %v4459_v22  ;;  %v4472_v46 = vsel %vm795_vm13, %v4459_v22, %v9859_v53  ;;  %v4805_v0 = vpop.permute.xlu0 %4804  ;;  %v4568_v12 = vmul.f32 %v9683_v11, %v4552_v47 }
0x143b   :  { %v4488_v4 = vmul.f32 %v11168_v42, %v4471_v9  ;;  %v4505_v16 = vmul.f32 %v9718_v48, %v4472_v46  ;;  %v4764_v46 = vsel %vm4115_vm5, %v4741_v24, 0.0 }
0x143c   :  { %v4769_v47 = vmul.f32 %v4764_v46, %v9466_v43 }
0x143d   :  { %v4504_v17 = vmul.f32 %v9718_v48, %v4488_v4  ;;  %v4513_v20 = vadd.f32 %v4505_v16, %v4449_v28 }
0x143f   :  { %v4512_v14 = vadd.f32 %v4504_v17, %v4448_v58  ;;  %v4577_v53 = vadd.f32 %v4569_v62, %v4513_v20  ;;  %4684 = vrot.lane.b32.xlu1 %v9793_v1, %s6345_s27  ;;  %v4720_v17 = vmul.f32 %v9694_v38, %v4704_v55 }
0x1441   :  { %v4803_v37 = vpop.permute.xlu2 %4802  ;;  %v4576_v22 = vadd.f32 %v4568_v12, %v4512_v14  ;;  %v4587_v9 = vpop.permute.xlu1 %4586  ;;  %v4705_v14 = vmul.f32 %v9174_v21, %v4700_v5 }
0x1442   :  { %v4816_v27 = vsel %vm11169_vm7, %v4803_v37, %v4805_v0  ;;  %v4599_v48 = vsel %vm649_vm8, %v9791_v15, %v4587_v9  ;;  %v4600_v40 = vsel %vm649_vm8, %v4587_v9, %v4589_v8  ;;  %v9940_v11 = vpop.permute.xlu0 %4462  ;;  %v4828_v15 = vsel %vm11170_vm10, %v4805_v0, 0.0  ;;  %vm11209_vm7 = vmmov %vm11137_vm1 }
0x1443   :  { %v4616_v20 = vmul.f32 %v9177_v61, %v4599_v48  ;;  %v4617_v18 = vmul.f32 %v9189_v52, %v4600_v40  ;;  %v4656_v8 = vmul.f32 %v9671_v30, %v9709_v13  ;;  %v4815_v16 = vsel %vm11171_vm11, %v4801_v23, %v4803_v37  ;;  %vm11211_vm10 = vmmov %vm11137_vm1 }
0x1444   :  { %v4721_v12 = vmul.f32 %v9694_v38, %v4705_v14  ;;  %v4833_v0 = vmul.f32 %v9451_v45, %v4828_v15  ;;  %v4831_v23 = vmul.f32 %v9454_v6, %v4815_v16  ;;  %v4848_v15 = vmul.f32 %v9714_v50, %v4816_v27 }
0x1445   :  { %v4632_v28 = vmul.f32 %v9733_v26, %v4616_v20  ;;  %v4633_v4 = vmul.f32 %v9733_v26, %v4617_v18  ;;  %v4785_v26 = vmul.f32 %v9755_v35, %v4769_v47 }
0x1446   :  { %v4849_v18 = vmul.f32 %v9714_v50, %v4833_v0 }
0x1447   :  { %v4640_v58 = vadd.f32 %v4632_v28, %v4576_v22  ;;  %v4641_v62 = vadd.f32 %v4633_v4, %v4577_v53  ;;  %5128 = vperm.xlu1 %6187, %v9613_v33  }
0x1449   :  { %v4664_v5 = vadd.f32 %v4656_v8, %v4640_v58  ;;  %v4665_v9 = vadd.f32 %v4657_v60, %v4641_v62  ;;  %v4869_v13 = vpop.permute.xlu2 %4868  ;;  %v4739_v46 = vpop.permute.xlu1 %4738 }
0x144a   :  { %v4892_v53 = vsel %vm4244_vm3, %v4869_v13, 0.0  ;;  %v4751_v30 = vsel %vm4115_vm5, %v9813_v31, %v4739_v46  ;;  %v4752_v41 = vsel %vm4115_vm5, %v4739_v46, %v4741_v24  ;;  %v9965_v37 = vpop.permute.xlu0 %4590  ;;  %v4847_v31 = vmul.f32 %v9714_v50, %v4831_v23 }
0x144b   :  { %v4729_v38 = vadd.f32 %v4721_v12, %v4665_v9  ;;  %v4897_v22 = vmul.f32 %v4892_v53, %v9545_v56  ;;  %v4728_v48 = vadd.f32 %v4720_v17, %v4664_v5  ;;  %v4767_v40 = vmul.f32 %v4751_v30, %v9470_v25 }
0x144c   :  { %v4768_v20 = vmul.f32 %v9177_v61, %v4752_v41 }
0x144d   :  { %v4793_v55 = vadd.f32 %v4785_v26, %v4729_v38  ;;  %v4783_v14 = vmul.f32 %v9755_v35, %v4767_v40  ;;  %v4913_v28 = vmul.f32 %v9767_v59, %v4897_v22  ;;  %v4485_v38 = vsel %vm795_vm13, 0.0, %v9940_v11 }
0x144e   :  { %v4784_v47 = vmul.f32 %v9755_v35, %v4768_v20  ;;  %v4613_v40 = vsel %vm649_vm8, 0.0, %v9965_v37 }
0x144f   :  { %v4857_v24 = vadd.f32 %v4849_v18, %v4793_v55  ;;  %v4791_v4 = vadd.f32 %v4783_v14, %v9910_v63  ;;  %4876 = vrot.lane.b32.xlu1 %v9793_v1, %s6478_s24 }
0x1450   :  { %v4792_v8 = vadd.f32 %v4784_v47, %v4728_v48  ;;  %v4490_v48 = vmul.f32 %v9161_v44, %v4485_v38 }
0x1451   :  { %v9979_v16 = vadd.f32 %v4913_v28, %v4857_v24  ;;  %v4409_v58 = vpop.permute.xlu2 %4408  ;;  %v4867_v62 = vpop.permute.xlu1 %4866  ;;  %v4855_v60 = vadd.f32 %v4847_v31, %v4791_v4 }
0x1452   :  { %v4856_v17 = vadd.f32 %v4848_v15, %v4792_v8  ;;  %v4879_v35 = vsel %vm4244_vm3, %v9823_v7, %v4867_v62  ;;  %v4880_v12 = vsel %vm4244_vm3, %v4867_v62, %v4869_v13  ;;  %v9984_v26 = vpop.permute.xlu0 %4742  ;;  %v4506_v31 = vmul.f32 %v9669_v3, %v4490_v48 }
0x1453   :  { %v4895_v63 = vmul.f32 %v4879_v35, %v9557_v29  ;;  %v4896_v0 = vmul.f32 %v9171_v39, %v4880_v12  ;;  %v4618_v8 = vmul.f32 %v9158_v2, %v4613_v40 }
0x1455   :  { %v4911_v50 = vmul.f32 %v9767_v59, %v4895_v63  ;;  %v4912_v27 = vmul.f32 %v9767_v59, %v4896_v0 }
0x1457   :  { %v9990_v5 = vadd.f32 %v4911_v50, %v4855_v60  ;;  %v9992_v9 = vadd.f32 %v4912_v27, %v4856_v17  ;;  %v4634_v27 = vmul.f32 %v9689_v57, %v4618_v8 }
0x1459   :  { %v4529_v46 = vpop.permute.xlu2 %4528  ;;  %v4407_v23 = vpop.permute.xlu1 %4406 }
0x145a   :  { %v9994_v53 = vpop.permute.xlu0 %4872  ;;  %v4429_v7 = vsel %vm3809_vm2, 0.0, %v4407_v23  ;;  %v4417_v18 = vsel %vm3809_vm2, %v4407_v23, %v4409_v58 }
0x145b   :  { %v4434_v22 = vmul.f32 %v4429_v7, %v11163_v49  ;;  %v4435_v60 = vmul.f32 %v9243_v51, %v4417_v18 }
0x145d   :  { %v4450_v20 = vmul.f32 %v9655_v54, %v4434_v22 }
0x145f   :  { %v4514_v17 = vadd.f32 %v4506_v31, %v4450_v20 }
0x1461   :  { %v9997_v13 = vpop.permute.xlu2 %4680  ;;  %v4465_v30 = vpop.permute.xlu1 %4464 }
0x1462   :  { %v9999_v41 = vpop.permute.xlu0 %4410  ;;  %v4473_v35 = vsel %vm795_vm13, %v9940_v11, %v4465_v30 }
0x1463   :  { %v4418_v59 = vsel %vm3809_vm2, %v4409_v58, %v9999_v41  ;;  %v4507_v23 = vmul.f32 %v9669_v3, %v4473_v35 }
0x1464   :  { %v4436_v55 = vmul.f32 %v4418_v59, %v11166_v36  ;;  %v4451_v59 = vmul.f32 %v9655_v54, %v4435_v60  ;;  %v11185_v36 = vld [vmem:[#allocation15_spill] sm:$0xff] }
0x1466   :  { %v4452_v12 = vmul.f32 %v9655_v54, %v4436_v55  ;;  %v4515_v55 = vadd.f32 %v4507_v23, %v4451_v59 }
0x1469   :  { %v10012_v14 = vpop.permute.xlu2 %4466  ;;  %v4527_v47 = vpop.permute.xlu1 %4526 }
0x146a   :  { %v4474_v24 = vsel %vm795_vm13, %v4465_v30, %v10012_v14  ;;  %v4537_v28 = vsel %vm3930_vm14, %v4527_v47, %v4529_v46  ;;  %v4549_v4 = vsel %vm3930_vm14, 0.0, %v4527_v47  ;;  %v10019_v15 = vpop.permute.xlu0 %4468 }
0x146b   :  { %v4492_v58 = vmul.f32 %v11168_v42, %v4474_v24  ;;  %v4554_v62 = vmul.f32 %v4549_v4, %v9293_v34  ;;  %v4555_v0 = vmul.f32 %v9198_v10, %v4537_v28 }
0x146d   :  { %v4508_v63 = vmul.f32 %v9669_v3, %v4492_v58  ;;  %v4570_v50 = vmul.f32 %v9663_v32, %v4554_v62  ;;  %v4571_v22 = vmul.f32 %v9663_v32, %v4555_v0 }
0x146f   :  { %v4516_v7 = vadd.f32 %v4508_v63, %v4452_v12  ;;  %v4578_v38 = vadd.f32 %v4570_v50, %v4514_v17  ;;  %v4579_v4 = vadd.f32 %v4571_v22, %v4515_v55  ;;  %v11172_v63 = vld [vmem:[#allocation40_spill] sm:$0xff]  ;;  %v11173_v50 = vld [vmem:[#allocation50_spill] sm:$0xff] }
0x1471   :  { %v4642_v48 = vadd.f32 %v4634_v27, %v4578_v38  ;;  %v10035_v11 = vpop.permute.xlu2 %4594  ;;  %v4593_v30 = vpop.permute.xlu1 %4592  ;;  %v11174_v27 = vld [vmem:[#allocation17_spill] sm:$0xff] }
0x1472   :  { %v4601_v40 = vsel %vm649_vm8, %v9965_v37, %v4593_v30  ;;  %v4602_v20 = vsel %vm649_vm8, %v4593_v30, %v10035_v11  ;;  %v10041_v18 = vpop.permute.xlu0 %4530  ;;  %v4658_v23 = vmul.f32 %v11174_v27, %v11173_v50  ;;  %v11175_v38 = vld [vmem:[#allocation53_spill] sm:$0xff]  ;;  %v11179_v50 = vld [vmem:[#allocation18_spill] sm:$0xff] }
0x1473   :  { %v4619_v47 = vmul.f32 %v9243_v51, %v4601_v40  ;;  %v4538_v31 = vsel %vm3930_vm14, %v4529_v46, %v10041_v18  ;;  %v4620_v24 = vmul.f32 %v9177_v61, %v4602_v20 }
0x1474   :  { %v4556_v28 = vmul.f32 %v4538_v31, %v11167_v19  ;;  %v4666_v40 = vadd.f32 %v4658_v23, %v4642_v48 }
0x1475   :  { %v4635_v8 = vmul.f32 %v9689_v57, %v4619_v47  ;;  %v4636_v62 = vmul.f32 %v9689_v57, %v4620_v24  ;;  %v11176_v47 = vld [vmem:[#allocation13_spill] sm:$0xff] }
0x1476   :  { %v4572_v37 = vmul.f32 %v9663_v32, %v4556_v28 }
0x1477   :  { %v4643_v58 = vadd.f32 %v4635_v8, %v4579_v4 }
0x1478   :  { %v4580_v60 = vadd.f32 %v4572_v37, %v4516_v7  ;;  %v10920_v37 = vmov 48  }
0x1479   :  { %v4679_v17 = vpop.permute.xlu1 %4678  ;;  %6192 = vset.pattern.permute.xlu1 %v10920_v37 }
0x147a   :  { %v10051_v35 = vadd.f32 %v4636_v62, %v4580_v60  ;;  %v4689_v12 = vsel %vm406_vm0, %v4679_v17, %v9997_v13  ;;  %v10055_v46 = vpop.permute.xlu0 %4596  ;;  %v11177_v62 = vld [vmem:[#allocation8_spill] sm:$0xff]  ;;  %v10075_v60 = vpop.permute.xlu2 %4746 }
0x147b   :  { %v4706_v0 = vmul.f32 %v11172_v63, %v4689_v12  ;;  %5260 = vperm.xlu1 %6192, %v11177_v62  }
0x147d   :  { %v4722_v59 = vmul.f32 %v11175_v38, %v4706_v0 }
0x147f   :  { %v4730_v55 = vadd.f32 %v4722_v59, %v4666_v40 }
0x1481   :  { %v4745_v22 = vpop.permute.xlu1 %4744 }
0x1482   :  { %v4753_v30 = vsel %vm4115_vm5, %v9984_v26, %v4745_v22  ;;  %v10063_v7 = vpop.permute.xlu0 %4682  ;;  %v4754_v12 = vsel %vm4115_vm5, %v4745_v22, %v10075_v60 }
0x1483   :  { %v4770_v20 = vmul.f32 %v9158_v2, %v4753_v30  ;;  %v4690_v8 = vsel %vm406_vm0, %v9997_v13, %v10063_v7  ;;  %v4659_v13 = vmul.f32 %v11174_v27, %v11179_v50  ;;  %v4771_v59 = vmul.f32 %v4754_v12, %v9470_v25 }
0x1484   :  { %v4707_v26 = vmul.f32 %v9198_v10, %v4690_v8  ;;  %v11181_v8 = vld [vmem:[#allocation58_spill] sm:$0xff] }
0x1485   :  { %v4786_v31 = vmul.f32 %v11176_v47, %v4770_v20  ;;  %v4667_v30 = vadd.f32 %v4659_v13, %v4643_v58  ;;  %v4787_v42 = vmul.f32 %v11176_v47, %v4771_v59 }
0x1486   :  { %v4723_v23 = vmul.f32 %v11175_v38, %v4707_v26 }
0x1487   :  { %v4794_v24 = vadd.f32 %v4786_v31, %v4730_v55  ;;  %v6491_v31 = vmov 49  }
0x1488   :  { %v4731_v55 = vadd.f32 %v4723_v23, %v4667_v30  ;;  %6193 = vset.pattern.permute.xlu1 %v6491_v31  ;;  %v11182_v23 = vld [vmem:[#allocation14_spill] sm:$0xff] }
0x1489   :  { %v4807_v28 = vpop.permute.xlu1 %4806  ;;  %5280 = vperm.xlu1 %6193, %v9613_v33  }
0x148a   :  { %v10067_v4 = vpop.permute.xlu0 %4748  ;;  %v4795_v12 = vadd.f32 %v4787_v42, %v4731_v55  ;;  %v4475_v42 = vsel %vm795_vm13, %v10012_v14, %v10019_v15 }
0x1491   :  { %v4809_v48 = vpop.permute.xlu1 %4808 }
0x1492   :  { %v10077_v17 = vpop.permute.xlu0 %4810  ;;  %v4817_v40 = vsel %vm11180_vm9, %v4807_v28, %v4809_v48 }
0x1493   :  { %v4818_v0 = vsel %vm11178_vm12, %v4809_v48, %v10077_v17  ;;  %v4850_v22 = vmul.f32 %v11181_v8, %v4817_v40 }
0x1494   :  { %v4835_v20 = vmul.f32 %v9454_v6, %v4818_v0  ;;  %v11184_v6 = vld [vmem:[#allocation48_spill] sm:$0xff] }
0x1495   :  { %v4858_v13 = vadd.f32 %v4850_v22, %v4794_v24 }
0x1496   :  { %v4851_v50 = vmul.f32 %v11181_v8, %v4835_v20  ;;  %v11183_v20 = vld [vmem:[#allocation51_spill] sm:$0xff] }
0x1498   :  { %v4859_v59 = vadd.f32 %v4851_v50, %v4795_v12 }
0x1499   :  { %v4871_v37 = vpop.permute.xlu1 %4870 }
0x149a   :  { %v4881_v26 = vsel %vm4244_vm3, %v4871_v37, %v9994_v53  ;;  %v10095_v58 = vpop.permute.xlu0 %4874  ;;  %v4934_v37 = vadd.f32 %v11184_v6, %v11183_v20 }
0x149b   :  { %v4898_v28 = vmul.f32 %v11172_v63, %v4881_v26  ;;  %v4882_v48 = vsel %vm4244_vm3, %v9994_v53, %v10095_v58  ;;  %v4935_v26 = vadd.f32 %v11184_v6, %v9990_v5  ;;  %v4509_v5 = vmul.f32 %v9669_v3, %v4475_v42 }
0x149c   :  { %v4899_v0 = vmul.f32 %v4882_v48, %v9557_v29  ;;  %v4942_v22 = vmax.f32 %v4934_v37, 0.0  ;;  %v6492_v3 = vmov 47  }
0x149d   :  { %v4914_v30 = vmul.f32 %v11182_v23, %v4898_v28  ;;  %v4943_v48 = vmax.f32 %v4935_v26, 0.0  ;;  %6189 = vset.pattern.permute.xlu2 %v6492_v3  ;;  %6190 = vset.pattern.permute.xlu0 %v6492_v3  ;;  %v6493_v26 = vmov 51  }
0x149e   :  { %v4915_v40 = vmul.f32 %v11182_v23, %v4899_v0  ;;  %5192 = vperm.xlu2 %6189, %v9613_v33   ;;  %5196 = vperm.xlu0 %6190, %v11177_v62  }
0x149f   :  { %v4922_v25 = vadd.f32 %v4914_v30, %v4858_v13  ;;  %6197 = vset.pattern.permute.xlu1 %v6493_v26 }
0x14a0   :  { %v4923_v19 = vadd.f32 %v4915_v40, %v4859_v59  ;;  %5408 = vperm.xlu1 %6197, %v9613_v33  }
0x14a1   :  { %v4938_v63 = vadd.f32 %v11185_v36, %v4922_v25  ;;  %v4413_v53 = vpop.permute.xlu1 %4412 }
0x14a2   :  { %v4939_v24 = vadd.f32 %v11185_v36, %v4923_v19  ;;  %v4419_v55 = vsel %vm3809_vm2, %v9999_v41, %v4413_v53  ;;  %v11186_v41 = vld [vmem:[#allocation56_spill] sm:$0xff] }
0x14a3   :  { %v4946_v50 = vmax.f32 %v4938_v63, 0.0  ;;  %v4437_v28 = vmul.f32 %v9189_v52, %v4419_v55 }
0x14a4   :  { %v4947_v12 = vmax.f32 %v4939_v24, 0.0  ;;  %v4765_v24 = vsel %vm4115_vm5, %v10067_v4, 0.0 }
0x14a5   :  { %v4453_v25 = vmul.f32 %v9655_v54, %v4437_v28  ;;  %v4950_v0 = vpack.c.bf16 %v4946_v50, %v4942_v22  ;;  %v4813_v22 = vpop.permute.xlu2 %4812 }
0x14a6   :  { %v4951_v13 = vpack.c.bf16 %v4947_v12, %v4943_v48  ;;  %6194 = vset.pattern.permute.xlu2 %v6491_v31  ;;  %v4661_v31 = vmul.f32 %v11174_v27, %v9793_v1  ;;  %v4773_v48 = vmul.f32 %v4765_v24, %v9466_v43  ;;  %v4829_v12 = vsel %vm11189_vm15, %v4813_v22, 0.0  ;;  %v6282_v1 = vld [vmem:[%s10768_s1] sm:$0xff] }
0x14a7   :  { %v4517_v30 = vadd.f32 %v4509_v5, %v4453_v25  ;;  %4974 = vmatpush.bf16.msra.mxu0 %v4950_v0  ;;  %5284 = vperm.xlu2 %6194, %v11177_v62   ;;  %v6494_v5 = vmov 52  }
0x14a8   :  { %4988 = vmatpush.bf16.msra.mxu1 %v4951_v13  ;;  %6199 = vset.pattern.permute.xlu1 %v6494_v5  ;;  %v4789_v13 = vmul.f32 %v11176_v47, %v4773_v48 }
0x14a9   :  { %v4533_v14 = vpop.permute.xlu1 %4532  ;;  %5472 = vperm.xlu1 %6199, %v6282_v1  }
0x14aa   :  { %v4539_v19 = vsel %vm3930_vm14, %v10041_v18, %v4533_v14  ;;  %5708 = vmatmul.msk.bf16.vlgmr.msra.gmra.mxu0 %vm795_vm13, %v11186_v41  ;;  %v4603_v18 = vsel %vm649_vm8, %v10035_v11, %v10055_v46  ;;  %v11187_v11 = vmov 48   ;;  %v4819_v14 = vsel %vm11190_vm6, %v10077_v17, %v4813_v22 }
0x14ab   :  { %v4557_v15 = vmul.f32 %v9174_v21, %v4539_v19  ;;  %5709 = vmatmul.msk.bf16.vlgmr.msra.gmra.mxu1 %vm795_vm13, %v11186_v41  ;;  %v4621_v59 = vmul.f32 %v9189_v52, %v4603_v18  ;;  %6191 = vset.pattern.permute.xlu0 %v11187_v11 }
0x14ac   :  { %5256 = vperm.xlu0 %6191, %v9613_v33  }
0x14ad   :  { %v4573_v54 = vmul.f32 %v9663_v32, %v4557_v15  ;;  %v4637_v32 = vmul.f32 %v9689_v57, %v4621_v59  ;;  %v11188_v57 = vld [vmem:[#allocation52_spill] sm:$0xff] }
0x14ae   :  { %v4660_v55 = vmul.f32 %v11174_v27, %v11188_v57  ;;  %v6495_v27 = vmov 50  }
0x14af   :  { %v4581_v63 = vadd.f32 %v4573_v54, %v4517_v30  ;;  %6195 = vset.pattern.permute.xlu2 %v6495_v27  ;;  %v6283_v30 = vld [vmem:[%s10768_s1 + $0x10] sm:$0xff] }
0x14b0   :  { %v4668_v28 = vadd.f32 %v4660_v55, %v10051_v35  ;;  %v4837_v35 = vmul.f32 %v9451_v45, %v4829_v12  ;;  %5344 = vperm.xlu2 %6195, %v6282_v1  }
0x14b1   :  { %v4685_v40 = vpop.permute.xlu1 %4684  ;;  %v4645_v46 = vadd.f32 %v4637_v32, %v4581_v63 }
0x14b2   :  { %v4691_v20 = vsel %vm406_vm0, %v10063_v7, %v4685_v40  ;;  %v4701_v37 = vsel %vm406_vm0, %v4685_v40, 0.0  ;;  %v4755_v7 = vsel %vm4115_vm5, %v10075_v60, %v10067_v4  ;;  %v4853_v63 = vmul.f32 %v11181_v8, %v4837_v35 }
0x14b3   :  { %v4708_v53 = vmul.f32 %v9171_v39, %v4691_v20  ;;  %v4709_v42 = vmul.f32 %v9174_v21, %v4701_v37  ;;  %v4772_v60 = vmul.f32 %v9177_v61, %v4755_v7  ;;  %v4669_v4 = vadd.f32 %v4661_v31, %v4645_v46 }
0x14b4   :  { %6196 = vset.pattern.permute.xlu0 %v6495_v27  ;;  %v11191_v46 = vmov 5  }
0x14b5   :  { %v4724_v50 = vmul.f32 %v11175_v38, %v4708_v53  ;;  %v4725_v62 = vmul.f32 %v11175_v38, %v4709_v42  ;;  %v4788_v38 = vmul.f32 %v11176_v47, %v4772_v60  ;;  %5348 = vperm.xlu0 %6196, %v6283_v30   ;;  %v4852_v47 = vmul.f32 %v11181_v8, %v4819_v14  ;;  %v11194_v60 = vld [vmem:[#allocation59_spill] sm:$0xff]  ;;  %v10283_v14 = vpop.permute.xlu0 %5076 }
0x14b6   :  { %v6496_v53 = vmov 53   ;;  %v4936_v42 = vadd.f32 %v11184_v6, %v9992_v9  ;;  %11195 = vst [vmem:[#allocation26_spill] sm:$0xff] %v10283_v14 }
0x14b7   :  { %v4732_v25 = vadd.f32 %v4724_v50, %v4668_v28  ;;  %v4733_v0 = vadd.f32 %v4725_v62, %v4669_v4  ;;  %6201 = vset.pattern.permute.xlu1 %v6496_v53 }
0x14b8   :  { %5536 = vperm.xlu1 %6201, %v6282_v1   ;;  %6198 = vset.pattern.permute.xlu2 %v6493_v26  ;;  %v4944_v57 = vmax.f32 %v4936_v42, 0.0 }
0x14b9   :  { %v10153_v33 = vpop.permute.xlu1 %5128  ;;  %v4796_v19 = vadd.f32 %v4788_v38, %v4732_v25  ;;  %v4797_v15 = vadd.f32 %v4789_v13, %v4733_v0  ;;  %5412 = vperm.xlu2 %6198, %v6283_v30  }
0x14bb   :  { %v4860_v20 = vadd.f32 %v4852_v47, %v4796_v19  ;;  %v4861_v37 = vadd.f32 %v4853_v63, %v4797_v15 }
0x14bd   :  { %6204 = vset.pattern.permute.xlu0 %v11191_v46 }
0x14c1   :  { %v4877_v3 = vpop.permute.xlu1 %4876  ;;  %6200 = vset.pattern.permute.xlu2 %v6494_v5 }
0x14c2   :  { %v4883_v54 = vsel %vm4244_vm3, %v10095_v58, %v4877_v3  ;;  %v4893_v18 = vsel %vm4244_vm3, %v4877_v3, 0.0  ;;  %v4937_v58 = vadd.f32 %v11184_v6, %v9979_v16  ;;  %5476 = vperm.xlu2 %6200, %v6283_v30  }
0x14c3   :  { %v4900_v59 = vmul.f32 %v9171_v39, %v4883_v54  ;;  %v4901_v40 = vmul.f32 %v4893_v18, %v9545_v56  ;;  %v11200_v56 = vld [vmem:[#allocation40_spill] sm:$0xff] }
0x14c5   :  { %v4916_v17 = vmul.f32 %v11182_v23, %v4900_v59  ;;  %v4917_v32 = vmul.f32 %v11182_v23, %v4901_v40  ;;  %v4945_v23 = vmax.f32 %v4937_v58, 0.0 }
0x14c7   :  { %v4924_v8 = vadd.f32 %v4916_v17, %v4860_v20  ;;  %v4925_v11 = vadd.f32 %v4917_v32, %v4861_v37 }
0x14c9   :  { %v4940_v7 = vadd.f32 %v11185_v36, %v4924_v8  ;;  %v4941_v24 = vadd.f32 %v11185_v36, %v4925_v11  ;;  %v11192_v36 = vld [vmem:[#allocation57_spill] sm:$0xff] }
0x14ca   :  { %6202 = vset.pattern.permute.xlu2 %v6496_v53 }
0x14cb   :  { %v4948_v55 = vmax.f32 %v4940_v7, 0.0  ;;  %v4949_v22 = vmax.f32 %v4941_v24, 0.0  ;;  %5540 = vperm.xlu2 %6202, %v6283_v30  }
0x14cd   :  { %v4952_v31 = vpack.c.bf16 %v4948_v55, %v4944_v57  ;;  %v4953_v16 = vpack.c.bf16 %v4949_v22, %v4945_v23 }
0x14cf   :  { %5002 = vmatpush.bf16.msra.mxu2 %v4952_v31  ;;  %5016 = vmatpush.bf16.msrb.mxu3 %v4953_v16 }
0x14d2   :  { %5710 = vmatmul.msk.bf16.vlgmr.msra.gmra.mxu2 %vm795_vm13, %v11186_v41  ;;  %5711 = vmatmul.msk.bf16.vlgmr.msrb.gmra.mxu3 %vm795_vm13, %v11186_v41  ;;  %v10215_v41 = vpop.permute.xlu2 %5132 }
0x14d3   :  { %6203 = vset.pattern.permute.xlu2 %v11191_v46  ;;  %11193 = vst [vmem:[#allocation60_spill] sm:$0xff] %v10215_v41 }
0x14ed   :  { %v10270_v35 = vpop.permute.xlu1 %5260 }
0x14f8   :  { %v10229_v12 = vpop.permute.xlu2 %5192 }
0x14fb   :  { %v10285_v19 = vpop.permute.xlu1 %5280 }
0x1501   :  { %v10243_v5 = vpop.permute.xlu2 %5284 }
0x150a   :  { %v10251_v25 = vpop.permute.xlu2 %5344 }
0x1510   :  { %v10295_v3 = vpop.permute.xlu0 %5196 }
0x1512   :  { %v10297_v54 = vpop.permute.xlu1 %5408 }
0x1513   :  { %v10259_v1 = vpop.permute.xlu2 %5412 }
0x151b   :  { %v10307_v47 = vpop.permute.xlu1 %5472 }
0x151c   :  { %v10275_v30 = vpop.permute.xlu2 %5476 }
0x151e   :  { %v10305_v63 = vpop.permute.xlu0 %5256 }
0x1525   :  { %v10291_v15 = vpop.permute.xlu2 %5540 }
0x1526   :  { %11196 = vst [vmem:[#allocation61_spill] sm:$0xff] %v10291_v15 }
0x1527   :  { %v4976_v6 = vpop.f32.mrf.mxu0  ;;  %v10324_v37 = vpop.permute.xlu0 %5348 }
0x1528   :  { %v10192_v9 = vadd.f32 %v4976_v6, %v11192_v36  ;;  %v4990_v26 = vpop.f32.mrf.mxu1 }
0x1529   :  { %v10195_v50 = vadd.f32 %v4990_v26, %v11192_v36 }
0x152a   :  { %5151 = vrot.lane.b32.xlu0 %v10192_v9, %s6469_s20  ;;  %5031 = vrot.lane.b32.xlu2 %v10192_v9, %s6466_s11  ;;  %v10328_v17 = vpop.permute.xlu1 %5536 }
0x152b   :  { %5033 = vrot.lane.b32.xlu1 %v10195_v50, %s6466_s11 }
0x152f   :  { %v4978_v62 = vpop.f32.mrf.mxu0 }
0x1530   :  { %v4992_v28 = vpop.f32.mrf.mxu1  ;;  %v10224_v48 = vadd.f32 %v4978_v62, %v11194_v60 }
0x1531   :  { %v10227_v4 = vadd.f32 %v4992_v28, %v11194_v60 }
0x1532   :  { %5303 = vrot.lane.b32.xlu0 %v10192_v9, %s6345_s27  ;;  %5089 = vrot.lane.b32.xlu2 %v10195_v50, %s6456_s7 }
0x1533   :  { %5087 = vrot.lane.b32.xlu1 %v10192_v9, %s6456_s7 }
0x153a   :  { %5367 = vrot.lane.b32.xlu0 %v10192_v9, %s6475_s18  ;;  %5217 = vrot.lane.b32.xlu2 %v10195_v50, %s6358_s25 }
0x153b   :  { %5153 = vrot.lane.b32.xlu1 %v10195_v50, %s6469_s20 }
0x1542   :  { %5433 = vrot.lane.b32.xlu0 %v10195_v50, %s6346_s17  ;;  %5431 = vrot.lane.b32.xlu2 %v10192_v9, %s6346_s17 }
0x1543   :  { %5215 = vrot.lane.b32.xlu1 %v10192_v9, %s6358_s25 }
0x154a   :  { %5095 = vrot.lane.b32.xlu0 %v10224_v48, %s6456_s7  ;;  %5041 = vrot.lane.b32.xlu2 %v10227_v4, %s6466_s11 }
0x154b   :  { %5305 = vrot.lane.b32.xlu1 %v10195_v50, %s6345_s27 }
0x1552   :  { %5225 = vrot.lane.b32.xlu0 %v10227_v4, %s6358_s25  ;;  %5161 = vrot.lane.b32.xlu2 %v10227_v4, %s6469_s20 }
0x1553   :  { %5369 = vrot.lane.b32.xlu1 %v10195_v50, %s6475_s18 }
0x1555   :  { %v5004_v0 = vpop.f32.mrf.mxu2  ;;  %v5018_v38 = vpop.f32.mrf.mxu3 }
0x1556   :  { %v10262_v27 = vadd.f32 %v5004_v0, %v11192_v36  ;;  %v10273_v13 = vadd.f32 %v5018_v38, %v11192_v36  ;;  %v11199_v36 = vld [vmem:[#allocation19_spill] sm:$0xff] }
0x155a   :  { %5223 = vrot.lane.b32.xlu0 %v10224_v48, %s6358_s25  ;;  %5311 = vrot.lane.b32.xlu2 %v10224_v48, %s6345_s27 }
0x155b   :  { %5039 = vrot.lane.b32.xlu1 %v10224_v48, %s6466_s11 }
0x155d   :  { %v5006_v40 = vpop.f32.mrf.mxu2  ;;  %v5020_v53 = vpop.f32.mrf.mxu3 }
0x155e   :  { %v10318_v20 = vadd.f32 %v5006_v40, %v11194_v60  ;;  %v10333_v58 = vadd.f32 %v5020_v53, %v11194_v60 }
0x1560   :  { %11197 = vst [vmem:[#allocation34_spill] sm:$0xff] %v10318_v20 }
0x1561   :  { %11198 = vst [vmem:[#allocation28_spill] sm:$0xff] %v10333_v58 }
0x1562   :  { %5313 = vrot.lane.b32.xlu0 %v10227_v4, %s6345_s27  ;;  %5375 = vrot.lane.b32.xlu2 %v10224_v48, %s6475_s18 }
0x1563   :  { %5097 = vrot.lane.b32.xlu1 %v10227_v4, %s6456_s7 }
0x156a   :  { %5377 = vrot.lane.b32.xlu0 %v10227_v4, %s6475_s18  ;;  %5035 = vrot.lane.b32.xlu2 %v10262_v27, %s6466_s11 }
0x156b   :  { %5159 = vrot.lane.b32.xlu1 %v10224_v48, %s6469_s20 }
0x1572   :  { %5439 = vrot.lane.b32.xlu0 %v10224_v48, %s6346_s17  ;;  %5093 = vrot.lane.b32.xlu2 %v10273_v13, %s6456_s7 }
0x1573   :  { %5441 = vrot.lane.b32.xlu1 %v10227_v4, %s6346_s17 }
0x157a   :  { %5037 = vrot.lane.b32.xlu0 %v10273_v13, %s6466_s11  ;;  %5155 = vrot.lane.b32.xlu2 %v10262_v27, %s6469_s20 }
0x157b   :  { %5091 = vrot.lane.b32.xlu1 %v10262_v27, %s6456_s7 }
0x1582   :  { %5157 = vrot.lane.b32.xlu0 %v10273_v13, %s6469_s20  ;;  %5221 = vrot.lane.b32.xlu2 %v10273_v13, %s6358_s25 }
0x1583   :  { %5219 = vrot.lane.b32.xlu1 %v10262_v27, %s6358_s25 }
0x1584   :  { %v5032_v18 = vpop.permute.xlu2 %5031 }
0x1585   :  { %v5061_v7 = vsel %vm3809_vm2, 0.0, %v5032_v18 }
0x1586   :  { %v5063_v22 = vmul.f32 %v5061_v7, %v11163_v49 }
0x1588   :  { %v5079_v0 = vmul.f32 %v11199_v36, %v5063_v22 }
0x158a   :  { %5499 = vrot.lane.b32.xlu0 %v10262_v27, %s6478_s24  ;;  %5307 = vrot.lane.b32.xlu2 %v10262_v27, %s6345_s27 }
0x158b   :  { %5309 = vrot.lane.b32.xlu1 %v10273_v13, %s6345_s27 }
0x158c   :  { %v10315_v59 = vpop.permute.xlu2 %5089 }
0x1592   :  { %5043 = vrot.lane.b32.xlu0 %v10318_v20, %s6466_s11  ;;  %5373 = vrot.lane.b32.xlu2 %v10273_v13, %s6475_s18 }
0x1593   :  { %5371 = vrot.lane.b32.xlu1 %v10262_v27, %s6475_s18 }
0x1594   :  { %v10330_v32 = vpop.permute.xlu2 %5217 }
0x159a   :  { %5101 = vrot.lane.b32.xlu0 %v10333_v58, %s6456_s7  ;;  %5099 = vrot.lane.b32.xlu2 %v10318_v20, %s6456_s7 }
0x159b   :  { %5437 = vrot.lane.b32.xlu1 %v10273_v13, %s6346_s17 }
0x159c   :  { %v10341_v42 = vpop.permute.xlu2 %5431  ;;  %v5152_v8 = vpop.permute.xlu0 %5151 }
0x159d   :  { %v10343_v11 = vpop.permute.xlu1 %5033  ;;  %v5181_v23 = vsel %vm3930_vm14, 0.0, %v5152_v8 }
0x159e   :  { %v5047_v46 = vsel %vm3809_vm2, %v5032_v18, %v10343_v11  ;;  %v5183_v62 = vmul.f32 %v5181_v23, %v9293_v34 }
0x159f   :  { %v5064_v24 = vmul.f32 %v9243_v51, %v5047_v46 }
0x15a0   :  { %v5199_v40 = vmul.f32 %v10229_v12, %v5183_v62 }
0x15a1   :  { %v5080_v26 = vmul.f32 %v11199_v36, %v5064_v24 }
0x15a2   :  { %5163 = vrot.lane.b32.xlu0 %v10318_v20, %s6469_s20  ;;  %5229 = vrot.lane.b32.xlu2 %v10333_v58, %s6358_s25 }
0x15a3   :  { %5435 = vrot.lane.b32.xlu1 %v10262_v27, %s6346_s17 }
0x15a4   :  { %v10356_v57 = vpop.permute.xlu2 %5041  ;;  %v5304_v55 = vpop.permute.xlu0 %5303 }
0x15a5   :  { %v5088_v31 = vpop.permute.xlu1 %5087 }
0x15a6   :  { %v5103_v16 = vsel %vm795_vm13, %v5088_v31, %v10315_v59  ;;  %v5117_v6 = vsel %vm795_vm13, 0.0, %v5088_v31 }
0x15a7   :  { %v5119_v28 = vmul.f32 %v9161_v44, %v5117_v6  ;;  %v5136_v60 = vmul.f32 %v10153_v33, %v5103_v16 }
0x15a9   :  { %v5135_v38 = vmul.f32 %v10153_v33, %v5119_v28  ;;  %v5144_v18 = vadd.f32 %v5136_v60, %v5080_v26 }
0x15aa   :  { %5317 = vrot.lane.b32.xlu0 %v10333_v58, %s6345_s27  ;;  %5315 = vrot.lane.b32.xlu2 %v10318_v20, %s6345_s27 }
0x15ab   :  { %v5143_v53 = vadd.f32 %v5135_v38, %v5079_v0  ;;  %5501 = vrot.lane.b32.xlu1 %v10273_v13, %s6478_s24 }
0x15ac   :  { %v10375_v46 = vpop.permute.xlu2 %5161  ;;  %v5368_v7 = vpop.permute.xlu0 %5367 }
0x15ad   :  { %v10377_v24 = vpop.permute.xlu1 %5153  ;;  %v5207_v23 = vadd.f32 %v5199_v40, %v5143_v53  ;;  %v5287_v53 = vmul.f32 %v10285_v19, %v10192_v9 }
0x15ae   :  { %v5167_v22 = vsel %vm3930_vm14, %v5152_v8, %v10377_v24 }
0x15af   :  { %v5184_v31 = vmul.f32 %v9198_v10, %v5167_v22  ;;  %v5288_v22 = vmul.f32 %v10285_v19, %v10195_v50 }
0x15b1   :  { %v5200_v16 = vmul.f32 %v10229_v12, %v5184_v31 }
0x15b2   :  { %5379 = vrot.lane.b32.xlu0 %v10318_v20, %s6475_s18  ;;  %5497 = vrot.lane.b32.xlu2 %v10195_v50, %s6478_s24 }
0x15b3   :  { %v5208_v6 = vadd.f32 %v5200_v16, %v5144_v18  ;;  %5045 = vrot.lane.b32.xlu1 %v10333_v58, %s6466_s11 }
0x15b4   :  { %v10389_v26 = vpop.permute.xlu2 %5311  ;;  %v10391_v62 = vpop.permute.xlu0 %5433 }
0x15b5   :  { %v5216_v28 = vpop.permute.xlu1 %5215 }
0x15b6   :  { %v5231_v8 = vsel %vm649_vm8, %v5216_v28, %v10330_v32  ;;  %v5245_v60 = vsel %vm649_vm8, 0.0, %v5216_v28 }
0x15b7   :  { %v5247_v0 = vmul.f32 %v9158_v2, %v5245_v60  ;;  %v5248_v38 = vmul.f32 %v9243_v51, %v5231_v8 }
0x15b9   :  { %v5263_v40 = vmul.f32 %v10305_v63, %v5247_v0  ;;  %v5264_v18 = vmul.f32 %v10305_v63, %v5248_v38 }
0x15ba   :  { %5503 = vrot.lane.b32.xlu0 %v10224_v48, %s6478_s24  ;;  %5445 = vrot.lane.b32.xlu2 %v10333_v58, %s6346_s17 }
0x15bb   :  { %v5271_v31 = vadd.f32 %v5263_v40, %v5207_v23  ;;  %v5272_v16 = vadd.f32 %v5264_v18, %v5208_v6  ;;  %5165 = vrot.lane.b32.xlu1 %v10333_v58, %s6469_s20 }
0x15bc   :  { %v10410_v28 = vpop.permute.xlu2 %5375  ;;  %v5096_v8 = vpop.permute.xlu0 %5095 }
0x15bd   :  { %v10412_v60 = vpop.permute.xlu1 %5305  ;;  %v5295_v0 = vadd.f32 %v5287_v53, %v5271_v31  ;;  %v10414_v38 = vadd.f32 %v5288_v22, %v5272_v16  ;;  %v5447_v53 = vsel %vm11137_vm1, %v10341_v42, %v10391_v62  ;;  %v5118_v31 = vsel %vm795_vm13, 0.0, %v5096_v8 }
0x15be   :  { %v5319_v15 = vsel %vm406_vm0, %v5304_v55, %v10412_v60 }
0x15bf   :  { %v5335_v45 = vmul.f32 %v11200_v56, %v5319_v15 }
0x15c1   :  { %v5351_v50 = vmul.f32 %v10251_v25, %v5335_v45 }
0x15c2   :  { %5509 = vrot.lane.b32.xlu0 %v10333_v58, %s6478_s24  ;;  %5443 = vrot.lane.b32.xlu2 %v10318_v20, %s6346_s17 }
0x15c3   :  { %v5359_v23 = vadd.f32 %v5351_v50, %v5295_v0  ;;  %5227 = vrot.lane.b32.xlu1 %v10318_v20, %s6358_s25  ;;  %v5123_v50 = vmul.f32 %v9161_v44, %v5118_v31 }
0x15c4   :  { %v10426_v6 = vpop.permute.xlu2 %5035  ;;  %v10428_v40 = vpop.permute.xlu0 %5225 }
0x15c5   :  { %11201 = vst [vmem:[#allocation41_spill] sm:$0xff] %v10428_v40  ;;  %v10433_v15 = vsel %vm3809_vm2, %v10343_v11, %v10426_v6  ;;  %v10435_v45 = vpop.permute.xlu1 %5369  ;;  %v6284_v11 = vld [vmem:[%s10769_s2 + $0x8] sm:$0xff] }
0x15c6   :  { %v5383_v55 = vsel %vm4115_vm5, %v5368_v7, %v10435_v45  ;;  %v5479_v7 = vmul.f32 %v10307_v47, %v5447_v53 }
0x15c7   :  { %v5399_v18 = vmul.f32 %v9158_v2, %v5383_v55 }
0x15c9   :  { %v5415_v22 = vmul.f32 %v10297_v54, %v5399_v18 }
0x15ca   :  { %5507 = vrot.lane.b32.xlu2 %v10318_v20, %s6478_s24  ;;  %5564 = vperm.xlu0 %6204, %v6284_v11  }
0x15cb   :  { %v5423_v16 = vadd.f32 %v5415_v22, %v5359_v23  ;;  %5381 = vrot.lane.b32.xlu1 %v10333_v58, %s6475_s18  ;;  %v5139_v23 = vmul.f32 %v10215_v41, %v5123_v50  ;;  %v6285_v22 = vld [vmem:[%s10769_s2] sm:$0xff] }
0x15cc   :  { %v10453_v0 = vpop.permute.xlu2 %5093  ;;  %v5224_v42 = vpop.permute.xlu0 %5223 }
0x15cd   :  { %v5040_v55 = vpop.permute.xlu1 %5039  ;;  %v10456_v18 = vadd.f32 %v5479_v7, %v5423_v16 }
0x15ce   :  { %v5062_v20 = vsel %vm3809_vm2, 0.0, %v5040_v55  ;;  %v5050_v11 = vsel %vm3809_vm2, %v5040_v55, %v10356_v57 }
0x15cf   :  { %11202 = vst [vmem:[#allocation42_spill] sm:$0xff] %v10456_v18  ;;  %v5067_v43 = vmul.f32 %v5062_v20, %v11163_v49  ;;  %v5068_v44 = vmul.f32 %v9243_v51, %v5050_v11 }
0x15d1   :  { %v5083_v53 = vmul.f32 %v10283_v14, %v5067_v43  ;;  %v5084_v55 = vmul.f32 %v10283_v14, %v5068_v44 }
0x15d2   :  { %5560 = vperm.xlu2 %6203, %v6285_v22  }
0x15d3   :  { %v5147_v31 = vadd.f32 %v5139_v23, %v5083_v53  ;;  %5495 = vrot.lane.b32.xlu1 %v10192_v9, %s6478_s24  ;;  %v6286_v23 = vld [vmem:[%s10771_s4] sm:$0xff] }
0x15d4   :  { %v10470_v7 = vpop.permute.xlu2 %5155  ;;  %v10472_v49 = vpop.permute.xlu0 %5313 }
0x15d5   :  { %v5168_v20 = vsel %vm3930_vm14, %v10377_v24, %v10470_v7  ;;  %v10477_v43 = vpop.permute.xlu1 %5097  ;;  %v5322_v16 = vsel %vm406_vm0, %v10389_v26, %v10472_v49  ;;  %v5246_v24 = vsel %vm649_vm8, 0.0, %v5224_v42  ;;  %v5234_v26 = vsel %vm649_vm8, %v5224_v42, %v10428_v40 }
0x15d6   :  { %v5106_v50 = vsel %vm795_vm13, %v5096_v8, %v10477_v43  ;;  %v5251_v44 = vmul.f32 %v9158_v2, %v5246_v24 }
0x15d7   :  { %v5140_v9 = vmul.f32 %v10215_v41, %v5106_v50 }
0x15d8   :  { %v5267_v40 = vmul.f32 %v10270_v35, %v5251_v44 }
0x15d9   :  { %v5148_v11 = vadd.f32 %v5140_v9, %v5084_v55  ;;  %v5252_v9 = vmul.f32 %v9243_v51, %v5234_v26  ;;  %v5291_v26 = vmul.f32 %v10243_v5, %v10224_v48 }
0x15da   :  { %5588 = vperm.xlu2 %6203, %v6286_v23  }
0x15db   :  { %5505 = vrot.lane.b32.xlu1 %v10227_v4, %s6478_s24  ;;  %v5268_v41 = vmul.f32 %v10270_v35, %v5252_v9 }
0x15dc   :  { %v10494_v53 = vpop.permute.xlu2 %5221  ;;  %v10496_v8 = vpop.permute.xlu0 %5377 }
0x15dd   :  { %v5160_v22 = vpop.permute.xlu1 %5159  ;;  %v5386_v24 = vsel %vm4115_vm5, %v10410_v28, %v10496_v8 }
0x15de   :  { %v5170_v50 = vsel %vm3930_vm14, %v5160_v22, %v10375_v46  ;;  %v5182_v55 = vsel %vm3930_vm14, 0.0, %v5160_v22  ;;  %v5339_v22 = vmul.f32 %v11200_v56, %v5322_v16  ;;  %v5403_v9 = vmul.f32 %v9158_v2, %v5386_v24 }
0x15df   :  { %v5187_v23 = vmul.f32 %v5182_v55, %v9293_v34  ;;  %v5188_v18 = vmul.f32 %v9198_v10, %v5170_v50  ;;  %v11203_v34 = vld [vmem:[#allocation23_spill] sm:$0xff] }
0x15e1   :  { %v5203_v42 = vmul.f32 %v10295_v3, %v5187_v23  ;;  %v5204_v58 = vmul.f32 %v10295_v3, %v5188_v18  ;;  %v5292_v18 = vmul.f32 %v10243_v5, %v10227_v4  ;;  %v5355_v4 = vmul.f32 %v10324_v37, %v5339_v22 }
0x15e3   :  { %v5211_v14 = vadd.f32 %v5203_v42, %v5147_v31  ;;  %v5212_v51 = vadd.f32 %v5204_v58, %v5148_v11  ;;  %5594 = vrot.lane.b32.xlu1 %v11203_v34, %s6435_s14  ;;  %v11205_v34 = vld [vmem:[#allocation37_spill] sm:$0xff] }
0x15e4   :  { %v10519_v44 = vpop.permute.xlu2 %5307  ;;  %v5440_v50 = vpop.permute.xlu0 %5439 }
0x15e5   :  { %v5275_v55 = vadd.f32 %v5267_v40, %v5211_v14  ;;  %v5276_v28 = vadd.f32 %v5268_v41, %v5212_v51  ;;  %v5320_v58 = vsel %vm406_vm0, %v10412_v60, %v10519_v44  ;;  %v10525_v31 = vpop.permute.xlu1 %5441  ;;  %v5419_v41 = vmul.f32 %v10259_v1, %v5403_v9 }
0x15e6   :  { %v5336_v16 = vmul.f32 %v9198_v10, %v5320_v58  ;;  %v5450_v48 = vsel %vm11204_vm4, %v5440_v50, %v10525_v31  ;;  %v5065_v50 = vmul.f32 %v10433_v15, %v11205_v34 }
0x15e7   :  { %v5299_v11 = vadd.f32 %v5291_v26, %v5275_v55  ;;  %v5300_v23 = vadd.f32 %v5292_v18, %v5276_v28  ;;  %v5483_v60 = vmul.f32 %v10275_v30, %v5450_v48  ;;  %v11206_v28 = vld [vmem:[#allocation43_spill] sm:$0xff] }
0x15e8   :  { %v5352_v14 = vmul.f32 %v10251_v25, %v5336_v16  ;;  %v5185_v9 = vmul.f32 %v5168_v20, %v11206_v28  ;;  %v11207_v16 = vld [vmem:[#allocation29_spill] sm:$0xff] }
0x15e9   :  { %v5363_v2 = vadd.f32 %v5355_v4, %v5299_v11  ;;  %v5081_v11 = vmul.f32 %v11199_v36, %v5065_v50 }
0x15ea   :  { %v5360_v40 = vadd.f32 %v5352_v14, %v10414_v38 }
0x15eb   :  { %v5427_v42 = vadd.f32 %v5419_v41, %v5363_v2 }
0x15ec   :  { %v10535_v24 = vpop.permute.xlu2 %5373  ;;  %v5038_v51 = vpop.permute.xlu0 %5037 }
0x15ed   :  { %v10539_v58 = vadd.f32 %v5483_v60, %v5427_v42  ;;  %v5092_v22 = vpop.permute.xlu1 %5091  ;;  %v5049_v26 = vsel %vm3809_vm2, %v10426_v6, %v5038_v51 }
0x15ee   :  { %v5104_v18 = vsel %vm795_vm13, %v10315_v59, %v5092_v22  ;;  %v5105_v38 = vsel %vm795_vm13, %v5092_v22, %v10453_v0  ;;  %v5066_v55 = vmul.f32 %v9189_v52, %v5049_v26  ;;  %v5201_v59 = vmul.f32 %v10229_v12, %v5185_v9 }
0x15ef   :  { %v5121_v48 = vmul.f32 %v11207_v16, %v5104_v18  ;;  %v5138_v15 = vmul.f32 %v10153_v33, %v5105_v38 }
0x15f0   :  { %v5082_v4 = vmul.f32 %v11199_v36, %v5066_v55 }
0x15f1   :  { %v5137_v6 = vmul.f32 %v10153_v33, %v5121_v48 }
0x15f2   :  { %v5146_v14 = vadd.f32 %v5138_v15, %v5082_v4 }
0x15f3   :  { %v5145_v41 = vadd.f32 %v5137_v6, %v5081_v11 }
0x15f4   :  { %v10555_v2 = vpop.permute.xlu2 %5099  ;;  %v5158_v0 = vpop.permute.xlu0 %5157 }
0x15f5   :  { %v5209_v42 = vadd.f32 %v5201_v59, %v5145_v41  ;;  %v5220_v60 = vpop.permute.xlu1 %5219  ;;  %v5169_v20 = vsel %vm3930_vm14, %v10470_v7, %v5158_v0 }
0x15f6   :  { %v5232_v51 = vsel %vm649_vm8, %v10330_v32, %v5220_v60  ;;  %v5233_v36 = vsel %vm649_vm8, %v5220_v60, %v10494_v53  ;;  %v5186_v33 = vmul.f32 %v9174_v21, %v5169_v20  ;;  %v5289_v32 = vmul.f32 %v10285_v19, %v10262_v27 }
0x15f7   :  { %v5249_v50 = vmul.f32 %v9177_v61, %v5232_v51  ;;  %v5250_v22 = vmul.f32 %v9189_v52, %v5233_v36  ;;  %v5290_v53 = vmul.f32 %v10285_v19, %v10273_v13  ;;  %v11208_v19 = vld [vmem:[#allocation27_spill] sm:$0xff] }
0x15f8   :  { %v5202_v26 = vmul.f32 %v10229_v12, %v5186_v33 }
0x15f9   :  { %v5265_v18 = vmul.f32 %v10305_v63, %v5249_v50  ;;  %v5266_v38 = vmul.f32 %v10305_v63, %v5250_v22 }
0x15fa   :  { %v5210_v55 = vadd.f32 %v5202_v26, %v5146_v14 }
0x15fb   :  { %v5273_v7 = vadd.f32 %v5265_v18, %v5209_v42 }
0x15fc   :  { %v5274_v9 = vadd.f32 %v5266_v38, %v5210_v55  ;;  %v10571_v48 = vpop.permute.xlu2 %5229  ;;  %v10575_v15 = vpop.permute.xlu0 %5499 }
0x15fd   :  { %v5310_v4 = vpop.permute.xlu1 %5309  ;;  %v10577_v11 = vadd.f32 %v5289_v32, %v5273_v7 }
0x15fe   :  { %v10579_v12 = vadd.f32 %v5290_v53, %v5274_v9 }
0x1604   :  { %v10581_v6 = vpop.permute.xlu2 %5315  ;;  %v5044_v63 = vpop.permute.xlu0 %5043 }
0x1605   :  { %v5323_v27 = vsel %vm406_vm0, %v10472_v49, %v10581_v6  ;;  %v5372_v14 = vpop.permute.xlu1 %5371 }
0x1606   :  { %v5340_v59 = vmul.f32 %v9198_v10, %v5323_v27  ;;  %v5384_v13 = vsel %vm4115_vm5, %v10435_v45, %v5372_v14 }
0x1607   :  { %v5400_v41 = vmul.f32 %v5384_v13, %v11208_v19 }
0x1608   :  { %v5356_v0 = vmul.f32 %v10324_v37, %v5340_v59 }
0x1609   :  { %v5416_v42 = vmul.f32 %v10297_v54, %v5400_v41 }
0x160a   :  { %v5364_v60 = vadd.f32 %v5356_v0, %v5300_v23  ;;  %v11210_v23 = vld [vmem:[#allocation46_spill] sm:$0xff] }
0x160b   :  { %v5424_v20 = vadd.f32 %v5416_v42, %v5360_v40 }
0x160c   :  { %v10592_v51 = vpop.permute.xlu2 %5497  ;;  %v5102_v36 = vpop.permute.xlu0 %5101 }
0x160d   :  { %v10594_v33 = vpop.permute.xlu1 %5437  ;;  %v5512_v22 = vsel %vm4244_vm3, %v10592_v51, %v10575_v15 }
0x160e   :  { %v5528_v18 = vmul.f32 %v5512_v22, %v9557_v29 }
0x1610   :  { %v5544_v32 = vmul.f32 %v10328_v17, %v5528_v18 }
0x1614   :  { %v5164_v49 = vpop.permute.xlu0 %5163  ;;  %v10598_v10 = vpop.permute.xlu2 %5445 }
0x1615   :  { %v10596_v50 = vpop.permute.xlu1 %5435 }
0x1616   :  { %v5448_v45 = vsel %vm11209_vm7, %v10391_v62, %v10596_v50 }
0x1617   :  { %v5464_v40 = vmul.f32 %v11210_v23, %v5448_v45  ;;  %v5333_v45 = vsel %vm406_vm0, %v5310_v4, 0.0 }
0x1619   :  { %v5480_v26 = vmul.f32 %v10307_v47, %v5464_v40  ;;  %v5051_v40 = vsel %vm3809_vm2, %v10356_v57, %v5044_v63  ;;  %v5385_v57 = vsel %vm4115_vm5, %v5372_v14, %v10535_v24  ;;  %v11213_v14 = vld [vmem:[#allocation26_spill] sm:$0xff] }
0x161b   :  { %v5488_v38 = vadd.f32 %v5480_v26, %v5424_v20  ;;  %v5321_v20 = vsel %vm406_vm0, %v10519_v44, %v5310_v4  ;;  %v5107_v44 = vsel %vm795_vm13, %v10477_v43, %v10555_v2  ;;  %v5338_v4 = vmul.f32 %v9174_v21, %v5333_v45  ;;  %v11215_v45 = vld [vmem:[#allocation34_spill] sm:$0xff] }
0x161c   :  { %v5318_v55 = vpop.permute.xlu0 %5317  ;;  %v10610_v9 = vpop.permute.xlu2 %5443  ;;  %v5337_v26 = vmul.f32 %v9171_v39, %v5321_v20 }
0x161d   :  { %v5502_v7 = vpop.permute.xlu1 %5501  ;;  %v10612_v53 = vadd.f32 %v5544_v32, %v5488_v38  ;;  %v5451_v62 = vsel %vm11211_vm10, %v10525_v31, %v10610_v9 }
0x161e   :  { %v5468_v41 = vmul.f32 %v11210_v23, %v5451_v62  ;;  %v11212_v62 = vld [vmem:[#allocation16_spill] sm:$0xff]  ;;  %v5353_v43 = vmul.f32 %v10251_v25, %v5337_v26 }
0x1620   :  { %v5484_v31 = vmul.f32 %v10275_v30, %v5468_v41 }
0x1624   :  { %v10617_v27 = vpop.permute.xlu0 %5379 }
0x1625   :  { %v5046_v59 = vpop.permute.xlu1 %5045  ;;  %v5387_v13 = vsel %vm4115_vm5, %v10496_v8, %v10617_v27 }
0x1626   :  { %v5404_v0 = vmul.f32 %v5387_v13, %v11208_v19  ;;  %v5052_v8 = vsel %vm3809_vm2, %v5044_v63, %v5046_v59  ;;  %v5397_v19 = vsel %vm4115_vm5, %v10535_v24, 0.0  ;;  %v5069_v63 = vmul.f32 %v5051_v40, %v11205_v34  ;;  %vm11214_vm2 = vmmov %vm11137_vm1 }
0x1627   :  { %v5070_v32 = vmul.f32 %v9189_v52, %v5052_v8  ;;  %v5402_v59 = vmul.f32 %v5397_v19, %v11212_v62  ;;  %v5125_v13 = vmul.f32 %v11207_v16, %v5107_v44  ;;  %v5401_v24 = vmul.f32 %v9177_v61, %v5385_v57  ;;  %v11218_v57 = vld [vmem:[#allocation41_spill] sm:$0xff] }
0x1628   :  { %v5420_v42 = vmul.f32 %v10259_v1, %v5404_v0  ;;  %v5461_v16 = vsel %vm11214_vm2, %v10594_v33, 0.0  ;;  %v5361_v40 = vadd.f32 %v5353_v43, %v10577_v11  ;;  %v5334_v43 = vsel %vm406_vm0, %v5318_v55, 0.0 }
0x1629   :  { %v5086_v20 = vmul.f32 %v11213_v14, %v5070_v32 }
0x162a   :  { %v5428_v22 = vadd.f32 %v5420_v42, %v5364_v60  ;;  %v5171_v60 = vsel %vm3930_vm14, %v10375_v46, %v5164_v49  ;;  %v5354_v46 = vmul.f32 %v10251_v25, %v5338_v4  ;;  %v5108_v42 = vsel %vm795_vm13, %v10555_v2, %v5102_v36  ;;  %v11216_v25 = vld [vmem:[#allocation60_spill] sm:$0xff] }
0x162b   :  { %v5189_v41 = vmul.f32 %v5171_v60, %v11206_v28  ;;  %v5293_v28 = vmul.f32 %v10243_v5, %v11215_v45  ;;  %v5417_v2 = vmul.f32 %v10297_v54, %v5401_v24  ;;  %v5142_v36 = vmul.f32 %v11216_v25, %v5108_v42  ;;  %v11217_v60 = vld [vmem:[#allocation45_spill] sm:$0xff] }
0x162c   :  { %v10633_v23 = vadd.f32 %v5484_v31, %v5428_v22  ;;  %v10652_v0 = vpop.permute.xlu0 %5503  ;;  %v5418_v31 = vmul.f32 %v10297_v54, %v5402_v59  ;;  %v5141_v22 = vmul.f32 %v11216_v25, %v5125_v13  ;;  %v5362_v8 = vadd.f32 %v5354_v46, %v10579_v12  ;;  %v11222_v25 = vld [vmem:[#allocation20_spill] sm:$0xff] }
0x162d   :  { %v5166_v18 = vpop.permute.xlu1 %5165  ;;  %v5205_v26 = vmul.f32 %v10295_v3, %v5189_v41  ;;  %v5150_v12 = vadd.f32 %v5142_v36, %v5086_v20  ;;  %v5324_v13 = vsel %vm406_vm0, %v10581_v6, %v5318_v55  ;;  %v5525_v41 = vsel %vm4244_vm3, %v5502_v7, 0.0  ;;  %vm11223_vm0 = vmmov %vm11137_vm1 }
0x162e   :  { %v5172_v38 = vsel %vm3930_vm14, %v5164_v49, %v5166_v18  ;;  %v5085_v49 = vmul.f32 %v11213_v14, %v5069_v63  ;;  %v5466_v18 = vmul.f32 %v11217_v60, %v5461_v16  ;;  %vm11219_vm14 = vmmov %vm11137_vm1  ;;  %v5426_v14 = vadd.f32 %v5418_v31, %v5362_v8 }
0x162f   :  { %v5190_v34 = vmul.f32 %v9174_v21, %v5172_v38  ;;  %v5462_v38 = vsel %vm11219_vm14, %v10598_v10, 0.0  ;;  %v5341_v55 = vmul.f32 %v9171_v39, %v5324_v13  ;;  %v5452_v8 = vsel %vm11223_vm0, %v10610_v9, %v10598_v10 }
0x1630   :  { %v5149_v4 = vadd.f32 %v5141_v22, %v5085_v49  ;;  %v11221_v49 = vld [vmem:[#allocation28_spill] sm:$0xff]  ;;  %v5482_v45 = vmul.f32 %v10307_v47, %v5466_v18  ;;  %v5530_v22 = vmul.f32 %v5525_v41, %v11222_v25 }
0x1631   :  { %v5206_v19 = vmul.f32 %v10295_v3, %v5190_v34  ;;  %v5513_v3 = vsel %vm4244_vm3, %v10575_v15, %v5502_v7  ;;  %v5294_v6 = vmul.f32 %v10243_v5, %v11221_v49  ;;  %v5342_v7 = vmul.f32 %v9174_v21, %v5334_v43 }
0x1632   :  { %v5213_v59 = vadd.f32 %v5205_v26, %v5149_v4  ;;  %v5529_v31 = vmul.f32 %v9171_v39, %v5513_v3 }
0x1633   :  { %v5214_v46 = vadd.f32 %v5206_v19, %v5150_v12  ;;  %v5358_v19 = vmul.f32 %v10324_v37, %v5342_v7 }
0x1634   :  { %v5510_v42 = vpop.permute.xlu0 %5509 }
0x1635   :  { %v5228_v44 = vpop.permute.xlu1 %5227 }
0x1636   :  { %v5235_v63 = vsel %vm649_vm8, %v11218_v57, %v5228_v44  ;;  %v5236_v11 = vsel %vm649_vm8, %v5228_v44, %v10571_v48  ;;  %v10688_v48 = vpop.permute.xlu2 %5507  ;;  %vm11220_vm8 = vmmov %vm11137_vm1 }
0x1637   :  { %v5253_v54 = vmul.f32 %v9177_v61, %v5235_v63  ;;  %v5254_v32 = vmul.f32 %v9189_v52, %v5236_v11  ;;  %v5425_v52 = vadd.f32 %v5417_v2, %v5361_v40  ;;  %v5449_v15 = vsel %vm11220_vm8, %v10596_v50, %v10594_v33 }
0x1638   :  { %v5516_v5 = vsel %vm4244_vm3, %v10688_v48, %v5510_v42  ;;  %v5526_v50 = vsel %vm4244_vm3, %v5510_v42, 0.0  ;;  %v5481_v21 = vmul.f32 %v10307_v47, %v5449_v15  ;;  %v5546_v47 = vmul.f32 %v10328_v17, %v5530_v22  ;;  %v11225_v22 = vld [vmem:[#allocation42_spill] sm:$0xff] }
0x1639   :  { %v5269_v24 = vmul.f32 %v10270_v35, %v5253_v54  ;;  %v5270_v34 = vmul.f32 %v10270_v35, %v5254_v32  ;;  %v5470_v35 = vmul.f32 %v11217_v60, %v5462_v38  ;;  %v5545_v60 = vmul.f32 %v10328_v17, %v5529_v31 }
0x163a   :  { %v5533_v18 = vmul.f32 %v9171_v39, %v5516_v5  ;;  %v5534_v10 = vmul.f32 %v5526_v50, %v11222_v25  ;;  %v5490_v11 = vadd.f32 %v5482_v45, %v5426_v14  ;;  %v11224_v39 = vld [vmem:[#allocation61_spill] sm:$0xff] }
0x163b   :  { %v5277_v16 = vadd.f32 %v5269_v24, %v5213_v59  ;;  %v5278_v20 = vadd.f32 %v5270_v34, %v5214_v46 }
0x163c   :  { %v5554_v59 = vadd.f32 %v5546_v47, %v5490_v11  ;;  %v5549_v3 = vmul.f32 %v11224_v39, %v5533_v18  ;;  %v5550_v13 = vmul.f32 %v11224_v39, %v5534_v10  ;;  %v5565_v34 = vpop.permute.xlu0 %5564 }
0x163d   :  { %v5301_v40 = vadd.f32 %v5293_v28, %v5277_v16  ;;  %v5302_v33 = vadd.f32 %v5294_v6, %v5278_v20  ;;  %v5382_v26 = vpop.permute.xlu1 %5381  ;;  %v5357_v28 = vmul.f32 %v10324_v37, %v5341_v55  ;;  %v5489_v37 = vadd.f32 %v5481_v21, %v5425_v52 }
0x163e   :  { %v5388_v2 = vsel %vm4115_vm5, %v10617_v27, %v5382_v26  ;;  %v5398_v36 = vsel %vm4115_vm5, %v5382_v26, 0.0  ;;  %v5561_v38 = vpop.permute.xlu2 %5560 }
0x163f   :  { %v5405_v44 = vmul.f32 %v9177_v61, %v5388_v2  ;;  %v5406_v4 = vmul.f32 %v5398_v36, %v11212_v62  ;;  %v5365_v9 = vadd.f32 %v5357_v28, %v5301_v40  ;;  %v5366_v27 = vadd.f32 %v5358_v19, %v5302_v33 }
0x1640   :  { %v5486_v61 = vmul.f32 %v10275_v30, %v5470_v35  ;;  %v5485_v62 = vmul.f32 %v10275_v30, %v5452_v8  ;;  %v5553_v32 = vadd.f32 %v5545_v60, %v5489_v37  ;;  %v5570_v14 = vadd.f32 %v5561_v38, %v5554_v59  ;;  %v11231_v59 = vld [vmem:[#allocation25_spill] sm:$0xff] }
0x1641   :  { %v5421_v57 = vmul.f32 %v10259_v1, %v5405_v44  ;;  %v5422_v63 = vmul.f32 %v10259_v1, %v5406_v4  ;;  %v5568_v26 = vadd.f32 %v5561_v38, %v10612_v53 }
0x1642   :  { %v5569_v24 = vadd.f32 %v5561_v38, %v5553_v32  ;;  %v5578_v55 = vmax.f32 %v5570_v14, 0.0 }
0x1643   :  { %v5429_v12 = vadd.f32 %v5421_v57, %v5365_v9  ;;  %v5430_v54 = vadd.f32 %v5422_v63, %v5366_v27  ;;  %v11226_v9 = vld [vmem:[#allocation54_spill] sm:$0xff]  ;;  %v11227_v57 = vld [vmem:[#allocation55_spill] sm:$0xff] }
0x1644   :  { %v5577_v42 = vmax.f32 %v5569_v24, 0.0 }
0x1645   :  { %v5496_v43 = vpop.permute.xlu1 %5495  ;;  %v5493_v41 = vadd.f32 %v5485_v62, %v5429_v12  ;;  %v5494_v46 = vadd.f32 %v5486_v61, %v5430_v54  ;;  %v11228_v61 = vld [vmem:[#allocation11_spill] sm:$0xff]  ;;  %v11230_v54 = vld [vmem:[#allocation24_spill] sm:$0xff] }
0x1646   :  { %v5511_v1 = vsel %vm4244_vm3, %v5496_v43, %v10592_v51  ;;  %v11233_v43 = vld [vmem:[#allocation10_spill] sm:$0xff] }
0x1647   :  { %v5527_v30 = vmul.f32 %v11200_v56, %v5511_v1  ;;  %v5557_v52 = vadd.f32 %v5549_v3, %v5493_v41  ;;  %v5558_v15 = vadd.f32 %v5550_v13, %v5494_v46  ;;  %v11232_v3 = vld [vmem:[#allocation9_spill] sm:$0xff] }
0x1649   :  { %v5573_v49 = vadd.f32 %v5565_v34, %v5557_v52  ;;  %v5574_v6 = vadd.f32 %v5565_v34, %v5558_v15  ;;  %v5543_v7 = vmul.f32 %v10328_v17, %v5527_v30 }
0x164b   :  { %v5581_v16 = vmax.f32 %v5573_v49, 0.0  ;;  %v5582_v20 = vmax.f32 %v5574_v6, 0.0  ;;  %v5551_v40 = vadd.f32 %v5543_v7, %v11225_v22 }
0x164d   :  { %v5585_v45 = vpack.c.bf16 %v5581_v16, %v5577_v42  ;;  %v5586_v35 = vpack.c.bf16 %v5582_v20, %v5578_v55  ;;  %v5506_v31 = vpop.permute.xlu1 %5505  ;;  %v5567_v21 = vadd.f32 %v5561_v38, %v5551_v40  ;;  %v11229_v38 = vld [vmem:[#allocation12_spill] sm:$0xff] }
0x164e   :  { %v5514_v51 = vsel %vm4244_vm3, %v10652_v0, %v5506_v31  ;;  %v5515_v25 = vsel %vm4244_vm3, %v5506_v31, %v10688_v48 }
0x164f   :  { %v5531_v33 = vmul.f32 %v11200_v56, %v5514_v51  ;;  %v5532_v5 = vmul.f32 %v5515_v25, %v9557_v29  ;;  %5632 = vmatpush.bf16.msrb.mxu2 %v5585_v45  ;;  %5645 = vmatpush.bf16.msra.mxu3 %v5586_v35  ;;  %v5576_v56 = vmax.f32 %v5568_v26, 0.0  ;;  %v5575_v29 = vmax.f32 %v5567_v21, 0.0 }
0x1651   :  { %v5547_v17 = vmul.f32 %v11224_v39, %v5531_v33  ;;  %v5548_v50 = vmul.f32 %v11224_v39, %v5532_v5 }
0x1653   :  { %v5555_v0 = vadd.f32 %v5547_v17, %v10539_v58  ;;  %v5556_v8 = vadd.f32 %v5548_v50, %v10633_v23  ;;  %v5589_v58 = vpop.permute.xlu2 %5588 }
0x1655   :  { %v5571_v48 = vadd.f32 %v5565_v34, %v5555_v0  ;;  %v5572_v2 = vadd.f32 %v5565_v34, %v5556_v8  ;;  %v5595_v36 = vpop.permute.xlu1 %5594 }
0x1656   :  { %5714 = vmatmul.msk.bf16.vlgmr.msrb.gmra.mxu2 %vm795_vm13, %v5595_v36  ;;  %5715 = vmatmul.msk.bf16.vlgmr.msra.gmra.mxu3 %vm795_vm13, %v5595_v36 }
0x1657   :  { %v5579_v28 = vmax.f32 %v5571_v48, 0.0  ;;  %v5580_v19 = vmax.f32 %v5572_v2, 0.0 }
0x1659   :  { %v5583_v44 = vpack.c.bf16 %v5579_v28, %v5575_v29  ;;  %v5584_v4 = vpack.c.bf16 %v5580_v19, %v5576_v56 }
0x165b   :  { %5606 = vmatpush.bf16.msrb.mxu0 %v5583_v44  ;;  %5619 = vmatpush.bf16.msrb.mxu1 %v5584_v4 }
0x165e   :  { %5712 = vmatmul.msk.bf16.vlgmr.msrb.gmra.mxu0 %vm795_vm13, %v5595_v36  ;;  %5713 = vmatmul.msk.bf16.vlgmr.msrb.gmra.mxu1 %vm795_vm13, %v5595_v36 }
0x16d9   :  { %v5634_v53 = vpop.f32.mrf.mxu2  ;;  %v5647_v23 = vpop.f32.mrf.mxu3 }
0x16da   :  { %v5635_v60 = vadd.f32 %v5634_v53, %v5589_v58  ;;  %v5648_v47 = vadd.f32 %v5647_v23, %v5589_v58 }
0x16db   :  { %v5608_v18 = vpop.f32.mrf.mxu0  ;;  %v5621_v10 = vpop.f32.mrf.mxu1 }
0x16dc   :  { %v5653_v27 = vadd.f32 %v5635_v60, %v11226_v9  ;;  %v5654_v63 = vadd.f32 %v5648_v47, %v11227_v57  ;;  %v5609_v11 = vadd.f32 %v5608_v18, %v5589_v58  ;;  %v5622_v37 = vadd.f32 %v5621_v10, %v5589_v58 }
0x16de   :  { %v5657_v62 = vadd.f32 %v5653_v27, %v11228_v61  ;;  %v5658_v12 = vadd.f32 %v5654_v63, %v11229_v38  ;;  %v5651_v32 = vadd.f32 %v5609_v11, %v11230_v54  ;;  %v5652_v39 = vadd.f32 %v5622_v37, %v11231_v59 }
0x16e0   :  { %5661 = vst [vmem:[%s10776_s9 + $0x10] sm:$0xff] %v5657_v62  ;;  %v5655_v13 = vadd.f32 %v5651_v32, %v11232_v3  ;;  %v5656_v41 = vadd.f32 %v5652_v39, %v11233_v43 }
0x16e1   :  { %5662 = vst [vmem:[%s10776_s9 + $0x18] sm:$0xff] %v5658_v12  ;;  %v5636_v46 = vpop.f32.mrf.mxu2  ;;  %v5649_v24 = vpop.f32.mrf.mxu3 }
0x16e2   :  { %5659 = vst [vmem:[%s10776_s9] sm:$0xff] %v5655_v13 }
0x16e3   :  { %5660 = vst [vmem:[%s10776_s9 + $0x8] sm:$0xff] %v5656_v41  ;;  %v5610_v1 = vpop.f32.mrf.mxu0  ;;  %v5623_v34 = vpop.f32.mrf.mxu1 }
0x16e4   :  { %5667 = vsyncpa [#allocation3], 1 }
0x16e5   :  { %5668 = vsyncpa [#allocation5], 1 }

</bundles_post_ra>
